<compile_context>
chip_gen: v6e
topology: v6e:2x2x1
jax: 0.10.0
libtpu: 0.0.40
codegen_flags: <defaults>
</compile_context>

<pallas_src>
import jax
import jax.numpy as jnp
from jax import lax
from jax.experimental import pallas as pl
from jax.experimental.pallas import tpu as pltpu

M_OUT = 64  # self.M in the PyTorch module


# --------------------------- fused per-batch kernel ---------------------------
def _spygr_fused_kernel(w_ref, b_ref, g_ref, pmask_ref, wstk_ref,
                        patch_ref, xr_ref, out_ref):
    M = w_ref.shape[0]             # 64
    C = wstk_ref.shape[0]          # image channels
    patch = patch_ref[0]           # (C*9, N) im2col patches of this batch
    xr = xr_ref[0]                 # (N, C)   raw torch view x.reshape(B, -1, C)
    g_col = g_ref[0]               # (M, 1)   glob_conv(glob_pool(x)) for this batch
    N = xr.shape[0]
    r = N // M                     # chunks per conv-output row for the (N, M) view
    blk = N // C                   # rows of the raw view belonging to one image channel

    # ---- phi_conv (3x3, pad=1, bias) as im2col matmul, + ReLU  ->  Q == relu(x_phi_T)
    q = jnp.dot(w_ref[...], patch, preferred_element_type=jnp.float32) + b_ref[...]
    q = jnp.maximum(q, 0.0)                                        # (M, N)

    q_blocks = [q[:, bb * M:(bb + 1) * M] for bb in range(r)]      # r x (M, M) lane slices

    def apply_v(w):
        """V @ w without materializing V, where V[a*r+b, :] = Q[a, b*M:(b+1)*M]
        (the raw torch view conv_out.view(N, M)).  P_b are one-hot placement masks."""
        acc = jnp.zeros((N, w.shape[1]), jnp.float32)
        for bb in range(r):
            y = jnp.dot(q_blocks[bb], w, preferred_element_type=jnp.float32)    # (M, k)
            acc = acc + jnp.dot(pmask_ref[bb], y,
                                preferred_element_type=jnp.float32)             # (N, k)
        return acc

    def apply_a(v):
        """A_tilde @ v = V @ (g * (Q @ v)) — A_tilde is never formed."""
        return apply_v(g_col * jnp.dot(q, v, preferred_element_type=jnp.float32))

    # rowsum(A) = A @ 1 = V @ (g * rowsum(Q))
    rowsum = apply_v(g_col * jnp.sum(q, axis=1, keepdims=True))    # (N, 1)

    # ---- out = (I - (D-A) A (D-A)) @ xr, with (D-A) t == rowsum*t - A t
    t1 = rowsum * xr - apply_a(xr)
    t2 = apply_a(t1)
    t3 = rowsum * t2 - apply_a(t2)
    out_nc = xr - t3                                               # (N, C)

    # ---- graph_weight (1x1 conv, no bias) + ReLU on the raw (C,H,W) view of out_nc:
    #   y[co, j*C + c2] = sum_ci w_gw[co, ci] * out_nc[ci*blk + j, c2]
    # done as C tiny matmuls against the Kronecker-expanded weight wstk
    # (wstk[ci, c2, co*C + c2'] = w_gw[co, ci] * delta(c2, c2')); the wrapper's
    # free reshape/transpose turns the (blk, C*C) block back into (C, H, W).
    y = jnp.zeros((blk, C * C), jnp.float32)
    for ci in range(C):
        y = y + jnp.dot(out_nc[ci * blk:(ci + 1) * blk, :], wstk_ref[ci],
                        preferred_element_type=jnp.float32)
    out_ref[0] = jnp.maximum(y, 0.0)


# --------------------------------- wrapper -----------------------------------
def spygr_forward(x, params):
    w_phi, b_phi, w_glob, w_gw = params
    B, C, H, W = x.shape
    N = H * W
    M = w_phi.shape[0]
    CK = C * 9
    assert N % M == 0, "kernel assumes M divides H*W (true for the module config)"
    assert N % C == 0, "kernel assumes C divides H*W (true for the module config)"
    r = N // M
    blk = N // C

    # im2col for the 3x3 conv: one-time XLA glue on a tiny (B, C*9, N) array.
    xp = jnp.pad(x, ((0, 0), (0, 0), (1, 1), (1, 1)))
    patches = jnp.stack(
        [xp[:, :, kh:kh + H, kw:kw + W] for kh in range(3) for kw in range(3)],
        axis=2)                                        # (B, C, 9, H, W)
    patches = patches.reshape(B, CK, N)

    w_flat = w_phi.reshape(M, CK)                      # (M, C*9)
    b_col = b_phi.reshape(M, 1)                        # (M, 1)

    # Hoisted glob_pool + glob_conv:  g[b, m] = sum_c w_glob[m, c] * mean_hw(x[b, c])
    pooled = jnp.mean(x, axis=(2, 3))                  # (B, C)
    g3 = jnp.einsum('mc,bc->bm', w_glob, pooled).reshape(B, M, 1)

    # raw torch view x.reshape(B, -1, C) — a free bitcast reshape
    xr = x.reshape(B, N, C)

    # One-hot placement masks for the raw view conv_out.view(N, M):
    #   V[a*r + b, :] = Q[a, b*M:(b+1)*M]   =>   V @ w = sum_b P_b @ (Q_b @ w)
    i_idx = jnp.arange(N)
    pmask = jnp.stack(
        [(i_idx[:, None] == (jnp.arange(M)[None, :] * r + bb)).astype(jnp.float32)
         for bb in range(r)], axis=0)                  # (r, N, M)

    # Kronecker-expanded graph_weight so the epilogue is a couple of tiny matmuls:
    #   wstk[ci, c2, co*C + c2'] = w_gw[co, ci] * delta(c2, c2')
    wstk = jnp.einsum('oc,pq->cpoq', w_gw,
                      jnp.eye(C, dtype=jnp.float32)).reshape(C, C, C * C)

    out3 = pl.pallas_call(
        _spygr_fused_kernel,
        out_shape=jax.ShapeDtypeStruct((B, blk, C * C), jnp.float32),
        grid=(B,),
        in_specs=[
            pl.BlockSpec((M, CK), lambda b: (0, 0)),            # conv weight (broadcast)
            pl.BlockSpec((M, 1), lambda b: (0, 0)),             # conv bias   (broadcast)
            pl.BlockSpec((1, M, 1), lambda b: (b, 0, 0)),       # hoisted glob vector (per batch)
            pl.BlockSpec((r, N, M), lambda b: (0, 0, 0)),       # raw-view placement masks
            pl.BlockSpec((C, C, C * C), lambda b: (0, 0, 0)),   # Kronecker graph weight
            pl.BlockSpec((1, CK, N), lambda b: (b, 0, 0)),      # im2col patches (per batch)
            pl.BlockSpec((1, N, C), lambda b: (b, 0, 0)),       # raw-view x (per batch)
        ],
        out_specs=pl.BlockSpec((1, blk, C * C), lambda b: (b, 0, 0)),
        compiler_params=pltpu.CompilerParams(
            dimension_semantics=("parallel",)),
    )(w_flat, b_col, g3, pmask, wstk, patches, xr)

    # free un-blocking: (B, blk, C, C)[b, j, co, c2] -> (B, C, H, W)[b, co, j*C + c2]
    y = out3.reshape(B, blk, C, C).transpose(0, 2, 1, 3).reshape(B, C, N)
    return y.reshape(B, C, H, W)


# ------------------------- pure-JAX reference (spec) -------------------------
def spygr_reference(x, params):
    w_phi, b_phi, w_glob, w_gw = params
    B, C, H, W = x.shape
    N = H * W
    M = w_phi.shape[0]
    hp = lax.Precision.HIGHEST

    conv = lax.conv_general_dilated(
        x, w_phi, (1, 1), 'SAME',
        dimension_numbers=('NCHW', 'OIHW', 'NCHW'), precision=hp)
    conv = conv + b_phi[None, :, None, None]                   # (B, M, H, W)

    x_phi = jax.nn.relu(conv.reshape(B, N, M))                 # torch .view([B,-1,M])
    x_phi_t = jax.nn.relu(conv.reshape(B, M, N))               # torch .view([B,M,-1])

    pooled = jnp.mean(x, axis=(2, 3))                          # (B, C)
    g = jnp.einsum('mc,bc->bm', w_glob, pooled, precision=hp)  # (B, M)

    a = jnp.einsum('bnm,bmk->bnk', x_phi * g[:, None, :], x_phi_t, precision=hp)
    d = jax.vmap(jnp.diag)(jnp.sum(a, axis=2))
    d_inv = d - a
    eye = jnp.eye(N, dtype=jnp.float32)[None]
    da = jnp.einsum('bij,bjk->bik', d_inv, a, precision=hp)
    l_t = eye - jnp.einsum('bij,bjk->bik', da, d_inv, precision=hp)
    out = jnp.einsum('bij,bjc->bic', l_t, x.reshape(B, N, C), precision=hp)
    out_img = out.reshape(B, C, H, W)
    y = jnp.einsum('oc,bchw->bohw', w_gw, out_img, precision=hp)
    return jax.nn.relu(y)


if __name__ == "__main__":
    key = jax.random.PRNGKey(0)
    B, C, H, W = 2, 4, 16, 16
    k1, k2, k3, k4, k5 = jax.random.split(key, 5)

    x = jax.random.normal(k1, (B, C, H, W), jnp.float32)
    # synthetic parameters (shapes from the module __init__; 1x1 conv weights squeezed)
    w_phi = 0.1 * jax.random.normal(k2, (M_OUT, C, 3, 3), jnp.float32)   # phi_conv.weight
    b_phi = 0.1 * jax.random.normal(k3, (M_OUT,), jnp.float32)           # phi_conv.bias
    w_glob = 0.1 * jax.random.normal(k4, (M_OUT, C), jnp.float32)        # glob_conv.weight
    w_gw = 0.1 * jax.random.normal(k5, (C, C), jnp.float32)              # graph_weight.weight
    params = (w_phi, b_phi, w_glob, w_gw)

    out = jax.jit(spygr_forward)(x, params)
    jax.block_until_ready(out)
    assert out.shape == (B, C, H, W) and out.dtype == jnp.float32

    ref = spygr_reference(x, params)
    err = float(jnp.max(jnp.abs(out - ref)))
    scale = float(jnp.max(jnp.abs(ref))) + 1e-6
    assert err / scale < 1e-2, f"mismatch vs reference: max_abs_err={err}, scale={scale}"
    print("KERNEL_OK")
</pallas_src>

<mosaic_0001>
module attributes {stable_mosaic.version = 11 : i64} {
  func.func @_spygr_fused_kernel(%arg0: i32, %arg1: memref<64x36xf32, #tpu.memory_space<vmem>>, %arg2: memref<64x1xf32, #tpu.memory_space<vmem>>, %arg3: memref<1x64x1xf32, #tpu.memory_space<vmem>>, %arg4: memref<4x256x64xf32, #tpu.memory_space<vmem>>, %arg5: memref<4x4x16xf32, #tpu.memory_space<vmem>>, %arg6: memref<1x36x256xf32, #tpu.memory_space<vmem>>, %arg7: memref<1x256x4xf32, #tpu.memory_space<vmem>>, %arg8: memref<1x64x16xf32, #tpu.memory_space<vmem>>) attributes {dimension_semantics = [#tpu.dimension_semantics<parallel>], iteration_bounds = array<i64: 2>, scalar_prefetch = 0 : i64, scratch_operands = 0 : i64, tpu.core_type = #tpu.core_type<tc>, window_params = [{pipeline_mode = #tpu.pipeline_mode<synchronous>, transform_indices = @transform_0, window_bounds = array<i64: 64, 36>}, {pipeline_mode = #tpu.pipeline_mode<synchronous>, transform_indices = @transform_1, window_bounds = array<i64: 64, 1>}, {transform_indices = @transform_2, window_bounds = array<i64: 1, 64, 1>}, {pipeline_mode = #tpu.pipeline_mode<synchronous>, transform_indices = @transform_3, window_bounds = array<i64: 4, 256, 64>}, {pipeline_mode = #tpu.pipeline_mode<synchronous>, transform_indices = @transform_4, window_bounds = array<i64: 4, 4, 16>}, {transform_indices = @transform_5, window_bounds = array<i64: 1, 36, 256>}, {transform_indices = @transform_6, window_bounds = array<i64: 1, 256, 4>}, {transform_indices = @transform_7, window_bounds = array<i64: 1, 64, 16>}]} {
    %c0 = arith.constant 0 : index
    %c0_0 = arith.constant 0 : index
    %c0_1 = arith.constant 0 : index
    %0 = vector.load %arg6[%c0, %c0_0, %c0_1] : memref<1x36x256xf32, #tpu.memory_space<vmem>>, vector<1x36x256xf32>
    %1 = vector.shape_cast %0 : vector<1x36x256xf32> to vector<36x256xf32>
    %c0_2 = arith.constant 0 : index
    %c0_3 = arith.constant 0 : index
    %c0_4 = arith.constant 0 : index
    %2 = vector.load %arg7[%c0_2, %c0_3, %c0_4] : memref<1x256x4xf32, #tpu.memory_space<vmem>>, vector<1x256x4xf32>
    %3 = vector.shape_cast %2 : vector<1x256x4xf32> to vector<256x4xf32>
    %c0_5 = arith.constant 0 : index
    %c0_6 = arith.constant 0 : index
    %c0_7 = arith.constant 0 : index
    %4 = vector.load %arg3[%c0_5, %c0_6, %c0_7] : memref<1x64x1xf32, #tpu.memory_space<vmem>>, vector<1x64x1xf32>
    %5 = vector.shape_cast %4 : vector<1x64x1xf32> to vector<64x1xf32>
    %c0_8 = arith.constant 0 : index
    %c0_9 = arith.constant 0 : index
    %6 = vector.load %arg1[%c0_8, %c0_9] : memref<64x36xf32, #tpu.memory_space<vmem>>, vector<64x36xf32>
    %cst = arith.constant dense<0.000000e+00> : vector<64x256xf32>
    %7 = tpu.matmul %6, %1, %cst {dimension_numbers = #tpu.dot_dimension_numbers<[1], [0], [0], [1], [0, 0, 1, 1], [], []>} : vector<64x36xf32>, vector<36x256xf32>, vector<64x256xf32> -> vector<64x256xf32>
    %c0_10 = arith.constant 0 : index
    %c0_11 = arith.constant 0 : index
    %8 = vector.load %arg2[%c0_10, %c0_11] : memref<64x1xf32, #tpu.memory_space<vmem>>, vector<64x1xf32>
    %9 = vector.broadcast %8 : vector<64x1xf32> to vector<64x256xf32>
    %10 = arith.addf %7, %9 : vector<64x256xf32>
    %cst_12 = arith.constant 0.000000e+00 : f32
    %11 = vector.broadcast %cst_12 : f32 to vector<64x256xf32>
    %12 = arith.maximumf %10, %11 : vector<64x256xf32>
    %13 = vector.extract_strided_slice %12 {offsets = [0, 0], sizes = [64, 64], strides = [1, 1]} : vector<64x256xf32> to vector<64x64xf32>
    %14 = vector.extract_strided_slice %12 {offsets = [0, 64], sizes = [64, 64], strides = [1, 1]} : vector<64x256xf32> to vector<64x64xf32>
    %15 = vector.extract_strided_slice %12 {offsets = [0, 128], sizes = [64, 64], strides = [1, 1]} : vector<64x256xf32> to vector<64x64xf32>
    %16 = vector.extract_strided_slice %12 {offsets = [0, 192], sizes = [64, 64], strides = [1, 1]} : vector<64x256xf32> to vector<64x64xf32>
    %cst_13 = arith.constant dense<0.000000e+00> : vector<64xf32>
    %17 = vector.multi_reduction <add>, %12, %cst_13 [1] : vector<64x256xf32> to vector<64xf32>
    %18 = vector.shape_cast %17 : vector<64xf32> to vector<64x1xf32>
    %19 = arith.mulf %5, %18 : vector<64x1xf32>
    %cst_14 = arith.constant 0.000000e+00 : f32
    %20 = vector.broadcast %cst_14 : f32 to vector<256x1xf32>
    %cst_15 = arith.constant dense<0.000000e+00> : vector<64x1xf32>
    %21 = tpu.matmul %13, %19, %cst_15 {dimension_numbers = #tpu.dot_dimension_numbers<[1], [0], [0], [1], [0, 0, 1, 1], [], []>} : vector<64x64xf32>, vector<64x1xf32>, vector<64x1xf32> -> vector<64x1xf32>
    %c0_16 = arith.constant 0 : index
    %c0_17 = arith.constant 0 : index
    %c0_18 = arith.constant 0 : index
    %22 = vector.load %arg4[%c0_16, %c0_17, %c0_18] : memref<4x256x64xf32, #tpu.memory_space<vmem>>, vector<1x256x64xf32>
    %23 = vector.shape_cast %22 : vector<1x256x64xf32> to vector<256x64xf32>
    %cst_19 = arith.constant dense<0.000000e+00> : vector<256x1xf32>
    %24 = tpu.matmul %23, %21, %cst_19 {dimension_numbers = #tpu.dot_dimension_numbers<[1], [0], [0], [1], [0, 0, 1, 1], [], []>} : vector<256x64xf32>, vector<64x1xf32>, vector<256x1xf32> -> vector<256x1xf32>
    %25 = arith.addf %20, %24 : vector<256x1xf32>
    %cst_20 = arith.constant dense<0.000000e+00> : vector<64x1xf32>
    %26 = tpu.matmul %14, %19, %cst_20 {dimension_numbers = #tpu.dot_dimension_numbers<[1], [0], [0], [1], [0, 0, 1, 1], [], []>} : vector<64x64xf32>, vector<64x1xf32>, vector<64x1xf32> -> vector<64x1xf32>
    %c1 = arith.constant 1 : index
    %c0_21 = arith.constant 0 : index
    %c0_22 = arith.constant 0 : index
    %27 = vector.load %arg4[%c1, %c0_21, %c0_22] : memref<4x256x64xf32, #tpu.memory_space<vmem>>, vector<1x256x64xf32>
    %28 = vector.shape_cast %27 : vector<1x256x64xf32> to vector<256x64xf32>
    %cst_23 = arith.constant dense<0.000000e+00> : vector<256x1xf32>
    %29 = tpu.matmul %28, %26, %cst_23 {dimension_numbers = #tpu.dot_dimension_numbers<[1], [0], [0], [1], [0, 0, 1, 1], [], []>} : vector<256x64xf32>, vector<64x1xf32>, vector<256x1xf32> -> vector<256x1xf32>
    %30 = arith.addf %25, %29 : vector<256x1xf32>
    %cst_24 = arith.constant dense<0.000000e+00> : vector<64x1xf32>
    %31 = tpu.matmul %15, %19, %cst_24 {dimension_numbers = #tpu.dot_dimension_numbers<[1], [0], [0], [1], [0, 0, 1, 1], [], []>} : vector<64x64xf32>, vector<64x1xf32>, vector<64x1xf32> -> vector<64x1xf32>
    %c2 = arith.constant 2 : index
    %c0_25 = arith.constant 0 : index
    %c0_26 = arith.constant 0 : index
    %32 = vector.load %arg4[%c2, %c0_25, %c0_26] : memref<4x256x64xf32, #tpu.memory_space<vmem>>, vector<1x256x64xf32>
    %33 = vector.shape_cast %32 : vector<1x256x64xf32> to vector<256x64xf32>
    %cst_27 = arith.constant dense<0.000000e+00> : vector<256x1xf32>
    %34 = tpu.matmul %33, %31, %cst_27 {dimension_numbers = #tpu.dot_dimension_numbers<[1], [0], [0], [1], [0, 0, 1, 1], [], []>} : vector<256x64xf32>, vector<64x1xf32>, vector<256x1xf32> -> vector<256x1xf32>
    %35 = arith.addf %30, %34 : vector<256x1xf32>
    %cst_28 = arith.constant dense<0.000000e+00> : vector<64x1xf32>
    %36 = tpu.matmul %16, %19, %cst_28 {dimension_numbers = #tpu.dot_dimension_numbers<[1], [0], [0], [1], [0, 0, 1, 1], [], []>} : vector<64x64xf32>, vector<64x1xf32>, vector<64x1xf32> -> vector<64x1xf32>
    %c3 = arith.constant 3 : index
    %c0_29 = arith.constant 0 : index
    %c0_30 = arith.constant 0 : index
    %37 = vector.load %arg4[%c3, %c0_29, %c0_30] : memref<4x256x64xf32, #tpu.memory_space<vmem>>, vector<1x256x64xf32>
    %38 = vector.shape_cast %37 : vector<1x256x64xf32> to vector<256x64xf32>
    %cst_31 = arith.constant dense<0.000000e+00> : vector<256x1xf32>
    %39 = tpu.matmul %38, %36, %cst_31 {dimension_numbers = #tpu.dot_dimension_numbers<[1], [0], [0], [1], [0, 0, 1, 1], [], []>} : vector<256x64xf32>, vector<64x1xf32>, vector<256x1xf32> -> vector<256x1xf32>
    %40 = arith.addf %35, %39 : vector<256x1xf32>
    %41 = vector.broadcast %40 : vector<256x1xf32> to vector<256x4xf32>
    %42 = arith.mulf %41, %3 : vector<256x4xf32>
    %cst_32 = arith.constant dense<0.000000e+00> : vector<64x4xf32>
    %43 = tpu.matmul %12, %3, %cst_32 {dimension_numbers = #tpu.dot_dimension_numbers<[1], [0], [0], [1], [0, 0, 1, 1], [], []>} : vector<64x256xf32>, vector<256x4xf32>, vector<64x4xf32> -> vector<64x4xf32>
    %44 = vector.broadcast %5 : vector<64x1xf32> to vector<64x4xf32>
    %45 = arith.mulf %44, %43 : vector<64x4xf32>
    %cst_33 = arith.constant 0.000000e+00 : f32
    %46 = vector.broadcast %cst_33 : f32 to vector<256x4xf32>
    %cst_34 = arith.constant dense<0.000000e+00> : vector<64x4xf32>
    %47 = tpu.matmul %13, %45, %cst_34 {dimension_numbers = #tpu.dot_dimension_numbers<[1], [0], [0], [1], [0, 0, 1, 1], [], []>} : vector<64x64xf32>, vector<64x4xf32>, vector<64x4xf32> -> vector<64x4xf32>
    %c0_35 = arith.constant 0 : index
    %c0_36 = arith.constant 0 : index
    %c0_37 = arith.constant 0 : index
    %48 = vector.load %arg4[%c0_35, %c0_36, %c0_37] : memref<4x256x64xf32, #tpu.memory_space<vmem>>, vector<1x256x64xf32>
    %49 = vector.shape_cast %48 : vector<1x256x64xf32> to vector<256x64xf32>
    %cst_38 = arith.constant dense<0.000000e+00> : vector<256x4xf32>
    %50 = tpu.matmul %49, %47, %cst_38 {dimension_numbers = #tpu.dot_dimension_numbers<[1], [0], [0], [1], [0, 0, 1, 1], [], []>} : vector<256x64xf32>, vector<64x4xf32>, vector<256x4xf32> -> vector<256x4xf32>
    %51 = arith.addf %46, %50 : vector<256x4xf32>
    %cst_39 = arith.constant dense<0.000000e+00> : vector<64x4xf32>
    %52 = tpu.matmul %14, %45, %cst_39 {dimension_numbers = #tpu.dot_dimension_numbers<[1], [0], [0], [1], [0, 0, 1, 1], [], []>} : vector<64x64xf32>, vector<64x4xf32>, vector<64x4xf32> -> vector<64x4xf32>
    %c1_40 = arith.constant 1 : index
    %c0_41 = arith.constant 0 : index
    %c0_42 = arith.constant 0 : index
    %53 = vector.load %arg4[%c1_40, %c0_41, %c0_42] : memref<4x256x64xf32, #tpu.memory_space<vmem>>, vector<1x256x64xf32>
    %54 = vector.shape_cast %53 : vector<1x256x64xf32> to vector<256x64xf32>
    %cst_43 = arith.constant dense<0.000000e+00> : vector<256x4xf32>
    %55 = tpu.matmul %54, %52, %cst_43 {dimension_numbers = #tpu.dot_dimension_numbers<[1], [0], [0], [1], [0, 0, 1, 1], [], []>} : vector<256x64xf32>, vector<64x4xf32>, vector<256x4xf32> -> vector<256x4xf32>
    %56 = arith.addf %51, %55 : vector<256x4xf32>
    %cst_44 = arith.constant dense<0.000000e+00> : vector<64x4xf32>
    %57 = tpu.matmul %15, %45, %cst_44 {dimension_numbers = #tpu.dot_dimension_numbers<[1], [0], [0], [1], [0, 0, 1, 1], [], []>} : vector<64x64xf32>, vector<64x4xf32>, vector<64x4xf32> -> vector<64x4xf32>
    %c2_45 = arith.constant 2 : index
    %c0_46 = arith.constant 0 : index
    %c0_47 = arith.constant 0 : index
    %58 = vector.load %arg4[%c2_45, %c0_46, %c0_47] : memref<4x256x64xf32, #tpu.memory_space<vmem>>, vector<1x256x64xf32>
    %59 = vector.shape_cast %58 : vector<1x256x64xf32> to vector<256x64xf32>
    %cst_48 = arith.constant dense<0.000000e+00> : vector<256x4xf32>
    %60 = tpu.matmul %59, %57, %cst_48 {dimension_numbers = #tpu.dot_dimension_numbers<[1], [0], [0], [1], [0, 0, 1, 1], [], []>} : vector<256x64xf32>, vector<64x4xf32>, vector<256x4xf32> -> vector<256x4xf32>
    %61 = arith.addf %56, %60 : vector<256x4xf32>
    %cst_49 = arith.constant dense<0.000000e+00> : vector<64x4xf32>
    %62 = tpu.matmul %16, %45, %cst_49 {dimension_numbers = #tpu.dot_dimension_numbers<[1], [0], [0], [1], [0, 0, 1, 1], [], []>} : vector<64x64xf32>, vector<64x4xf32>, vector<64x4xf32> -> vector<64x4xf32>
    %c3_50 = arith.constant 3 : index
    %c0_51 = arith.constant 0 : index
    %c0_52 = arith.constant 0 : index
    %63 = vector.load %arg4[%c3_50, %c0_51, %c0_52] : memref<4x256x64xf32, #tpu.memory_space<vmem>>, vector<1x256x64xf32>
    %64 = vector.shape_cast %63 : vector<1x256x64xf32> to vector<256x64xf32>
    %cst_53 = arith.constant dense<0.000000e+00> : vector<256x4xf32>
    %65 = tpu.matmul %64, %62, %cst_53 {dimension_numbers = #tpu.dot_dimension_numbers<[1], [0], [0], [1], [0, 0, 1, 1], [], []>} : vector<256x64xf32>, vector<64x4xf32>, vector<256x4xf32> -> vector<256x4xf32>
    %66 = arith.addf %61, %65 : vector<256x4xf32>
    %67 = arith.subf %42, %66 : vector<256x4xf32>
    %cst_54 = arith.constant dense<0.000000e+00> : vector<64x4xf32>
    %68 = tpu.matmul %12, %67, %cst_54 {dimension_numbers = #tpu.dot_dimension_numbers<[1], [0], [0], [1], [0, 0, 1, 1], [], []>} : vector<64x256xf32>, vector<256x4xf32>, vector<64x4xf32> -> vector<64x4xf32>
    %69 = vector.broadcast %5 : vector<64x1xf32> to vector<64x4xf32>
    %70 = arith.mulf %69, %68 : vector<64x4xf32>
    %cst_55 = arith.constant 0.000000e+00 : f32
    %71 = vector.broadcast %cst_55 : f32 to vector<256x4xf32>
    %cst_56 = arith.constant dense<0.000000e+00> : vector<64x4xf32>
    %72 = tpu.matmul %13, %70, %cst_56 {dimension_numbers = #tpu.dot_dimension_numbers<[1], [0], [0], [1], [0, 0, 1, 1], [], []>} : vector<64x64xf32>, vector<64x4xf32>, vector<64x4xf32> -> vector<64x4xf32>
    %c0_57 = arith.constant 0 : index
    %c0_58 = arith.constant 0 : index
    %c0_59 = arith.constant 0 : index
    %73 = vector.load %arg4[%c0_57, %c0_58, %c0_59] : memref<4x256x64xf32, #tpu.memory_space<vmem>>, vector<1x256x64xf32>
    %74 = vector.shape_cast %73 : vector<1x256x64xf32> to vector<256x64xf32>
    %cst_60 = arith.constant dense<0.000000e+00> : vector<256x4xf32>
    %75 = tpu.matmul %74, %72, %cst_60 {dimension_numbers = #tpu.dot_dimension_numbers<[1], [0], [0], [1], [0, 0, 1, 1], [], []>} : vector<256x64xf32>, vector<64x4xf32>, vector<256x4xf32> -> vector<256x4xf32>
    %76 = arith.addf %71, %75 : vector<256x4xf32>
    %cst_61 = arith.constant dense<0.000000e+00> : vector<64x4xf32>
    %77 = tpu.matmul %14, %70, %cst_61 {dimension_numbers = #tpu.dot_dimension_numbers<[1], [0], [0], [1], [0, 0, 1, 1], [], []>} : vector<64x64xf32>, vector<64x4xf32>, vector<64x4xf32> -> vector<64x4xf32>
    %c1_62 = arith.constant 1 : index
    %c0_63 = arith.constant 0 : index
    %c0_64 = arith.constant 0 : index
    %78 = vector.load %arg4[%c1_62, %c0_63, %c0_64] : memref<4x256x64xf32, #tpu.memory_space<vmem>>, vector<1x256x64xf32>
    %79 = vector.shape_cast %78 : vector<1x256x64xf32> to vector<256x64xf32>
    %cst_65 = arith.constant dense<0.000000e+00> : vector<256x4xf32>
    %80 = tpu.matmul %79, %77, %cst_65 {dimension_numbers = #tpu.dot_dimension_numbers<[1], [0], [0], [1], [0, 0, 1, 1], [], []>} : vector<256x64xf32>, vector<64x4xf32>, vector<256x4xf32> -> vector<256x4xf32>
    %81 = arith.addf %76, %80 : vector<256x4xf32>
    %cst_66 = arith.constant dense<0.000000e+00> : vector<64x4xf32>
    %82 = tpu.matmul %15, %70, %cst_66 {dimension_numbers = #tpu.dot_dimension_numbers<[1], [0], [0], [1], [0, 0, 1, 1], [], []>} : vector<64x64xf32>, vector<64x4xf32>, vector<64x4xf32> -> vector<64x4xf32>
    %c2_67 = arith.constant 2 : index
    %c0_68 = arith.constant 0 : index
    %c0_69 = arith.constant 0 : index
    %83 = vector.load %arg4[%c2_67, %c0_68, %c0_69] : memref<4x256x64xf32, #tpu.memory_space<vmem>>, vector<1x256x64xf32>
    %84 = vector.shape_cast %83 : vector<1x256x64xf32> to vector<256x64xf32>
    %cst_70 = arith.constant dense<0.000000e+00> : vector<256x4xf32>
    %85 = tpu.matmul %84, %82, %cst_70 {dimension_numbers = #tpu.dot_dimension_numbers<[1], [0], [0], [1], [0, 0, 1, 1], [], []>} : vector<256x64xf32>, vector<64x4xf32>, vector<256x4xf32> -> vector<256x4xf32>
    %86 = arith.addf %81, %85 : vector<256x4xf32>
    %cst_71 = arith.constant dense<0.000000e+00> : vector<64x4xf32>
    %87 = tpu.matmul %16, %70, %cst_71 {dimension_numbers = #tpu.dot_dimension_numbers<[1], [0], [0], [1], [0, 0, 1, 1], [], []>} : vector<64x64xf32>, vector<64x4xf32>, vector<64x4xf32> -> vector<64x4xf32>
    %c3_72 = arith.constant 3 : index
    %c0_73 = arith.constant 0 : index
    %c0_74 = arith.constant 0 : index
    %88 = vector.load %arg4[%c3_72, %c0_73, %c0_74] : memref<4x256x64xf32, #tpu.memory_space<vmem>>, vector<1x256x64xf32>
    %89 = vector.shape_cast %88 : vector<1x256x64xf32> to vector<256x64xf32>
    %cst_75 = arith.constant dense<0.000000e+00> : vector<256x4xf32>
    %90 = tpu.matmul %89, %87, %cst_75 {dimension_numbers = #tpu.dot_dimension_numbers<[1], [0], [0], [1], [0, 0, 1, 1], [], []>} : vector<256x64xf32>, vector<64x4xf32>, vector<256x4xf32> -> vector<256x4xf32>
    %91 = arith.addf %86, %90 : vector<256x4xf32>
    %92 = vector.broadcast %40 : vector<256x1xf32> to vector<256x4xf32>
    %93 = arith.mulf %92, %91 : vector<256x4xf32>
    %cst_76 = arith.constant dense<0.000000e+00> : vector<64x4xf32>
    %94 = tpu.matmul %12, %91, %cst_76 {dimension_numbers = #tpu.dot_dimension_numbers<[1], [0], [0], [1], [0, 0, 1, 1], [], []>} : vector<64x256xf32>, vector<256x4xf32>, vector<64x4xf32> -> vector<64x4xf32>
    %95 = vector.broadcast %5 : vector<64x1xf32> to vector<64x4xf32>
    %96 = arith.mulf %95, %94 : vector<64x4xf32>
    %cst_77 = arith.constant 0.000000e+00 : f32
    %97 = vector.broadcast %cst_77 : f32 to vector<256x4xf32>
    %cst_78 = arith.constant dense<0.000000e+00> : vector<64x4xf32>
    %98 = tpu.matmul %13, %96, %cst_78 {dimension_numbers = #tpu.dot_dimension_numbers<[1], [0], [0], [1], [0, 0, 1, 1], [], []>} : vector<64x64xf32>, vector<64x4xf32>, vector<64x4xf32> -> vector<64x4xf32>
    %c0_79 = arith.constant 0 : index
    %c0_80 = arith.constant 0 : index
    %c0_81 = arith.constant 0 : index
    %99 = vector.load %arg4[%c0_79, %c0_80, %c0_81] : memref<4x256x64xf32, #tpu.memory_space<vmem>>, vector<1x256x64xf32>
    %100 = vector.shape_cast %99 : vector<1x256x64xf32> to vector<256x64xf32>
    %cst_82 = arith.constant dense<0.000000e+00> : vector<256x4xf32>
    %101 = tpu.matmul %100, %98, %cst_82 {dimension_numbers = #tpu.dot_dimension_numbers<[1], [0], [0], [1], [0, 0, 1, 1], [], []>} : vector<256x64xf32>, vector<64x4xf32>, vector<256x4xf32> -> vector<256x4xf32>
    %102 = arith.addf %97, %101 : vector<256x4xf32>
    %cst_83 = arith.constant dense<0.000000e+00> : vector<64x4xf32>
    %103 = tpu.matmul %14, %96, %cst_83 {dimension_numbers = #tpu.dot_dimension_numbers<[1], [0], [0], [1], [0, 0, 1, 1], [], []>} : vector<64x64xf32>, vector<64x4xf32>, vector<64x4xf32> -> vector<64x4xf32>
    %c1_84 = arith.constant 1 : index
    %c0_85 = arith.constant 0 : index
    %c0_86 = arith.constant 0 : index
    %104 = vector.load %arg4[%c1_84, %c0_85, %c0_86] : memref<4x256x64xf32, #tpu.memory_space<vmem>>, vector<1x256x64xf32>
    %105 = vector.shape_cast %104 : vector<1x256x64xf32> to vector<256x64xf32>
    %cst_87 = arith.constant dense<0.000000e+00> : vector<256x4xf32>
    %106 = tpu.matmul %105, %103, %cst_87 {dimension_numbers = #tpu.dot_dimension_numbers<[1], [0], [0], [1], [0, 0, 1, 1], [], []>} : vector<256x64xf32>, vector<64x4xf32>, vector<256x4xf32> -> vector<256x4xf32>
    %107 = arith.addf %102, %106 : vector<256x4xf32>
    %cst_88 = arith.constant dense<0.000000e+00> : vector<64x4xf32>
    %108 = tpu.matmul %15, %96, %cst_88 {dimension_numbers = #tpu.dot_dimension_numbers<[1], [0], [0], [1], [0, 0, 1, 1], [], []>} : vector<64x64xf32>, vector<64x4xf32>, vector<64x4xf32> -> vector<64x4xf32>
    %c2_89 = arith.constant 2 : index
    %c0_90 = arith.constant 0 : index
    %c0_91 = arith.constant 0 : index
    %109 = vector.load %arg4[%c2_89, %c0_90, %c0_91] : memref<4x256x64xf32, #tpu.memory_space<vmem>>, vector<1x256x64xf32>
    %110 = vector.shape_cast %109 : vector<1x256x64xf32> to vector<256x64xf32>
    %cst_92 = arith.constant dense<0.000000e+00> : vector<256x4xf32>
    %111 = tpu.matmul %110, %108, %cst_92 {dimension_numbers = #tpu.dot_dimension_numbers<[1], [0], [0], [1], [0, 0, 1, 1], [], []>} : vector<256x64xf32>, vector<64x4xf32>, vector<256x4xf32> -> vector<256x4xf32>
    %112 = arith.addf %107, %111 : vector<256x4xf32>
    %cst_93 = arith.constant dense<0.000000e+00> : vector<64x4xf32>
    %113 = tpu.matmul %16, %96, %cst_93 {dimension_numbers = #tpu.dot_dimension_numbers<[1], [0], [0], [1], [0, 0, 1, 1], [], []>} : vector<64x64xf32>, vector<64x4xf32>, vector<64x4xf32> -> vector<64x4xf32>
    %c3_94 = arith.constant 3 : index
    %c0_95 = arith.constant 0 : index
    %c0_96 = arith.constant 0 : index
    %114 = vector.load %arg4[%c3_94, %c0_95, %c0_96] : memref<4x256x64xf32, #tpu.memory_space<vmem>>, vector<1x256x64xf32>
    %115 = vector.shape_cast %114 : vector<1x256x64xf32> to vector<256x64xf32>
    %cst_97 = arith.constant dense<0.000000e+00> : vector<256x4xf32>
    %116 = tpu.matmul %115, %113, %cst_97 {dimension_numbers = #tpu.dot_dimension_numbers<[1], [0], [0], [1], [0, 0, 1, 1], [], []>} : vector<256x64xf32>, vector<64x4xf32>, vector<256x4xf32> -> vector<256x4xf32>
    %117 = arith.addf %112, %116 : vector<256x4xf32>
    %118 = arith.subf %93, %117 : vector<256x4xf32>
    %119 = arith.subf %3, %118 : vector<256x4xf32>
    %cst_98 = arith.constant 0.000000e+00 : f32
    %120 = vector.broadcast %cst_98 : f32 to vector<64x16xf32>
    %121 = vector.extract_strided_slice %119 {offsets = [0, 0], sizes = [64, 4], strides = [1, 1]} : vector<256x4xf32> to vector<64x4xf32>
    %c0_99 = arith.constant 0 : index
    %c0_100 = arith.constant 0 : index
    %c0_101 = arith.constant 0 : index
    %122 = vector.load %arg5[%c0_99, %c0_100, %c0_101] : memref<4x4x16xf32, #tpu.memory_space<vmem>>, vector<1x4x16xf32>
    %123 = vector.shape_cast %122 : vector<1x4x16xf32> to vector<4x16xf32>
    %cst_102 = arith.constant dense<0.000000e+00> : vector<64x16xf32>
    %124 = tpu.matmul %121, %123, %cst_102 {dimension_numbers = #tpu.dot_dimension_numbers<[1], [0], [0], [1], [0, 0, 1, 1], [], []>} : vector<64x4xf32>, vector<4x16xf32>, vector<64x16xf32> -> vector<64x16xf32>
    %125 = arith.addf %120, %124 : vector<64x16xf32>
    %126 = vector.extract_strided_slice %119 {offsets = [64, 0], sizes = [64, 4], strides = [1, 1]} : vector<256x4xf32> to vector<64x4xf32>
    %c1_103 = arith.constant 1 : index
    %c0_104 = arith.constant 0 : index
    %c0_105 = arith.constant 0 : index
    %127 = vector.load %arg5[%c1_103, %c0_104, %c0_105] : memref<4x4x16xf32, #tpu.memory_space<vmem>>, vector<1x4x16xf32>
    %128 = vector.shape_cast %127 : vector<1x4x16xf32> to vector<4x16xf32>
    %cst_106 = arith.constant dense<0.000000e+00> : vector<64x16xf32>
    %129 = tpu.matmul %126, %128, %cst_106 {dimension_numbers = #tpu.dot_dimension_numbers<[1], [0], [0], [1], [0, 0, 1, 1], [], []>} : vector<64x4xf32>, vector<4x16xf32>, vector<64x16xf32> -> vector<64x16xf32>
    %130 = arith.addf %125, %129 : vector<64x16xf32>
    %131 = vector.extract_strided_slice %119 {offsets = [128, 0], sizes = [64, 4], strides = [1, 1]} : vector<256x4xf32> to vector<64x4xf32>
    %c2_107 = arith.constant 2 : index
    %c0_108 = arith.constant 0 : index
    %c0_109 = arith.constant 0 : index
    %132 = vector.load %arg5[%c2_107, %c0_108, %c0_109] : memref<4x4x16xf32, #tpu.memory_space<vmem>>, vector<1x4x16xf32>
    %133 = vector.shape_cast %132 : vector<1x4x16xf32> to vector<4x16xf32>
    %cst_110 = arith.constant dense<0.000000e+00> : vector<64x16xf32>
    %134 = tpu.matmul %131, %133, %cst_110 {dimension_numbers = #tpu.dot_dimension_numbers<[1], [0], [0], [1], [0, 0, 1, 1], [], []>} : vector<64x4xf32>, vector<4x16xf32>, vector<64x16xf32> -> vector<64x16xf32>
    %135 = arith.addf %130, %134 : vector<64x16xf32>
    %136 = vector.extract_strided_slice %119 {offsets = [192, 0], sizes = [64, 4], strides = [1, 1]} : vector<256x4xf32> to vector<64x4xf32>
    %c3_111 = arith.constant 3 : index
    %c0_112 = arith.constant 0 : index
    %c0_113 = arith.constant 0 : index
    %137 = vector.load %arg5[%c3_111, %c0_112, %c0_113] : memref<4x4x16xf32, #tpu.memory_space<vmem>>, vector<1x4x16xf32>
    %138 = vector.shape_cast %137 : vector<1x4x16xf32> to vector<4x16xf32>
    %cst_114 = arith.constant dense<0.000000e+00> : vector<64x16xf32>
    %139 = tpu.matmul %136, %138, %cst_114 {dimension_numbers = #tpu.dot_dimension_numbers<[1], [0], [0], [1], [0, 0, 1, 1], [], []>} : vector<64x4xf32>, vector<4x16xf32>, vector<64x16xf32> -> vector<64x16xf32>
    %140 = arith.addf %135, %139 : vector<64x16xf32>
    %cst_115 = arith.constant 0.000000e+00 : f32
    %141 = vector.broadcast %cst_115 : f32 to vector<64x16xf32>
    %142 = arith.maximumf %140, %141 : vector<64x16xf32>
    %c0_116 = arith.constant 0 : index
    %c0_117 = arith.constant 0 : index
    %c0_118 = arith.constant 0 : index
    %143 = vector.load %arg8[%c0_116, %c0_117, %c0_118] : memref<1x64x16xf32, #tpu.memory_space<vmem>>, vector<1x64x16xf32>
    %144 = vector.shape_cast %143 : vector<1x64x16xf32> to vector<64x16xf32>
    %145 = vector.shape_cast %142 : vector<64x16xf32> to vector<1x64x16xf32>
    tpu.vector_store %arg8[%c0_116, %c0_117, %c0_118], %145 {strides = array<i32>} : memref<1x64x16xf32, #tpu.memory_space<vmem>>, vector<1x64x16xf32>,
    return
  }
  func.func @transform_0(%arg0: i32) -> (i32, i32) {
    %c0_i32 = arith.constant 0 : i32
    %c0_i32_0 = arith.constant 0 : i32
    %c0_i32_1 = arith.constant 0 : i32
    return %c0_i32, %c0_i32_0 : i32, i32
  }
  func.func @transform_1(%arg0: i32) -> (i32, i32) {
    %c0_i32 = arith.constant 0 : i32
    %c0_i32_0 = arith.constant 0 : i32
    %c0_i32_1 = arith.constant 0 : i32
    return %c0_i32, %c0_i32_0 : i32, i32
  }
  func.func @transform_2(%arg0: i32) -> (i32, i32, i32) {
    %c0_i32 = arith.constant 0 : i32
    %c0_i32_0 = arith.constant 0 : i32
    %c0_i32_1 = arith.constant 0 : i32
    return %arg0, %c0_i32, %c0_i32_0 : i32, i32, i32
  }
  func.func @transform_3(%arg0: i32) -> (i32, i32, i32) {
    %c0_i32 = arith.constant 0 : i32
    %c0_i32_0 = arith.constant 0 : i32
    %c0_i32_1 = arith.constant 0 : i32
    %c0_i32_2 = arith.constant 0 : i32
    return %c0_i32, %c0_i32_0, %c0_i32_1 : i32, i32, i32
  }
  func.func @transform_4(%arg0: i32) -> (i32, i32, i32) {
    %c0_i32 = arith.constant 0 : i32
    %c0_i32_0 = arith.constant 0 : i32
    %c0_i32_1 = arith.constant 0 : i32
    %c0_i32_2 = arith.constant 0 : i32
    return %c0_i32, %c0_i32_0, %c0_i32_1 : i32, i32, i32
  }
  func.func @transform_5(%arg0: i32) -> (i32, i32, i32) {
    %c0_i32 = arith.constant 0 : i32
    %c0_i32_0 = arith.constant 0 : i32
    %c0_i32_1 = arith.constant 0 : i32
    return %arg0, %c0_i32, %c0_i32_0 : i32, i32, i32
  }
  func.func @transform_6(%arg0: i32) -> (i32, i32, i32) {
    %c0_i32 = arith.constant 0 : i32
    %c0_i32_0 = arith.constant 0 : i32
    %c0_i32_1 = arith.constant 0 : i32
    return %arg0, %c0_i32, %c0_i32_0 : i32, i32, i32
  }
  func.func @transform_7(%arg0: i32) -> (i32, i32, i32) {
    %c0_i32 = arith.constant 0 : i32
    %c0_i32_0 = arith.constant 0 : i32
    %c0_i32_1 = arith.constant 0 : i32
    return %arg0, %c0_i32, %c0_i32_0 : i32, i32, i32
  }
}

</mosaic_0001>

<bundles_post_ra>
// kernel: spygr_forward.1
= control target key start
LH: loop header
LB: loop body
LE: loop exit
PB: predicated region body
PF: predicated region fallthrough
CT: control target
= control target key end

     0   :  { %s12072_s24 = smov 0   ;;  %s16501_s0 = inlined_call_operand.vmem [shape: f32[64,36], index: 0, kind: input, shape index: {}]   ;;  %s16502_s1 = inlined_call_operand.vmem [shape: f32[64,1], index: 1, kind: input, shape index: {}]   ;;  %s16503_s2 = inlined_call_operand.vmem [shape: f32[2,64,1], index: 2, kind: input, shape index: {}]   ;;  %s16504_s3 = inlined_call_operand.vmem [shape: f32[4,256,64], index: 3, kind: input, shape index: {}]   ;;  %s16505_s4 = inlined_call_operand.vmem [shape: f32[4,4,16], index: 4, kind: input, shape index: {}]   ;;  %s16506_s5 = inlined_call_operand.vmem [shape: f32[2,36,256], index: 5, kind: input, shape index: {}]   ;;  %s16507_s6 = inlined_call_operand.vmem [shape: f32[2,256,4], index: 6, kind: input, shape index: {}]   ;;  %s16508_s7 = inlined_call_operand.vmem [shape: f32[2,64,16], index: 7, kind: output, shape index: {}]  }
   0x1 LB: > { %s8129_s25 = sadd.s32 4294967295, %s12027_s24   ;;  %p8133_p0 = scmp.ge.s32.totalorder %s12027_s24, 1  ;;  %s12027_s24 = sphi %s12072_s24, %s17_s24  }
   0x2   : > { %p257_p1 = scmp.lt.s32.totalorder %s12027_s24, 3 }
   0x4   : > { %p258_p2 = pnand %p8133_p0, %p257_p1 }
   0x6   : > { %261 = sbr.rel (%p258_p2) target bundleno = 4336 (0x10f0), region = 48 }
   0xb   : > { %p299_p3 = scmp.lt.s32.totalorder %s8129_s25, 1  ;;  %v12029_v0 = vmov 0.0   ;;  %v12030_v1 = vmov 0   ;;  %v382_v2 = vld [vmem:[%s16502_s1 + $0x28] sm:$0xff]  ;;  %v384_v3 = vld [vmem:[%s16502_s1 + $0x38] sm:$0xff]  ;;  %vm450_vm0 = vcmask 1043456  }
   0xc   : > { %521 = vmatprep.mubr.f32.mxu0 %v12029_v0  ;;  %11572 = vset.pattern.permute.xlu1 %v12030_v1  ;;  %v381_v4 = vld [vmem:[%s16502_s1 + $0x20] sm:$0xff]  ;;  %v383_v5 = vld [vmem:[%s16502_s1 + $0x30] sm:$0xff]  ;;  %v380_v13 = vld [vmem:[%s16502_s1 + $0x18] sm:$0xff]  ;;  %vm425_vm1 = vcmask 293888   ;;  %vm618_vm2 = vcmask 523264   ;;  %s12031_s18 = smov 64  }
   0xd   : > { %s17230_s25 = smov (!%p299_p3, %s8129_s25), 1  ;;  %11571 = vset.pattern.permute.xlu0 %v12030_v1  ;;  %412 = vperm.xlu1 %11572, %v382_v2   ;;  %v379_v11 = vld [vmem:[%s16502_s1 + $0x10] sm:$0xff]  ;;  %v377_v17 = vld [vmem:[%s16502_s1] sm:$0xff]  ;;  %v378_v19 = vld [vmem:[%s16502_s1 + $0x8] sm:$0xff]  ;;  %vm7484_vm3 = vcmask 31744   ;;  %vm8041_vm4 = vcmask 130048  }
   0xe   : > { %s11559_s30 = smul.u32 80, %s17230_s25  ;;  %422 = vperm.xlu0 %11571, %v384_v3   ;;  %v369_v20 = vld [vmem:[%s16501_s0] sm:$0xff]  ;;  %v370_v21 = vld [vmem:[%s16501_s0 + $0x8] sm:$0xff]  ;;  %v371_v22 = vld [vmem:[%s16501_s0 + $0x10] sm:$0xff]  ;;  %s8928_s19 = sshll.u32 %s17230_s25, 6 }
   0xf   : > { %v372_v23 = vld [vmem:[%s16501_s0 + $0x18] sm:$0xff]  ;;  %v373_v24 = vld [vmem:[%s16501_s0 + $0x20] sm:$0xff]  ;;  %v374_v25 = vld [vmem:[%s16501_s0 + $0x28] sm:$0xff]  ;;  %s303_s22 = scalar_lea.vmem %s16503_s2, %s8928_s19  ;;  %s8929_s14 = sshll.u32 %s17230_s25, 8 }
  0x10   : > { %s308_s12 = scalar_lea.vmem %s16506_s5, %s11559_s30  ;;  %v375_v26 = vld [vmem:[%s16501_s0 + $0x30] sm:$0xff]  ;;  %v376_v27 = vld [vmem:[%s16501_s0 + $0x38] sm:$0xff]  ;;  %s12764_s17 = scalar_lea.vmem %s16507_s6, %s8929_s14 }
  0x11   : > { %v328_v6 = vld [vmem:[%s308_s12 + $0x48] sm:$0xf]  ;;  %v327_v7 = vld [vmem:[%s308_s12 + $0x40] sm:$0xf]  ;;  %v326_v8 = vld [vmem:[%s308_s12 + $0x38] sm:$0xff]  ;;  %407 = vperm.xlu1 %11572, %v381_v4   ;;  %s16480_s29 = scalar_lea.vmem %s16508_s7, %s8928_s19 }
  0x12   : > { %8141 = vmatprep.subr.msk.mxu0 %vm450_vm0, %v328_v6  ;;  %v325_v9 = vld [vmem:[%s308_s12 + $0x30] sm:$0xff]  ;;  %v324_v10 = vld [vmem:[%s308_s12 + $0x28] sm:$0xff]  ;;  %417 = vperm.xlu0 %11571, %v383_v5   ;;  %v323_v12 = vld [vmem:[%s308_s12 + $0x20] sm:$0xff] }
  0x13   : > { %8142 = vmatpush1.msk.msra.mxu0 %vm450_vm0, %v327_v7  ;;  %v322_v14 = vld [vmem:[%s308_s12 + $0x18] sm:$0xff]  ;;  %v321_v15 = vld [vmem:[%s308_s12 + $0x10] sm:$0xff]  ;;  %v320_v16 = vld [vmem:[%s308_s12 + $0x8] sm:$0xff] }
  0x14   : > { %481 = vmatprep.subr.mxu0 %v326_v8  ;;  %v319_v18 = vld [vmem:[%s308_s12] sm:$0xff] }
  0x15   : > { %482 = vmatpush1.msra.mxu0 %v325_v9  ;;  %397 = vperm.xlu1 %11572, %v379_v11  }
  0x16   : > { %483 = vmatprep.subr.mxu0 %v324_v10  ;;  %402 = vperm.xlu0 %11571, %v380_v13  }
  0x17   : > { %484 = vmatpush1.msra.mxu0 %v323_v12 }
  0x18   : > { %485 = vmatprep.subr.mxu0 %v322_v14 }
  0x19   : > { %486 = vmatpush1.msra.mxu0 %v321_v15  ;;  %387 = vperm.xlu1 %11572, %v377_v17  }
  0x1a   : > { %487 = vmatprep.subr.mxu0 %v320_v16  ;;  %392 = vperm.xlu0 %11571, %v378_v19  }
  0x1b   : > { %488 = vmatpush1.msra.mxu0 %v319_v18 }
  0x1c   : > { %8143 = vmatmul.mubr.msk.f32.vlgmr.msra.gmra.mxu0 %vm425_vm1, %v369_v20 }
  0x1d   : > { %527 = vmatprep.mubr.f32.mxu0 %v12029_v0 }
  0x20   : > { %8144 = vmatmul.mubr.msk.f32.gmra.mxu0 %vm425_vm1, %v370_v21 }
  0x21   : > { %533 = vmatprep.mubr.f32.mxu0 %v12029_v0 }
  0x24   : > { %8145 = vmatmul.mubr.msk.f32.gmra.mxu0 %vm425_vm1, %v371_v22 }
  0x25   : > { %539 = vmatprep.mubr.f32.mxu0 %v12029_v0 }
  0x28   : > { %8146 = vmatmul.mubr.msk.f32.gmra.mxu0 %vm425_vm1, %v372_v23 }
  0x29   : > { %545 = vmatprep.mubr.f32.mxu0 %v12029_v0 }
  0x2c   : > { %8147 = vmatmul.mubr.msk.f32.gmra.mxu0 %vm425_vm1, %v373_v24 }
  0x2d   : > { %551 = vmatprep.mubr.f32.mxu0 %v12029_v0 }
  0x30   : > { %8148 = vmatmul.mubr.msk.f32.gmra.mxu0 %vm425_vm1, %v374_v25 }
  0x31   : > { %557 = vmatprep.mubr.f32.mxu0 %v12029_v0 }
  0x34   : > { %8149 = vmatmul.mubr.msk.f32.gmra.mxu0 %vm425_vm1, %v375_v26 }
  0x35   : > { %563 = vmatprep.mubr.f32.mxu0 %v12029_v0 }
  0x38   : > { %8150 = vmatmul.mubr.msk.f32.gmra.mxu0 %vm425_vm1, %v376_v27 }
  0x88   : > { %v413_v28 = vpop.permute.xlu1 %412 }
  0x89   : > { %v423_v40 = vpop.permute.xlu0 %422 }
  0x8c   : > { %v408_v29 = vpop.permute.xlu1 %407 }
  0x8d   : > { %v418_v44 = vpop.permute.xlu0 %417 }
  0x90   : > { %v398_v30 = vpop.permute.xlu1 %397 }
  0x91   : > { %v403_v48 = vpop.permute.xlu0 %402 }
  0x94   : > { %v388_v31 = vpop.permute.xlu1 %387 }
  0x95   : > { %v393_v55 = vpop.permute.xlu0 %392 }
  0xdc   : > { %v523_v32 = vpop.f32.mrf.mxu0 }
  0xdd   : > { %v524_v33 = vadd.f32 %v523_v32, %v388_v31  ;;  %v361_v32 = vld [vmem:[%s303_s22] sm:$0xff] }
  0xde   : > { %v525_v34 = vpop.f32.mrf.mxu0 }
  0xdf   : > { %v12152_v35 = vmax.f32 %v524_v33, 0.0  ;;  %v526_v21 = vadd.f32 %v525_v34, %v388_v31  ;;  %v368_v31 = vld [vmem:[%s303_s22 + $0x38] sm:$0xff]  ;;  %v366_v33 = vld [vmem:[%s303_s22 + $0x28] sm:$0xff] }
  0xe0   : > { %v529_v36 = vpop.f32.mrf.mxu0  ;;  %v364_v34 = vld [vmem:[%s303_s22 + $0x18] sm:$0xff] }
  0xe1   : > { %16652 = vst [vmem:[#allocation2_spill] sm:$0xff] %v12152_v35  ;;  %10047 = vmatprep.mubr.msk.f32.mxu1 %vm618_vm2, %v12152_v35  ;;  %v530_v2 = vadd.f32 %v529_v36, %v393_v55  ;;  %v12196_v25 = vmax.f32 %v526_v21, 0.0  ;;  %v362_v36 = vld [vmem:[%s303_s22 + $0x8] sm:$0xff] }
  0xe2   : > { %v531_v37 = vpop.f32.mrf.mxu0 }
  0xe3   : > { %v532_v60 = vadd.f32 %v531_v37, %v393_v55  ;;  %v12178_v12 = vmax.f32 %v530_v2, 0.0  ;;  %16667 = vst [vmem:[#allocation17_spill] sm:$0xff] %v12196_v25  ;;  %v586_v27 = vadd.f32 %v12196_v25, %v12152_v35 }
  0xe4   : > { %v535_v38 = vpop.f32.mrf.mxu0 }
  0xe5   : > { %v12170_v7 = vmax.f32 %v532_v60, 0.0  ;;  %16661 = vst [vmem:[#allocation11_spill] sm:$0xff] %v12178_v12  ;;  %v536_v19 = vadd.f32 %v535_v38, %v398_v30 }
  0xe6   : > { %v537_v39 = vpop.f32.mrf.mxu0 }
  0xe7   : > { %16659 = vst [vmem:[#allocation9_spill] sm:$0xff] %v12170_v7  ;;  %v538_v15 = vadd.f32 %v537_v39, %v398_v30  ;;  %v589_v18 = vadd.f32 %v12170_v7, %v12178_v12  ;;  %v12194_v24 = vmax.f32 %v536_v19, 0.0  ;;  %v363_v30 = vld [vmem:[%s303_s22 + $0x10] sm:$0xff] }
  0xe8   : > { %v541_v41 = vpop.f32.mrf.mxu0 }
  0xe9   : > { %v542_v56 = vadd.f32 %v541_v41, %v403_v48  ;;  %v12190_v22 = vmax.f32 %v538_v15, 0.0  ;;  %16666 = vst [vmem:[#allocation16_spill] sm:$0xff] %v12194_v24 }
  0xea   : > { %v543_v42 = vpop.f32.mrf.mxu0 }
  0xeb   : > { %v544_v52 = vadd.f32 %v543_v42, %v403_v48  ;;  %v12164_v3 = vmax.f32 %v542_v56, 0.0  ;;  %16665 = vst [vmem:[#allocation15_spill] sm:$0xff] %v12190_v22  ;;  %v592_v26 = vadd.f32 %v12190_v22, %v12194_v24 }
  0xec   : > { %v547_v43 = vpop.f32.mrf.mxu0 }
  0xed   : > { %v12160_v62 = vmax.f32 %v544_v52, 0.0  ;;  %16656 = vst [vmem:[#allocation6_spill] sm:$0xff] %v12164_v3  ;;  %v548_v13 = vadd.f32 %v547_v43, %v408_v29 }
  0xee   : > { %v549_v45 = vpop.f32.mrf.mxu0 }
  0xef   : > { %16655 = vst [vmem:[#allocation5_spill] sm:$0xff] %v12160_v62  ;;  %v550_v8 = vadd.f32 %v549_v45, %v408_v29  ;;  %v595_v11 = vadd.f32 %v12160_v62, %v12164_v3  ;;  %v12188_v20 = vmax.f32 %v548_v13, 0.0  ;;  %v365_v29 = vld [vmem:[%s303_s22 + $0x20] sm:$0xff] }
  0xf0   : > { %v553_v46 = vpop.f32.mrf.mxu0 }
  0xf1   : > { %v554_v4 = vadd.f32 %v553_v46, %v413_v28  ;;  %v12182_v16 = vmax.f32 %v550_v8, 0.0  ;;  %16664 = vst [vmem:[#allocation14_spill] sm:$0xff] %v12188_v20 }
  0xf2   : > { %v555_v47 = vpop.f32.mrf.mxu0 }
  0xf3   : > { %v556_v63 = vadd.f32 %v555_v47, %v413_v28  ;;  %v12180_v14 = vmax.f32 %v554_v4, 0.0  ;;  %16663 = vst [vmem:[#allocation13_spill] sm:$0xff] %v12182_v16  ;;  %v598_v23 = vadd.f32 %v12182_v16, %v12188_v20  ;;  %v367_v28 = vld [vmem:[%s303_s22 + $0x30] sm:$0xff] }
  0xf4   : > { %v559_v49 = vpop.f32.mrf.mxu0 }
  0xf5   : > { %v560_v50 = vadd.f32 %v559_v49, %v418_v44  ;;  %v12172_v9 = vmax.f32 %v556_v63, 0.0  ;;  %16662 = vst [vmem:[#allocation12_spill] sm:$0xff] %v12180_v14 }
  0xf6   : > { %v561_v51 = vpop.f32.mrf.mxu0 }
  0xf7   : > { %v562_v53 = vadd.f32 %v561_v51, %v418_v44  ;;  %v12156_v57 = vmax.f32 %v560_v50, 0.0  ;;  %16660 = vst [vmem:[#allocation10_spill] sm:$0xff] %v12172_v9  ;;  %v601_v17 = vadd.f32 %v12172_v9, %v12180_v14 }
  0xf8   : > { %v565_v54 = vpop.f32.mrf.mxu0 }
  0xf9   : > { %16653 = vst [vmem:[#allocation3_spill] sm:$0xff] %v12156_v57  ;;  %v12158_v58 = vmax.f32 %v562_v53, 0.0  ;;  %v566_v59 = vadd.f32 %v565_v54, %v423_v40 }
  0xfa   : > { %v567_v61 = vpop.f32.mrf.mxu0 }
  0xfb   : > { %16654 = vst [vmem:[#allocation4_spill] sm:$0xff] %v12158_v58  ;;  %v568_v0 = vadd.f32 %v567_v61, %v423_v40  ;;  %v604_v1 = vadd.f32 %v12158_v58, %v12156_v57  ;;  %v12166_v5 = vmax.f32 %v566_v59, 0.0 }
  0xfd   : > { %16657 = vst [vmem:[#allocation7_spill] sm:$0xff] %v12166_v5  ;;  %v12168_v6 = vmax.f32 %v568_v0, 0.0  ;;  %605 = vadd.xlane.f32.xlu1 %v604_v1  ;;  %v8167_v0 = vld [vmem:[%s16504_s3 + $0x100] sm:$0xff] }
  0xfe   : > { %v748_v1 = vld [vmem:[%s16504_s3] sm:$0xff]  ;;  %10103 = vmatprep.mubr.msk.f32.mxu0 %vm618_vm2, %v8167_v0  ;;  %v759_v0 = vld [vmem:[%s16504_s3 + $0x58] sm:$0xff] }
  0xff   : > { %16658 = vst [vmem:[#allocation8_spill] sm:$0xff] %v12168_v6  ;;  %v607_v10 = vadd.f32 %v12168_v6, %v12166_v5 }
 0x101   : > { %608 = vadd.xlane.f32.xlu0 %v607_v10  ;;  %596 = vadd.xlane.f32.xlu1 %v595_v11 }
 0x105   : > { %602 = vadd.xlane.f32.xlu0 %v601_v17  ;;  %590 = vadd.xlane.f32.xlu1 %v589_v18 }
 0x109   : > { %599 = vadd.xlane.f32.xlu0 %v598_v23 }
 0x10d   : > { %593 = vadd.xlane.f32.xlu0 %v592_v26 }
 0x111   : > { %587 = vadd.xlane.f32.xlu0 %v586_v27 }
 0x116   : > { %780 = vrot.lane.b32.xlu1 %v12152_v35, %s12031_s18 }
 0x11a   : > { %784 = vrot.lane.b32.xlu1 %v12194_v24, %s12031_s18 }
 0x11e   : > { %786 = vrot.lane.b32.xlu1 %v12164_v3, %s12031_s18 }
 0x122   : > { %790 = vrot.lane.b32.xlu1 %v12180_v14, %s12031_s18 }
 0x126   : > { %794 = vrot.lane.b32.xlu1 %v12166_v5, %s12031_s18 }
 0x127   : > { %782 = vrot.lane.b32.xlu0 %v12178_v12, %s12031_s18 }
 0x12a   : > { %2109 = vrot.lane.b32.xlu1 %v12170_v7, %s12031_s18 }
 0x12b   : > { %788 = vrot.lane.b32.xlu0 %v12188_v20, %s12031_s18 }
 0x12e   : > { %2113 = vrot.lane.b32.xlu1 %v12160_v62, %s12031_s18 }
 0x12f   : > { %792 = vrot.lane.b32.xlu0 %v12156_v57, %s12031_s18 }
 0x132   : > { %2117 = vrot.lane.b32.xlu1 %v12172_v9, %s12031_s18 }
 0x133   : > { %2107 = vrot.lane.b32.xlu0 %v12196_v25, %s12031_s18 }
 0x136   : > { %2121 = vrot.lane.b32.xlu1 %v12168_v6, %s12031_s18 }
 0x137   : > { %2111 = vrot.lane.b32.xlu0 %v12190_v22, %s12031_s18 }
 0x13a   : > { %2959 = vperm.xlu1 %11572, %v367_v28  }
 0x13b   : > { %2115 = vrot.lane.b32.xlu0 %v12182_v16, %s12031_s18 }
 0x13e   : > { %2949 = vperm.xlu1 %11572, %v365_v29  }
 0x13f   : > { %2119 = vrot.lane.b32.xlu0 %v12158_v58, %s12031_s18 }
 0x142   : > { %2939 = vperm.xlu1 %11572, %v363_v30  }
 0x143   : > { %2964 = vperm.xlu0 %11571, %v368_v31  }
 0x146   : > { %2929 = vperm.xlu1 %11572, %v361_v32  }
 0x147   : > { %2954 = vperm.xlu0 %11571, %v366_v33  }
 0x14b   : > { %2944 = vperm.xlu0 %11571, %v364_v34  }
 0x14f   : > { %2934 = vperm.xlu0 %11571, %v362_v36  }
 0x186   : > { %v606_v37 = vpop.xlane.xlu1 %605 }
 0x187   : > { %v12226_v40 = vmul.f32 %v606_v37, %v367_v28  ;;  %v749_v28 = vld [vmem:[%s16504_s3 + $0x8] sm:$0xff]  ;;  %v755_v37 = vld [vmem:[%s16504_s3 + $0x38] sm:$0xff] }
 0x18a   : > { %v609_v38 = vpop.xlane.xlu0 %608  ;;  %v597_v43 = vpop.xlane.xlu1 %596 }
 0x18b   : > { %v12224_v39 = vmul.f32 %v609_v38, %v368_v31  ;;  %v12238_v46 = vmul.f32 %v597_v43, %v364_v34  ;;  %v753_v34 = vld [vmem:[%s16504_s3 + $0x28] sm:$0xff]  ;;  %v756_v38 = vld [vmem:[%s16504_s3 + $0x40] sm:$0xff]  ;;  %v8169_v43 = vld [vmem:[%s16504_s3 + $0x110] sm:$0xff] }
 0x18d   : > { %10031 = vmatprep.subr.mxu1 %v12224_v39 }
 0x18e   : > { %v603_v41 = vpop.xlane.xlu0 %602  ;;  %10032 = vmatpush3.msra.mxu1 %v12224_v39  ;;  %v591_v47 = vpop.xlane.xlu1 %590 }
 0x18f   : > { %v12230_v42 = vmul.f32 %v603_v41, %v366_v33  ;;  %10033 = vmatprep.subr.mxu1 %v12226_v40  ;;  %v12246_v50 = vmul.f32 %v591_v47, %v362_v36  ;;  %v752_v33 = vld [vmem:[%s16504_s3 + $0x20] sm:$0xff]  ;;  %v754_v36 = vld [vmem:[%s16504_s3 + $0x30] sm:$0xff]  ;;  %v8168_v41 = vld [vmem:[%s16504_s3 + $0x108] sm:$0xff] }
 0x190   : > { %10034 = vmatpush3.msra.mxu1 %v12226_v40  ;;  %v758_v47 = vld [vmem:[%s16504_s3 + $0x50] sm:$0xff] }
 0x191   : > { %10035 = vmatprep.subr.mxu1 %v12230_v42 }
 0x192   : > { %v600_v44 = vpop.xlane.xlu0 %599  ;;  %10036 = vmatpush3.msra.mxu1 %v12230_v42  ;;  %v12263_v53 = vpop.permute.xlu1 %780 }
 0x193   : > { %v12236_v45 = vmul.f32 %v600_v44, %v365_v29  ;;  %16668 = vst [vmem:[#allocation18_spill] sm:$0xff] %v12263_v53  ;;  %v750_v29 = vld [vmem:[%s16504_s3 + $0x10] sm:$0xff]  ;;  %v757_v44 = vld [vmem:[%s16504_s3 + $0x48] sm:$0xff] }
 0x195   : > { %10037 = vmatprep.subr.mxu1 %v12236_v45 }
 0x196   : > { %v594_v48 = vpop.xlane.xlu0 %593  ;;  %10038 = vmatpush3.msra.mxu1 %v12236_v45  ;;  %v12277_v54 = vpop.permute.xlu1 %784 }
 0x197   : > { %v12242_v49 = vmul.f32 %v594_v48, %v363_v30  ;;  %10039 = vmatprep.subr.mxu1 %v12238_v46  ;;  %16669 = vst [vmem:[#allocation19_spill] sm:$0xff] %v12277_v54  ;;  %v8170_v48 = vld [vmem:[%s16504_s3 + $0x118] sm:$0xff] }
 0x198   : > { %10040 = vmatpush3.msra.mxu1 %v12238_v46 }
 0x199   : > { %10041 = vmatprep.subr.mxu1 %v12242_v49 }
 0x19a   : > { %v588_v51 = vpop.xlane.xlu0 %587  ;;  %10042 = vmatpush3.msra.mxu1 %v12242_v49  ;;  %v12293_v56 = vpop.permute.xlu1 %786 }
 0x19b   : > { %v12250_v52 = vmul.f32 %v588_v51, %v361_v32  ;;  %10043 = vmatprep.subr.mxu1 %v12246_v50  ;;  %16671 = vst [vmem:[#allocation21_spill] sm:$0xff] %v12293_v56  ;;  %v751_v32 = vld [vmem:[%s16504_s3 + $0x18] sm:$0xff]  ;;  %v8171_v51 = vld [vmem:[%s16504_s3 + $0x120] sm:$0xff] }
 0x19c   : > { %10044 = vmatpush3.msra.mxu1 %v12246_v50 }
 0x19d   : > { %10045 = vmatprep.subr.mxu1 %v12250_v52 }
 0x19e   : > { %10046 = vmatpush3.msra.mxu1 %v12250_v52  ;;  %v12284_v55 = vpop.permute.xlu0 %782  ;;  %v12304_v60 = vpop.permute.xlu1 %790 }
 0x19f   : > { %10048 = vmatmul.mubr.msk.f32.vlgmr.msra.gmra.mxu1 %vm618_vm2, %v12178_v12  ;;  %10059 = vmatprep.subr.mxu1 %v12224_v39  ;;  %16670 = vst [vmem:[#allocation20_spill] sm:$0xff] %v12284_v55  ;;  %16673 = vst [vmem:[#allocation23_spill] sm:$0xff] %v12304_v60 }
 0x1a0   : > { %10050 = vmatprep.mubr.msk.f32.mxu1 %vm618_vm2, %v12194_v24  ;;  %10060 = vmatpush3.msra.mxu1 %v12224_v39 }
 0x1a1   : > { %10061 = vmatprep.subr.mxu1 %v12226_v40 }
 0x1a2   : > { %10062 = vmatpush3.msra.mxu1 %v12226_v40  ;;  %v12300_v59 = vpop.permute.xlu0 %788  ;;  %v12314_v63 = vpop.permute.xlu1 %794 }
 0x1a3   : > { %10051 = vmatmul.mubr.msk.f32.gmra.mxu1 %vm618_vm2, %v12164_v3  ;;  %10063 = vmatprep.subr.mxu1 %v12230_v42  ;;  %16672 = vst [vmem:[#allocation22_spill] sm:$0xff] %v12300_v59  ;;  %16675 = vst [vmem:[#allocation25_spill] sm:$0xff] %v12314_v63 }
 0x1a4   : > { %10053 = vmatprep.mubr.msk.f32.mxu1 %vm618_vm2, %v12188_v20  ;;  %10064 = vmatpush3.msra.mxu1 %v12230_v42 }
 0x1a5   : > { %10065 = vmatprep.subr.mxu1 %v12236_v45 }
 0x1a6   : > { %10066 = vmatpush3.msra.mxu1 %v12236_v45  ;;  %v12308_v61 = vpop.permute.xlu0 %792 }
 0x1a7   : > { %10054 = vmatmul.mubr.msk.f32.gmra.mxu1 %vm618_vm2, %v12180_v14  ;;  %10067 = vmatprep.subr.mxu1 %v12238_v46  ;;  %16674 = vst [vmem:[#allocation24_spill] sm:$0xff] %v12308_v61 }
 0x1a8   : > { %10056 = vmatprep.mubr.msk.f32.mxu1 %vm618_vm2, %v12156_v57  ;;  %10068 = vmatpush3.msra.mxu1 %v12238_v46 }
 0x1a9   : > { %10069 = vmatprep.subr.mxu1 %v12242_v49 }
 0x1aa   : > { %10070 = vmatpush3.msra.mxu1 %v12242_v49 }
 0x1ab   : > { %10057 = vmatmul.mubr.msk.f32.gmra.mxu1 %vm618_vm2, %v12166_v5  ;;  %10071 = vmatprep.subr.mxu1 %v12246_v50 }
 0x1ac   : > { %10072 = vmatpush3.msra.mxu1 %v12246_v50  ;;  %10075 = vmatprep.mubr.msk.f32.mxu1 %vm618_vm2, %v12263_v53 }
 0x1ad   : > { %10073 = vmatprep.subr.mxu1 %v12250_v52 }
 0x1ae   : > { %10074 = vmatpush3.msra.mxu1 %v12250_v52 }
 0x1af   : > { %10076 = vmatmul.mubr.msk.f32.vlgmr.msra.gmra.mxu1 %vm618_vm2, %v12284_v55 }
 0x1b0   : > { %10078 = vmatprep.mubr.msk.f32.mxu1 %vm618_vm2, %v12277_v54 }
 0x1b3   : > { %10079 = vmatmul.mubr.msk.f32.gmra.mxu1 %vm618_vm2, %v12293_v56 }
 0x1b4   : > { %10081 = vmatprep.mubr.msk.f32.mxu1 %vm618_vm2, %v12300_v59 }
 0x1b7   : > { %10082 = vmatmul.mubr.msk.f32.gmra.mxu1 %vm618_vm2, %v12304_v60 }
 0x1b8   : > { %10084 = vmatprep.mubr.msk.f32.mxu1 %vm618_vm2, %v12308_v61 }
 0x1bb   : > { %10085 = vmatmul.mubr.msk.f32.gmra.mxu1 %vm618_vm2, %v12314_v63 }
 0x1bc   : > { %10167 = vmatprep.mubr.msk.f32.mxu1 %vm618_vm2, %v748_v1  ;;  %v760_v1 = vld [vmem:[%s16504_s3 + $0x60] sm:$0xff] }
 0x25f   : > { %v10049_v2 = vpop.f32.mrf.mxu1 }
 0x261   : > { %v709_v4 = vpop.f32.mrf.mxu1 }
 0x263   : > { %v10052_v8 = vpop.f32.mrf.mxu1 }
 0x265   : > { %v719_v10 = vpop.f32.mrf.mxu1 }
 0x267   : > { %v10055_v11 = vpop.f32.mrf.mxu1 }
 0x269   : > { %v729_v13 = vpop.f32.mrf.mxu1 }
 0x26b   : > { %v10058_v15 = vpop.f32.mrf.mxu1 }
 0x26c   : > { %10151 = vmatprep.subr.mxu1 %v10058_v15 }
 0x26d   : > { %v739_v17 = vpop.f32.mrf.mxu1  ;;  %10152 = vmatpush3.msra.mxu1 %v10058_v15  ;;  %v763_v15 = vld [vmem:[%s16504_s3 + $0x78] sm:$0xff] }
 0x26e   : > { %10153 = vmatprep.subr.mxu1 %v739_v17 }
 0x26f   : > { %v10077_v18 = vpop.f32.mrf.mxu1  ;;  %10154 = vmatpush3.msra.mxu1 %v739_v17  ;;  %v764_v17 = vld [vmem:[%s16504_s3 + $0x80] sm:$0xff] }
 0x270   : > { %10155 = vmatprep.subr.mxu1 %v10055_v11 }
 0x271   : > { %v878_v19 = vpop.f32.mrf.mxu1  ;;  %10156 = vmatpush3.msra.mxu1 %v10055_v11  ;;  %v8174_v11 = vld [vmem:[%s16504_s3 + $0x138] sm:$0xff] }
 0x272   : > { %10157 = vmatprep.subr.mxu1 %v729_v13 }
 0x273   : > { %v10080_v21 = vpop.f32.mrf.mxu1  ;;  %10158 = vmatpush3.msra.mxu1 %v729_v13  ;;  %v8175_v13 = vld [vmem:[%s16504_s3 + $0x140] sm:$0xff] }
 0x274   : > { %10159 = vmatprep.subr.mxu1 %v10052_v8 }
 0x275   : > { %v888_v23 = vpop.f32.mrf.mxu1  ;;  %10160 = vmatpush3.msra.mxu1 %v10052_v8  ;;  %v761_v8 = vld [vmem:[%s16504_s3 + $0x68] sm:$0xff] }
 0x276   : > { %10161 = vmatprep.subr.mxu1 %v719_v10 }
 0x277   : > { %v10083_v26 = vpop.f32.mrf.mxu1  ;;  %10162 = vmatpush3.msra.mxu1 %v719_v10  ;;  %v762_v10 = vld [vmem:[%s16504_s3 + $0x70] sm:$0xff] }
 0x278   : > { %10163 = vmatprep.subr.mxu1 %v10049_v2 }
 0x279   : > { %v898_v27 = vpop.f32.mrf.mxu1  ;;  %10164 = vmatpush3.msra.mxu1 %v10049_v2  ;;  %v8172_v2 = vld [vmem:[%s16504_s3 + $0x128] sm:$0xff] }
 0x27a   : > { %10165 = vmatprep.subr.mxu1 %v709_v4 }
 0x27b   : > { %v10086_v30 = vpop.f32.mrf.mxu1  ;;  %10166 = vmatpush3.msra.mxu1 %v709_v4  ;;  %v8173_v4 = vld [vmem:[%s16504_s3 + $0x130] sm:$0xff] }
 0x27c   : > { %10087 = vmatprep.subr.mxu0 %v10086_v30  ;;  %10168 = vmatmul.mubr.msk.f32.vlgmr.msra.gmra.mxu1 %vm618_vm2, %v749_v28  ;;  %v767_v28 = vld [vmem:[%s16504_s3 + $0x98] sm:$0xff] }
 0x27d   : > { %v908_v31 = vpop.f32.mrf.mxu1  ;;  %10088 = vmatpush3.msra.mxu0 %v10086_v30  ;;  %10170 = vmatprep.mubr.msk.f32.mxu1 %vm618_vm2, %v750_v29  ;;  %v768_v29 = vld [vmem:[%s16504_s3 + $0xa0] sm:$0xff]  ;;  %v8180_v30 = vld [vmem:[%s16504_s3 + $0x168] sm:$0xff] }
 0x27e   : > { %10089 = vmatprep.subr.mxu0 %v908_v31 }
 0x27f   : > { %10090 = vmatpush3.msra.mxu0 %v908_v31  ;;  %v8181_v31 = vld [vmem:[%s16504_s3 + $0x170] sm:$0xff] }
 0x280   : > { %10091 = vmatprep.subr.mxu0 %v10083_v26  ;;  %10171 = vmatmul.mubr.msk.f32.gmra.mxu1 %vm618_vm2, %v751_v32  ;;  %v769_v32 = vld [vmem:[%s16504_s3 + $0xa8] sm:$0xff] }
 0x281   : > { %10092 = vmatpush3.msra.mxu0 %v10083_v26  ;;  %10173 = vmatprep.mubr.msk.f32.mxu1 %vm618_vm2, %v752_v33  ;;  %v8178_v26 = vld [vmem:[%s16504_s3 + $0x158] sm:$0xff]  ;;  %v770_v33 = vld [vmem:[%s16504_s3 + $0xb0] sm:$0xff] }
 0x282   : > { %10093 = vmatprep.subr.mxu0 %v898_v27 }
 0x283   : > { %10094 = vmatpush3.msra.mxu0 %v898_v27  ;;  %v8179_v27 = vld [vmem:[%s16504_s3 + $0x160] sm:$0xff] }
 0x284   : > { %10095 = vmatprep.subr.mxu0 %v10080_v21  ;;  %10174 = vmatmul.mubr.msk.f32.gmra.mxu1 %vm618_vm2, %v753_v34  ;;  %v8182_v34 = vld [vmem:[%s16504_s3 + $0x178] sm:$0xff] }
 0x285   : > { %10096 = vmatpush3.msra.mxu0 %v10080_v21  ;;  %10176 = vmatprep.mubr.msk.f32.mxu1 %vm618_vm2, %v754_v36  ;;  %v765_v21 = vld [vmem:[%s16504_s3 + $0x88] sm:$0xff]  ;;  %v8183_v36 = vld [vmem:[%s16504_s3 + $0x180] sm:$0xff] }
 0x286   : > { %10097 = vmatprep.subr.mxu0 %v888_v23 }
 0x287   : > { %10098 = vmatpush3.msra.mxu0 %v888_v23  ;;  %v766_v23 = vld [vmem:[%s16504_s3 + $0x90] sm:$0xff] }
 0x288   : > { %10099 = vmatprep.subr.mxu0 %v10077_v18  ;;  %10177 = vmatmul.mubr.msk.f32.gmra.mxu1 %vm618_vm2, %v755_v37  ;;  %v771_v37 = vld [vmem:[%s16504_s3 + $0xb8] sm:$0xff] }
 0x289   : > { %10100 = vmatpush3.msra.mxu0 %v10077_v18  ;;  %10179 = vmatprep.mubr.msk.f32.mxu1 %vm618_vm2, %v756_v38  ;;  %v8176_v18 = vld [vmem:[%s16504_s3 + $0x148] sm:$0xff]  ;;  %v772_v38 = vld [vmem:[%s16504_s3 + $0xc0] sm:$0xff] }
 0x28a   : > { %10101 = vmatprep.subr.mxu0 %v878_v19 }
 0x28b   : > { %10102 = vmatpush3.msra.mxu0 %v878_v19  ;;  %v8177_v19 = vld [vmem:[%s16504_s3 + $0x150] sm:$0xff] }
 0x28c   : > { %10104 = vmatmul.mubr.msk.f32.vlgmr.msra.gmra.mxu0 %vm618_vm2, %v8168_v41  ;;  %10215 = vmatprep.subr.mxu0 %v12224_v39  ;;  %v8184_v41 = vld [vmem:[%s16504_s3 + $0x188] sm:$0xff] }
 0x28d   : > { %10216 = vmatpush3.msra.mxu0 %v12224_v39  ;;  %10106 = vmatprep.mubr.msk.f32.mxu0 %vm618_vm2, %v8169_v43  ;;  %v8185_v43 = vld [vmem:[%s16504_s3 + $0x190] sm:$0xff] }
 0x28e   : > { %10217 = vmatprep.subr.mxu0 %v12226_v40  ;;  %10180 = vmatmul.mubr.msk.f32.gmra.mxu1 %vm618_vm2, %v757_v44  ;;  %v773_v44 = vld [vmem:[%s16504_s3 + $0xc8] sm:$0xff] }
 0x28f   : > { %10218 = vmatpush3.msra.mxu0 %v12226_v40  ;;  %10182 = vmatprep.mubr.msk.f32.mxu1 %vm618_vm2, %v758_v47  ;;  %v774_v47 = vld [vmem:[%s16504_s3 + $0xd0] sm:$0xff] }
 0x290   : > { %10107 = vmatmul.mubr.msk.f32.gmra.mxu0 %vm618_vm2, %v8170_v48  ;;  %10219 = vmatprep.subr.mxu0 %v12230_v42  ;;  %v8186_v48 = vld [vmem:[%s16504_s3 + $0x198] sm:$0xff] }
 0x291   : > { %10220 = vmatpush3.msra.mxu0 %v12230_v42  ;;  %10109 = vmatprep.mubr.msk.f32.mxu0 %vm618_vm2, %v8171_v51  ;;  %v8187_v51 = vld [vmem:[%s16504_s3 + $0x1a0] sm:$0xff] }
 0x292   : > { %10221 = vmatprep.subr.mxu0 %v12236_v45  ;;  %10183 = vmatmul.mubr.msk.f32.gmra.mxu1 %vm618_vm2, %v759_v0  ;;  %v775_v0 = vld [vmem:[%s16504_s3 + $0xd8] sm:$0xff] }
 0x293   : > { %10222 = vmatpush3.msra.mxu0 %v12236_v45  ;;  %10185 = vmatprep.mubr.msk.f32.mxu1 %vm618_vm2, %v760_v1  ;;  %v776_v1 = vld [vmem:[%s16504_s3 + $0xe0] sm:$0xff] }
 0x294   : > { %10110 = vmatmul.mubr.msk.f32.gmra.mxu0 %vm618_vm2, %v8172_v2  ;;  %10223 = vmatprep.subr.mxu0 %v12238_v46  ;;  %v8188_v2 = vld [vmem:[%s16504_s3 + $0x1a8] sm:$0xff] }
 0x295   : > { %10224 = vmatpush3.msra.mxu0 %v12238_v46  ;;  %10112 = vmatprep.mubr.msk.f32.mxu0 %vm618_vm2, %v8173_v4  ;;  %v8189_v4 = vld [vmem:[%s16504_s3 + $0x1b0] sm:$0xff] }
 0x296   : > { %10225 = vmatprep.subr.mxu0 %v12242_v49  ;;  %10186 = vmatmul.mubr.msk.f32.gmra.mxu1 %vm618_vm2, %v761_v8  ;;  %v777_v8 = vld [vmem:[%s16504_s3 + $0xe8] sm:$0xff] }
 0x297   : > { %10226 = vmatpush3.msra.mxu0 %v12242_v49  ;;  %10188 = vmatprep.mubr.msk.f32.mxu1 %vm618_vm2, %v762_v10  ;;  %v778_v10 = vld [vmem:[%s16504_s3 + $0xf0] sm:$0xff] }
 0x298   : > { %10113 = vmatmul.mubr.msk.f32.gmra.mxu0 %vm618_vm2, %v8174_v11  ;;  %10227 = vmatprep.subr.mxu0 %v12246_v50  ;;  %v8190_v11 = vld [vmem:[%s16504_s3 + $0x1b8] sm:$0xff] }
 0x299   : > { %10228 = vmatpush3.msra.mxu0 %v12246_v50  ;;  %10115 = vmatprep.mubr.msk.f32.mxu0 %vm618_vm2, %v8175_v13  ;;  %v8191_v13 = vld [vmem:[%s16504_s3 + $0x1c0] sm:$0xff] }
 0x29a   : > { %10229 = vmatprep.subr.mxu0 %v12250_v52  ;;  %10189 = vmatmul.mubr.msk.f32.gmra.mxu1 %vm618_vm2, %v763_v15  ;;  %v779_v15 = vld [vmem:[%s16504_s3 + $0xf8] sm:$0xff] }
 0x29b   : > { %10230 = vmatpush3.msra.mxu0 %v12250_v52  ;;  %10191 = vmatprep.mubr.msk.f32.mxu1 %vm618_vm2, %v764_v17  ;;  %v8192_v17 = vld [vmem:[%s16504_s3 + $0x1c8] sm:$0xff] }
 0x29c   : > { %10116 = vmatmul.mubr.msk.f32.gmra.mxu0 %vm618_vm2, %v8176_v18  ;;  %10307 = vmatprep.subr.mxu0 %v12224_v39  ;;  %v8193_v18 = vld [vmem:[%s16504_s3 + $0x1d0] sm:$0xff] }
 0x29d   : > { %10118 = vmatprep.mubr.msk.f32.mxu0 %vm618_vm2, %v8177_v19  ;;  %v8194_v19 = vld [vmem:[%s16504_s3 + $0x1d8] sm:$0xff] }
 0x29e   : > { %10192 = vmatmul.mubr.msk.f32.gmra.mxu1 %vm618_vm2, %v765_v21  ;;  %v8195_v21 = vld [vmem:[%s16504_s3 + $0x1e0] sm:$0xff] }
 0x29f   : > { %10194 = vmatprep.mubr.msk.f32.mxu1 %vm618_vm2, %v766_v23  ;;  %v8196_v23 = vld [vmem:[%s16504_s3 + $0x1e8] sm:$0xff] }
 0x2a0   : > { %10119 = vmatmul.mubr.msk.f32.gmra.mxu0 %vm618_vm2, %v8178_v26  ;;  %v8197_v26 = vld [vmem:[%s16504_s3 + $0x1f0] sm:$0xff] }
 0x2a1   : > { %10121 = vmatprep.mubr.msk.f32.mxu0 %vm618_vm2, %v8179_v27  ;;  %v8198_v27 = vld [vmem:[%s16504_s3 + $0x1f8] sm:$0xff] }
 0x2a2   : > { %10195 = vmatmul.mubr.msk.f32.gmra.mxu1 %vm618_vm2, %v767_v28  ;;  %v12606_v28 = vpop.permute.xlu0 %2107 }
 0x2a3   : > { %10197 = vmatprep.mubr.msk.f32.mxu1 %vm618_vm2, %v768_v29  ;;  %16676 = vst [vmem:[#allocation26_spill] sm:$0xff] %v12606_v28  ;;  %v8343_v29 = vld [vmem:[%s16504_s3 + $0x300] sm:$0xff] }
 0x2a4   : > { %10122 = vmatmul.mubr.msk.f32.gmra.mxu0 %vm618_vm2, %v8180_v30 }
 0x2a5   : > { %10124 = vmatprep.mubr.msk.f32.mxu0 %vm618_vm2, %v8181_v31 }
 0x2a6   : > { %10198 = vmatmul.mubr.msk.f32.gmra.mxu1 %vm618_vm2, %v769_v32 }
 0x2a7   : > { %10200 = vmatprep.mubr.msk.f32.mxu1 %vm618_vm2, %v770_v33 }
 0x2a8   : > { %10125 = vmatmul.mubr.msk.f32.gmra.mxu0 %vm618_vm2, %v8182_v34 }
 0x2a9   : > { %10127 = vmatprep.mubr.msk.f32.mxu0 %vm618_vm2, %v8183_v36 }
 0x2aa   : > { %10201 = vmatmul.mubr.msk.f32.gmra.mxu1 %vm618_vm2, %v771_v37 }
 0x2ab   : > { %10203 = vmatprep.mubr.msk.f32.mxu1 %vm618_vm2, %v772_v38 }
 0x2ac   : > { %10128 = vmatmul.mubr.msk.f32.gmra.mxu0 %vm618_vm2, %v8184_v41 }
 0x2ad   : > { %10130 = vmatprep.mubr.msk.f32.mxu0 %vm618_vm2, %v8185_v43 }
 0x2ae   : > { %10204 = vmatmul.mubr.msk.f32.gmra.mxu1 %vm618_vm2, %v773_v44 }
 0x2af   : > { %10206 = vmatprep.mubr.msk.f32.mxu1 %vm618_vm2, %v774_v47 }
 0x2b0   : > { %10131 = vmatmul.mubr.msk.f32.gmra.mxu0 %vm618_vm2, %v8186_v48 }
 0x2b1   : > { %10133 = vmatprep.mubr.msk.f32.mxu0 %vm618_vm2, %v8187_v51 }
 0x2b2   : > { %10207 = vmatmul.mubr.msk.f32.gmra.mxu1 %vm618_vm2, %v775_v0 }
 0x2b3   : > { %10209 = vmatprep.mubr.msk.f32.mxu1 %vm618_vm2, %v776_v1 }
 0x2b4   : > { %10134 = vmatmul.mubr.msk.f32.gmra.mxu0 %vm618_vm2, %v8188_v2 }
 0x2b5   : > { %10136 = vmatprep.mubr.msk.f32.mxu0 %vm618_vm2, %v8189_v4 }
 0x2b6   : > { %10210 = vmatmul.mubr.msk.f32.gmra.mxu1 %vm618_vm2, %v777_v8 }
 0x2b7   : > { %10212 = vmatprep.mubr.msk.f32.mxu1 %vm618_vm2, %v778_v10 }
 0x2b8   : > { %10137 = vmatmul.mubr.msk.f32.gmra.mxu0 %vm618_vm2, %v8190_v11 }
 0x2b9   : > { %10139 = vmatprep.mubr.msk.f32.mxu0 %vm618_vm2, %v8191_v13 }
 0x2ba   : > { %10213 = vmatmul.mubr.msk.f32.gmra.mxu1 %vm618_vm2, %v779_v15 }
 0x2bc   : > { %10140 = vmatmul.mubr.msk.f32.gmra.mxu0 %vm618_vm2, %v8192_v17 }
 0x2bd   : > { %10142 = vmatprep.mubr.msk.f32.mxu0 %vm618_vm2, %v8193_v18 }
 0x2c0   : > { %10143 = vmatmul.mubr.msk.f32.gmra.mxu0 %vm618_vm2, %v8194_v19 }
 0x2c1   : > { %10145 = vmatprep.mubr.msk.f32.mxu0 %vm618_vm2, %v8195_v21 }
 0x2c4   : > { %10146 = vmatmul.mubr.msk.f32.gmra.mxu0 %vm618_vm2, %v8196_v23 }
 0x2c5   : > { %10148 = vmatprep.mubr.msk.f32.mxu0 %vm618_vm2, %v8197_v26 }
 0x2c8   : > { %10149 = vmatmul.mubr.msk.f32.gmra.mxu0 %vm618_vm2, %v8198_v27 }
 0x2c9   : > { %10231 = vmatprep.mubr.msk.f32.mxu0 %vm618_vm2, %v12196_v25 }
 0x2cc   : > { %10232 = vmatmul.mubr.msk.f32.vlgmr.msra.gmra.mxu0 %vm618_vm2, %v12170_v7 }
 0x2cd   : > { %10308 = vmatpush3.msra.mxu0 %v12224_v39  ;;  %10234 = vmatprep.mubr.msk.f32.mxu0 %vm618_vm2, %v12190_v22  ;;  %v12613_v39 = vpop.permute.xlu1 %2109 }
 0x2ce   : > { %10309 = vmatprep.subr.mxu0 %v12226_v40  ;;  %16677 = vst [vmem:[#allocation27_spill] sm:$0xff] %v12613_v39 }
 0x2cf   : > { %10310 = vmatpush3.msra.mxu0 %v12226_v40  ;;  %v12620_v40 = vpop.permute.xlu0 %2111 }
 0x2d0   : > { %10311 = vmatprep.subr.mxu0 %v12230_v42  ;;  %10235 = vmatmul.mubr.msk.f32.gmra.mxu0 %vm618_vm2, %v12160_v62  ;;  %16678 = vst [vmem:[#allocation28_spill] sm:$0xff] %v12620_v40 }
 0x2d1   : > { %10312 = vmatpush3.msra.mxu0 %v12230_v42  ;;  %10237 = vmatprep.mubr.msk.f32.mxu0 %vm618_vm2, %v12182_v16  ;;  %v12629_v42 = vpop.permute.xlu1 %2113 }
 0x2d2   : > { %10313 = vmatprep.subr.mxu0 %v12236_v45  ;;  %16679 = vst [vmem:[#allocation29_spill] sm:$0xff] %v12629_v42 }
 0x2d3   : > { %10314 = vmatpush3.msra.mxu0 %v12236_v45  ;;  %v12636_v45 = vpop.permute.xlu0 %2115 }
 0x2d4   : > { %10315 = vmatprep.subr.mxu0 %v12238_v46  ;;  %10238 = vmatmul.mubr.msk.f32.gmra.mxu0 %vm618_vm2, %v12172_v9  ;;  %16680 = vst [vmem:[#allocation30_spill] sm:$0xff] %v12636_v45 }
 0x2d5   : > { %10316 = vmatpush3.msra.mxu0 %v12238_v46  ;;  %10240 = vmatprep.mubr.msk.f32.mxu0 %vm618_vm2, %v12158_v58  ;;  %v12640_v46 = vpop.permute.xlu1 %2117 }
 0x2d6   : > { %10317 = vmatprep.subr.mxu0 %v12242_v49  ;;  %16681 = vst [vmem:[#allocation31_spill] sm:$0xff] %v12640_v46 }
 0x2d7   : > { %10318 = vmatpush3.msra.mxu0 %v12242_v49  ;;  %v12644_v49 = vpop.permute.xlu0 %2119 }
 0x2d8   : > { %10319 = vmatprep.subr.mxu0 %v12246_v50  ;;  %10241 = vmatmul.mubr.msk.f32.gmra.mxu0 %vm618_vm2, %v12168_v6  ;;  %16682 = vst [vmem:[#allocation32_spill] sm:$0xff] %v12644_v49 }
 0x2d9   : > { %10320 = vmatpush3.msra.mxu0 %v12246_v50  ;;  %10323 = vmatprep.mubr.msk.f32.mxu0 %vm618_vm2, %v12606_v28  ;;  %v12650_v50 = vpop.permute.xlu1 %2121 }
 0x2da   : > { %10321 = vmatprep.subr.mxu0 %v12250_v52  ;;  %16683 = vst [vmem:[#allocation33_spill] sm:$0xff] %v12650_v50 }
 0x2db   : > { %10322 = vmatpush3.msra.mxu0 %v12250_v52  ;;  %v8271_v52 = vld [vmem:[%s16504_s3 + $0x200] sm:$0xff] }
 0x2dc   : > { %10324 = vmatmul.mubr.msk.f32.vlgmr.msra.gmra.mxu0 %vm618_vm2, %v12613_v39  ;;  %10259 = vmatprep.mubr.msk.f32.mxu1 %vm618_vm2, %v8271_v52 }
 0x2dd   : > { %10326 = vmatprep.mubr.msk.f32.mxu0 %vm618_vm2, %v12620_v40 }
 0x2e0   : > { %10327 = vmatmul.mubr.msk.f32.gmra.mxu0 %vm618_vm2, %v12629_v42 }
 0x2e1   : > { %10329 = vmatprep.mubr.msk.f32.mxu0 %vm618_vm2, %v12636_v45 }
 0x2e4   : > { %10330 = vmatmul.mubr.msk.f32.gmra.mxu0 %vm618_vm2, %v12640_v46 }
 0x2e5   : > { %10332 = vmatprep.mubr.msk.f32.mxu0 %vm618_vm2, %v12644_v49 }
 0x2e8   : > { %10333 = vmatmul.mubr.msk.f32.gmra.mxu0 %vm618_vm2, %v12650_v50 }
 0x2e9   : > { %10351 = vmatprep.mubr.msk.f32.mxu0 %vm618_vm2, %v8343_v29 }
 0x33c   : > { %v10169_v30 = vpop.f32.mrf.mxu1 }
 0x33e   : > { %v12662_v31 = vpop.f32.mrf.mxu1 }
 0x33f   : > { %16684 = vst [vmem:[#allocation34_spill] sm:$0xff] %v12662_v31 }
 0x340   : > { %v10172_v32 = vpop.f32.mrf.mxu1 }
 0x342   : > { %v12664_v33 = vpop.f32.mrf.mxu1 }
 0x344   : > { %v10175_v34 = vpop.f32.mrf.mxu1 }
 0x346   : > { %v12666_v36 = vpop.f32.mrf.mxu1 }
 0x348   : > { %v10178_v37 = vpop.f32.mrf.mxu1 }
 0x34a   : > { %v12668_v38 = vpop.f32.mrf.mxu1 }
 0x34c   : > { %v10105_v41 = vpop.f32.mrf.mxu0 }
 0x34d   : > { %v12670_v43 = vadd.f32 %v10169_v30, %v10105_v41 }
 0x34e   : > { %v12672_v44 = vpop.f32.mrf.mxu0  ;;  %v10181_v47 = vpop.f32.mrf.mxu1 }
 0x34f   : > { %16685 = vst [vmem:[#allocation35_spill] sm:$0xff] %v12672_v44 }
 0x350   : > { %v10108_v48 = vpop.f32.mrf.mxu0  ;;  %v12674_v51 = vpop.f32.mrf.mxu1 }
 0x351   : > { %v12676_v0 = vadd.f32 %v10172_v32, %v10108_v48 }
 0x352   : > { %v12678_v1 = vpop.f32.mrf.mxu0  ;;  %v10184_v2 = vpop.f32.mrf.mxu1 }
 0x354   : > { %v10111_v4 = vpop.f32.mrf.mxu0  ;;  %v12680_v8 = vpop.f32.mrf.mxu1 }
 0x355   : > { %v12682_v10 = vadd.f32 %v10175_v34, %v10111_v4 }
 0x356   : > { %v12684_v11 = vpop.f32.mrf.mxu0  ;;  %v10187_v13 = vpop.f32.mrf.mxu1 }
 0x358   : > { %v10114_v15 = vpop.f32.mrf.mxu0  ;;  %v12686_v17 = vpop.f32.mrf.mxu1 }
 0x359   : > { %v12688_v18 = vadd.f32 %v10178_v37, %v10114_v15 }
 0x35a   : > { %v12690_v19 = vpop.f32.mrf.mxu0  ;;  %v10190_v21 = vpop.f32.mrf.mxu1 }
 0x35c   : > { %v10117_v23 = vpop.f32.mrf.mxu0  ;;  %v12692_v26 = vpop.f32.mrf.mxu1 }
 0x35d   : > { %v12694_v27 = vadd.f32 %v10181_v47, %v10117_v23 }
 0x35e   : > { %v12696_v52 = vpop.f32.mrf.mxu0  ;;  %v10193_v29 = vpop.f32.mrf.mxu1 }
 0x360   : > { %v10120_v30 = vpop.f32.mrf.mxu0  ;;  %v12698_v32 = vpop.f32.mrf.mxu1 }
 0x361   : > { %16686 = vst [vmem:[#allocation36_spill] sm:$0xff] %v12698_v32  ;;  %v12700_v34 = vadd.f32 %v10184_v2, %v10120_v30 }
 0x362   : > { %v12702_v41 = vpop.f32.mrf.mxu0  ;;  %v10196_v37 = vpop.f32.mrf.mxu1 }
 0x364   : > { %v10123_v48 = vpop.f32.mrf.mxu0  ;;  %v12704_v4 = vpop.f32.mrf.mxu1 }
 0x365   : > { %16687 = vst [vmem:[#allocation37_spill] sm:$0xff] %v12704_v4  ;;  %v12706_v15 = vadd.f32 %v10187_v13, %v10123_v48 }
 0x366   : > { %v12708_v50 = vpop.f32.mrf.mxu0  ;;  %v10199_v47 = vpop.f32.mrf.mxu1 }
 0x368   : > { %v10126_v23 = vpop.f32.mrf.mxu0  ;;  %v12710_v49 = vpop.f32.mrf.mxu1 }
 0x369   : > { %16688 = vst [vmem:[#allocation38_spill] sm:$0xff] %v12710_v49  ;;  %v12712_v46 = vadd.f32 %v10190_v21, %v10126_v23 }
 0x36a   : > { %v12714_v45 = vpop.f32.mrf.mxu0  ;;  %v10202_v2 = vpop.f32.mrf.mxu1 }
 0x36c   : > { %v10129_v30 = vpop.f32.mrf.mxu0  ;;  %v12716_v42 = vpop.f32.mrf.mxu1 }
 0x36d   : > { %16689 = vst [vmem:[#allocation39_spill] sm:$0xff] %v12716_v42  ;;  %v12718_v40 = vadd.f32 %v10193_v29, %v10129_v30 }
 0x36e   : > { %v12720_v39 = vpop.f32.mrf.mxu0  ;;  %v10205_v13 = vpop.f32.mrf.mxu1 }
 0x36f   : > { %16690 = vst [vmem:[#allocation40_spill] sm:$0xff] %v12720_v39 }
 0x370   : > { %v10132_v48 = vpop.f32.mrf.mxu0  ;;  %v12726_v61 = vpop.f32.mrf.mxu1 }
 0x371   : > { %v12722_v28 = vadd.f32 %v10196_v37, %v10132_v48 }
 0x372   : > { %v12724_v63 = vpop.f32.mrf.mxu0  ;;  %v10208_v59 = vpop.f32.mrf.mxu1 }
 0x373   : > { %16691 = vst [vmem:[#allocation41_spill] sm:$0xff] %v12724_v63 }
 0x374   : > { %v10135_v21 = vpop.f32.mrf.mxu0  ;;  %v12736_v30 = vpop.f32.mrf.mxu1 }
 0x375   : > { %v12728_v23 = vadd.f32 %v10199_v47, %v10135_v21 }
 0x376   : > { %v12730_v60 = vpop.f32.mrf.mxu0  ;;  %v10211_v54 = vpop.f32.mrf.mxu1 }
 0x377   : > { %16692 = vst [vmem:[#allocation42_spill] sm:$0xff] %v12728_v23  ;;  %16693 = vst [vmem:[#allocation43_spill] sm:$0xff] %v12730_v60 }
 0x378   : > { %v10138_v56 = vpop.f32.mrf.mxu0  ;;  %v12746_v21 = vpop.f32.mrf.mxu1 }
 0x379   : > { %v12732_v32 = vadd.f32 %v10202_v2, %v10138_v56  ;;  %16695 = vst [vmem:[#allocation45_spill] sm:$0xff] %v12746_v21 }
 0x37a   : > { %v12734_v29 = vpop.f32.mrf.mxu0  ;;  %v10214_v49 = vpop.f32.mrf.mxu1 }
 0x37b   : > { %16694 = vst [vmem:[#allocation44_spill] sm:$0xff] %v12734_v29 }
 0x37c   : > { %v10141_v39 = vpop.f32.mrf.mxu0 }
 0x37d   : > { %v12738_v37 = vadd.f32 %v10205_v13, %v10141_v39 }
 0x37e   : > { %v12740_v48 = vpop.f32.mrf.mxu0 }
 0x380   : > { %v10144_v55 = vpop.f32.mrf.mxu0 }
 0x381   : > { %v12742_v4 = vadd.f32 %v10208_v59, %v10144_v55 }
 0x382   : > { %v12744_v47 = vpop.f32.mrf.mxu0 }
 0x384   : > { %v10147_v63 = vpop.f32.mrf.mxu0 }
 0x385   : > { %v12748_v56 = vadd.f32 %v10211_v54, %v10147_v63 }
 0x386   : > { %v12750_v2 = vpop.f32.mrf.mxu0 }
 0x388   : > { %v10150_v60 = vpop.f32.mrf.mxu0 }
 0x389   : > { %v12752_v23 = vadd.f32 %v10214_v49, %v10150_v60 }
 0x38a   : > { %v12754_v39 = vpop.f32.mrf.mxu0 }
 0x38b   : > { %16696 = vst [vmem:[#allocation46_spill] sm:$0xff] %v12752_v23  ;;  %16697 = vst [vmem:[#allocation47_spill] sm:$0xff] %v12754_v39  ;;  %v8274_v23 = vld [vmem:[%s16504_s3 + $0x218] sm:$0xff] }
 0x38c   : > { %v10233_v13 = vpop.f32.mrf.mxu0 }
 0x38e   : > { %v1682_v42 = vpop.f32.mrf.mxu0 }
 0x390   : > { %v10236_v29 = vpop.f32.mrf.mxu0 }
 0x392   : > { %v1692_v55 = vpop.f32.mrf.mxu0 }
 0x394   : > { %v10239_v59 = vpop.f32.mrf.mxu0 }
 0x396   : > { %v1702_v31 = vpop.f32.mrf.mxu0 }
 0x398   : > { %v10242_v44 = vpop.f32.mrf.mxu0 }
 0x399   : > { %10243 = vmatprep.subr.mxu1 %v10242_v44 }
 0x39a   : > { %v1712_v21 = vpop.f32.mrf.mxu0  ;;  %10244 = vmatpush3.msra.mxu1 %v10242_v44 }
 0x39b   : > { %10245 = vmatprep.subr.mxu1 %v1712_v21 }
 0x39c   : > { %10246 = vmatpush3.msra.mxu1 %v1712_v21  ;;  %v12756_v54 = vpop.f32.mrf.mxu0 }
 0x39d   : > { %10247 = vmatprep.subr.mxu1 %v10239_v59 }
 0x39e   : > { %10248 = vmatpush3.msra.mxu1 %v10239_v59  ;;  %v12758_v60 = vpop.f32.mrf.mxu0  ;;  %v344_v59 = vld [vmem:[%s12764_s17 + $0x78] sm:$0xff] }
 0x39f   : > { %10249 = vmatprep.subr.mxu1 %v1702_v31 }
 0x3a0   : > { %10250 = vmatpush3.msra.mxu1 %v1702_v31  ;;  %v10328_v63 = vpop.f32.mrf.mxu0  ;;  %v8272_v31 = vld [vmem:[%s16504_s3 + $0x208] sm:$0xff] }
 0x3a1   : > { %10251 = vmatprep.subr.mxu1 %v10236_v29 }
 0x3a2   : > { %10252 = vmatpush3.msra.mxu1 %v10236_v29  ;;  %v2215_v49 = vpop.f32.mrf.mxu0  ;;  %v8273_v29 = vld [vmem:[%s16504_s3 + $0x210] sm:$0xff] }
 0x3a3   : > { %10253 = vmatprep.subr.mxu1 %v1692_v55 }
 0x3a4   : > { %10254 = vmatpush3.msra.mxu1 %v1692_v55  ;;  %v10331_v39 = vpop.f32.mrf.mxu0  ;;  %v360_v55 = vld [vmem:[%s12764_s17 + $0xf8] sm:$0xff] }
 0x3a5   : > { %10255 = vmatprep.subr.mxu1 %v10233_v13 }
 0x3a6   : > { %10256 = vmatpush3.msra.mxu1 %v10233_v13  ;;  %v2225_v44 = vpop.f32.mrf.mxu0 }
 0x3a7   : > { %10257 = vmatprep.subr.mxu1 %v1682_v42 }
 0x3a8   : > { %10258 = vmatpush3.msra.mxu1 %v1682_v42  ;;  %v10334_v21 = vpop.f32.mrf.mxu0  ;;  %v8275_v42 = vld [vmem:[%s16504_s3 + $0x220] sm:$0xff] }
 0x3a9   : > { %10260 = vmatmul.mubr.msk.f32.vlgmr.msra.gmra.mxu1 %vm618_vm2, %v8272_v31  ;;  %10335 = vmatprep.subr.mxu0 %v10334_v21  ;;  %v359_v31 = vld [vmem:[%s12764_s17 + $0xf0] sm:$0xff] }
 0x3aa   : > { %v2235_v13 = vpop.f32.mrf.mxu0  ;;  %10336 = vmatpush3.msra.mxu0 %v10334_v21  ;;  %10262 = vmatprep.mubr.msk.f32.mxu1 %vm618_vm2, %v8273_v29  ;;  %v343_v21 = vld [vmem:[%s12764_s17 + $0x70] sm:$0xff]  ;;  %v8276_v29 = vld [vmem:[%s16504_s3 + $0x228] sm:$0xff] }
 0x3ab   : > { %10337 = vmatprep.subr.mxu0 %v2235_v13  ;;  %9155 = vmatprep.subr.mxu1 %v360_v55  ;;  %v8277_v55 = vld [vmem:[%s16504_s3 + $0x230] sm:$0xff] }
 0x3ac   : > { %10338 = vmatpush3.msra.mxu0 %v2235_v13  ;;  %9156 = vmatpush3.msra.mxu1 %v344_v59  ;;  %v8278_v59 = vld [vmem:[%s16504_s3 + $0x238] sm:$0xff]  ;;  %v8279_v13 = vld [vmem:[%s16504_s3 + $0x240] sm:$0xff] }
 0x3ad   : > { %10263 = vmatmul.mubr.msk.f32.gmra.mxu1 %vm618_vm2, %v8274_v23  ;;  %10339 = vmatprep.subr.mxu0 %v10331_v39  ;;  %v358_v23 = vld [vmem:[%s12764_s17 + $0xe8] sm:$0xff] }
 0x3ae   : > { %10340 = vmatpush3.msra.mxu0 %v10331_v39  ;;  %10265 = vmatprep.mubr.msk.f32.mxu1 %vm618_vm2, %v8275_v42  ;;  %v342_v39 = vld [vmem:[%s12764_s17 + $0x68] sm:$0xff] }
 0x3af   : > { %10341 = vmatprep.subr.mxu0 %v2225_v44  ;;  %9157 = vmatprep.subr.mxu1 %v359_v31  ;;  %v8280_v42 = vld [vmem:[%s16504_s3 + $0x248] sm:$0xff]  ;;  %v8281_v31 = vld [vmem:[%s16504_s3 + $0x250] sm:$0xff] }
 0x3b0   : > { %10342 = vmatpush3.msra.mxu0 %v2225_v44  ;;  %9158 = vmatpush3.msra.mxu1 %v343_v21  ;;  %v357_v44 = vld [vmem:[%s12764_s17 + $0xe0] sm:$0xff]  ;;  %v356_v21 = vld [vmem:[%s12764_s17 + $0xd8] sm:$0xff] }
 0x3b1   : > { %10266 = vmatmul.mubr.msk.f32.gmra.mxu1 %vm618_vm2, %v8276_v29  ;;  %10343 = vmatprep.subr.mxu0 %v10328_v63  ;;  %v340_v29 = vld [vmem:[%s12764_s17 + $0x58] sm:$0xff] }
 0x3b2   : > { %10344 = vmatpush3.msra.mxu0 %v10328_v63  ;;  %10268 = vmatprep.mubr.msk.f32.mxu1 %vm618_vm2, %v8277_v55  ;;  %v341_v63 = vld [vmem:[%s12764_s17 + $0x60] sm:$0xff]  ;;  %v8282_v55 = vld [vmem:[%s16504_s3 + $0x258] sm:$0xff] }
 0x3b3   : > { %10345 = vmatprep.subr.mxu0 %v2215_v49  ;;  %9159 = vmatprep.subr.mxu1 %v358_v23  ;;  %v8283_v23 = vld [vmem:[%s16504_s3 + $0x260] sm:$0xff] }
 0x3b4   : > { %10346 = vmatpush3.msra.mxu0 %v2215_v49  ;;  %9160 = vmatpush3.msra.mxu1 %v342_v39  ;;  %v8344_v49 = vld [vmem:[%s16504_s3 + $0x308] sm:$0xff]  ;;  %v8347_v39 = vld [vmem:[%s16504_s3 + $0x320] sm:$0xff] }
 0x3b5   : > { %10269 = vmatmul.mubr.msk.f32.gmra.mxu1 %vm618_vm2, %v8278_v59  ;;  %10347 = vmatprep.subr.mxu0 %v12756_v54  ;;  %v355_v59 = vld [vmem:[%s12764_s17 + $0xd0] sm:$0xff] }
 0x3b6   : > { %10348 = vmatpush3.msra.mxu0 %v12756_v54  ;;  %10271 = vmatprep.mubr.msk.f32.mxu1 %vm618_vm2, %v8279_v13  ;;  %v8345_v54 = vld [vmem:[%s16504_s3 + $0x310] sm:$0xff] }
 0x3b7   : > { %10349 = vmatprep.subr.mxu0 %v12758_v60  ;;  %9161 = vmatprep.subr.mxu1 %v357_v44  ;;  %v339_v13 = vld [vmem:[%s12764_s17 + $0x50] sm:$0xff]  ;;  %v8284_v44 = vld [vmem:[%s16504_s3 + $0x268] sm:$0xff] }
 0x3b8   : > { %10350 = vmatpush3.msra.mxu0 %v12758_v60  ;;  %9162 = vmatpush3.msra.mxu1 %v341_v63  ;;  %v8346_v60 = vld [vmem:[%s16504_s3 + $0x318] sm:$0xff]  ;;  %v8348_v63 = vld [vmem:[%s16504_s3 + $0x328] sm:$0xff] }
 0x3b9   : > { %10272 = vmatmul.mubr.msk.f32.gmra.mxu1 %vm618_vm2, %v8280_v42  ;;  %10352 = vmatmul.mubr.msk.f32.vlgmr.msra.gmra.mxu0 %vm618_vm2, %v8344_v49  ;;  %v8285_v42 = vld [vmem:[%s16504_s3 + $0x270] sm:$0xff] }
 0x3ba   : > { %10274 = vmatprep.mubr.msk.f32.mxu1 %vm618_vm2, %v8281_v31  ;;  %10354 = vmatprep.mubr.msk.f32.mxu0 %vm618_vm2, %v8345_v54  ;;  %v8349_v49 = vld [vmem:[%s16504_s3 + $0x330] sm:$0xff]  ;;  %v354_v31 = vld [vmem:[%s12764_s17 + $0xc8] sm:$0xff] }
 0x3bb   : > { %9163 = vmatprep.subr.mxu1 %v356_v21  ;;  %v338_v54 = vld [vmem:[%s12764_s17 + $0x48] sm:$0xff]  ;;  %v8286_v21 = vld [vmem:[%s16504_s3 + $0x278] sm:$0xff] }
 0x3bc   : > { %9164 = vmatpush3.msra.mxu1 %v340_v29  ;;  %v8350_v29 = vld [vmem:[%s16504_s3 + $0x338] sm:$0xff] }
 0x3bd   : > { %10275 = vmatmul.mubr.msk.f32.gmra.mxu1 %vm618_vm2, %v8282_v55  ;;  %10355 = vmatmul.mubr.msk.f32.gmra.mxu0 %vm618_vm2, %v8346_v60  ;;  %v8287_v55 = vld [vmem:[%s16504_s3 + $0x280] sm:$0xff] }
 0x3be   : > { %10277 = vmatprep.mubr.msk.f32.mxu1 %vm618_vm2, %v8283_v23  ;;  %10357 = vmatprep.mubr.msk.f32.mxu0 %vm618_vm2, %v8347_v39  ;;  %v8351_v60 = vld [vmem:[%s16504_s3 + $0x340] sm:$0xff] }
 0x3bf   : > { %9165 = vmatprep.subr.mxu1 %v355_v59  ;;  %v353_v23 = vld [vmem:[%s12764_s17 + $0xc0] sm:$0xff]  ;;  %v8288_v59 = vld [vmem:[%s16504_s3 + $0x288] sm:$0xff] }
 0x3c0   : > { %9166 = vmatpush3.msra.mxu1 %v339_v13  ;;  %v337_v39 = vld [vmem:[%s12764_s17 + $0x40] sm:$0xff]  ;;  %v8352_v13 = vld [vmem:[%s16504_s3 + $0x348] sm:$0xff] }
 0x3c1   : > { %10278 = vmatmul.mubr.msk.f32.gmra.mxu1 %vm618_vm2, %v8284_v44  ;;  %10358 = vmatmul.mubr.msk.f32.gmra.mxu0 %vm618_vm2, %v8348_v63  ;;  %v8289_v44 = vld [vmem:[%s16504_s3 + $0x290] sm:$0xff] }
 0x3c2   : > { %10280 = vmatprep.mubr.msk.f32.mxu1 %vm618_vm2, %v8285_v42  ;;  %10360 = vmatprep.mubr.msk.f32.mxu0 %vm618_vm2, %v8349_v49  ;;  %v8353_v63 = vld [vmem:[%s16504_s3 + $0x350] sm:$0xff]  ;;  %v352_v42 = vld [vmem:[%s12764_s17 + $0xb8] sm:$0xff] }
 0x3c3   : > { %9167 = vmatprep.subr.mxu1 %v354_v31  ;;  %v336_v49 = vld [vmem:[%s12764_s17 + $0x38] sm:$0xff] }
 0x3c4   : > { %9168 = vmatpush3.msra.mxu1 %v338_v54  ;;  %v8290_v31 = vld [vmem:[%s16504_s3 + $0x298] sm:$0xff] }
 0x3c5   : > { %10281 = vmatmul.mubr.msk.f32.gmra.mxu1 %vm618_vm2, %v8286_v21  ;;  %10361 = vmatmul.mubr.msk.f32.gmra.mxu0 %vm618_vm2, %v8350_v29  ;;  %v8354_v54 = vld [vmem:[%s16504_s3 + $0x358] sm:$0xff]  ;;  %v8291_v21 = vld [vmem:[%s16504_s3 + $0x2a0] sm:$0xff] }
 0x3c6   : > { %10283 = vmatprep.mubr.msk.f32.mxu1 %vm618_vm2, %v8287_v55  ;;  %10363 = vmatprep.mubr.msk.f32.mxu0 %vm618_vm2, %v8351_v60  ;;  %v8355_v29 = vld [vmem:[%s16504_s3 + $0x360] sm:$0xff]  ;;  %v351_v55 = vld [vmem:[%s12764_s17 + $0xb0] sm:$0xff] }
 0x3c7   : > { %9169 = vmatprep.subr.mxu1 %v353_v23  ;;  %v335_v60 = vld [vmem:[%s12764_s17 + $0x30] sm:$0xff]  ;;  %v8292_v23 = vld [vmem:[%s16504_s3 + $0x2a8] sm:$0xff] }
 0x3c8   : > { %9170 = vmatpush3.msra.mxu1 %v337_v39  ;;  %v8356_v39 = vld [vmem:[%s16504_s3 + $0x368] sm:$0xff] }
 0x3c9   : > { %10284 = vmatmul.mubr.msk.f32.gmra.mxu1 %vm618_vm2, %v8288_v59  ;;  %10364 = vmatmul.mubr.msk.f32.gmra.mxu0 %vm618_vm2, %v8352_v13  ;;  %v8293_v59 = vld [vmem:[%s16504_s3 + $0x2b0] sm:$0xff] }
 0x3ca   : > { %10286 = vmatprep.mubr.msk.f32.mxu1 %vm618_vm2, %v8289_v44  ;;  %10366 = vmatprep.mubr.msk.f32.mxu0 %vm618_vm2, %v8353_v63  ;;  %v8357_v13 = vld [vmem:[%s16504_s3 + $0x370] sm:$0xff]  ;;  %v350_v44 = vld [vmem:[%s12764_s17 + $0xa8] sm:$0xff] }
 0x3cb   : > { %9171 = vmatprep.subr.mxu1 %v352_v42  ;;  %v334_v63 = vld [vmem:[%s12764_s17 + $0x28] sm:$0xff]  ;;  %v8294_v42 = vld [vmem:[%s16504_s3 + $0x2b8] sm:$0xff] }
 0x3cc   : > { %9172 = vmatpush3.msra.mxu1 %v336_v49  ;;  %v8358_v49 = vld [vmem:[%s16504_s3 + $0x378] sm:$0xff] }
 0x3cd   : > { %10287 = vmatmul.mubr.msk.f32.gmra.mxu1 %vm618_vm2, %v8290_v31  ;;  %10367 = vmatmul.mubr.msk.f32.gmra.mxu0 %vm618_vm2, %v8354_v54  ;;  %v8295_v31 = vld [vmem:[%s16504_s3 + $0x2c0] sm:$0xff] }
 0x3ce   : > { %10289 = vmatprep.mubr.msk.f32.mxu1 %vm618_vm2, %v8291_v21  ;;  %10369 = vmatprep.mubr.msk.f32.mxu0 %vm618_vm2, %v8355_v29  ;;  %v8359_v54 = vld [vmem:[%s16504_s3 + $0x380] sm:$0xff] }
 0x3cf   : > { %9173 = vmatprep.subr.mxu1 %v351_v55  ;;  %v349_v21 = vld [vmem:[%s12764_s17 + $0xa0] sm:$0xff]  ;;  %v8296_v55 = vld [vmem:[%s16504_s3 + $0x2c8] sm:$0xff] }
 0x3d0   : > { %9174 = vmatpush3.msra.mxu1 %v335_v60  ;;  %v333_v29 = vld [vmem:[%s12764_s17 + $0x20] sm:$0xff]  ;;  %v8360_v60 = vld [vmem:[%s16504_s3 + $0x388] sm:$0xff] }
 0x3d1   : > { %10290 = vmatmul.mubr.msk.f32.gmra.mxu1 %vm618_vm2, %v8292_v23  ;;  %10370 = vmatmul.mubr.msk.f32.gmra.mxu0 %vm618_vm2, %v8356_v39  ;;  %v8297_v23 = vld [vmem:[%s16504_s3 + $0x2d0] sm:$0xff] }
 0x3d2   : > { %10292 = vmatprep.mubr.msk.f32.mxu1 %vm618_vm2, %v8293_v59  ;;  %10372 = vmatprep.mubr.msk.f32.mxu0 %vm618_vm2, %v8357_v13  ;;  %v8361_v39 = vld [vmem:[%s16504_s3 + $0x390] sm:$0xff]  ;;  %v348_v59 = vld [vmem:[%s12764_s17 + $0x98] sm:$0xff] }
 0x3d3   : > { %9175 = vmatprep.subr.mxu1 %v350_v44  ;;  %v332_v13 = vld [vmem:[%s12764_s17 + $0x18] sm:$0xff] }
 0x3d4   : > { %9176 = vmatpush3.msra.mxu1 %v334_v63  ;;  %v8298_v44 = vld [vmem:[%s16504_s3 + $0x2d8] sm:$0xff] }
 0x3d5   : > { %10293 = vmatmul.mubr.msk.f32.gmra.mxu1 %vm618_vm2, %v8294_v42  ;;  %10373 = vmatmul.mubr.msk.f32.gmra.mxu0 %vm618_vm2, %v8358_v49  ;;  %v8362_v63 = vld [vmem:[%s16504_s3 + $0x398] sm:$0xff]  ;;  %v8299_v42 = vld [vmem:[%s16504_s3 + $0x2e0] sm:$0xff] }
 0x3d6   : > { %10295 = vmatprep.mubr.msk.f32.mxu1 %vm618_vm2, %v8295_v31  ;;  %10375 = vmatprep.mubr.msk.f32.mxu0 %vm618_vm2, %v8359_v54  ;;  %v8363_v49 = vld [vmem:[%s16504_s3 + $0x3a0] sm:$0xff]  ;;  %v347_v31 = vld [vmem:[%s12764_s17 + $0x90] sm:$0xff] }
 0x3d7   : > { %9177 = vmatprep.subr.mxu1 %v349_v21  ;;  %v331_v54 = vld [vmem:[%s12764_s17 + $0x10] sm:$0xff]  ;;  %v8300_v21 = vld [vmem:[%s16504_s3 + $0x2e8] sm:$0xff] }
 0x3d8   : > { %9178 = vmatpush3.msra.mxu1 %v333_v29  ;;  %v8364_v29 = vld [vmem:[%s16504_s3 + $0x3a8] sm:$0xff] }
 0x3d9   : > { %10296 = vmatmul.mubr.msk.f32.gmra.mxu1 %vm618_vm2, %v8296_v55  ;;  %10376 = vmatmul.mubr.msk.f32.gmra.mxu0 %vm618_vm2, %v8360_v60  ;;  %v8301_v55 = vld [vmem:[%s16504_s3 + $0x2f0] sm:$0xff] }
 0x3da   : > { %10298 = vmatprep.mubr.msk.f32.mxu1 %vm618_vm2, %v8297_v23  ;;  %10378 = vmatprep.mubr.msk.f32.mxu0 %vm618_vm2, %v8361_v39  ;;  %v8365_v60 = vld [vmem:[%s16504_s3 + $0x3b0] sm:$0xff]  ;;  %v346_v23 = vld [vmem:[%s12764_s17 + $0x88] sm:$0xff] }
 0x3db   : > { %9179 = vmatprep.subr.mxu1 %v348_v59  ;;  %v330_v39 = vld [vmem:[%s12764_s17 + $0x8] sm:$0xff]  ;;  %v8302_v59 = vld [vmem:[%s16504_s3 + $0x2f8] sm:$0xff] }
 0x3dc   : > { %9180 = vmatpush3.msra.mxu1 %v332_v13  ;;  %v8366_v13 = vld [vmem:[%s16504_s3 + $0x3b8] sm:$0xff] }
 0x3dd   : > { %10299 = vmatmul.mubr.msk.f32.gmra.mxu1 %vm618_vm2, %v8298_v44  ;;  %10379 = vmatmul.mubr.msk.f32.gmra.mxu0 %vm618_vm2, %v8362_v63  ;;  %v345_v44 = vld [vmem:[%s12764_s17 + $0x80] sm:$0xff] }
 0x3de   : > { %10301 = vmatprep.mubr.msk.f32.mxu1 %vm618_vm2, %v8299_v42  ;;  %10381 = vmatprep.mubr.msk.f32.mxu0 %vm618_vm2, %v8363_v49  ;;  %v8367_v63 = vld [vmem:[%s16504_s3 + $0x3c0] sm:$0xff]  ;;  %v8368_v49 = vld [vmem:[%s16504_s3 + $0x3c8] sm:$0xff] }
 0x3df   : > { %9181 = vmatprep.subr.mxu1 %v347_v31  ;;  %v329_v42 = vld [vmem:[%s12764_s17] sm:$0xff]  ;;  %v8369_v31 = vld [vmem:[%s16504_s3 + $0x3d0] sm:$0xff] }
 0x3e0   : > { %9182 = vmatpush3.msra.mxu1 %v331_v54  ;;  %v8370_v54 = vld [vmem:[%s16504_s3 + $0x3d8] sm:$0xff] }
 0x3e1   : > { %10302 = vmatmul.mubr.msk.f32.gmra.mxu1 %vm618_vm2, %v8300_v21  ;;  %10382 = vmatmul.mubr.msk.f32.gmra.mxu0 %vm618_vm2, %v8364_v29  ;;  %v8371_v21 = vld [vmem:[%s16504_s3 + $0x3e0] sm:$0xff]  ;;  %v8372_v29 = vld [vmem:[%s16504_s3 + $0x3e8] sm:$0xff] }
 0x3e2   : > { %10304 = vmatprep.mubr.msk.f32.mxu1 %vm618_vm2, %v8301_v55  ;;  %10384 = vmatprep.mubr.msk.f32.mxu0 %vm618_vm2, %v8365_v60  ;;  %v8373_v55 = vld [vmem:[%s16504_s3 + $0x3f0] sm:$0xff]  ;;  %v8374_v60 = vld [vmem:[%s16504_s3 + $0x3f8] sm:$0xff] }
 0x3e3   : > { %9183 = vmatprep.subr.mxu1 %v346_v23  ;;  %v13070_v23 = vpop.f32.mrf.mxu1 }
 0x3e4   : > { %9184 = vmatpush3.msra.mxu1 %v330_v39  ;;  %16698 = vst [vmem:[#allocation48_spill] sm:$0xff] %v13070_v23 }
 0x3e5   : > { %10305 = vmatmul.mubr.msk.f32.gmra.mxu1 %vm618_vm2, %v8302_v59  ;;  %10385 = vmatmul.mubr.msk.f32.gmra.mxu0 %vm618_vm2, %v8366_v13 }
 0x3e6   : > { %2886 = vmatprep.mubr.f32.mxu1 %v12196_v25  ;;  %9185 = vmatprep.subr.mxu1 %v345_v44 }
 0x3e7   : > { %10387 = vmatprep.mubr.msk.f32.mxu0 %vm618_vm2, %v8367_v63  ;;  %9186 = vmatpush3.msra.mxu1 %v329_v42 }
 0x3e9   : > { %10388 = vmatmul.mubr.msk.f32.gmra.mxu0 %vm618_vm2, %v8368_v49  ;;  %2887 = vmatmul.mubr.f32.vlgmr.msra.gmra.mxu1 %v12152_v35 }
 0x3ea   : > { %2891 = vmatprep.mubr.f32.mxu1 %v12170_v7  ;;  %10390 = vmatprep.mubr.msk.f32.mxu0 %vm618_vm2, %v8369_v31 }
 0x3ed   : > { %10391 = vmatmul.mubr.msk.f32.gmra.mxu0 %vm618_vm2, %v8370_v54  ;;  %2892 = vmatmul.mubr.f32.gmra.mxu1 %v12178_v12 }
 0x3ee   : > { %2896 = vmatprep.mubr.f32.mxu1 %v12190_v22  ;;  %10393 = vmatprep.mubr.msk.f32.mxu0 %vm618_vm2, %v8371_v21 }
 0x3f1   : > { %10394 = vmatmul.mubr.msk.f32.gmra.mxu0 %vm618_vm2, %v8372_v29  ;;  %2897 = vmatmul.mubr.f32.gmra.mxu1 %v12194_v24 }
 0x3f2   : > { %2901 = vmatprep.mubr.f32.mxu1 %v12160_v62  ;;  %10396 = vmatprep.mubr.msk.f32.mxu0 %vm618_vm2, %v8373_v55 }
 0x3f5   : > { %10397 = vmatmul.mubr.msk.f32.gmra.mxu0 %vm618_vm2, %v8374_v60  ;;  %2902 = vmatmul.mubr.f32.gmra.mxu1 %v12164_v3 }
 0x3f6   : > { %2906 = vmatprep.mubr.f32.mxu1 %v12182_v16  ;;  %10415 = vmatprep.mubr.msk.f32.mxu0 %vm618_vm2, %v12152_v35 }
 0x3f9   : > { %2907 = vmatmul.mubr.f32.gmra.mxu1 %v12188_v20  ;;  %v1474_v20 = vadd.f32 %v12674_v51, %v12696_v52 }
 0x3fa   : > { %2911 = vmatprep.mubr.f32.mxu1 %v12172_v9 }
 0x3fd   : > { %2912 = vmatmul.mubr.f32.gmra.mxu1 %v12180_v14 }
 0x3fe   : > { %2916 = vmatprep.mubr.f32.mxu1 %v12158_v58 }
 0x401   : > { %2917 = vmatmul.mubr.f32.gmra.mxu1 %v12156_v57 }
 0x402   : > { %2921 = vmatprep.mubr.f32.mxu1 %v12168_v6 }
 0x405   : > { %2922 = vmatmul.mubr.f32.gmra.mxu1 %v12166_v5 }
 0x406   : > { %10443 = vmatprep.mubr.msk.f32.mxu1 %vm618_vm2, %v12263_v53 }
 0x469   : > { %v10261_v39 = vpop.f32.mrf.mxu1 }
 0x46a   : > { %v2076_v59 = vadd.f32 %v10261_v39, %v12670_v43 }
 0x46b   : > { %v13073_v13 = vpop.f32.mrf.mxu1 }
 0x46d   : > { %v10264_v44 = vpop.f32.mrf.mxu1 }
 0x46e   : > { %v13076_v63 = vadd.f32 %v10264_v44, %v12676_v0 }
 0x46f   : > { %v13078_v42 = vpop.f32.mrf.mxu1 }
 0x471   : > { %v13080_v49 = vpop.f32.mrf.mxu1 }
 0x473   : > { %v13082_v31 = vpop.f32.mrf.mxu1 }
 0x475   : > { %v10270_v54 = vpop.f32.mrf.mxu1 }
 0x476   : > { %v2082_v62 = vadd.f32 %v10270_v54, %v12688_v18 }
 0x477   : > { %v13084_v21 = vpop.f32.mrf.mxu1 }
 0x479   : > { %v10273_v29 = vpop.f32.mrf.mxu1  ;;  %v10353_v55 = vpop.f32.mrf.mxu0 }
 0x47a   : > { %v13086_v60 = vadd.f32 %v10353_v55, %v2076_v59  ;;  %v2084_v5 = vadd.f32 %v10273_v29, %v12694_v27 }
 0x47b   : > { %v1956_v43 = vpop.f32.mrf.mxu1  ;;  %v13088_v39 = vpop.f32.mrf.mxu0 }
 0x47c   : > { %16699 = vst [vmem:[#allocation49_spill] sm:$0xff] %v13088_v39  ;;  %v2083_v54 = vadd.f32 %v1956_v43, %v1474_v20 }
 0x47d   : > { %v10276_v53 = vpop.f32.mrf.mxu1  ;;  %v13090_v35 = vpop.f32.mrf.mxu0 }
 0x47f   : > { %v1966_v0 = vpop.f32.mrf.mxu1  ;;  %v13092_v44 = vpop.f32.mrf.mxu0 }
 0x481   : > { %v10279_v6 = vpop.f32.mrf.mxu1  ;;  %v13094_v58 = vpop.f32.mrf.mxu0 }
 0x483   : > { %v1976_v9 = vpop.f32.mrf.mxu1  ;;  %v13096_v16 = vpop.f32.mrf.mxu0 }
 0x485   : > { %v10282_v22 = vpop.f32.mrf.mxu1  ;;  %v10362_v59 = vpop.f32.mrf.mxu0 }
 0x486   : > { %v2605_v55 = vadd.f32 %v10362_v59, %v2082_v62 }
 0x487   : > { %v1986_v7 = vpop.f32.mrf.mxu1  ;;  %v13099_v25 = vpop.f32.mrf.mxu0 }
 0x488   : > { %2667 = vperm.xlu1 %11572, %v2605_v55   ;;  %v2086_v55 = vadd.f32 %v10276_v53, %v12700_v34  ;;  %v2088_v53 = vadd.f32 %v10279_v6, %v12706_v15  ;;  %v2090_v15 = vadd.f32 %v10282_v22, %v12712_v46  ;;  %v1464_v22 = vadd.f32 %v12668_v38, %v12690_v19 }
 0x489   : > { %v10285_v57 = vpop.f32.mrf.mxu1  ;;  %v10365_v14 = vpop.f32.mrf.mxu0 }
 0x48a   : > { %v2092_v3 = vadd.f32 %v10285_v57, %v12718_v40  ;;  %v2607_v24 = vadd.f32 %v10365_v14, %v2084_v5  ;;  %v1484_v5 = vadd.f32 %v12680_v8, %v12702_v41  ;;  %v1494_v8 = vadd.f32 %v12686_v17, %v12708_v50 }
 0x48b   : > { %v13105_v12 = vpop.f32.mrf.mxu1  ;;  %v2479_v18 = vpop.f32.mrf.mxu0 }
 0x48c   : > { %2677 = vperm.xlu1 %11572, %v2607_v24   ;;  %v2606_v39 = vadd.f32 %v2479_v18, %v2083_v54  ;;  %v2085_v40 = vadd.f32 %v1966_v0, %v1484_v5 }
 0x48d   : > { %v10288_v62 = vpop.f32.mrf.mxu1  ;;  %v10368_v59 = vpop.f32.mrf.mxu0 }
 0x48e   : > { %v13108_v23 = vadd.f32 %v10288_v62, %v12722_v28  ;;  %v2609_v14 = vadd.f32 %v10368_v59, %v2086_v55  ;;  %v2087_v55 = vadd.f32 %v1976_v9, %v1494_v8 }
 0x48f   : > { %v13110_v27 = vpop.f32.mrf.mxu1  ;;  %v2489_v29 = vpop.f32.mrf.mxu0 }
 0x490   : > { %2672 = vperm.xlu1 %11572, %v2606_v39   ;;  %v2608_v43 = vadd.f32 %v2489_v29, %v2085_v40 }
 0x491   : > { %v13113_v51 = vpop.f32.mrf.mxu1  ;;  %v10371_v57 = vpop.f32.mrf.mxu0 }
 0x492   : > { %v2611_v41 = vadd.f32 %v10371_v57, %v2088_v53 }
 0x493   : > { %v13117_v20 = vpop.f32.mrf.mxu1  ;;  %v2499_v24 = vpop.f32.mrf.mxu0 }
 0x494   : > { %2687 = vperm.xlu1 %11572, %v2609_v14   ;;  %v2610_v14 = vadd.f32 %v2499_v24, %v2087_v55 }
 0x495   : > { %v10294_v28 = vpop.f32.mrf.mxu1  ;;  %v10374_v52 = vpop.f32.mrf.mxu0 }
 0x496   : > { %v2613_v17 = vadd.f32 %v10374_v52, %v2090_v15  ;;  %v2080_v15 = vadd.f32 %v13080_v49, %v12682_v10  ;;  %v1564_v49 = vadd.f32 %v12736_v30, %v12744_v47 }
 0x497   : > { %v13119_v18 = vpop.f32.mrf.mxu1  ;;  %v2509_v54 = vpop.f32.mrf.mxu0 }
 0x498   : > { %2682 = vperm.xlu1 %11572, %v2608_v43  }
 0x499   : > { %v10297_v34 = vpop.f32.mrf.mxu1  ;;  %v10377_v39 = vpop.f32.mrf.mxu0 }
 0x49a   : > { %v13124_v62 = vadd.f32 %v10377_v39, %v2092_v3  ;;  %v1504_v3 = vadd.f32 %v12692_v26, %v12714_v45  ;;  %v2098_v39 = vadd.f32 %v10294_v28, %v12732_v32  ;;  %v2081_v45 = vadd.f32 %v13084_v21, %v1464_v22 }
 0x49b   : > { %v2036_v59 = vpop.f32.mrf.mxu1  ;;  %v13126_v0 = vpop.f32.mrf.mxu0  ;;  %v2100_v26 = vadd.f32 %v10297_v34, %v12738_v37  ;;  %v1554_v28 = vadd.f32 %v12726_v61, %v12740_v48  ;;  %v1454_v34 = vadd.f32 %v12666_v36, %v12684_v11 }
 0x49c   : > { %2697 = vperm.xlu1 %11572, %v2611_v41   ;;  %v2089_v53 = vadd.f32 %v1986_v7, %v1504_v3  ;;  %v2604_v38 = vadd.f32 %v13099_v25, %v2081_v45  ;;  %v2603_v3 = vadd.f32 %v13094_v58, %v2080_v15  ;;  %v16704_v15 = vld [vmem:[#allocation47_spill] sm:$0xff] }
 0x49d   : > { %v10300_v29 = vpop.f32.mrf.mxu1  ;;  %v13128_v5 = vpop.f32.mrf.mxu0  ;;  %v2099_v21 = vadd.f32 %v2036_v59, %v1554_v28  ;;  %v16702_v28 = vld [vmem:[#allocation34_spill] sm:$0xff] }
 0x49e   : > { %v2612_v46 = vadd.f32 %v2509_v54, %v2089_v53  ;;  %v2102_v53 = vadd.f32 %v10300_v29, %v12742_v4  ;;  %v1444_v4 = vadd.f32 %v12664_v33, %v12678_v1 }
 0x49f   : > { %v2046_v40 = vpop.f32.mrf.mxu1  ;;  %v13130_v6 = vpop.f32.mrf.mxu0 }
 0x4a0   : > { %2692 = vperm.xlu1 %11572, %v2610_v14  }
 0x4a1   : > { %v10303_v43 = vpop.f32.mrf.mxu1  ;;  %v13133_v50 = vpop.f32.mrf.mxu0 }
 0x4a2   : > { %v2104_v47 = vadd.f32 %v10303_v43, %v12748_v56 }
 0x4a3   : > { %v2056_v57 = vpop.f32.mrf.mxu1  ;;  %v13137_v9 = vpop.f32.mrf.mxu0 }
 0x4a4   : > { %2707 = vperm.xlu1 %11572, %v2613_v17   ;;  %v2079_v17 = vadd.f32 %v13082_v31, %v1454_v34  ;;  %v2601_v31 = vadd.f32 %v13090_v35, %v13076_v63  ;;  %v16701_v63 = vld [vmem:[#allocation35_spill] sm:$0xff]  ;;  %v16706_v34 = vld [vmem:[#allocation49_spill] sm:$0xff] }
 0x4a5   : > { %v13140_v24 = vpop.f32.mrf.mxu1  ;;  %v10386_v8 = vpop.f32.mrf.mxu0 }
 0x4a6   : > { %v2621_v41 = vadd.f32 %v10386_v8, %v2098_v39  ;;  %v2602_v59 = vadd.f32 %v13096_v16, %v2079_v17  ;;  %v2101_v39 = vadd.f32 %v2046_v40, %v1564_v49  ;;  %v2077_v16 = vadd.f32 %v13078_v42, %v1444_v4 }
 0x4a7   : > { %v13144_v55 = vpop.f32.mrf.mxu1  ;;  %v13146_v14 = vpop.f32.mrf.mxu0  ;;  %v1434_v42 = vadd.f32 %v16702_v28, %v16701_v63 }
 0x4a8   : > { %2702 = vperm.xlu1 %11572, %v2612_v46   ;;  %2747 = vperm.xlu0 %11571, %v2621_v41   ;;  %v16700_v46 = vld [vmem:[#allocation45_spill] sm:$0xff]  ;;  %v2600_v45 = vadd.f32 %v13092_v44, %v2077_v16 }
 0x4a9   : > { %v10389_v7 = vpop.f32.mrf.mxu0  ;;  %v13150_v32 = vpop.f32.mrf.mxu1  ;;  %v1574_v41 = vadd.f32 %v16700_v46, %v12750_v2 }
 0x4aa   : > { %v2623_v19 = vadd.f32 %v10389_v7, %v2100_v26 }
 0x4ab   : > { %v2559_v52 = vpop.f32.mrf.mxu0  ;;  %v13155_v54 = vpop.f32.mrf.mxu1  ;;  %v2103_v7 = vadd.f32 %v2056_v57, %v1574_v41  ;;  %v16705_v57 = vld [vmem:[#allocation48_spill] sm:$0xff] }
 0x4ac   : > { %2662 = vperm.xlu1 %11572, %v2604_v38   ;;  %2757 = vperm.xlu0 %11571, %v2623_v19   ;;  %v2622_v61 = vadd.f32 %v2559_v52, %v2099_v21  ;;  %v2075_v19 = vadd.f32 %v13073_v13, %v1434_v42  ;;  %v16703_v52 = vld [vmem:[#allocation46_spill] sm:$0xff]  ;;  %v1584_v21 = vadd.f32 %v16705_v57, %v16704_v15  ;;  %v16727_v15 = vld [vmem:[#allocation36_spill] sm:$0xff] }
 0x4ad   : > { %v13159_v37 = vpop.f32.mrf.mxu1  ;;  %v10392_v48 = vpop.f32.mrf.mxu0  ;;  %v2106_v2 = vadd.f32 %v13140_v24, %v16703_v52  ;;  %v16723_v52 = vld [vmem:[#allocation20_spill] sm:$0xff]  ;;  %v16728_v57 = vld [vmem:[#allocation6_spill] sm:$0xff] }
 0x4ae   : > { %v2625_v36 = vadd.f32 %v10392_v48, %v2102_v53  ;;  %v13195_v53 = vpop.permute.xlu0 %2964  ;;  %v2105_v49 = vadd.f32 %v13144_v55, %v1584_v21  ;;  %v16729_v21 = vld [vmem:[#allocation21_spill] sm:$0xff] }
 0x4af   : > { %v13164_v25 = vpop.f32.mrf.mxu1  ;;  %v2569_v11 = vpop.f32.mrf.mxu0  ;;  %16707 = vst [vmem:[#allocation45_spill] sm:$0xff] %v13195_v53 }
 0x4b0   : > { %2657 = vperm.xlu1 %11572, %v2603_v3   ;;  %2752 = vperm.xlu0 %11571, %v2622_v61   ;;  %v2624_v29 = vadd.f32 %v2569_v11, %v2101_v39  ;;  %v2598_v3 = vadd.f32 %v16706_v34, %v2075_v19  ;;  %v9192_v28 = vadd.f32 %v13164_v25, %v13159_v37  ;;  %v16722_v19 = vld [vmem:[#allocation11_spill] sm:$0xff] }
 0x4b1   : > { %v13168_v10 = vpop.f32.mrf.mxu1  ;;  %v10395_v22 = vpop.f32.mrf.mxu0  ;;  %v9189_v25 = vadd.f32 %v13155_v54, %v13150_v32  ;;  %v16720_v32 = vld [vmem:[#allocation41_spill] sm:$0xff] }
 0x4b2   : > { %v2627_v26 = vadd.f32 %v10395_v22, %v2104_v47  ;;  %v13203_v22 = vpop.permute.xlu0 %2954  ;;  %v16721_v54 = vld [vmem:[#allocation37_spill] sm:$0xff] }
 0x4b3   : > { %v13173_v58 = vpop.f32.mrf.mxu1  ;;  %v2579_v33 = vpop.f32.mrf.mxu0  ;;  %16711 = vst [vmem:[#allocation34_spill] sm:$0xff] %v13203_v22 }
 0x4b4   : > { %2652 = vperm.xlu1 %11572, %v2602_v59   ;;  %2767 = vperm.xlu0 %11571, %v2625_v36   ;;  %v2626_v38 = vadd.f32 %v2579_v33, %v2103_v7  ;;  %v13198_v59 = vpop.permute.xlu1 %2959  ;;  %v16710_v36 = vld [vmem:[#allocation39_spill] sm:$0xff]  ;;  %v9195_v63 = vadd.f32 %v13173_v58, %v13168_v10  ;;  %v2617_v58 = vadd.f32 %v13128_v5, %v13108_v23 }
 0x4b5   : > { %v13175_v8 = vpop.f32.mrf.mxu1  ;;  %v10398_v56 = vpop.f32.mrf.mxu0  ;;  %16708 = vst [vmem:[#allocation35_spill] sm:$0xff] %v13198_v59 }
 0x4b6   : > { %v2629_v61 = vadd.f32 %v10398_v56, %v2106_v2  ;;  %v1524_v56 = vadd.f32 %v16721_v54, %v16720_v32  ;;  %v16725_v2 = vld [vmem:[#allocation19_spill] sm:$0xff]  ;;  %v11581_v32 = vld [vmem:[%s16504_s3 + $0x18] sm:$0xff]  ;;  %v11582_v54 = vld [vmem:[%s16504_s3 + $0x20] sm:$0xff] }
 0x4b7   : > { %v9197_v30 = vpop.f32.mrf.mxu1  ;;  %v2589_v48 = vpop.f32.mrf.mxu0 }
 0x4b8   : > { %2647 = vperm.xlu1 %11572, %v2601_v31   ;;  %2762 = vperm.xlu0 %11571, %v2624_v29   ;;  %v2628_v24 = vadd.f32 %v2589_v48, %v2105_v49  ;;  %v13214_v41 = vpop.permute.xlu1 %2949  ;;  %v9198_v7 = vadd.f32 %v9197_v30, %v13175_v8  ;;  %v2093_v23 = vadd.f32 %v13110_v27, %v1524_v56  ;;  %v16724_v27 = vld [vmem:[#allocation16_spill] sm:$0xff]  ;;  %v16733_v49 = vld [vmem:[#allocation23_spill] sm:$0xff] }
 0x4b9   : > { %v9199_v40 = vpop.f32.mrf.mxu1  ;;  %16712 = vst [vmem:[#allocation46_spill] sm:$0xff] %v13214_v41  ;;  %v11583_v56 = vld [vmem:[%s16504_s3 + $0x128] sm:$0xff] }
 0x4ba   : > { %v2616_v5 = vadd.f32 %v13130_v6, %v2093_v23  ;;  %v11584_v23 = vld [vmem:[%s16504_s3 + $0x130] sm:$0xff] }
 0x4bb   : > { %v9200_v1 = vpop.f32.mrf.mxu1 }
 0x4bc   : > { %2642 = vperm.xlu1 %11572, %v2600_v45   ;;  %2777 = vperm.xlu0 %11571, %v2627_v26   ;;  %v16713_v45 = vld [vmem:[#allocation42_spill] sm:$0xff]  ;;  %v9201_v26 = vadd.f32 %v9200_v1, %v9199_v40  ;;  %v16715_v40 = vld [vmem:[#allocation43_spill] sm:$0xff]  ;;  %v13243_v30 = vpop.permute.xlu1 %2939 }
 0x4bd   : > { %v9202_v35 = vpop.f32.mrf.mxu1  ;;  %v16716_v1 = vld [vmem:[#allocation38_spill] sm:$0xff]  ;;  %16717 = vst [vmem:[#allocation48_spill] sm:$0xff] %v13243_v30 }
 0x4bf   : > { %v9203_v43 = vpop.f32.mrf.mxu1 }
 0x4c0   : > { %2637 = vperm.xlu1 %11572, %v13086_v60   ;;  %2772 = vperm.xlu0 %11571, %v2626_v38   ;;  %v16709_v60 = vld [vmem:[#allocation44_spill] sm:$0xff]  ;;  %v9204_v16 = vadd.f32 %v9203_v43, %v9202_v35  ;;  %v1534_v35 = vadd.f32 %v16716_v1, %v16715_v40  ;;  %v13274_v38 = vpop.permute.xlu1 %2929 }
 0x4c1   : > { %v9205_v44 = vpop.f32.mrf.mxu1  ;;  %v1544_v11 = vadd.f32 %v16710_v36, %v16709_v60  ;;  %16719 = vst [vmem:[#allocation44_spill] sm:$0xff] %v13274_v38  ;;  %v13281_v43 = vmul.f32 %v9189_v25, %v13274_v38  ;;  %v11574_v60 = vld [vmem:[%s16504_s3] sm:$0xff]  ;;  %v11579_v25 = vld [vmem:[%s16504_s3 + $0x118] sm:$0xff] }
 0x4c2   : > { %v13220_v33 = vmul.f32 %v9204_v16, %v13203_v22  ;;  %v2095_v8 = vadd.f32 %v13117_v20, %v1534_v35  ;;  %v13256_v20 = vmul.f32 %v9195_v63, %v13243_v30  ;;  %v11575_v63 = vld [vmem:[%s16504_s3 + $0x108] sm:$0xff] }
 0x4c3   : > { %v9206_v17 = vpop.f32.mrf.mxu1  ;;  %v2097_v29 = vadd.f32 %v13119_v18, %v1544_v11  ;;  %v2096_v18 = vadd.f32 %v13113_v51, %v16713_v45  ;;  %v13228_v51 = vpop.permute.xlu0 %2944 }
 0x4c4   : > { %2632 = vperm.xlu1 %11572, %v2598_v3   ;;  %2787 = vperm.xlu0 %11571, %v2629_v61   ;;  %v9207_v4 = vadd.f32 %v9206_v17, %v9205_v44  ;;  %16714 = vst [vmem:[#allocation47_spill] sm:$0xff] %v13228_v51  ;;  %v13248_v42 = vmul.f32 %v9198_v7, %v13228_v51  ;;  %v16726_v44 = vld [vmem:[#allocation40_spill] sm:$0xff]  ;;  %v16730_v3 = vld [vmem:[#allocation14_spill] sm:$0xff] }
 0x4c5   : > { %v9208_v13 = vpop.f32.mrf.mxu1  ;;  %v2620_v47 = vadd.f32 %v13146_v14, %v2097_v29  ;;  %v2619_v14 = vadd.f32 %v13133_v50, %v2096_v18  ;;  %v13237_v50 = vmul.f32 %v9201_v26, %v13214_v41  ;;  %v2618_v10 = vadd.f32 %v13137_v9, %v2095_v8  ;;  %v16731_v61 = vld [vmem:[#allocation22_spill] sm:$0xff]  ;;  %v16732_v17 = vld [vmem:[#allocation12_spill] sm:$0xff] }
 0x4c6   : > { %v13210_v46 = vmul.f32 %v9207_v4, %v13198_v59  ;;  %v1514_v6 = vadd.f32 %v16727_v15, %v16726_v44  ;;  %v11576_v8 = vld [vmem:[%s16504_s3 + $0x110] sm:$0xff]  ;;  %v11587_v15 = vld [vmem:[%s16504_s3 + $0x138] sm:$0xff] }
 0x4c7   : > { %v9209_v39 = vpop.f32.mrf.mxu1  ;;  %v13260_v37 = vpop.permute.xlu0 %2934  ;;  %v11586_v44 = vld [vmem:[%s16504_s3 + $0x30] sm:$0xff] }
 0x4c8   : > { %v9210_v31 = vadd.f32 %v9209_v39, %v9208_v13  ;;  %2782 = vperm.xlu0 %11571, %v2628_v24   ;;  %16718 = vst [vmem:[#allocation49_spill] sm:$0xff] %v13260_v37  ;;  %v13266_v9 = vmul.f32 %v9192_v28, %v13260_v37  ;;  %v2091_v34 = vadd.f32 %v13105_v12, %v1514_v6  ;;  %v16734_v13 = vld [vmem:[#allocation3_spill] sm:$0xff]  ;;  %v16735_v12 = vld [vmem:[#allocation24_spill] sm:$0xff]  ;;  %v16737_v24 = vld [vmem:[#allocation25_spill] sm:$0xff] }
 0x4c9   : > { %v11577_v28 = vld [vmem:[%s16504_s3 + $0x8] sm:$0xff]  ;;  %v11588_v6 = vld [vmem:[%s16504_s3 + $0x140] sm:$0xff] }
 0x4ca   : > { %v13206_v55 = vmul.f32 %v9210_v31, %v13195_v53  ;;  %v2614_v48 = vadd.f32 %v13126_v0, %v2091_v34  ;;  %v11573_v0 = vld [vmem:[%s16504_s3 + $0x100] sm:$0xff]  ;;  %v11589_v34 = vld [vmem:[%s16504_s3 + $0x38] sm:$0xff] }
 0x4cc   : > { %10399 = vmatprep.subr.mxu0 %v13206_v55  ;;  %10427 = vmatprep.subr.mxu1 %v13206_v55 }
 0x4cd   : > { %2742 = vperm.xlu0 %11571, %v2620_v47   ;;  %10400 = vmatpush3.msra.mxu0 %v13206_v55 }
 0x4ce   : > { %10428 = vmatpush3.msra.mxu1 %v13206_v55  ;;  %10401 = vmatprep.subr.mxu0 %v13210_v46 }
 0x4cf   : > { %10429 = vmatprep.subr.mxu1 %v13210_v46  ;;  %10402 = vmatpush3.msra.mxu0 %v13210_v46 }
 0x4d0   : > { %10430 = vmatpush3.msra.mxu1 %v13210_v46  ;;  %10403 = vmatprep.subr.mxu0 %v13220_v33 }
 0x4d1   : > { %10431 = vmatprep.subr.mxu1 %v13220_v33  ;;  %2737 = vperm.xlu0 %11571, %v2619_v14  }
 0x4d2   : > { %10404 = vmatpush3.msra.mxu0 %v13220_v33  ;;  %10432 = vmatpush3.msra.mxu1 %v13220_v33 }
 0x4d3   : > { %10405 = vmatprep.subr.mxu0 %v13237_v50  ;;  %10433 = vmatprep.subr.mxu1 %v13237_v50 }
 0x4d4   : > { %10406 = vmatpush3.msra.mxu0 %v13237_v50  ;;  %10434 = vmatpush3.msra.mxu1 %v13237_v50 }
 0x4d5   : > { %10407 = vmatprep.subr.mxu0 %v13248_v42  ;;  %10435 = vmatprep.subr.mxu1 %v13248_v42 }
 0x4d6   : > { %2732 = vperm.xlu0 %11571, %v2618_v10   ;;  %10408 = vmatpush3.msra.mxu0 %v13248_v42  ;;  %v11578_v10 = vld [vmem:[%s16504_s3 + $0x10] sm:$0xff] }
 0x4d7   : > { %10436 = vmatpush3.msra.mxu1 %v13248_v42  ;;  %10409 = vmatprep.subr.mxu0 %v13256_v20 }
 0x4d8   : > { %10437 = vmatprep.subr.mxu1 %v13256_v20  ;;  %10410 = vmatpush3.msra.mxu0 %v13256_v20 }
 0x4d9   : > { %10438 = vmatpush3.msra.mxu1 %v13256_v20  ;;  %10411 = vmatprep.subr.mxu0 %v13266_v9 }
 0x4da   : > { %10439 = vmatprep.subr.mxu1 %v13266_v9  ;;  %2727 = vperm.xlu0 %11571, %v2617_v58   ;;  %v11580_v58 = vld [vmem:[%s16504_s3 + $0x120] sm:$0xff] }
 0x4db   : > { %10412 = vmatpush3.msra.mxu0 %v13266_v9  ;;  %10440 = vmatpush3.msra.mxu1 %v13266_v9 }
 0x4dc   : > { %10413 = vmatprep.subr.mxu0 %v13281_v43  ;;  %10441 = vmatprep.subr.mxu1 %v13281_v43 }
 0x4dd   : > { %10414 = vmatpush3.msra.mxu0 %v13281_v43  ;;  %10442 = vmatpush3.msra.mxu1 %v13281_v43 }
 0x4de   : > { %10416 = vmatmul.mubr.msk.f32.vlgmr.msra.gmra.mxu0 %vm618_vm2, %v16722_v19  ;;  %10444 = vmatmul.mubr.msk.f32.vlgmr.msra.gmra.mxu1 %vm618_vm2, %v16723_v52 }
 0x4df   : > { %2722 = vperm.xlu0 %11571, %v2616_v5   ;;  %10418 = vmatprep.mubr.msk.f32.mxu0 %vm618_vm2, %v16724_v27  ;;  %v11585_v5 = vld [vmem:[%s16504_s3 + $0x28] sm:$0xff] }
 0x4e0   : > { %10446 = vmatprep.mubr.msk.f32.mxu1 %vm618_vm2, %v16725_v2 }
 0x4e2   : > { %10419 = vmatmul.mubr.msk.f32.gmra.mxu0 %vm618_vm2, %v16728_v57  ;;  %10447 = vmatmul.mubr.msk.f32.gmra.mxu1 %vm618_vm2, %v16729_v21 }
 0x4e3   : > { %2717 = vperm.xlu0 %11571, %v13124_v62   ;;  %10421 = vmatprep.mubr.msk.f32.mxu0 %vm618_vm2, %v16730_v3  ;;  %v16736_v62 = vld [vmem:[#allocation7_spill] sm:$0xff] }
 0x4e4   : > { %10449 = vmatprep.mubr.msk.f32.mxu1 %vm618_vm2, %v16731_v61 }
 0x4e6   : > { %10422 = vmatmul.mubr.msk.f32.gmra.mxu0 %vm618_vm2, %v16732_v17  ;;  %10450 = vmatmul.mubr.msk.f32.gmra.mxu1 %vm618_vm2, %v16733_v49 }
 0x4e7   : > { %2712 = vperm.xlu0 %11571, %v2614_v48   ;;  %10424 = vmatprep.mubr.msk.f32.mxu0 %vm618_vm2, %v16734_v13  ;;  %v11590_v48 = vld [vmem:[%s16504_s3 + $0x40] sm:$0xff] }
 0x4e8   : > { %10452 = vmatprep.mubr.msk.f32.mxu1 %vm618_vm2, %v16735_v12 }
 0x4ea   : > { %10425 = vmatmul.mubr.msk.f32.gmra.mxu0 %vm618_vm2, %v16736_v62  ;;  %10453 = vmatmul.mubr.msk.f32.gmra.mxu1 %vm618_vm2, %v16737_v24 }
 0x4eb   : > { %10471 = vmatprep.mubr.msk.f32.mxu0 %vm618_vm2, %v11573_v0  ;;  %10535 = vmatprep.mubr.msk.f32.mxu1 %vm618_vm2, %v11574_v60  ;;  %v11591_v0 = vld [vmem:[%s16504_s3 + $0x148] sm:$0xff]  ;;  %v11592_v60 = vld [vmem:[%s16504_s3 + $0x150] sm:$0xff] }
 0x59e   : > { %v10417_v36 = vpop.f32.mrf.mxu0  ;;  %v10445_v11 = vpop.f32.mrf.mxu1 }
 0x5a0   : > { %v3041_v39 = vpop.f32.mrf.mxu0  ;;  %v3146_v4 = vpop.f32.mrf.mxu1 }
 0x5a2   : > { %v10420_v31 = vpop.f32.mrf.mxu0  ;;  %v10448_v29 = vpop.f32.mrf.mxu1 }
 0x5a4   : > { %v3051_v16 = vpop.f32.mrf.mxu0  ;;  %v3156_v47 = vpop.f32.mrf.mxu1 }
 0x5a6   : > { %v10423_v45 = vpop.f32.mrf.mxu0  ;;  %v10451_v18 = vpop.f32.mrf.mxu1 }
 0x5a8   : > { %v3061_v26 = vpop.f32.mrf.mxu0  ;;  %v3166_v14 = vpop.f32.mrf.mxu1 }
 0x5aa   : > { %v10426_v7 = vpop.f32.mrf.mxu0  ;;  %v10454_v40 = vpop.f32.mrf.mxu1 }
 0x5ab   : > { %10455 = vmatprep.subr.mxu0 %v10454_v40  ;;  %10519 = vmatprep.subr.mxu1 %v10426_v7 }
 0x5ac   : > { %v3071_v1 = vpop.f32.mrf.mxu0  ;;  %v3176_v35 = vpop.f32.mrf.mxu1  ;;  %10456 = vmatpush3.msra.mxu0 %v10454_v40  ;;  %10520 = vmatpush3.msra.mxu1 %v10426_v7  ;;  %v11605_v7 = vld [vmem:[%s16504_s3 + $0x78] sm:$0xff]  ;;  %v11606_v40 = vld [vmem:[%s16504_s3 + $0x80] sm:$0xff] }
 0x5ad   : > { %10457 = vmatprep.subr.mxu0 %v3176_v35  ;;  %10521 = vmatprep.subr.mxu1 %v3071_v1 }
 0x5ae   : > { %10458 = vmatpush3.msra.mxu0 %v3176_v35  ;;  %10522 = vmatpush3.msra.mxu1 %v3071_v1  ;;  %v11607_v1 = vld [vmem:[%s16504_s3 + $0x188] sm:$0xff]  ;;  %v11608_v35 = vld [vmem:[%s16504_s3 + $0x190] sm:$0xff] }
 0x5af   : > { %10459 = vmatprep.subr.mxu0 %v10451_v18  ;;  %10523 = vmatprep.subr.mxu1 %v10423_v45 }
 0x5b0   : > { %10460 = vmatpush3.msra.mxu0 %v10451_v18  ;;  %10524 = vmatpush3.msra.mxu1 %v10423_v45  ;;  %v11601_v45 = vld [vmem:[%s16504_s3 + $0x68] sm:$0xff]  ;;  %v11602_v18 = vld [vmem:[%s16504_s3 + $0x70] sm:$0xff] }
 0x5b1   : > { %10461 = vmatprep.subr.mxu0 %v3166_v14  ;;  %10525 = vmatprep.subr.mxu1 %v3061_v26 }
 0x5b2   : > { %10462 = vmatpush3.msra.mxu0 %v3166_v14  ;;  %10526 = vmatpush3.msra.mxu1 %v3061_v26  ;;  %v11603_v26 = vld [vmem:[%s16504_s3 + $0x178] sm:$0xff]  ;;  %v11604_v14 = vld [vmem:[%s16504_s3 + $0x180] sm:$0xff] }
 0x5b3   : > { %10463 = vmatprep.subr.mxu0 %v10448_v29  ;;  %10527 = vmatprep.subr.mxu1 %v10420_v31 }
 0x5b4   : > { %10464 = vmatpush3.msra.mxu0 %v10448_v29  ;;  %10528 = vmatpush3.msra.mxu1 %v10420_v31  ;;  %v11597_v31 = vld [vmem:[%s16504_s3 + $0x58] sm:$0xff]  ;;  %v11598_v29 = vld [vmem:[%s16504_s3 + $0x60] sm:$0xff] }
 0x5b5   : > { %10465 = vmatprep.subr.mxu0 %v3156_v47  ;;  %10529 = vmatprep.subr.mxu1 %v3051_v16 }
 0x5b6   : > { %10466 = vmatpush3.msra.mxu0 %v3156_v47  ;;  %10530 = vmatpush3.msra.mxu1 %v3051_v16  ;;  %v11599_v16 = vld [vmem:[%s16504_s3 + $0x168] sm:$0xff]  ;;  %v11600_v47 = vld [vmem:[%s16504_s3 + $0x170] sm:$0xff] }
 0x5b7   : > { %10467 = vmatprep.subr.mxu0 %v10445_v11  ;;  %10531 = vmatprep.subr.mxu1 %v10417_v36 }
 0x5b8   : > { %10468 = vmatpush3.msra.mxu0 %v10445_v11  ;;  %10532 = vmatpush3.msra.mxu1 %v10417_v36  ;;  %v11593_v36 = vld [vmem:[%s16504_s3 + $0x48] sm:$0xff]  ;;  %v11594_v11 = vld [vmem:[%s16504_s3 + $0x50] sm:$0xff] }
 0x5b9   : > { %10469 = vmatprep.subr.mxu0 %v3146_v4  ;;  %10533 = vmatprep.subr.mxu1 %v3041_v39 }
 0x5ba   : > { %10470 = vmatpush3.msra.mxu0 %v3146_v4  ;;  %10534 = vmatpush3.msra.mxu1 %v3041_v39  ;;  %v11595_v39 = vld [vmem:[%s16504_s3 + $0x158] sm:$0xff]  ;;  %v11596_v4 = vld [vmem:[%s16504_s3 + $0x160] sm:$0xff] }
 0x5bb   : > { %10472 = vmatmul.mubr.msk.f32.vlgmr.msra.gmra.mxu0 %vm618_vm2, %v11575_v63  ;;  %10583 = vmatprep.subr.mxu0 %v13206_v55  ;;  %v11609_v63 = vld [vmem:[%s16504_s3 + $0x88] sm:$0xff] }
 0x5bc   : > { %10584 = vmatpush3.msra.mxu0 %v13206_v55  ;;  %10474 = vmatprep.mubr.msk.f32.mxu0 %vm618_vm2, %v11576_v8  ;;  %v11610_v8 = vld [vmem:[%s16504_s3 + $0x90] sm:$0xff] }
 0x5bd   : > { %10585 = vmatprep.subr.mxu0 %v13210_v46  ;;  %10536 = vmatmul.mubr.msk.f32.vlgmr.msra.gmra.mxu1 %vm618_vm2, %v11577_v28  ;;  %v11611_v28 = vld [vmem:[%s16504_s3 + $0x198] sm:$0xff] }
 0x5be   : > { %10586 = vmatpush3.msra.mxu0 %v13210_v46  ;;  %10538 = vmatprep.mubr.msk.f32.mxu1 %vm618_vm2, %v11578_v10  ;;  %v11612_v10 = vld [vmem:[%s16504_s3 + $0x1a0] sm:$0xff] }
 0x5bf   : > { %10475 = vmatmul.mubr.msk.f32.gmra.mxu0 %vm618_vm2, %v11579_v25  ;;  %10587 = vmatprep.subr.mxu0 %v13220_v33  ;;  %v11613_v25 = vld [vmem:[%s16504_s3 + $0x98] sm:$0xff] }
 0x5c0   : > { %10588 = vmatpush3.msra.mxu0 %v13220_v33  ;;  %10477 = vmatprep.mubr.msk.f32.mxu0 %vm618_vm2, %v11580_v58  ;;  %v11614_v58 = vld [vmem:[%s16504_s3 + $0xa0] sm:$0xff] }
 0x5c1   : > { %10589 = vmatprep.subr.mxu0 %v13237_v50  ;;  %10539 = vmatmul.mubr.msk.f32.gmra.mxu1 %vm618_vm2, %v11581_v32  ;;  %v11615_v32 = vld [vmem:[%s16504_s3 + $0x1a8] sm:$0xff] }
 0x5c2   : > { %10590 = vmatpush3.msra.mxu0 %v13237_v50  ;;  %10541 = vmatprep.mubr.msk.f32.mxu1 %vm618_vm2, %v11582_v54  ;;  %v11616_v54 = vld [vmem:[%s16504_s3 + $0x1b0] sm:$0xff] }
 0x5c3   : > { %10478 = vmatmul.mubr.msk.f32.gmra.mxu0 %vm618_vm2, %v11583_v56  ;;  %10591 = vmatprep.subr.mxu0 %v13248_v42  ;;  %v11617_v56 = vld [vmem:[%s16504_s3 + $0xa8] sm:$0xff] }
 0x5c4   : > { %10592 = vmatpush3.msra.mxu0 %v13248_v42  ;;  %10480 = vmatprep.mubr.msk.f32.mxu0 %vm618_vm2, %v11584_v23  ;;  %v11618_v23 = vld [vmem:[%s16504_s3 + $0xb0] sm:$0xff] }
 0x5c5   : > { %10593 = vmatprep.subr.mxu0 %v13256_v20  ;;  %10542 = vmatmul.mubr.msk.f32.gmra.mxu1 %vm618_vm2, %v11585_v5  ;;  %v11619_v5 = vld [vmem:[%s16504_s3 + $0x1b8] sm:$0xff] }
 0x5c6   : > { %10594 = vmatpush3.msra.mxu0 %v13256_v20  ;;  %10544 = vmatprep.mubr.msk.f32.mxu1 %vm618_vm2, %v11586_v44  ;;  %v11620_v44 = vld [vmem:[%s16504_s3 + $0x1c0] sm:$0xff] }
 0x5c7   : > { %10481 = vmatmul.mubr.msk.f32.gmra.mxu0 %vm618_vm2, %v11587_v15  ;;  %10595 = vmatprep.subr.mxu0 %v13266_v9  ;;  %v11621_v15 = vld [vmem:[%s16504_s3 + $0xb8] sm:$0xff] }
 0x5c8   : > { %10596 = vmatpush3.msra.mxu0 %v13266_v9  ;;  %10483 = vmatprep.mubr.msk.f32.mxu0 %vm618_vm2, %v11588_v6  ;;  %v11622_v6 = vld [vmem:[%s16504_s3 + $0xc0] sm:$0xff] }
 0x5c9   : > { %10597 = vmatprep.subr.mxu0 %v13281_v43  ;;  %10545 = vmatmul.mubr.msk.f32.gmra.mxu1 %vm618_vm2, %v11589_v34  ;;  %v11623_v34 = vld [vmem:[%s16504_s3 + $0x1c8] sm:$0xff] }
 0x5ca   : > { %10598 = vmatpush3.msra.mxu0 %v13281_v43  ;;  %10547 = vmatprep.mubr.msk.f32.mxu1 %vm618_vm2, %v11590_v48  ;;  %v11624_v48 = vld [vmem:[%s16504_s3 + $0x1d0] sm:$0xff] }
 0x5cb   : > { %10484 = vmatmul.mubr.msk.f32.gmra.mxu0 %vm618_vm2, %v11591_v0  ;;  %10675 = vmatprep.subr.mxu0 %v13206_v55  ;;  %v11625_v0 = vld [vmem:[%s16504_s3 + $0xc8] sm:$0xff] }
 0x5cc   : > { %10486 = vmatprep.mubr.msk.f32.mxu0 %vm618_vm2, %v11592_v60  ;;  %v11626_v60 = vld [vmem:[%s16504_s3 + $0xd0] sm:$0xff] }
 0x5cd   : > { %10548 = vmatmul.mubr.msk.f32.gmra.mxu1 %vm618_vm2, %v11593_v36  ;;  %v11627_v36 = vld [vmem:[%s16504_s3 + $0x1d8] sm:$0xff] }
 0x5ce   : > { %10550 = vmatprep.mubr.msk.f32.mxu1 %vm618_vm2, %v11594_v11  ;;  %v11628_v11 = vld [vmem:[%s16504_s3 + $0x1e0] sm:$0xff] }
 0x5cf   : > { %10487 = vmatmul.mubr.msk.f32.gmra.mxu0 %vm618_vm2, %v11595_v39  ;;  %v11629_v39 = vld [vmem:[%s16504_s3 + $0xd8] sm:$0xff] }
 0x5d0   : > { %10489 = vmatprep.mubr.msk.f32.mxu0 %vm618_vm2, %v11596_v4  ;;  %v11630_v4 = vld [vmem:[%s16504_s3 + $0xe0] sm:$0xff] }
 0x5d1   : > { %10551 = vmatmul.mubr.msk.f32.gmra.mxu1 %vm618_vm2, %v11597_v31  ;;  %v11631_v31 = vld [vmem:[%s16504_s3 + $0x1e8] sm:$0xff] }
 0x5d2   : > { %10553 = vmatprep.mubr.msk.f32.mxu1 %vm618_vm2, %v11598_v29  ;;  %v11632_v29 = vld [vmem:[%s16504_s3 + $0x1f0] sm:$0xff] }
 0x5d3   : > { %10490 = vmatmul.mubr.msk.f32.gmra.mxu0 %vm618_vm2, %v11599_v16  ;;  %v11633_v16 = vld [vmem:[%s16504_s3 + $0xe8] sm:$0xff] }
 0x5d4   : > { %10492 = vmatprep.mubr.msk.f32.mxu0 %vm618_vm2, %v11600_v47  ;;  %v11634_v47 = vld [vmem:[%s16504_s3 + $0xf0] sm:$0xff] }
 0x5d5   : > { %10554 = vmatmul.mubr.msk.f32.gmra.mxu1 %vm618_vm2, %v11601_v45  ;;  %v11635_v45 = vld [vmem:[%s16504_s3 + $0x1f8] sm:$0xff] }
 0x5d6   : > { %10556 = vmatprep.mubr.msk.f32.mxu1 %vm618_vm2, %v11602_v18  ;;  %v16738_v18 = vld [vmem:[#allocation17_spill] sm:$0xff] }
 0x5d7   : > { %10493 = vmatmul.mubr.msk.f32.gmra.mxu0 %vm618_vm2, %v11603_v26  ;;  %v11636_v26 = vld [vmem:[%s16504_s3 + $0xf8] sm:$0xff] }
 0x5d8   : > { %10495 = vmatprep.mubr.msk.f32.mxu0 %vm618_vm2, %v11604_v14  ;;  %v11637_v14 = vld [vmem:[%s16504_s3 + $0x200] sm:$0xff] }
 0x5d9   : > { %10557 = vmatmul.mubr.msk.f32.gmra.mxu1 %vm618_vm2, %v11605_v7  ;;  %v16739_v7 = vld [vmem:[#allocation9_spill] sm:$0xff] }
 0x5da   : > { %10559 = vmatprep.mubr.msk.f32.mxu1 %vm618_vm2, %v11606_v40  ;;  %v16740_v40 = vld [vmem:[#allocation15_spill] sm:$0xff] }
 0x5db   : > { %10496 = vmatmul.mubr.msk.f32.gmra.mxu0 %vm618_vm2, %v11607_v1  ;;  %v16741_v1 = vld [vmem:[#allocation5_spill] sm:$0xff] }
 0x5dc   : > { %10498 = vmatprep.mubr.msk.f32.mxu0 %vm618_vm2, %v11608_v35  ;;  %v16742_v35 = vld [vmem:[#allocation13_spill] sm:$0xff] }
 0x5dd   : > { %10560 = vmatmul.mubr.msk.f32.gmra.mxu1 %vm618_vm2, %v11609_v63  ;;  %v16748_v63 = vld [vmem:[#allocation28_spill] sm:$0xff] }
 0x5de   : > { %10562 = vmatprep.mubr.msk.f32.mxu1 %vm618_vm2, %v11610_v8  ;;  %v16750_v8 = vld [vmem:[#allocation30_spill] sm:$0xff] }
 0x5df   : > { %10499 = vmatmul.mubr.msk.f32.gmra.mxu0 %vm618_vm2, %v11611_v28  ;;  %v16752_v28 = vld [vmem:[#allocation32_spill] sm:$0xff] }
 0x5e0   : > { %10501 = vmatprep.mubr.msk.f32.mxu0 %vm618_vm2, %v11612_v10  ;;  %v16753_v10 = vld [vmem:[#allocation33_spill] sm:$0xff] }
 0x5e1   : > { %10563 = vmatmul.mubr.msk.f32.gmra.mxu1 %vm618_vm2, %v11613_v25 }
 0x5e2   : > { %10565 = vmatprep.mubr.msk.f32.mxu1 %vm618_vm2, %v11614_v58 }
 0x5e3   : > { %10502 = vmatmul.mubr.msk.f32.gmra.mxu0 %vm618_vm2, %v11615_v32 }
 0x5e4   : > { %10504 = vmatprep.mubr.msk.f32.mxu0 %vm618_vm2, %v11616_v54 }
 0x5e5   : > { %10566 = vmatmul.mubr.msk.f32.gmra.mxu1 %vm618_vm2, %v11617_v56 }
 0x5e6   : > { %10568 = vmatprep.mubr.msk.f32.mxu1 %vm618_vm2, %v11618_v23 }
 0x5e7   : > { %10505 = vmatmul.mubr.msk.f32.gmra.mxu0 %vm618_vm2, %v11619_v5 }
 0x5e8   : > { %10507 = vmatprep.mubr.msk.f32.mxu0 %vm618_vm2, %v11620_v44 }
 0x5e9   : > { %10569 = vmatmul.mubr.msk.f32.gmra.mxu1 %vm618_vm2, %v11621_v15 }
 0x5ea   : > { %10571 = vmatprep.mubr.msk.f32.mxu1 %vm618_vm2, %v11622_v6 }
 0x5eb   : > { %10508 = vmatmul.mubr.msk.f32.gmra.mxu0 %vm618_vm2, %v11623_v34 }
 0x5ec   : > { %10510 = vmatprep.mubr.msk.f32.mxu0 %vm618_vm2, %v11624_v48 }
 0x5ed   : > { %10572 = vmatmul.mubr.msk.f32.gmra.mxu1 %vm618_vm2, %v11625_v0 }
 0x5ee   : > { %10574 = vmatprep.mubr.msk.f32.mxu1 %vm618_vm2, %v11626_v60 }
 0x5ef   : > { %10511 = vmatmul.mubr.msk.f32.gmra.mxu0 %vm618_vm2, %v11627_v36 }
 0x5f0   : > { %10513 = vmatprep.mubr.msk.f32.mxu0 %vm618_vm2, %v11628_v11 }
 0x5f1   : > { %10575 = vmatmul.mubr.msk.f32.gmra.mxu1 %vm618_vm2, %v11629_v39 }
 0x5f2   : > { %10577 = vmatprep.mubr.msk.f32.mxu1 %vm618_vm2, %v11630_v4 }
 0x5f3   : > { %10514 = vmatmul.mubr.msk.f32.gmra.mxu0 %vm618_vm2, %v11631_v31 }
 0x5f4   : > { %10516 = vmatprep.mubr.msk.f32.mxu0 %vm618_vm2, %v11632_v29 }
 0x5f5   : > { %10578 = vmatmul.mubr.msk.f32.gmra.mxu1 %vm618_vm2, %v11633_v16 }
 0x5f6   : > { %10580 = vmatprep.mubr.msk.f32.mxu1 %vm618_vm2, %v11634_v47 }
 0x5f7   : > { %10517 = vmatmul.mubr.msk.f32.gmra.mxu0 %vm618_vm2, %v11635_v45 }
 0x5f8   : > { %10599 = vmatprep.mubr.msk.f32.mxu0 %vm618_vm2, %v16738_v18 }
 0x5f9   : > { %10581 = vmatmul.mubr.msk.f32.gmra.mxu1 %vm618_vm2, %v11636_v26 }
 0x5fa   : > { %10627 = vmatprep.mubr.msk.f32.mxu1 %vm618_vm2, %v11637_v14 }
 0x5fb   : > { %10600 = vmatmul.mubr.msk.f32.vlgmr.msra.gmra.mxu0 %vm618_vm2, %v16739_v7 }
 0x5fc   : > { %10676 = vmatpush3.msra.mxu0 %v13206_v55  ;;  %10602 = vmatprep.mubr.msk.f32.mxu0 %vm618_vm2, %v16740_v40  ;;  %v16743_v55 = vld [vmem:[#allocation10_spill] sm:$0xff] }
 0x5fd   : > { %10677 = vmatprep.subr.mxu0 %v13210_v46 }
 0x5fe   : > { %10678 = vmatpush3.msra.mxu0 %v13210_v46  ;;  %v16744_v46 = vld [vmem:[#allocation4_spill] sm:$0xff] }
 0x5ff   : > { %10679 = vmatprep.subr.mxu0 %v13220_v33  ;;  %10603 = vmatmul.mubr.msk.f32.gmra.mxu0 %vm618_vm2, %v16741_v1 }
 0x600   : > { %10680 = vmatpush3.msra.mxu0 %v13220_v33  ;;  %10605 = vmatprep.mubr.msk.f32.mxu0 %vm618_vm2, %v16742_v35  ;;  %v16745_v33 = vld [vmem:[#allocation8_spill] sm:$0xff] }
 0x601   : > { %10681 = vmatprep.subr.mxu0 %v13237_v50 }
 0x602   : > { %10682 = vmatpush3.msra.mxu0 %v13237_v50  ;;  %v16746_v50 = vld [vmem:[#allocation26_spill] sm:$0xff] }
 0x603   : > { %10683 = vmatprep.subr.mxu0 %v13248_v42  ;;  %10606 = vmatmul.mubr.msk.f32.gmra.mxu0 %vm618_vm2, %v16743_v55 }
 0x604   : > { %10684 = vmatpush3.msra.mxu0 %v13248_v42  ;;  %10608 = vmatprep.mubr.msk.f32.mxu0 %vm618_vm2, %v16744_v46  ;;  %v16747_v42 = vld [vmem:[#allocation27_spill] sm:$0xff] }
 0x605   : > { %10685 = vmatprep.subr.mxu0 %v13256_v20 }
 0x606   : > { %10686 = vmatpush3.msra.mxu0 %v13256_v20  ;;  %v16749_v20 = vld [vmem:[#allocation29_spill] sm:$0xff] }
 0x607   : > { %10687 = vmatprep.subr.mxu0 %v13266_v9  ;;  %10609 = vmatmul.mubr.msk.f32.gmra.mxu0 %vm618_vm2, %v16745_v33 }
 0x608   : > { %10688 = vmatpush3.msra.mxu0 %v13266_v9  ;;  %10691 = vmatprep.mubr.msk.f32.mxu0 %vm618_vm2, %v16746_v50  ;;  %v16751_v9 = vld [vmem:[#allocation31_spill] sm:$0xff] }
 0x609   : > { %10689 = vmatprep.subr.mxu0 %v13281_v43 }
 0x60a   : > { %10690 = vmatpush3.msra.mxu0 %v13281_v43  ;;  %v11638_v43 = vld [vmem:[%s16504_s3 + $0x300] sm:$0xff] }
 0x60b   : > { %10692 = vmatmul.mubr.msk.f32.vlgmr.msra.gmra.mxu0 %vm618_vm2, %v16747_v42 }
 0x60c   : > { %10694 = vmatprep.mubr.msk.f32.mxu0 %vm618_vm2, %v16748_v63 }
 0x60f   : > { %10695 = vmatmul.mubr.msk.f32.gmra.mxu0 %vm618_vm2, %v16749_v20 }
 0x610   : > { %10697 = vmatprep.mubr.msk.f32.mxu0 %vm618_vm2, %v16750_v8 }
 0x613   : > { %10698 = vmatmul.mubr.msk.f32.gmra.mxu0 %vm618_vm2, %v16751_v9 }
 0x614   : > { %10700 = vmatprep.mubr.msk.f32.mxu0 %vm618_vm2, %v16752_v28 }
 0x617   : > { %10701 = vmatmul.mubr.msk.f32.gmra.mxu0 %vm618_vm2, %v16753_v10 }
 0x618   : > { %10719 = vmatprep.mubr.msk.f32.mxu0 %vm618_vm2, %v11638_v43 }
 0x67b   : > { %v10473_v25 = vpop.f32.mrf.mxu0 }
 0x67d   : > { %v13653_v58 = vpop.f32.mrf.mxu0  ;;  %v10537_v32 = vpop.f32.mrf.mxu1 }
 0x67e   : > { %16754 = vst [vmem:[#allocation39_spill] sm:$0xff] %v13653_v58  ;;  %v13655_v54 = vadd.f32 %v10537_v32, %v10473_v25 }
 0x67f   : > { %v10476_v56 = vpop.f32.mrf.mxu0  ;;  %v13657_v23 = vpop.f32.mrf.mxu1 }
 0x680   : > { %16755 = vst [vmem:[#allocation42_spill] sm:$0xff] %v13657_v23 }
 0x681   : > { %v13659_v5 = vpop.f32.mrf.mxu0  ;;  %v10540_v44 = vpop.f32.mrf.mxu1 }
 0x682   : > { %16756 = vst [vmem:[#allocation43_spill] sm:$0xff] %v13659_v5  ;;  %v13661_v15 = vadd.f32 %v10540_v44, %v10476_v56 }
 0x683   : > { %v10479_v6 = vpop.f32.mrf.mxu0  ;;  %v13663_v34 = vpop.f32.mrf.mxu1 }
 0x684   : > { %16757 = vst [vmem:[#allocation38_spill] sm:$0xff] %v13663_v34 }
 0x685   : > { %v13665_v48 = vpop.f32.mrf.mxu0  ;;  %v10543_v0 = vpop.f32.mrf.mxu1 }
 0x686   : > { %16758 = vst [vmem:[#allocation41_spill] sm:$0xff] %v13665_v48  ;;  %v13667_v60 = vadd.f32 %v10543_v0, %v10479_v6 }
 0x687   : > { %v10482_v36 = vpop.f32.mrf.mxu0  ;;  %v13669_v11 = vpop.f32.mrf.mxu1 }
 0x688   : > { %16759 = vst [vmem:[#allocation37_spill] sm:$0xff] %v13669_v11 }
 0x689   : > { %v13671_v39 = vpop.f32.mrf.mxu0  ;;  %v10546_v4 = vpop.f32.mrf.mxu1 }
 0x68a   : > { %16760 = vst [vmem:[#allocation40_spill] sm:$0xff] %v13671_v39  ;;  %v13673_v31 = vadd.f32 %v10546_v4, %v10482_v36 }
 0x68b   : > { %v10485_v29 = vpop.f32.mrf.mxu0  ;;  %v13675_v16 = vpop.f32.mrf.mxu1 }
 0x68c   : > { %16761 = vst [vmem:[#allocation36_spill] sm:$0xff] %v13675_v16 }
 0x68d   : > { %v13677_v47 = vpop.f32.mrf.mxu0  ;;  %v10549_v45 = vpop.f32.mrf.mxu1 }
 0x68e   : > { %v13679_v26 = vadd.f32 %v10549_v45, %v10485_v29 }
 0x68f   : > { %v10488_v14 = vpop.f32.mrf.mxu0  ;;  %v13681_v43 = vpop.f32.mrf.mxu1 }
 0x690   : > { %16762 = vst [vmem:[#allocation50_spill] sm:$0xff] %v13679_v26 }
 0x691   : > { %v13683_v25 = vpop.f32.mrf.mxu0  ;;  %v10552_v32 = vpop.f32.mrf.mxu1 }
 0x692   : > { %v13685_v56 = vadd.f32 %v10552_v32, %v10488_v14 }
 0x693   : > { %v10491_v44 = vpop.f32.mrf.mxu0  ;;  %v13687_v6 = vpop.f32.mrf.mxu1 }
 0x695   : > { %v13689_v0 = vpop.f32.mrf.mxu0  ;;  %v10555_v36 = vpop.f32.mrf.mxu1 }
 0x696   : > { %v13691_v4 = vadd.f32 %v10555_v36, %v10491_v44 }
 0x697   : > { %v10494_v10 = vpop.f32.mrf.mxu0  ;;  %v13693_v28 = vpop.f32.mrf.mxu1 }
 0x699   : > { %v13695_v29 = vpop.f32.mrf.mxu0  ;;  %v10558_v45 = vpop.f32.mrf.mxu1 }
 0x69a   : > { %v13697_v9 = vadd.f32 %v10558_v45, %v10494_v10 }
 0x69b   : > { %v10497_v8 = vpop.f32.mrf.mxu0  ;;  %v13699_v20 = vpop.f32.mrf.mxu1 }
 0x69c   : > { %v3547_v26 = vadd.f32 %v13699_v20, %v13695_v29  ;;  %v11706_v20 = vld [vmem:[%s12764_s17 + $0x70] sm:$0xff] }
 0x69d   : > { %v13701_v14 = vpop.f32.mrf.mxu0  ;;  %v10561_v32 = vpop.f32.mrf.mxu1 }
 0x69e   : > { %16763 = vst [vmem:[#allocation51_spill] sm:$0xff] %v13701_v14  ;;  %v13703_v63 = vadd.f32 %v10561_v32, %v10497_v8 }
 0x69f   : > { %v10500_v42 = vpop.f32.mrf.mxu0  ;;  %v13705_v50 = vpop.f32.mrf.mxu1 }
 0x6a0   : > { %16764 = vst [vmem:[#allocation52_spill] sm:$0xff] %v13703_v63  ;;  %16765 = vst [vmem:[#allocation53_spill] sm:$0xff] %v13705_v50 }
 0x6a1   : > { %v13707_v44 = vpop.f32.mrf.mxu0  ;;  %v10564_v36 = vpop.f32.mrf.mxu1 }
 0x6a2   : > { %16766 = vst [vmem:[#allocation54_spill] sm:$0xff] %v13707_v44  ;;  %v13709_v24 = vadd.f32 %v10564_v36, %v10500_v42 }
 0x6a3   : > { %v10503_v12 = vpop.f32.mrf.mxu0  ;;  %v13711_v49 = vpop.f32.mrf.mxu1 }
 0x6a4   : > { %16767 = vst [vmem:[#allocation55_spill] sm:$0xff] %v13709_v24  ;;  %16768 = vst [vmem:[#allocation56_spill] sm:$0xff] %v13711_v49 }
 0x6a5   : > { %v13713_v10 = vpop.f32.mrf.mxu0  ;;  %v10567_v45 = vpop.f32.mrf.mxu1 }
 0x6a6   : > { %16769 = vst [vmem:[#allocation57_spill] sm:$0xff] %v13713_v10  ;;  %v13715_v61 = vadd.f32 %v10567_v45, %v10503_v12 }
 0x6a7   : > { %v10506_v21 = vpop.f32.mrf.mxu0  ;;  %v13717_v2 = vpop.f32.mrf.mxu1 }
 0x6a8   : > { %16770 = vst [vmem:[#allocation58_spill] sm:$0xff] %v13715_v61  ;;  %16771 = vst [vmem:[#allocation59_spill] sm:$0xff] %v13717_v2 }
 0x6a9   : > { %v13719_v8 = vpop.f32.mrf.mxu0  ;;  %v10570_v32 = vpop.f32.mrf.mxu1 }
 0x6aa   : > { %16772 = vst [vmem:[#allocation60_spill] sm:$0xff] %v13719_v8  ;;  %v13721_v52 = vadd.f32 %v10570_v32, %v10506_v21 }
 0x6ab   : > { %v10509_v38 = vpop.f32.mrf.mxu0  ;;  %v13723_v37 = vpop.f32.mrf.mxu1 }
 0x6ac   : > { %16773 = vst [vmem:[#allocation61_spill] sm:$0xff] %v13721_v52  ;;  %16774 = vst [vmem:[#allocation62_spill] sm:$0xff] %v13723_v37 }
 0x6ad   : > { %v13725_v42 = vpop.f32.mrf.mxu0  ;;  %v10573_v36 = vpop.f32.mrf.mxu1 }
 0x6ae   : > { %v13727_v30 = vadd.f32 %v10573_v36, %v10509_v38 }
 0x6af   : > { %v10512_v51 = vpop.f32.mrf.mxu0  ;;  %v13729_v41 = vpop.f32.mrf.mxu1 }
 0x6b1   : > { %v13731_v12 = vpop.f32.mrf.mxu0  ;;  %v10576_v45 = vpop.f32.mrf.mxu1 }
 0x6b2   : > { %v13733_v22 = vadd.f32 %v10576_v45, %v10512_v51 }
 0x6b3   : > { %v10515_v59 = vpop.f32.mrf.mxu0  ;;  %v13735_v53 = vpop.f32.mrf.mxu1 }
 0x6b5   : > { %v13737_v21 = vpop.f32.mrf.mxu0  ;;  %v10579_v32 = vpop.f32.mrf.mxu1 }
 0x6b6   : > { %v13739_v62 = vadd.f32 %v10579_v32, %v10515_v59 }
 0x6b7   : > { %v13741_v33 = vpop.f32.mrf.mxu0 }
 0x6b9   : > { %v13743_v38 = vpop.f32.mrf.mxu0 }
 0x6bb   : > { %v10601_v36 = vpop.f32.mrf.mxu0 }
 0x6bd   : > { %v3701_v13 = vpop.f32.mrf.mxu0 }
 0x6bf   : > { %v10604_v46 = vpop.f32.mrf.mxu0 }
 0x6c1   : > { %v3711_v17 = vpop.f32.mrf.mxu0 }
 0x6c3   : > { %v10607_v55 = vpop.f32.mrf.mxu0 }
 0x6c5   : > { %v3721_v3 = vpop.f32.mrf.mxu0 }
 0x6c7   : > { %v10610_v51 = vpop.f32.mrf.mxu0 }
 0x6c8   : > { %10611 = vmatprep.subr.mxu1 %v10610_v51 }
 0x6c9   : > { %v3731_v45 = vpop.f32.mrf.mxu0  ;;  %10612 = vmatpush3.msra.mxu1 %v10610_v51 }
 0x6ca   : > { %10613 = vmatprep.subr.mxu1 %v3731_v45 }
 0x6cb   : > { %10614 = vmatpush3.msra.mxu1 %v3731_v45  ;;  %v10693_v35 = vpop.f32.mrf.mxu0  ;;  %v11646_v45 = vld [vmem:[%s16504_s3 + $0x240] sm:$0xff] }
 0x6cc   : > { %10615 = vmatprep.subr.mxu1 %v10607_v55 }
 0x6cd   : > { %10616 = vmatpush3.msra.mxu1 %v10607_v55  ;;  %v4063_v59 = vpop.f32.mrf.mxu0  ;;  %v11639_v55 = vld [vmem:[%s16504_s3 + $0x208] sm:$0xff] }
 0x6ce   : > { %10617 = vmatprep.subr.mxu1 %v3721_v3 }
 0x6cf   : > { %10618 = vmatpush3.msra.mxu1 %v3721_v3  ;;  %v10696_v32 = vpop.f32.mrf.mxu0 }
 0x6d0   : > { %10619 = vmatprep.subr.mxu1 %v10604_v46 }
 0x6d1   : > { %10620 = vmatpush3.msra.mxu1 %v10604_v46  ;;  %v4073_v57 = vpop.f32.mrf.mxu0  ;;  %v11642_v46 = vld [vmem:[%s16504_s3 + $0x220] sm:$0xff] }
 0x6d2   : > { %10621 = vmatprep.subr.mxu1 %v3711_v17 }
 0x6d3   : > { %10622 = vmatpush3.msra.mxu1 %v3711_v17  ;;  %v10699_v1 = vpop.f32.mrf.mxu0  ;;  %v11640_v17 = vld [vmem:[%s16504_s3 + $0x210] sm:$0xff] }
 0x6d4   : > { %10623 = vmatprep.subr.mxu1 %v10601_v36 }
 0x6d5   : > { %10624 = vmatpush3.msra.mxu1 %v10601_v36  ;;  %v4083_v27 = vpop.f32.mrf.mxu0  ;;  %v11643_v36 = vld [vmem:[%s16504_s3 + $0x228] sm:$0xff] }
 0x6d6   : > { %10625 = vmatprep.subr.mxu1 %v3701_v13 }
 0x6d7   : > { %10626 = vmatpush3.msra.mxu1 %v3701_v13  ;;  %v10702_v51 = vpop.f32.mrf.mxu0  ;;  %v11641_v13 = vld [vmem:[%s16504_s3 + $0x218] sm:$0xff] }
 0x6d8   : > { %10628 = vmatmul.mubr.msk.f32.vlgmr.msra.gmra.mxu1 %vm618_vm2, %v11639_v55  ;;  %10703 = vmatprep.subr.mxu0 %v10702_v51  ;;  %v11652_v55 = vld [vmem:[%s16504_s3 + $0x318] sm:$0xff] }
 0x6d9   : > { %v4093_v3 = vpop.f32.mrf.mxu0  ;;  %10704 = vmatpush3.msra.mxu0 %v10702_v51  ;;  %10630 = vmatprep.mubr.msk.f32.mxu1 %vm618_vm2, %v11640_v17  ;;  %v11651_v51 = vld [vmem:[%s16504_s3 + $0x258] sm:$0xff]  ;;  %v11654_v17 = vld [vmem:[%s16504_s3 + $0x320] sm:$0xff] }
 0x6da   : > { %10705 = vmatprep.subr.mxu0 %v4093_v3 }
 0x6db   : > { %10706 = vmatpush3.msra.mxu0 %v4093_v3  ;;  %v11653_v3 = vld [vmem:[%s16504_s3 + $0x260] sm:$0xff] }
 0x6dc   : > { %10631 = vmatmul.mubr.msk.f32.gmra.mxu1 %vm618_vm2, %v11641_v13  ;;  %10707 = vmatprep.subr.mxu0 %v10699_v1  ;;  %v11655_v13 = vld [vmem:[%s16504_s3 + $0x268] sm:$0xff] }
 0x6dd   : > { %10708 = vmatpush3.msra.mxu0 %v10699_v1  ;;  %10633 = vmatprep.mubr.msk.f32.mxu1 %vm618_vm2, %v11642_v46  ;;  %v11644_v1 = vld [vmem:[%s16504_s3 + $0x230] sm:$0xff]  ;;  %v11656_v46 = vld [vmem:[%s16504_s3 + $0x328] sm:$0xff] }
 0x6de   : > { %10709 = vmatprep.subr.mxu0 %v4083_v27 }
 0x6df   : > { %10710 = vmatpush3.msra.mxu0 %v4083_v27  ;;  %v11645_v27 = vld [vmem:[%s16504_s3 + $0x238] sm:$0xff] }
 0x6e0   : > { %10634 = vmatmul.mubr.msk.f32.gmra.mxu1 %vm618_vm2, %v11643_v36  ;;  %10711 = vmatprep.subr.mxu0 %v10696_v32  ;;  %v11657_v36 = vld [vmem:[%s16504_s3 + $0x270] sm:$0xff] }
 0x6e1   : > { %10712 = vmatpush3.msra.mxu0 %v10696_v32  ;;  %10636 = vmatprep.mubr.msk.f32.mxu1 %vm618_vm2, %v11644_v1  ;;  %v11648_v32 = vld [vmem:[%s16504_s3 + $0x308] sm:$0xff]  ;;  %v11658_v1 = vld [vmem:[%s16504_s3 + $0x330] sm:$0xff] }
 0x6e2   : > { %10713 = vmatprep.subr.mxu0 %v4073_v57 }
 0x6e3   : > { %10714 = vmatpush3.msra.mxu0 %v4073_v57  ;;  %v11647_v57 = vld [vmem:[%s16504_s3 + $0x248] sm:$0xff] }
 0x6e4   : > { %10637 = vmatmul.mubr.msk.f32.gmra.mxu1 %vm618_vm2, %v11645_v27  ;;  %10715 = vmatprep.subr.mxu0 %v10693_v35  ;;  %v11659_v27 = vld [vmem:[%s16504_s3 + $0x278] sm:$0xff] }
 0x6e5   : > { %10716 = vmatpush3.msra.mxu0 %v10693_v35  ;;  %10639 = vmatprep.mubr.msk.f32.mxu1 %vm618_vm2, %v11646_v45  ;;  %v11649_v35 = vld [vmem:[%s16504_s3 + $0x250] sm:$0xff]  ;;  %v11660_v45 = vld [vmem:[%s16504_s3 + $0x338] sm:$0xff] }
 0x6e6   : > { %10717 = vmatprep.subr.mxu0 %v4063_v59 }
 0x6e7   : > { %10718 = vmatpush3.msra.mxu0 %v4063_v59  ;;  %v11650_v59 = vld [vmem:[%s16504_s3 + $0x310] sm:$0xff] }
 0x6e8   : > { %10640 = vmatmul.mubr.msk.f32.gmra.mxu1 %vm618_vm2, %v11647_v57  ;;  %10720 = vmatmul.mubr.msk.f32.vlgmr.msra.gmra.mxu0 %vm618_vm2, %v11648_v32  ;;  %v11661_v57 = vld [vmem:[%s16504_s3 + $0x280] sm:$0xff] }
 0x6e9   : > { %10642 = vmatprep.mubr.msk.f32.mxu1 %vm618_vm2, %v11649_v35  ;;  %10722 = vmatprep.mubr.msk.f32.mxu0 %vm618_vm2, %v11650_v59  ;;  %v11662_v32 = vld [vmem:[%s16504_s3 + $0x340] sm:$0xff]  ;;  %v11663_v35 = vld [vmem:[%s16504_s3 + $0x288] sm:$0xff] }
 0x6ea   : > { %v11664_v59 = vld [vmem:[%s16504_s3 + $0x348] sm:$0xff] }
 0x6ec   : > { %10643 = vmatmul.mubr.msk.f32.gmra.mxu1 %vm618_vm2, %v11651_v51  ;;  %10723 = vmatmul.mubr.msk.f32.gmra.mxu0 %vm618_vm2, %v11652_v55  ;;  %v11665_v51 = vld [vmem:[%s16504_s3 + $0x290] sm:$0xff] }
 0x6ed   : > { %10645 = vmatprep.mubr.msk.f32.mxu1 %vm618_vm2, %v11653_v3  ;;  %10725 = vmatprep.mubr.msk.f32.mxu0 %vm618_vm2, %v11654_v17  ;;  %v11666_v55 = vld [vmem:[%s16504_s3 + $0x350] sm:$0xff]  ;;  %v11667_v3 = vld [vmem:[%s16504_s3 + $0x298] sm:$0xff] }
 0x6ee   : > { %v11668_v17 = vld [vmem:[%s16504_s3 + $0x358] sm:$0xff] }
 0x6f0   : > { %10646 = vmatmul.mubr.msk.f32.gmra.mxu1 %vm618_vm2, %v11655_v13  ;;  %10726 = vmatmul.mubr.msk.f32.gmra.mxu0 %vm618_vm2, %v11656_v46  ;;  %v11669_v13 = vld [vmem:[%s16504_s3 + $0x2a0] sm:$0xff] }
 0x6f1   : > { %10648 = vmatprep.mubr.msk.f32.mxu1 %vm618_vm2, %v11657_v36  ;;  %10728 = vmatprep.mubr.msk.f32.mxu0 %vm618_vm2, %v11658_v1  ;;  %v11670_v46 = vld [vmem:[%s16504_s3 + $0x360] sm:$0xff]  ;;  %v11671_v36 = vld [vmem:[%s16504_s3 + $0x2a8] sm:$0xff] }
 0x6f2   : > { %v11672_v1 = vld [vmem:[%s16504_s3 + $0x368] sm:$0xff] }
 0x6f4   : > { %10649 = vmatmul.mubr.msk.f32.gmra.mxu1 %vm618_vm2, %v11659_v27  ;;  %10729 = vmatmul.mubr.msk.f32.gmra.mxu0 %vm618_vm2, %v11660_v45  ;;  %v11673_v27 = vld [vmem:[%s16504_s3 + $0x2b0] sm:$0xff] }
 0x6f5   : > { %10651 = vmatprep.mubr.msk.f32.mxu1 %vm618_vm2, %v11661_v57  ;;  %10731 = vmatprep.mubr.msk.f32.mxu0 %vm618_vm2, %v11662_v32  ;;  %v11674_v45 = vld [vmem:[%s16504_s3 + $0x370] sm:$0xff]  ;;  %v11675_v57 = vld [vmem:[%s16504_s3 + $0x2b8] sm:$0xff] }
 0x6f6   : > { %v11676_v32 = vld [vmem:[%s16504_s3 + $0x378] sm:$0xff] }
 0x6f8   : > { %10652 = vmatmul.mubr.msk.f32.gmra.mxu1 %vm618_vm2, %v11663_v35  ;;  %10732 = vmatmul.mubr.msk.f32.gmra.mxu0 %vm618_vm2, %v11664_v59  ;;  %v11677_v35 = vld [vmem:[%s16504_s3 + $0x2c0] sm:$0xff] }
 0x6f9   : > { %10654 = vmatprep.mubr.msk.f32.mxu1 %vm618_vm2, %v11665_v51  ;;  %10734 = vmatprep.mubr.msk.f32.mxu0 %vm618_vm2, %v11666_v55  ;;  %v11678_v59 = vld [vmem:[%s16504_s3 + $0x380] sm:$0xff]  ;;  %v11679_v51 = vld [vmem:[%s16504_s3 + $0x2c8] sm:$0xff] }
 0x6fa   : > { %v11680_v55 = vld [vmem:[%s16504_s3 + $0x388] sm:$0xff] }
 0x6fc   : > { %10655 = vmatmul.mubr.msk.f32.gmra.mxu1 %vm618_vm2, %v11667_v3  ;;  %10735 = vmatmul.mubr.msk.f32.gmra.mxu0 %vm618_vm2, %v11668_v17  ;;  %v11681_v3 = vld [vmem:[%s16504_s3 + $0x2d0] sm:$0xff] }
 0x6fd   : > { %10657 = vmatprep.mubr.msk.f32.mxu1 %vm618_vm2, %v11669_v13  ;;  %10737 = vmatprep.mubr.msk.f32.mxu0 %vm618_vm2, %v11670_v46  ;;  %v11682_v17 = vld [vmem:[%s16504_s3 + $0x390] sm:$0xff]  ;;  %v11683_v13 = vld [vmem:[%s16504_s3 + $0x2d8] sm:$0xff] }
 0x6fe   : > { %v11684_v46 = vld [vmem:[%s16504_s3 + $0x398] sm:$0xff] }
 0x700   : > { %10658 = vmatmul.mubr.msk.f32.gmra.mxu1 %vm618_vm2, %v11671_v36  ;;  %10738 = vmatmul.mubr.msk.f32.gmra.mxu0 %vm618_vm2, %v11672_v1  ;;  %v11685_v36 = vld [vmem:[%s16504_s3 + $0x2e0] sm:$0xff] }
 0x701   : > { %10660 = vmatprep.mubr.msk.f32.mxu1 %vm618_vm2, %v11673_v27  ;;  %10740 = vmatprep.mubr.msk.f32.mxu0 %vm618_vm2, %v11674_v45  ;;  %v11686_v1 = vld [vmem:[%s16504_s3 + $0x3a0] sm:$0xff]  ;;  %v11687_v27 = vld [vmem:[%s16504_s3 + $0x2e8] sm:$0xff] }
 0x702   : > { %v11688_v45 = vld [vmem:[%s16504_s3 + $0x3a8] sm:$0xff] }
 0x704   : > { %10661 = vmatmul.mubr.msk.f32.gmra.mxu1 %vm618_vm2, %v11675_v57  ;;  %10741 = vmatmul.mubr.msk.f32.gmra.mxu0 %vm618_vm2, %v11676_v32  ;;  %v11689_v57 = vld [vmem:[%s16504_s3 + $0x2f0] sm:$0xff] }
 0x705   : > { %10663 = vmatprep.mubr.msk.f32.mxu1 %vm618_vm2, %v11677_v35  ;;  %10743 = vmatprep.mubr.msk.f32.mxu0 %vm618_vm2, %v11678_v59  ;;  %v11690_v32 = vld [vmem:[%s16504_s3 + $0x3b0] sm:$0xff]  ;;  %v11691_v35 = vld [vmem:[%s16504_s3 + $0x2f8] sm:$0xff] }
 0x706   : > { %v11692_v59 = vld [vmem:[%s16504_s3 + $0x3b8] sm:$0xff] }
 0x708   : > { %10664 = vmatmul.mubr.msk.f32.gmra.mxu1 %vm618_vm2, %v11679_v51  ;;  %10744 = vmatmul.mubr.msk.f32.gmra.mxu0 %vm618_vm2, %v11680_v55  ;;  %v11693_v51 = vld [vmem:[%s16504_s3 + $0x3c0] sm:$0xff]  ;;  %v11694_v55 = vld [vmem:[%s16504_s3 + $0x3c8] sm:$0xff] }
 0x709   : > { %10666 = vmatprep.mubr.msk.f32.mxu1 %vm618_vm2, %v11681_v3  ;;  %10746 = vmatprep.mubr.msk.f32.mxu0 %vm618_vm2, %v11682_v17  ;;  %v11695_v3 = vld [vmem:[%s16504_s3 + $0x3d0] sm:$0xff]  ;;  %v11696_v17 = vld [vmem:[%s16504_s3 + $0x3d8] sm:$0xff] }
 0x70c   : > { %10667 = vmatmul.mubr.msk.f32.gmra.mxu1 %vm618_vm2, %v11683_v13  ;;  %10747 = vmatmul.mubr.msk.f32.gmra.mxu0 %vm618_vm2, %v11684_v46  ;;  %v11697_v13 = vld [vmem:[%s16504_s3 + $0x3e0] sm:$0xff]  ;;  %v11698_v46 = vld [vmem:[%s16504_s3 + $0x3e8] sm:$0xff] }
 0x70d   : > { %10669 = vmatprep.mubr.msk.f32.mxu1 %vm618_vm2, %v11685_v36  ;;  %10749 = vmatprep.mubr.msk.f32.mxu0 %vm618_vm2, %v11686_v1  ;;  %v11699_v36 = vld [vmem:[%s16504_s3 + $0x3f0] sm:$0xff]  ;;  %v11700_v1 = vld [vmem:[%s16504_s3 + $0x3f8] sm:$0xff] }
 0x710   : > { %10670 = vmatmul.mubr.msk.f32.gmra.mxu1 %vm618_vm2, %v11687_v27  ;;  %10750 = vmatmul.mubr.msk.f32.gmra.mxu0 %vm618_vm2, %v11688_v45  ;;  %v16775_v27 = vld [vmem:[#allocation2_spill] sm:$0xff]  ;;  %v13996_v45 = vpop.f32.mrf.mxu1 }
 0x711   : > { %10672 = vmatprep.mubr.msk.f32.mxu1 %vm618_vm2, %v11689_v57  ;;  %10752 = vmatprep.mubr.msk.f32.mxu0 %vm618_vm2, %v11690_v32 }
 0x712   : > { %v13998_v57 = vpop.f32.mrf.mxu1 }
 0x714   : > { %10673 = vmatmul.mubr.msk.f32.gmra.mxu1 %vm618_vm2, %v11691_v35  ;;  %10753 = vmatmul.mubr.msk.f32.gmra.mxu0 %vm618_vm2, %v11692_v59  ;;  %v14000_v32 = vpop.f32.mrf.mxu1 }
 0x715   : > { %4455 = vmatprep.mubr.f32.mxu1 %v16738_v18  ;;  %10755 = vmatprep.mubr.msk.f32.mxu0 %vm618_vm2, %v11693_v51  ;;  %v14011_v18 = vpop.permute.xlu0 %2747 }
 0x716   : > { %16779 = vst [vmem:[#allocation66_spill] sm:$0xff] %v14011_v18 }
 0x718   : > { %10756 = vmatmul.mubr.msk.f32.gmra.mxu0 %vm618_vm2, %v11694_v55 }
 0x719   : > { %10758 = vmatprep.mubr.msk.f32.mxu0 %vm618_vm2, %v11695_v3 }
 0x71c   : > { %10759 = vmatmul.mubr.msk.f32.gmra.mxu0 %vm618_vm2, %v11696_v17 }
 0x71d   : > { %10761 = vmatprep.mubr.msk.f32.mxu0 %vm618_vm2, %v11697_v13 }
 0x720   : > { %10762 = vmatmul.mubr.msk.f32.gmra.mxu0 %vm618_vm2, %v11698_v46 }
 0x721   : > { %10764 = vmatprep.mubr.msk.f32.mxu0 %vm618_vm2, %v11699_v36 }
 0x724   : > { %10765 = vmatmul.mubr.msk.f32.gmra.mxu0 %vm618_vm2, %v11700_v1 }
 0x725   : > { %10783 = vmatprep.mubr.msk.f32.mxu0 %vm618_vm2, %v16775_v27 }
 0x798   : > { %v10629_v35 = vpop.f32.mrf.mxu1 }
 0x799   : > { %v3966_v59 = vadd.f32 %v10629_v35, %v13655_v54  ;;  %v14016_v54 = vpop.permute.xlu1 %2667 }
 0x79a   : > { %v14003_v51 = vpop.f32.mrf.mxu1  ;;  %16781 = vst [vmem:[#allocation68_spill] sm:$0xff] %v14016_v54 }
 0x79b   : > { %16776 = vst [vmem:[#allocation63_spill] sm:$0xff] %v14003_v51 }
 0x79c   : > { %v10632_v55 = vpop.f32.mrf.mxu1 }
 0x79d   : > { %v3968_v3 = vadd.f32 %v10632_v55, %v13661_v15  ;;  %v14030_v23 = vpop.permute.xlu1 %2677 }
 0x79e   : > { %v14006_v17 = vpop.f32.mrf.mxu1  ;;  %16787 = vst [vmem:[#allocation74_spill] sm:$0xff] %v14030_v23 }
 0x79f   : > { %16777 = vst [vmem:[#allocation64_spill] sm:$0xff] %v14006_v17 }
 0x7a0   : > { %v10635_v13 = vpop.f32.mrf.mxu1 }
 0x7a1   : > { %v3970_v46 = vadd.f32 %v10635_v13, %v13667_v60  ;;  %v14026_v60 = vpop.permute.xlu0 %2757  ;;  %v14048_v14 = vpop.permute.xlu1 %2672 }
 0x7a2   : > { %v14009_v36 = vpop.f32.mrf.mxu1  ;;  %16786 = vst [vmem:[#allocation73_spill] sm:$0xff] %v14026_v60  ;;  %16793 = vst [vmem:[#allocation80_spill] sm:$0xff] %v14048_v14 }
 0x7a3   : > { %16778 = vst [vmem:[#allocation65_spill] sm:$0xff] %v14009_v36 }
 0x7a4   : > { %v10638_v1 = vpop.f32.mrf.mxu1 }
 0x7a5   : > { %v3972_v40 = vadd.f32 %v10638_v1, %v13673_v31 }
 0x7a6   : > { %v14014_v19 = vpop.f32.mrf.mxu1 }
 0x7a7   : > { %16780 = vst [vmem:[#allocation67_spill] sm:$0xff] %v14014_v19 }
 0x7a8   : > { %v14018_v35 = vpop.f32.mrf.mxu1  ;;  %v10721_v7 = vpop.f32.mrf.mxu0 }
 0x7a9   : > { %16782 = vst [vmem:[#allocation69_spill] sm:$0xff] %v14018_v35  ;;  %v14020_v15 = vadd.f32 %v10721_v7, %v3966_v59  ;;  %v14040_v59 = vpop.permute.xlu0 %2752 }
 0x7aa   : > { %v14022_v55 = vpop.f32.mrf.mxu1  ;;  %v14024_v27 = vpop.f32.mrf.mxu0  ;;  %16790 = vst [vmem:[#allocation77_spill] sm:$0xff] %v14040_v59 }
 0x7ab   : > { %16783 = vst [vmem:[#allocation70_spill] sm:$0xff] %v14020_v15  ;;  %16784 = vst [vmem:[#allocation71_spill] sm:$0xff] %v14022_v55 }
 0x7ac   : > { %16785 = vst [vmem:[#allocation72_spill] sm:$0xff] %v14024_v27  ;;  %v14028_v13 = vpop.f32.mrf.mxu1  ;;  %v10724_v51 = vpop.f32.mrf.mxu0 }
 0x7ad   : > { %v14032_v31 = vadd.f32 %v10724_v51, %v3968_v3  ;;  %v14058_v34 = vpop.permute.xlu0 %2767 }
 0x7ae   : > { %v14034_v1 = vpop.f32.mrf.mxu1  ;;  %v14036_v58 = vpop.f32.mrf.mxu0  ;;  %16796 = vst [vmem:[#allocation83_spill] sm:$0xff] %v14058_v34 }
 0x7af   : > { %16788 = vst [vmem:[#allocation75_spill] sm:$0xff] %v14032_v31  ;;  %16789 = vst [vmem:[#allocation76_spill] sm:$0xff] %v14036_v58 }
 0x7b0   : > { %v14038_v63 = vpop.f32.mrf.mxu1  ;;  %v10727_v7 = vpop.f32.mrf.mxu0 }
 0x7b1   : > { %v14042_v15 = vadd.f32 %v10727_v7, %v3970_v46  ;;  %v14064_v7 = vpop.permute.xlu1 %2687 }
 0x7b2   : > { %v14044_v27 = vpop.f32.mrf.mxu1  ;;  %v14046_v50 = vpop.f32.mrf.mxu0  ;;  %16799 = vst [vmem:[#allocation86_spill] sm:$0xff] %v14064_v7 }
 0x7b3   : > { %16791 = vst [vmem:[#allocation78_spill] sm:$0xff] %v14042_v15  ;;  %16792 = vst [vmem:[#allocation79_spill] sm:$0xff] %v14046_v50 }
 0x7b4   : > { %v14050_v17 = vpop.f32.mrf.mxu1  ;;  %v10730_v51 = vpop.f32.mrf.mxu0 }
 0x7b5   : > { %v14052_v3 = vadd.f32 %v10730_v51, %v3972_v40  ;;  %v14074_v51 = vpop.permute.xlu0 %2762 }
 0x7b6   : > { %v14054_v31 = vpop.f32.mrf.mxu1  ;;  %v14056_v58 = vpop.f32.mrf.mxu0  ;;  %16803 = vst [vmem:[#allocation90_spill] sm:$0xff] %v14074_v51 }
 0x7b7   : > { %16794 = vst [vmem:[#allocation81_spill] sm:$0xff] %v14052_v3  ;;  %16795 = vst [vmem:[#allocation82_spill] sm:$0xff] %v14056_v58  ;;  %v14080_v3 = vpop.permute.xlu1 %2682 }
 0x7b8   : > { %v14060_v5 = vpop.f32.mrf.mxu1  ;;  %v14062_v46 = vpop.f32.mrf.mxu0  ;;  %16806 = vst [vmem:[#allocation93_spill] sm:$0xff] %v14080_v3 }
 0x7b9   : > { %16797 = vst [vmem:[#allocation84_spill] sm:$0xff] %v14060_v5  ;;  %16798 = vst [vmem:[#allocation85_spill] sm:$0xff] %v14062_v46  ;;  %v14090_v11 = vpop.permute.xlu0 %2777 }
 0x7ba   : > { %v14066_v15 = vpop.f32.mrf.mxu1  ;;  %v14068_v50 = vpop.f32.mrf.mxu0  ;;  %16809 = vst [vmem:[#allocation96_spill] sm:$0xff] %v14090_v11 }
 0x7bb   : > { %16800 = vst [vmem:[#allocation87_spill] sm:$0xff] %v14066_v15  ;;  %16801 = vst [vmem:[#allocation88_spill] sm:$0xff] %v14068_v50  ;;  %v14094_v54 = vpop.permute.xlu1 %2697 }
 0x7bc   : > { %v14070_v24 = vpop.f32.mrf.mxu1  ;;  %v14072_v40 = vpop.f32.mrf.mxu0  ;;  %16811 = vst [vmem:[#allocation98_spill] sm:$0xff] %v14094_v54 }
 0x7bd   : > { %16802 = vst [vmem:[#allocation89_spill] sm:$0xff] %v14070_v24  ;;  %v14104_v10 = vpop.permute.xlu0 %2772 }
 0x7be   : > { %v14076_v49 = vpop.f32.mrf.mxu1  ;;  %v14078_v44 = vpop.f32.mrf.mxu0  ;;  %16814 = vst [vmem:[#allocation101_spill] sm:$0xff] %v14104_v10 }
 0x7bf   : > { %16804 = vst [vmem:[#allocation91_spill] sm:$0xff] %v14076_v49  ;;  %16805 = vst [vmem:[#allocation92_spill] sm:$0xff] %v14078_v44  ;;  %v14110_v18 = vpop.permute.xlu1 %2692 }
 0x7c0   : > { %v14082_v5 = vpop.f32.mrf.mxu1  ;;  %v14084_v36 = vpop.f32.mrf.mxu0  ;;  %16817 = vst [vmem:[#allocation104_spill] sm:$0xff] %v14110_v18 }
 0x7c1   : > { %16807 = vst [vmem:[#allocation94_spill] sm:$0xff] %v14082_v5 }
 0x7c2   : > { %v14086_v58 = vpop.f32.mrf.mxu1  ;;  %v14088_v15 = vpop.f32.mrf.mxu0 }
 0x7c3   : > { %16808 = vst [vmem:[#allocation95_spill] sm:$0xff] %v14086_v58  ;;  %v14122_v39 = vpop.permute.xlu1 %2707 }
 0x7c4   : > { %v14092_v24 = vpop.f32.mrf.mxu1  ;;  %v10742_v48 = vpop.f32.mrf.mxu0  ;;  %16822 = vst [vmem:[#allocation109_spill] sm:$0xff] %v14122_v39 }
 0x7c5   : > { %16810 = vst [vmem:[#allocation97_spill] sm:$0xff] %v14092_v24 }
 0x7c6   : > { %v14096_v49 = vpop.f32.mrf.mxu1  ;;  %v14098_v61 = vpop.f32.mrf.mxu0 }
 0x7c7   : > { %16812 = vst [vmem:[#allocation99_spill] sm:$0xff] %v14096_v49  ;;  %v14118_v49 = vpop.permute.xlu0 %2787 }
 0x7c8   : > { %v14100_v2 = vpop.f32.mrf.mxu1  ;;  %v14102_v5 = vpop.f32.mrf.mxu0  ;;  %16820 = vst [vmem:[#allocation107_spill] sm:$0xff] %v14118_v49 }
 0x7c9   : > { %16813 = vst [vmem:[#allocation100_spill] sm:$0xff] %v14102_v5 }
 0x7ca   : > { %v14106_v58 = vpop.f32.mrf.mxu1  ;;  %v14108_v19 = vpop.f32.mrf.mxu0 }
 0x7cb   : > { %16815 = vst [vmem:[#allocation102_spill] sm:$0xff] %v14106_v58  ;;  %16816 = vst [vmem:[#allocation103_spill] sm:$0xff] %v14108_v19  ;;  %v14130_v24 = vpop.permute.xlu0 %2782  ;;  %v11701_v58 = vld [vmem:[%s12764_s17 + $0x58] sm:$0xff] }
 0x7cc   : > { %v14112_v14 = vpop.f32.mrf.mxu0  ;;  %v14114_v59 = vpop.f32.mrf.mxu1  ;;  %16825 = vst [vmem:[#allocation112_spill] sm:$0xff] %v14130_v24  ;;  %v14150_v51 = vmul.f32 %v11701_v58, %v14064_v7  ;;  %v3980_v58 = vadd.f32 %v14050_v17, %v13697_v9  ;;  %v11707_v9 = vld [vmem:[%s12764_s17 + $0xf8] sm:$0xff] }
 0x7cd   : > { %16818 = vst [vmem:[#allocation105_spill] sm:$0xff] %v14112_v14  ;;  %v2821_v17 = vmul.f32 %v11707_v9, %v14118_v49  ;;  %v16935_v49 = vld [vmem:[#allocation35_spill] sm:$0xff] }
 0x7ce   : > { %v14116_v50 = vpop.f32.mrf.mxu0  ;;  %v14124_v5 = vpop.f32.mrf.mxu1  ;;  %16832 = vst [vmem:[#allocation119_spill] sm:$0xff] %v14150_v51  ;;  %v11704_v51 = vld [vmem:[%s12764_s17 + $0x60] sm:$0xff] }
 0x7cf   : > { %16819 = vst [vmem:[#allocation106_spill] sm:$0xff] %v14116_v50  ;;  %v14134_v50 = vpop.permute.xlu1 %2702  ;;  %v14140_v46 = vpop.permute.xlu0 %2742 }
 0x7d0   : > { %v14120_v16 = vpop.f32.mrf.mxu0  ;;  %v10671_v14 = vpop.f32.mrf.mxu1  ;;  %16827 = vst [vmem:[#allocation114_spill] sm:$0xff] %v14134_v50  ;;  %16830 = vst [vmem:[#allocation117_spill] sm:$0xff] %v14140_v46  ;;  %v11702_v46 = vld [vmem:[%s12764_s17 + $0x50] sm:$0xff]  ;;  %v2804_v29 = vmul.f32 %v11706_v20, %v14134_v50 }
 0x7d1   : > { %16821 = vst [vmem:[#allocation108_spill] sm:$0xff] %v14120_v16  ;;  %v14158_v44 = vmul.f32 %v11702_v46, %v14080_v3 }
 0x7d2   : > { %v14126_v23 = vpop.f32.mrf.mxu0  ;;  %v3946_v16 = vpop.f32.mrf.mxu1  ;;  %v16846_v9 = vld [vmem:[#allocation102_spill] sm:$0xff] }
 0x7d3   : > { %16823 = vst [vmem:[#allocation110_spill] sm:$0xff] %v14126_v23  ;;  %v14144_v23 = vpop.permute.xlu1 %2662  ;;  %16834 = vst [vmem:[#allocation121_spill] sm:$0xff] %v14158_v44  ;;  %v3979_v44 = vadd.f32 %v14054_v31, %v3547_v26 }
 0x7d4   : > { %v14128_v19 = vpop.f32.mrf.mxu0  ;;  %16831 = vst [vmem:[#allocation118_spill] sm:$0xff] %v14144_v23  ;;  %v11703_v23 = vld [vmem:[%s12764_s17 + $0x68] sm:$0xff] }
 0x7d5   : > { %16824 = vst [vmem:[#allocation111_spill] sm:$0xff] %v14128_v19  ;;  %v10674_v19 = vpop.f32.mrf.mxu1  ;;  %v14162_v35 = vmul.f32 %v11703_v23, %v14094_v54  ;;  %v3627_v23 = vadd.f32 %v14000_v32, %v13743_v38  ;;  %v11708_v38 = vld [vmem:[%s12764_s17 + $0xf0] sm:$0xff]  ;;  %v3978_v32 = vadd.f32 %v14038_v63, %v13691_v4  ;;  %v3976_v4 = vadd.f32 %v14028_v13, %v13685_v56 }
 0x7d6   : > { %v14132_v52 = vpop.f32.mrf.mxu0 }
 0x7d7   : > { %16826 = vst [vmem:[#allocation113_spill] sm:$0xff] %v14132_v52  ;;  %v3956_v7 = vpop.f32.mrf.mxu1  ;;  %v14174_v3 = vpop.permute.xlu1 %2657  ;;  %v4338_v56 = vadd.f32 %v14072_v40, %v3976_v4  ;;  %v16840_v40 = vld [vmem:[#allocation50_spill] sm:$0xff]  ;;  %v16858_v4 = vld [vmem:[#allocation40_spill] sm:$0xff] }
 0x7d8   : > { %v14136_v37 = vpop.f32.mrf.mxu0  ;;  %16836 = vst [vmem:[#allocation123_spill] sm:$0xff] %v14174_v3  ;;  %v3995_v3 = vadd.f32 %v3956_v7, %v3627_v23 }
 0x7d9   : > { %16828 = vst [vmem:[#allocation115_spill] sm:$0xff] %v14136_v37  ;;  %v14152_v37 = vpop.permute.xlu0 %2737 }
 0x7da   : > { %v14138_v8 = vpop.f32.mrf.mxu0  ;;  %16833 = vst [vmem:[#allocation120_spill] sm:$0xff] %v14152_v37 }
 0x7db   : > { %16829 = vst [vmem:[#allocation116_spill] sm:$0xff] %v14138_v8  ;;  %v3632_v8 = vadd.f32 %v13998_v57, %v13741_v33  ;;  %v14170_v33 = vmul.f32 %v11704_v51, %v14110_v18  ;;  %v11705_v57 = vld [vmem:[%s12764_s17 + $0x78] sm:$0xff]  ;;  %v4342_v51 = vadd.f32 %v10742_v48, %v3980_v58  ;;  %v4341_v48 = vadd.f32 %v14098_v61, %v3979_v44 }
 0x7dc   : > { %v14142_v55 = vpop.f32.mrf.mxu0  ;;  %v2805_v46 = vmul.f32 %v11705_v57, %v14122_v39  ;;  %v3617_v57 = vadd.f32 %v13996_v45, %v13737_v21  ;;  %v3994_v39 = vadd.f32 %v10671_v14, %v13739_v62  ;;  %v11709_v45 = vld [vmem:[%s12764_s17 + $0xe8] sm:$0xff]  ;;  %v3607_v61 = vadd.f32 %v13735_v53, %v13731_v12 }
 0x7dd   : > { %16835 = vst [vmem:[#allocation122_spill] sm:$0xff] %v14170_v33  ;;  %v3996_v54 = vadd.f32 %v10674_v19, %v3632_v8  ;;  %v2820_v19 = vmul.f32 %v11708_v38, %v14130_v24  ;;  %v3537_v8 = vadd.f32 %v13693_v28, %v13689_v0  ;;  %v2819_v62 = vmul.f32 %v11709_v45, %v14090_v11 }
 0x7de   : > { %v14146_v60 = vpop.f32.mrf.mxu0  ;;  %v3993_v31 = vadd.f32 %v3946_v16, %v3617_v57  ;;  %v4340_v28 = vadd.f32 %v14084_v36, %v3978_v32  ;;  %v4374_v0 = vsub.f32 %v2805_v46, %v4342_v51  ;;  %v3527_v16 = vadd.f32 %v13687_v6, %v13683_v25  ;;  %v11710_v36 = vld [vmem:[%s12764_s17 + $0xe0] sm:$0xff]  ;;  %v16842_v46 = vld [vmem:[#allocation92_spill] sm:$0xff] }
 0x7df   : > { %v3977_v14 = vadd.f32 %v14044_v27, %v3537_v8  ;;  %v4373_v27 = vsub.f32 %v2804_v29, %v4341_v48  ;;  %v2818_v53 = vmul.f32 %v11710_v36, %v14104_v10  ;;  %v3991_v12 = vadd.f32 %v14124_v5, %v3607_v61  ;;  %v16849_v8 = vld [vmem:[#allocation71_spill] sm:$0xff]  ;;  %v16850_v48 = vld [vmem:[#allocation85_spill] sm:$0xff]  ;;  %v16860_v36 = vld [vmem:[#allocation88_spill] sm:$0xff] }
 0x7e0   : > { %v10763_v52 = vpop.f32.mrf.mxu0  ;;  %v3975_v25 = vadd.f32 %v14034_v1, %v3527_v16  ;;  %v4372_v6 = vsub.f32 %v14162_v35, %v4340_v28  ;;  %v3990_v5 = vadd.f32 %v14100_v2, %v13727_v30  ;;  %v3517_v1 = vadd.f32 %v13681_v43, %v13677_v47  ;;  %v11712_v30 = vld [vmem:[%s12764_s17 + $0xd0] sm:$0xff]  ;;  %v16845_v2 = vld [vmem:[#allocation90_spill] sm:$0xff]  ;;  %v16847_v51 = vld [vmem:[#allocation115_spill] sm:$0xff] }
 0x7e1   : > { %v4356_v58 = vadd.f32 %v10763_v52, %v3994_v39  ;;  %v3992_v52 = vadd.f32 %v14114_v59, %v13733_v22  ;;  %v4339_v44 = vadd.f32 %v14088_v15, %v3977_v14  ;;  %v11711_v59 = vld [vmem:[%s12764_s17 + $0xd8] sm:$0xff]  ;;  %v3597_v15 = vadd.f32 %v13729_v41, %v13725_v42  ;;  %v11713_v47 = vld [vmem:[%s12764_s17 + $0xc8] sm:$0xff] }
 0x7e2   : > { %v4308_v37 = vpop.f32.mrf.mxu0  ;;  %v4337_v23 = vadd.f32 %v16842_v46, %v3975_v25  ;;  %v4352_v57 = vadd.f32 %v16847_v51, %v3990_v5  ;;  %v16848_v43 = vld [vmem:[#allocation73_spill] sm:$0xff]  ;;  %v3973_v32 = vadd.f32 %v16849_v8, %v3517_v1  ;;  %v16863_v25 = vld [vmem:[#allocation99_spill] sm:$0xff]  ;;  %v16872_v51 = vld [vmem:[#allocation58_spill] sm:$0xff] }
 0x7e3   : > { %v4355_v63 = vadd.f32 %v4308_v37, %v3993_v31  ;;  %v4354_v22 = vadd.f32 %v14142_v55, %v3992_v52  ;;  %v4388_v37 = vsub.f32 %v2819_v62, %v4356_v58  ;;  %v4353_v55 = vadd.f32 %v14146_v60, %v3991_v12  ;;  %v16851_v31 = vld [vmem:[#allocation119_spill] sm:$0xff]  ;;  %v16854_v62 = vld [vmem:[#allocation61_spill] sm:$0xff] }
 0x7e4   : > { %v10766_v18 = vpop.f32.mrf.mxu0  ;;  %v16843_v29 = vld [vmem:[#allocation122_spill] sm:$0xff]  ;;  %v2816_v60 = vmul.f32 %v11712_v30, %v16845_v2  ;;  %v4370_v58 = vsub.f32 %v16851_v31, %v4338_v56  ;;  %v16855_v14 = vld [vmem:[#allocation97_spill] sm:$0xff] }
 0x7e5   : > { %v4358_v33 = vadd.f32 %v10766_v18, %v3996_v54  ;;  %v14195_v18 = vpop.permute.xlu0 %2732  ;;  %v14199_v54 = vpop.permute.xlu1 %2652  ;;  %v4387_v13 = vsub.f32 %v2818_v53, %v4355_v63  ;;  %v4371_v41 = vsub.f32 %v16843_v29, %v4339_v44  ;;  %v3988_v28 = vadd.f32 %v16855_v14, %v16854_v62  ;;  %v11714_v63 = vld [vmem:[%s12764_s17 + $0x48] sm:$0xff]  ;;  %v16859_v44 = vld [vmem:[#allocation36_spill] sm:$0xff]  ;;  %v16861_v12 = vld [vmem:[#allocation121_spill] sm:$0xff] }
 0x7e6   : > { %v4318_v26 = vpop.f32.mrf.mxu0  ;;  %16837 = vst [vmem:[#allocation124_spill] sm:$0xff] %v14195_v18  ;;  %16838 = vst [vmem:[#allocation125_spill] sm:$0xff] %v14199_v54  ;;  %v4385_v52 = vsub.f32 %v2816_v60, %v4353_v55  ;;  %v4335_v53 = vadd.f32 %v16860_v36, %v3973_v32  ;;  %v11716_v55 = vld [vmem:[%s12764_s17 + $0x40] sm:$0xff]  ;;  %v16870_v60 = vld [vmem:[#allocation57_spill] sm:$0xff] }
 0x7e7   : > { %v4390_v20 = vsub.f32 %v2821_v17, %v4358_v33  ;;  %v4357_v21 = vadd.f32 %v4318_v26, %v3995_v3  ;;  %v2817_v3 = vmul.f32 %v11711_v59, %v14058_v34  ;;  %v16841_v33 = vld [vmem:[#allocation69_spill] sm:$0xff]  ;;  %v3989_v17 = vadd.f32 %v16846_v9, %v3597_v15  ;;  %v16871_v9 = vld [vmem:[#allocation59_spill] sm:$0xff]  ;;  %v11719_v14 = vld [vmem:[%s12764_s17 + $0xb0] sm:$0xff] }
 0x7e8   : > { %v3974_v35 = vadd.f32 %v16841_v33, %v16840_v40  ;;  %v16862_v59 = vld [vmem:[#allocation77_spill] sm:$0xff]  ;;  %v16866_v33 = vld [vmem:[#allocation66_spill] sm:$0xff] }
 0x7e9   : > { %v4389_v39 = vsub.f32 %v2820_v19, %v4357_v21  ;;  %9435 = vmatprep.subr.mxu1 %v4390_v20  ;;  %v14224_v7 = vpop.permute.xlu0 %2727  ;;  %v14232_v42 = vpop.permute.xlu1 %2647  ;;  %v4386_v38 = vsub.f32 %v2817_v3, %v4354_v22  ;;  %v2815_v19 = vmul.f32 %v11713_v47, %v16848_v43  ;;  %v16852_v20 = vld [vmem:[#allocation60_spill] sm:$0xff]  ;;  %v16853_v21 = vld [vmem:[#allocation62_spill] sm:$0xff]  ;;  %v4369_v22 = vsub.f32 %v16861_v12, %v4337_v23  ;;  %v11717_v40 = vld [vmem:[%s12764_s17 + $0xb8] sm:$0xff] }
 0x7ea   : > { %9436 = vmatpush3.msra.mxu1 %v4374_v0  ;;  %16839 = vst [vmem:[#allocation126_spill] sm:$0xff] %v14224_v7  ;;  %16844 = vst [vmem:[#allocation50_spill] sm:$0xff] %v14232_v42  ;;  %v4336_v26 = vadd.f32 %v16850_v48, %v3974_v35  ;;  %v3587_v45 = vadd.f32 %v16853_v21, %v16852_v20  ;;  %v16856_v0 = vld [vmem:[#allocation116_spill] sm:$0xff]  ;;  %v2813_v35 = vmul.f32 %v11717_v40, %v16866_v33  ;;  %v16868_v23 = vld [vmem:[#allocation67_spill] sm:$0xff] }
 0x7eb   : > { %9437 = vmatprep.subr.mxu1 %v4389_v39  ;;  %v4351_v61 = vadd.f32 %v16856_v0, %v3989_v17  ;;  %v16857_v39 = vld [vmem:[#allocation74_spill] sm:$0xff]  ;;  %v4384_v5 = vsub.f32 %v2815_v19, %v4352_v57  ;;  %v3577_v17 = vadd.f32 %v16871_v9, %v16870_v60  ;;  %v16874_v47 = vld [vmem:[#allocation113_spill] sm:$0xff]  ;;  %v16875_v48 = vld [vmem:[#allocation68_spill] sm:$0xff] }
 0x7ec   : > { %9438 = vmatpush3.msra.mxu1 %v4373_v27  ;;  %v2799_v16 = vmul.f32 %v11714_v63, %v16857_v39  ;;  %v3507_v27 = vadd.f32 %v16859_v44, %v16858_v4  ;;  %v3987_v56 = vadd.f32 %v16863_v25, %v3587_v45  ;;  %v16873_v57 = vld [vmem:[#allocation94_spill] sm:$0xff]  ;;  %v11718_v32 = vld [vmem:[%s12764_s17 + $0x38] sm:$0xff]  ;;  %v11720_v44 = vld [vmem:[%s12764_s17 + $0x30] sm:$0xff] }
 0x7ed   : > { %9439 = vmatprep.subr.mxu1 %v4388_v37  ;;  %v11715_v37 = vld [vmem:[%s12764_s17 + $0xc0] sm:$0xff]  ;;  %v14262_v46 = vpop.permute.xlu0 %2722  ;;  %v14265_v30 = vpop.permute.xlu1 %2642  ;;  %v2797_v31 = vmul.f32 %v11718_v32, %v16875_v48  ;;  %v11721_v12 = vld [vmem:[%s12764_s17 + $0xa8] sm:$0xff]  ;;  %v16889_v40 = vld [vmem:[#allocation89_spill] sm:$0xff] }
 0x7ee   : > { %9440 = vmatpush3.msra.mxu1 %v4372_v6  ;;  %v2814_v3 = vmul.f32 %v11715_v37, %v16862_v59  ;;  %v16864_v6 = vld [vmem:[#allocation111_spill] sm:$0xff]  ;;  %16867 = vst [vmem:[#allocation69_spill] sm:$0xff] %v14262_v46  ;;  %v3971_v29 = vadd.f32 %v16868_v23, %v3507_v27  ;;  %16869 = vst [vmem:[#allocation92_spill] sm:$0xff] %v14265_v30  ;;  %v4349_v19 = vadd.f32 %v16874_v47, %v3987_v56  ;;  %v16878_v21 = vld [vmem:[#allocation82_spill] sm:$0xff] }
 0x7ef   : > { %9441 = vmatprep.subr.mxu1 %v4387_v13  ;;  %v4350_v15 = vadd.f32 %v16864_v6, %v3988_v28  ;;  %v16865_v13 = vld [vmem:[#allocation80_spill] sm:$0xff]  ;;  %v16879_v28 = vld [vmem:[#allocation117_spill] sm:$0xff]  ;;  %v16882_v27 = vld [vmem:[#allocation118_spill] sm:$0xff] }
 0x7f0   : > { %9442 = vmatpush3.msra.mxu1 %v4371_v41  ;;  %v2798_v1 = vmul.f32 %v11716_v55, %v16865_v13  ;;  %v4368_v41 = vsub.f32 %v2799_v16, %v4336_v26  ;;  %v4383_v8 = vsub.f32 %v2814_v3, %v4351_v61  ;;  %v16877_v26 = vld [vmem:[#allocation37_spill] sm:$0xff]  ;;  %v4333_v45 = vadd.f32 %v16878_v21, %v3971_v29  ;;  %v16881_v16 = vld [vmem:[#allocation108_spill] sm:$0xff]  ;;  %v16886_v6 = vld [vmem:[#allocation54_spill] sm:$0xff] }
 0x7f1   : > { %9443 = vmatprep.subr.mxu1 %v4386_v38  ;;  %v3986_v38 = vadd.f32 %v16873_v57, %v16872_v51  ;;  %v2812_v0 = vmul.f32 %v11719_v14, %v16879_v28  ;;  %v4382_v4 = vsub.f32 %v2813_v35, %v4350_v15  ;;  %v2796_v36 = vmul.f32 %v11720_v44, %v16882_v27  ;;  %v16884_v3 = vld [vmem:[#allocation65_spill] sm:$0xff]  ;;  %v16890_v15 = vld [vmem:[#allocation110_spill] sm:$0xff]  ;;  %v16891_v60 = vld [vmem:[#allocation123_spill] sm:$0xff] }
 0x7f2   : > { %9444 = vmatpush3.msra.mxu1 %v4370_v58  ;;  %v16876_v58 = vld [vmem:[#allocation41_spill] sm:$0xff]  ;;  %v4367_v62 = vsub.f32 %v2798_v1, %v4335_v53  ;;  %v16888_v1 = vld [vmem:[#allocation55_spill] sm:$0xff]  ;;  %v16894_v57 = vld [vmem:[#allocation38_spill] sm:$0xff] }
 0x7f3   : > { %9445 = vmatprep.subr.mxu1 %v4385_v52  ;;  %v3497_v20 = vadd.f32 %v16877_v26, %v16876_v58  ;;  %v16880_v52 = vld [vmem:[#allocation95_spill] sm:$0xff]  ;;  %v4348_v61 = vadd.f32 %v16881_v16, %v3986_v38  ;;  %v16885_v53 = vld [vmem:[#allocation81_spill] sm:$0xff]  ;;  %v3984_v23 = vadd.f32 %v16889_v40, %v16888_v1  ;;  %v4381_v29 = vsub.f32 %v2812_v0, %v4349_v19  ;;  %v11723_v58 = vld [vmem:[%s12764_s17 + $0xa0] sm:$0xff] }
 0x7f4   : > { %9446 = vmatpush3.msra.mxu1 %v4369_v22  ;;  %v3985_v63 = vadd.f32 %v16880_v52, %v3577_v17  ;;  %v16883_v22 = vld [vmem:[#allocation120_spill] sm:$0xff]  ;;  %v4366_v56 = vsub.f32 %v2797_v31, %v16885_v53  ;;  %v14294_v17 = vpop.permute.xlu0 %2717  ;;  %v16893_v51 = vld [vmem:[#allocation43_spill] sm:$0xff]  ;;  %v4365_v32 = vsub.f32 %v2796_v36, %v4333_v45  ;;  %v14299_v31 = vpop.permute.xlu1 %2637  ;;  %v2810_v19 = vmul.f32 %v11723_v58, %v14195_v18  ;;  %v16898_v21 = vld [vmem:[#allocation105_spill] sm:$0xff] }
 0x7f5   : > { %9447 = vmatprep.subr.mxu1 %v4384_v5  ;;  %v2811_v37 = vmul.f32 %v11721_v12, %v16883_v22  ;;  %v3969_v25 = vadd.f32 %v16884_v3, %v3497_v20  ;;  %v16887_v5 = vld [vmem:[#allocation56_spill] sm:$0xff]  ;;  %16892 = vst [vmem:[#allocation122_spill] sm:$0xff] %v14294_v17  ;;  %v3487_v38 = vadd.f32 %v16894_v57, %v16893_v51  ;;  %v16895_v47 = vld [vmem:[#allocation79_spill] sm:$0xff]  ;;  %16896 = vst [vmem:[#allocation102_spill] sm:$0xff] %v14299_v31 }
 0x7f6   : > { %9448 = vmatpush3.msra.mxu1 %v4368_v41  ;;  %v3567_v55 = vadd.f32 %v16887_v5, %v16886_v6  ;;  %v4347_v35 = vadd.f32 %v16890_v15, %v3985_v63  ;;  %v11722_v41 = vld [vmem:[%s12764_s17 + $0x28] sm:$0xff]  ;;  %v11724_v0 = vld [vmem:[%s12764_s17 + $0x20] sm:$0xff]  ;;  %v11725_v63 = vld [vmem:[%s12764_s17 + $0x98] sm:$0xff] }
 0x7f7   : > { %9449 = vmatprep.subr.mxu1 %v4383_v8  ;;  %v2795_v9 = vmul.f32 %v11722_v41, %v16891_v60  ;;  %v4331_v8 = vadd.f32 %v16895_v47, %v3969_v25  ;;  %v16897_v26 = vld [vmem:[#allocation91_spill] sm:$0xff]  ;;  %v4380_v14 = vsub.f32 %v2811_v37, %v4348_v61  ;;  %v2794_v52 = vmul.f32 %v11724_v0, %v14199_v54  ;;  %v16899_v16 = vld [vmem:[#allocation64_spill] sm:$0xff]  ;;  %v16900_v44 = vld [vmem:[#allocation78_spill] sm:$0xff] }
 0x7f8   : > { %9450 = vmatpush3.msra.mxu1 %v4367_v62  ;;  %v3983_v20 = vadd.f32 %v16897_v26, %v3567_v55  ;;  %v4346_v62 = vadd.f32 %v16898_v21, %v3984_v23  ;;  %v2809_v45 = vmul.f32 %v11725_v63, %v14224_v7  ;;  %v16901_v12 = vld [vmem:[#allocation51_spill] sm:$0xff]  ;;  %v16902_v3 = vld [vmem:[#allocation53_spill] sm:$0xff]  ;;  %v16903_v53 = vld [vmem:[#allocation52_spill] sm:$0xff]  ;;  %v4379_v5 = vsub.f32 %v2810_v19, %v4347_v35 }
 0x7f9   : > { %9451 = vmatprep.subr.mxu1 %v4382_v4  ;;  %v3967_v4 = vadd.f32 %v16899_v16, %v3487_v38  ;;  %v4364_v36 = vsub.f32 %v2795_v9, %v16900_v44  ;;  %v3557_v25 = vadd.f32 %v16902_v3, %v16901_v12  ;;  %v16905_v61 = vld [vmem:[#allocation106_spill] sm:$0xff]  ;;  %v11726_v55 = vld [vmem:[%s12764_s17 + $0x18] sm:$0xff]  ;;  %v16906_v40 = vld [vmem:[#allocation39_spill] sm:$0xff]  ;;  %v4363_v9 = vsub.f32 %v2794_v52, %v4331_v8  ;;  %v14331_v52 = vpop.permute.xlu1 %2632 }
 0x7fa   : > { %9452 = vmatpush3.msra.mxu1 %v4366_v56  ;;  %v16904_v56 = vld [vmem:[#allocation84_spill] sm:$0xff]  ;;  %v4345_v37 = vadd.f32 %v16905_v61, %v3983_v20  ;;  %v2793_v1 = vmul.f32 %v11726_v55, %v14232_v42  ;;  %v16907_v23 = vld [vmem:[#allocation42_spill] sm:$0xff]  ;;  %v16909_v38 = vld [vmem:[#allocation87_spill] sm:$0xff]  ;;  %v4378_v58 = vsub.f32 %v2809_v45, %v4346_v62  ;;  %v14327_v20 = vpop.permute.xlu0 %2712  ;;  %16914 = vst [vmem:[#allocation71_spill] sm:$0xff] %v14331_v52 }
 0x7fb   : > { %9453 = vmatprep.subr.mxu1 %v4381_v29  ;;  %v3982_v6 = vadd.f32 %v16904_v56, %v16903_v53  ;;  %v3477_v15 = vadd.f32 %v16907_v23, %v16906_v40  ;;  %v16908_v29 = vld [vmem:[#allocation76_spill] sm:$0xff]  ;;  %v3981_v47 = vadd.f32 %v16909_v38, %v3557_v25  ;;  %16911 = vst [vmem:[#allocation115_spill] sm:$0xff] %v14327_v20  ;;  %v16912_v21 = vld [vmem:[#allocation63_spill] sm:$0xff]  ;;  %v11731_v53 = vld [vmem:[%s12764_s17 + $0x80] sm:$0xff] }
 0x7fc   : > { %9454 = vmatpush3.msra.mxu1 %v4365_v32  ;;  %v4329_v41 = vadd.f32 %v16908_v29, %v3967_v4  ;;  %v11727_v51 = vld [vmem:[%s12764_s17 + $0x90] sm:$0xff]  ;;  %v16913_v8 = vld [vmem:[#allocation75_spill] sm:$0xff]  ;;  %v2806_v56 = vmul.f32 %v11731_v53, %v14327_v20  ;;  %v11732_v61 = vld [vmem:[%s12764_s17] sm:$0xff] }
 0x7fd   : > { %9455 = vmatprep.subr.mxu1 %v4380_v14  ;;  %v2808_v57 = vmul.f32 %v11727_v51, %v14262_v46  ;;  %v16910_v32 = vld [vmem:[#allocation100_spill] sm:$0xff]  ;;  %v3965_v14 = vadd.f32 %v16912_v21, %v3477_v15  ;;  %v4362_v0 = vsub.f32 %v2793_v1, %v16913_v8  ;;  %v11729_v63 = vld [vmem:[%s12764_s17 + $0x88] sm:$0xff]  ;;  %v16917_v55 = vld [vmem:[#allocation70_spill] sm:$0xff] }
 0x7fe   : > { %9456 = vmatpush3.msra.mxu1 %v4364_v36  ;;  %v4344_v35 = vadd.f32 %v16910_v32, %v3982_v6  ;;  %v11728_v19 = vld [vmem:[%s12764_s17 + $0x10] sm:$0xff]  ;;  %v2807_v16 = vmul.f32 %v11729_v63, %v14294_v17  ;;  %v16915_v4 = vld [vmem:[#allocation103_spill] sm:$0xff]  ;;  %v16918_v23 = vld [vmem:[#allocation2_spill] sm:$0xff] }
 0x7ff   : > { %9457 = vmatprep.subr.mxu1 %v4379_v5  ;;  %v2792_v26 = vmul.f32 %v11728_v19, %v14265_v30  ;;  %v4343_v62 = vadd.f32 %v16915_v4, %v3981_v47  ;;  %v4377_v45 = vsub.f32 %v2808_v57, %v4345_v37  ;;  %v11730_v44 = vld [vmem:[%s12764_s17 + $0x8] sm:$0xff]  ;;  %v16916_v12 = vld [vmem:[#allocation72_spill] sm:$0xff]  ;;  %v2790_v5 = vmul.f32 %v11732_v61, %v14331_v52  ;;  %v16919_v15 = vld [vmem:[#allocation9_spill] sm:$0xff] }
 0x800   : > { %9458 = vmatpush3.msra.mxu1 %v4363_v9  ;;  %v2791_v36 = vmul.f32 %v11730_v44, %v14299_v31  ;;  %v4327_v3 = vadd.f32 %v16916_v12, %v3965_v14  ;;  %v4376_v6 = vsub.f32 %v2807_v16, %v4344_v35  ;;  %v16920_v29 = vld [vmem:[#allocation11_spill] sm:$0xff]  ;;  %v16922_v9 = vld [vmem:[#allocation16_spill] sm:$0xff]  ;;  %v16923_v51 = vld [vmem:[#allocation5_spill] sm:$0xff] }
 0x801   : > { %9459 = vmatprep.subr.mxu1 %v4378_v58  ;;  %v4361_v25 = vsub.f32 %v2792_v26, %v4329_v41  ;;  %v4375_v37 = vsub.f32 %v2806_v56, %v4343_v62  ;;  %v16921_v41 = vld [vmem:[#allocation15_spill] sm:$0xff]  ;;  %v16924_v57 = vld [vmem:[#allocation6_spill] sm:$0xff]  ;;  %v16925_v38 = vld [vmem:[#allocation13_spill] sm:$0xff] }
 0x802   : > { %9460 = vmatpush3.msra.mxu1 %v4362_v0  ;;  %v4360_v1 = vsub.f32 %v2791_v36, %v16917_v55  ;;  %v4359_v40 = vsub.f32 %v2790_v5, %v4327_v3  ;;  %v16926_v47 = vld [vmem:[#allocation14_spill] sm:$0xff]  ;;  %v16928_v35 = vld [vmem:[#allocation12_spill] sm:$0xff]  ;;  %v16930_v19 = vld [vmem:[#allocation3_spill] sm:$0xff] }
 0x803   : > { %9461 = vmatprep.subr.mxu1 %v4377_v45  ;;  %v16927_v32 = vld [vmem:[#allocation10_spill] sm:$0xff]  ;;  %v16929_v58 = vld [vmem:[#allocation4_spill] sm:$0xff]  ;;  %v16932_v21 = vld [vmem:[#allocation7_spill] sm:$0xff] }
 0x804   : > { %9462 = vmatpush3.msra.mxu1 %v4361_v25  ;;  %v16931_v26 = vld [vmem:[#allocation8_spill] sm:$0xff]  ;;  %v16933_v14 = vld [vmem:[#allocation18_spill] sm:$0xff] }
 0x805   : > { %9463 = vmatprep.subr.mxu1 %v4376_v6  ;;  %v16936_v2 = vld [vmem:[#allocation34_spill] sm:$0xff] }
 0x806   : > { %9464 = vmatpush3.msra.mxu1 %v4360_v1 }
 0x807   : > { %9465 = vmatprep.subr.mxu1 %v4375_v37  ;;  %v16934_v37 = vld [vmem:[#allocation45_spill] sm:$0xff] }
 0x808   : > { %9466 = vmatpush3.msra.mxu1 %v4359_v40 }
 0x809   : > { %4456 = vmatmul.mubr.f32.vlgmr.msra.gmra.mxu1 %v16918_v23 }
 0x80a   : > { %4460 = vmatprep.mubr.f32.mxu1 %v16919_v15 }
 0x80d   : > { %4461 = vmatmul.mubr.f32.gmra.mxu1 %v16920_v29 }
 0x80e   : > { %4465 = vmatprep.mubr.f32.mxu1 %v16921_v41 }
 0x811   : > { %4466 = vmatmul.mubr.f32.gmra.mxu1 %v16922_v9 }
 0x812   : > { %4470 = vmatprep.mubr.f32.mxu1 %v16923_v51 }
 0x815   : > { %4471 = vmatmul.mubr.f32.gmra.mxu1 %v16924_v57 }
 0x816   : > { %4475 = vmatprep.mubr.f32.mxu1 %v16925_v38 }
 0x819   : > { %4476 = vmatmul.mubr.f32.gmra.mxu1 %v16926_v47 }
 0x81a   : > { %4480 = vmatprep.mubr.f32.mxu1 %v16927_v32 }
 0x81d   : > { %4481 = vmatmul.mubr.f32.gmra.mxu1 %v16928_v35 }
 0x81e   : > { %4485 = vmatprep.mubr.f32.mxu1 %v16929_v58 }
 0x821   : > { %4486 = vmatmul.mubr.f32.gmra.mxu1 %v16930_v19 }
 0x822   : > { %4490 = vmatprep.mubr.f32.mxu1 %v16931_v26 }
 0x825   : > { %4491 = vmatmul.mubr.f32.gmra.mxu1 %v16932_v21 }
 0x826   : > { %10811 = vmatprep.mubr.msk.f32.mxu1 %vm618_vm2, %v16933_v14 }
 0x8c9   : > { %v9467_v8 = vpop.f32.mrf.mxu1 }
 0x8cb   : > { %v9468_v0 = vpop.f32.mrf.mxu1 }
 0x8cd   : > { %v9470_v63 = vpop.f32.mrf.mxu1 }
 0x8cf   : > { %v9471_v16 = vpop.f32.mrf.mxu1 }
 0x8d1   : > { %v9473_v4 = vpop.f32.mrf.mxu1 }
 0x8d3   : > { %v9474_v62 = vpop.f32.mrf.mxu1 }
 0x8d5   : > { %v9476_v45 = vpop.f32.mrf.mxu1 }
 0x8d7   : > { %v9477_v44 = vpop.f32.mrf.mxu1 }
 0x8d8   : > { %v9478_v11 = vadd.f32 %v9477_v44, %v9476_v45  ;;  %v9472_v45 = vadd.f32 %v9471_v16, %v9470_v63  ;;  %v16938_v44 = vld [vmem:[#allocation47_spill] sm:$0xff]  ;;  %v16942_v16 = vld [vmem:[#allocation20_spill] sm:$0xff] }
 0x8d9   : > { %v9479_v36 = vpop.f32.mrf.mxu1 }
 0x8db   : > { %v9480_v12 = vpop.f32.mrf.mxu1 }
 0x8dc   : > { %v9481_v24 = vadd.f32 %v9480_v12, %v9479_v36  ;;  %v9475_v36 = vadd.f32 %v9474_v62, %v9473_v4  ;;  %v16937_v12 = vld [vmem:[#allocation46_spill] sm:$0xff]  ;;  %v16939_v4 = vld [vmem:[#allocation48_spill] sm:$0xff] }
 0x8dd   : > { %v9482_v3 = vpop.f32.mrf.mxu1 }
 0x8de   : > { %v14393_v62 = vmul.f32 %v9475_v36, %v16939_v4  ;;  %v11733_v36 = vld [vmem:[%s16504_s3 + $0x100] sm:$0xff] }
 0x8df   : > { %v9483_v25 = vpop.f32.mrf.mxu1 }
 0x8e0   : > { %v9484_v1 = vadd.f32 %v9483_v25, %v9482_v3  ;;  %v14379_v3 = vmul.f32 %v9481_v24, %v16937_v12  ;;  %v14386_v25 = vmul.f32 %v9478_v11, %v16938_v44  ;;  %v9469_v24 = vadd.f32 %v9468_v0, %v9467_v8  ;;  %v16940_v11 = vld [vmem:[#allocation49_spill] sm:$0xff]  ;;  %v16941_v8 = vld [vmem:[#allocation44_spill] sm:$0xff] }
 0x8e1   : > { %v9485_v53 = vpop.f32.mrf.mxu1  ;;  %v14400_v63 = vmul.f32 %v9472_v45, %v16940_v11  ;;  %v11734_v45 = vld [vmem:[%s16504_s3] sm:$0xff] }
 0x8e2   : > { %v14407_v0 = vmul.f32 %v9469_v24, %v16941_v8 }
 0x8e3   : > { %v9486_v56 = vpop.f32.mrf.mxu1 }
 0x8e4   : > { %v9487_v5 = vadd.f32 %v9486_v56, %v9485_v53  ;;  %v14372_v53 = vmul.f32 %v9484_v1, %v16936_v2  ;;  %v16943_v56 = vld [vmem:[#allocation19_spill] sm:$0xff]  ;;  %v16948_v1 = vld [vmem:[#allocation25_spill] sm:$0xff] }
 0x8e5   : > { %v9488_v6 = vpop.f32.mrf.mxu1 }
 0x8e6   : > { %v14365_v10 = vmul.f32 %v9487_v5, %v16935_v49  ;;  %v16946_v5 = vld [vmem:[#allocation23_spill] sm:$0xff] }
 0x8e7   : > { %v9489_v61 = vpop.f32.mrf.mxu1 }
 0x8e8   : > { %v9490_v55 = vadd.f32 %v9489_v61, %v9488_v6  ;;  %v16944_v6 = vld [vmem:[#allocation21_spill] sm:$0xff]  ;;  %v16945_v61 = vld [vmem:[#allocation22_spill] sm:$0xff] }
 0x8ea   : > { %v14362_v40 = vmul.f32 %v9490_v55, %v16934_v37  ;;  %v16947_v55 = vld [vmem:[#allocation24_spill] sm:$0xff] }
 0x8ec   : > { %10767 = vmatprep.subr.mxu0 %v14362_v40  ;;  %10795 = vmatprep.subr.mxu1 %v14362_v40 }
 0x8ed   : > { %10768 = vmatpush3.msra.mxu0 %v14362_v40  ;;  %10796 = vmatpush3.msra.mxu1 %v14362_v40 }
 0x8ee   : > { %10769 = vmatprep.subr.mxu0 %v14365_v10  ;;  %10797 = vmatprep.subr.mxu1 %v14365_v10 }
 0x8ef   : > { %10770 = vmatpush3.msra.mxu0 %v14365_v10  ;;  %10798 = vmatpush3.msra.mxu1 %v14365_v10 }
 0x8f0   : > { %10771 = vmatprep.subr.mxu0 %v14372_v53  ;;  %10799 = vmatprep.subr.mxu1 %v14372_v53 }
 0x8f1   : > { %10772 = vmatpush3.msra.mxu0 %v14372_v53  ;;  %10800 = vmatpush3.msra.mxu1 %v14372_v53 }
 0x8f2   : > { %10773 = vmatprep.subr.mxu0 %v14379_v3  ;;  %10801 = vmatprep.subr.mxu1 %v14379_v3 }
 0x8f3   : > { %10774 = vmatpush3.msra.mxu0 %v14379_v3  ;;  %10802 = vmatpush3.msra.mxu1 %v14379_v3 }
 0x8f4   : > { %10775 = vmatprep.subr.mxu0 %v14386_v25  ;;  %10803 = vmatprep.subr.mxu1 %v14386_v25 }
 0x8f5   : > { %10776 = vmatpush3.msra.mxu0 %v14386_v25  ;;  %10804 = vmatpush3.msra.mxu1 %v14386_v25 }
 0x8f6   : > { %10777 = vmatprep.subr.mxu0 %v14393_v62  ;;  %10805 = vmatprep.subr.mxu1 %v14393_v62 }
 0x8f7   : > { %10778 = vmatpush3.msra.mxu0 %v14393_v62  ;;  %10806 = vmatpush3.msra.mxu1 %v14393_v62 }
 0x8f8   : > { %10779 = vmatprep.subr.mxu0 %v14400_v63  ;;  %10807 = vmatprep.subr.mxu1 %v14400_v63 }
 0x8f9   : > { %10780 = vmatpush3.msra.mxu0 %v14400_v63  ;;  %10808 = vmatpush3.msra.mxu1 %v14400_v63 }
 0x8fa   : > { %10781 = vmatprep.subr.mxu0 %v14407_v0  ;;  %10809 = vmatprep.subr.mxu1 %v14407_v0 }
 0x8fb   : > { %10782 = vmatpush3.msra.mxu0 %v14407_v0  ;;  %10810 = vmatpush3.msra.mxu1 %v14407_v0 }
 0x8fc   : > { %10784 = vmatmul.mubr.msk.f32.vlgmr.msra.gmra.mxu0 %vm618_vm2, %v16920_v29  ;;  %10812 = vmatmul.mubr.msk.f32.vlgmr.msra.gmra.mxu1 %vm618_vm2, %v16942_v16 }
 0x8fd   : > { %10786 = vmatprep.mubr.msk.f32.mxu0 %vm618_vm2, %v16922_v9  ;;  %10814 = vmatprep.mubr.msk.f32.mxu1 %vm618_vm2, %v16943_v56 }
 0x900   : > { %10787 = vmatmul.mubr.msk.f32.gmra.mxu0 %vm618_vm2, %v16924_v57  ;;  %10815 = vmatmul.mubr.msk.f32.gmra.mxu1 %vm618_vm2, %v16944_v6 }
 0x901   : > { %10789 = vmatprep.mubr.msk.f32.mxu0 %vm618_vm2, %v16926_v47  ;;  %10817 = vmatprep.mubr.msk.f32.mxu1 %vm618_vm2, %v16945_v61 }
 0x904   : > { %10790 = vmatmul.mubr.msk.f32.gmra.mxu0 %vm618_vm2, %v16928_v35  ;;  %10818 = vmatmul.mubr.msk.f32.gmra.mxu1 %vm618_vm2, %v16946_v5 }
 0x905   : > { %10792 = vmatprep.mubr.msk.f32.mxu0 %vm618_vm2, %v16930_v19  ;;  %10820 = vmatprep.mubr.msk.f32.mxu1 %vm618_vm2, %v16947_v55 }
 0x908   : > { %10793 = vmatmul.mubr.msk.f32.gmra.mxu0 %vm618_vm2, %v16932_v21  ;;  %10821 = vmatmul.mubr.msk.f32.gmra.mxu1 %vm618_vm2, %v16948_v1 }
 0x909   : > { %10839 = vmatprep.mubr.msk.f32.mxu0 %vm618_vm2, %v11733_v36  ;;  %10903 = vmatprep.mubr.msk.f32.mxu1 %vm618_vm2, %v11734_v45  ;;  %v11749_v45 = vld [vmem:[%s16504_s3 + $0x38] sm:$0xff] }
 0x9bc   : > { %v10785_v24 = vpop.f32.mrf.mxu0  ;;  %v10813_v34 = vpop.f32.mrf.mxu1 }
 0x9be   : > { %v4570_v59 = vpop.f32.mrf.mxu0  ;;  %v4675_v43 = vpop.f32.mrf.mxu1 }
 0x9c0   : > { %v10788_v28 = vpop.f32.mrf.mxu0  ;;  %v10816_v48 = vpop.f32.mrf.mxu1 }
 0x9c2   : > { %v4580_v33 = vpop.f32.mrf.mxu0  ;;  %v4685_v18 = vpop.f32.mrf.mxu1 }
 0x9c4   : > { %v10791_v22 = vpop.f32.mrf.mxu0  ;;  %v10819_v46 = vpop.f32.mrf.mxu1 }
 0x9c6   : > { %v4590_v7 = vpop.f32.mrf.mxu0  ;;  %v4695_v20 = vpop.f32.mrf.mxu1 }
 0x9c8   : > { %v10794_v17 = vpop.f32.mrf.mxu0  ;;  %v10822_v36 = vpop.f32.mrf.mxu1 }
 0x9c9   : > { %10823 = vmatprep.subr.mxu0 %v10822_v36  ;;  %10887 = vmatprep.subr.mxu1 %v10794_v17 }
 0x9ca   : > { %v4600_v50 = vpop.f32.mrf.mxu0  ;;  %v4705_v27 = vpop.f32.mrf.mxu1  ;;  %10824 = vmatpush3.msra.mxu0 %v10822_v36  ;;  %10888 = vmatpush3.msra.mxu1 %v10794_v17  ;;  %v11747_v17 = vld [vmem:[%s16504_s3 + $0x138] sm:$0xff]  ;;  %v11751_v36 = vld [vmem:[%s16504_s3 + $0x148] sm:$0xff] }
 0x9cb   : > { %10825 = vmatprep.subr.mxu0 %v4705_v27  ;;  %10889 = vmatprep.subr.mxu1 %v4600_v50 }
 0x9cc   : > { %10826 = vmatpush3.msra.mxu0 %v4705_v27  ;;  %10890 = vmatpush3.msra.mxu1 %v4600_v50  ;;  %v11735_v50 = vld [vmem:[%s16504_s3 + $0x108] sm:$0xff] }
 0x9cd   : > { %10827 = vmatprep.subr.mxu0 %v10819_v46  ;;  %10891 = vmatprep.subr.mxu1 %v10791_v22  ;;  %v11745_v27 = vld [vmem:[%s16504_s3 + $0x28] sm:$0xff] }
 0x9ce   : > { %10828 = vmatpush3.msra.mxu0 %v10819_v46  ;;  %10892 = vmatpush3.msra.mxu1 %v10791_v22  ;;  %v11742_v46 = vld [vmem:[%s16504_s3 + $0x20] sm:$0xff]  ;;  %v11746_v22 = vld [vmem:[%s16504_s3 + $0x30] sm:$0xff] }
 0x9cf   : > { %10829 = vmatprep.subr.mxu0 %v4695_v20  ;;  %10893 = vmatprep.subr.mxu1 %v4590_v7 }
 0x9d0   : > { %10830 = vmatpush3.msra.mxu0 %v4695_v20  ;;  %10894 = vmatpush3.msra.mxu1 %v4590_v7  ;;  %v11738_v7 = vld [vmem:[%s16504_s3 + $0x10] sm:$0xff]  ;;  %v11748_v20 = vld [vmem:[%s16504_s3 + $0x140] sm:$0xff] }
 0x9d1   : > { %10831 = vmatprep.subr.mxu0 %v10816_v48  ;;  %10895 = vmatprep.subr.mxu1 %v10788_v28 }
 0x9d2   : > { %10832 = vmatpush3.msra.mxu0 %v10816_v48  ;;  %10896 = vmatpush3.msra.mxu1 %v10788_v28  ;;  %v11743_v48 = vld [vmem:[%s16504_s3 + $0x128] sm:$0xff]  ;;  %v11744_v28 = vld [vmem:[%s16504_s3 + $0x130] sm:$0xff] }
 0x9d3   : > { %10833 = vmatprep.subr.mxu0 %v4685_v18  ;;  %10897 = vmatprep.subr.mxu1 %v4580_v33 }
 0x9d4   : > { %10834 = vmatpush3.msra.mxu0 %v4685_v18  ;;  %10898 = vmatpush3.msra.mxu1 %v4580_v33  ;;  %v11736_v18 = vld [vmem:[%s16504_s3 + $0x110] sm:$0xff]  ;;  %v11741_v33 = vld [vmem:[%s16504_s3 + $0x18] sm:$0xff] }
 0x9d5   : > { %10835 = vmatprep.subr.mxu0 %v10813_v34  ;;  %10899 = vmatprep.subr.mxu1 %v10785_v24 }
 0x9d6   : > { %10836 = vmatpush3.msra.mxu0 %v10813_v34  ;;  %10900 = vmatpush3.msra.mxu1 %v10785_v24  ;;  %v11737_v34 = vld [vmem:[%s16504_s3 + $0x8] sm:$0xff]  ;;  %v11750_v24 = vld [vmem:[%s16504_s3 + $0x40] sm:$0xff] }
 0x9d7   : > { %10837 = vmatprep.subr.mxu0 %v4675_v43  ;;  %10901 = vmatprep.subr.mxu1 %v4570_v59 }
 0x9d8   : > { %10838 = vmatpush3.msra.mxu0 %v4675_v43  ;;  %10902 = vmatpush3.msra.mxu1 %v4570_v59  ;;  %v11739_v43 = vld [vmem:[%s16504_s3 + $0x118] sm:$0xff]  ;;  %v11740_v59 = vld [vmem:[%s16504_s3 + $0x120] sm:$0xff] }
 0x9d9   : > { %10840 = vmatmul.mubr.msk.f32.vlgmr.msra.gmra.mxu0 %vm618_vm2, %v11735_v50  ;;  %10951 = vmatprep.subr.mxu0 %v14362_v40  ;;  %v11752_v50 = vld [vmem:[%s16504_s3 + $0x150] sm:$0xff] }
 0x9da   : > { %10952 = vmatpush3.msra.mxu0 %v14362_v40  ;;  %10842 = vmatprep.mubr.msk.f32.mxu0 %vm618_vm2, %v11736_v18  ;;  %v11753_v18 = vld [vmem:[%s16504_s3 + $0x48] sm:$0xff] }
 0x9db   : > { %10953 = vmatprep.subr.mxu0 %v14365_v10  ;;  %10904 = vmatmul.mubr.msk.f32.vlgmr.msra.gmra.mxu1 %vm618_vm2, %v11737_v34  ;;  %v11754_v34 = vld [vmem:[%s16504_s3 + $0x50] sm:$0xff] }
 0x9dc   : > { %10954 = vmatpush3.msra.mxu0 %v14365_v10  ;;  %10906 = vmatprep.mubr.msk.f32.mxu1 %vm618_vm2, %v11738_v7  ;;  %v11755_v7 = vld [vmem:[%s16504_s3 + $0x158] sm:$0xff] }
 0x9dd   : > { %10843 = vmatmul.mubr.msk.f32.gmra.mxu0 %vm618_vm2, %v11739_v43  ;;  %10955 = vmatprep.subr.mxu0 %v14372_v53  ;;  %v11756_v43 = vld [vmem:[%s16504_s3 + $0x160] sm:$0xff] }
 0x9de   : > { %10956 = vmatpush3.msra.mxu0 %v14372_v53  ;;  %10845 = vmatprep.mubr.msk.f32.mxu0 %vm618_vm2, %v11740_v59  ;;  %v11757_v59 = vld [vmem:[%s16504_s3 + $0x58] sm:$0xff] }
 0x9df   : > { %10957 = vmatprep.subr.mxu0 %v14379_v3  ;;  %10907 = vmatmul.mubr.msk.f32.gmra.mxu1 %vm618_vm2, %v11741_v33  ;;  %v11758_v33 = vld [vmem:[%s16504_s3 + $0x60] sm:$0xff] }
 0x9e0   : > { %10958 = vmatpush3.msra.mxu0 %v14379_v3  ;;  %10909 = vmatprep.mubr.msk.f32.mxu1 %vm618_vm2, %v11742_v46  ;;  %v11759_v46 = vld [vmem:[%s16504_s3 + $0x168] sm:$0xff] }
 0x9e1   : > { %10846 = vmatmul.mubr.msk.f32.gmra.mxu0 %vm618_vm2, %v11743_v48  ;;  %10959 = vmatprep.subr.mxu0 %v14386_v25  ;;  %v11760_v48 = vld [vmem:[%s16504_s3 + $0x170] sm:$0xff] }
 0x9e2   : > { %10960 = vmatpush3.msra.mxu0 %v14386_v25  ;;  %10848 = vmatprep.mubr.msk.f32.mxu0 %vm618_vm2, %v11744_v28  ;;  %v11761_v28 = vld [vmem:[%s16504_s3 + $0x68] sm:$0xff] }
 0x9e3   : > { %10961 = vmatprep.subr.mxu0 %v14393_v62  ;;  %10910 = vmatmul.mubr.msk.f32.gmra.mxu1 %vm618_vm2, %v11745_v27  ;;  %v11762_v27 = vld [vmem:[%s16504_s3 + $0x70] sm:$0xff] }
 0x9e4   : > { %10962 = vmatpush3.msra.mxu0 %v14393_v62  ;;  %10912 = vmatprep.mubr.msk.f32.mxu1 %vm618_vm2, %v11746_v22  ;;  %v11763_v22 = vld [vmem:[%s16504_s3 + $0x178] sm:$0xff] }
 0x9e5   : > { %10849 = vmatmul.mubr.msk.f32.gmra.mxu0 %vm618_vm2, %v11747_v17  ;;  %10963 = vmatprep.subr.mxu0 %v14400_v63  ;;  %v11764_v17 = vld [vmem:[%s16504_s3 + $0x180] sm:$0xff] }
 0x9e6   : > { %10964 = vmatpush3.msra.mxu0 %v14400_v63  ;;  %10851 = vmatprep.mubr.msk.f32.mxu0 %vm618_vm2, %v11748_v20  ;;  %v11765_v20 = vld [vmem:[%s16504_s3 + $0x78] sm:$0xff] }
 0x9e7   : > { %10965 = vmatprep.subr.mxu0 %v14407_v0  ;;  %10913 = vmatmul.mubr.msk.f32.gmra.mxu1 %vm618_vm2, %v11749_v45  ;;  %v11766_v45 = vld [vmem:[%s16504_s3 + $0x80] sm:$0xff] }
 0x9e8   : > { %10966 = vmatpush3.msra.mxu0 %v14407_v0  ;;  %10915 = vmatprep.mubr.msk.f32.mxu1 %vm618_vm2, %v11750_v24  ;;  %v11767_v24 = vld [vmem:[%s16504_s3 + $0x188] sm:$0xff] }
 0x9e9   : > { %10852 = vmatmul.mubr.msk.f32.gmra.mxu0 %vm618_vm2, %v11751_v36  ;;  %11043 = vmatprep.subr.mxu0 %v14362_v40  ;;  %v11768_v36 = vld [vmem:[%s16504_s3 + $0x190] sm:$0xff] }
 0x9ea   : > { %10854 = vmatprep.mubr.msk.f32.mxu0 %vm618_vm2, %v11752_v50  ;;  %v11769_v50 = vld [vmem:[%s16504_s3 + $0x88] sm:$0xff] }
 0x9eb   : > { %10916 = vmatmul.mubr.msk.f32.gmra.mxu1 %vm618_vm2, %v11753_v18  ;;  %v11770_v18 = vld [vmem:[%s16504_s3 + $0x90] sm:$0xff] }
 0x9ec   : > { %10918 = vmatprep.mubr.msk.f32.mxu1 %vm618_vm2, %v11754_v34  ;;  %v11771_v34 = vld [vmem:[%s16504_s3 + $0x198] sm:$0xff] }
 0x9ed   : > { %10855 = vmatmul.mubr.msk.f32.gmra.mxu0 %vm618_vm2, %v11755_v7  ;;  %v11772_v7 = vld [vmem:[%s16504_s3 + $0x1a0] sm:$0xff] }
 0x9ee   : > { %10857 = vmatprep.mubr.msk.f32.mxu0 %vm618_vm2, %v11756_v43  ;;  %v11773_v43 = vld [vmem:[%s16504_s3 + $0x98] sm:$0xff] }
 0x9ef   : > { %10919 = vmatmul.mubr.msk.f32.gmra.mxu1 %vm618_vm2, %v11757_v59  ;;  %v11774_v59 = vld [vmem:[%s16504_s3 + $0xa0] sm:$0xff] }
 0x9f0   : > { %10921 = vmatprep.mubr.msk.f32.mxu1 %vm618_vm2, %v11758_v33  ;;  %v11775_v33 = vld [vmem:[%s16504_s3 + $0x1a8] sm:$0xff] }
 0x9f1   : > { %10858 = vmatmul.mubr.msk.f32.gmra.mxu0 %vm618_vm2, %v11759_v46  ;;  %v11776_v46 = vld [vmem:[%s16504_s3 + $0x1b0] sm:$0xff] }
 0x9f2   : > { %10860 = vmatprep.mubr.msk.f32.mxu0 %vm618_vm2, %v11760_v48  ;;  %v11777_v48 = vld [vmem:[%s16504_s3 + $0xa8] sm:$0xff] }
 0x9f3   : > { %10922 = vmatmul.mubr.msk.f32.gmra.mxu1 %vm618_vm2, %v11761_v28  ;;  %v11778_v28 = vld [vmem:[%s16504_s3 + $0xb0] sm:$0xff] }
 0x9f4   : > { %10924 = vmatprep.mubr.msk.f32.mxu1 %vm618_vm2, %v11762_v27  ;;  %v11779_v27 = vld [vmem:[%s16504_s3 + $0x1b8] sm:$0xff] }
 0x9f5   : > { %10861 = vmatmul.mubr.msk.f32.gmra.mxu0 %vm618_vm2, %v11763_v22  ;;  %v11780_v22 = vld [vmem:[%s16504_s3 + $0x1c0] sm:$0xff] }
 0x9f6   : > { %10863 = vmatprep.mubr.msk.f32.mxu0 %vm618_vm2, %v11764_v17  ;;  %v11781_v17 = vld [vmem:[%s16504_s3 + $0xb8] sm:$0xff] }
 0x9f7   : > { %10925 = vmatmul.mubr.msk.f32.gmra.mxu1 %vm618_vm2, %v11765_v20  ;;  %v11782_v20 = vld [vmem:[%s16504_s3 + $0xc0] sm:$0xff] }
 0x9f8   : > { %10927 = vmatprep.mubr.msk.f32.mxu1 %vm618_vm2, %v11766_v45  ;;  %v11783_v45 = vld [vmem:[%s16504_s3 + $0x1c8] sm:$0xff] }
 0x9f9   : > { %10864 = vmatmul.mubr.msk.f32.gmra.mxu0 %vm618_vm2, %v11767_v24  ;;  %v11784_v24 = vld [vmem:[%s16504_s3 + $0x1d0] sm:$0xff] }
 0x9fa   : > { %10866 = vmatprep.mubr.msk.f32.mxu0 %vm618_vm2, %v11768_v36  ;;  %v11785_v36 = vld [vmem:[%s16504_s3 + $0xc8] sm:$0xff] }
 0x9fb   : > { %10928 = vmatmul.mubr.msk.f32.gmra.mxu1 %vm618_vm2, %v11769_v50  ;;  %v11786_v50 = vld [vmem:[%s16504_s3 + $0xd0] sm:$0xff] }
 0x9fc   : > { %10930 = vmatprep.mubr.msk.f32.mxu1 %vm618_vm2, %v11770_v18  ;;  %v11787_v18 = vld [vmem:[%s16504_s3 + $0x1d8] sm:$0xff] }
 0x9fd   : > { %10867 = vmatmul.mubr.msk.f32.gmra.mxu0 %vm618_vm2, %v11771_v34  ;;  %v11788_v34 = vld [vmem:[%s16504_s3 + $0x1e0] sm:$0xff] }
 0x9fe   : > { %10869 = vmatprep.mubr.msk.f32.mxu0 %vm618_vm2, %v11772_v7  ;;  %v11789_v7 = vld [vmem:[%s16504_s3 + $0xd8] sm:$0xff] }
 0x9ff   : > { %10931 = vmatmul.mubr.msk.f32.gmra.mxu1 %vm618_vm2, %v11773_v43  ;;  %v11790_v43 = vld [vmem:[%s16504_s3 + $0xe0] sm:$0xff] }
 0xa00   : > { %10933 = vmatprep.mubr.msk.f32.mxu1 %vm618_vm2, %v11774_v59  ;;  %v11791_v59 = vld [vmem:[%s16504_s3 + $0x1e8] sm:$0xff] }
 0xa01   : > { %10870 = vmatmul.mubr.msk.f32.gmra.mxu0 %vm618_vm2, %v11775_v33  ;;  %v11792_v33 = vld [vmem:[%s16504_s3 + $0x1f0] sm:$0xff] }
 0xa02   : > { %10872 = vmatprep.mubr.msk.f32.mxu0 %vm618_vm2, %v11776_v46  ;;  %v11793_v46 = vld [vmem:[%s16504_s3 + $0xe8] sm:$0xff] }
 0xa03   : > { %10934 = vmatmul.mubr.msk.f32.gmra.mxu1 %vm618_vm2, %v11777_v48  ;;  %v11794_v48 = vld [vmem:[%s16504_s3 + $0xf0] sm:$0xff] }
 0xa04   : > { %10936 = vmatprep.mubr.msk.f32.mxu1 %vm618_vm2, %v11778_v28  ;;  %v11795_v28 = vld [vmem:[%s16504_s3 + $0x1f8] sm:$0xff] }
 0xa05   : > { %10873 = vmatmul.mubr.msk.f32.gmra.mxu0 %vm618_vm2, %v11779_v27  ;;  %v16949_v27 = vld [vmem:[#allocation17_spill] sm:$0xff] }
 0xa06   : > { %10875 = vmatprep.mubr.msk.f32.mxu0 %vm618_vm2, %v11780_v22  ;;  %v11796_v22 = vld [vmem:[%s16504_s3 + $0xf8] sm:$0xff] }
 0xa07   : > { %10937 = vmatmul.mubr.msk.f32.gmra.mxu1 %vm618_vm2, %v11781_v17  ;;  %v11797_v17 = vld [vmem:[%s16504_s3 + $0x200] sm:$0xff] }
 0xa08   : > { %10939 = vmatprep.mubr.msk.f32.mxu1 %vm618_vm2, %v11782_v20  ;;  %v16957_v20 = vld [vmem:[#allocation33_spill] sm:$0xff] }
 0xa09   : > { %10876 = vmatmul.mubr.msk.f32.gmra.mxu0 %vm618_vm2, %v11783_v45 }
 0xa0a   : > { %10878 = vmatprep.mubr.msk.f32.mxu0 %vm618_vm2, %v11784_v24 }
 0xa0b   : > { %10940 = vmatmul.mubr.msk.f32.gmra.mxu1 %vm618_vm2, %v11785_v36 }
 0xa0c   : > { %10942 = vmatprep.mubr.msk.f32.mxu1 %vm618_vm2, %v11786_v50 }
 0xa0d   : > { %10879 = vmatmul.mubr.msk.f32.gmra.mxu0 %vm618_vm2, %v11787_v18 }
 0xa0e   : > { %10881 = vmatprep.mubr.msk.f32.mxu0 %vm618_vm2, %v11788_v34 }
 0xa0f   : > { %10943 = vmatmul.mubr.msk.f32.gmra.mxu1 %vm618_vm2, %v11789_v7 }
 0xa10   : > { %10945 = vmatprep.mubr.msk.f32.mxu1 %vm618_vm2, %v11790_v43 }
 0xa11   : > { %10882 = vmatmul.mubr.msk.f32.gmra.mxu0 %vm618_vm2, %v11791_v59 }
 0xa12   : > { %10884 = vmatprep.mubr.msk.f32.mxu0 %vm618_vm2, %v11792_v33 }
 0xa13   : > { %10946 = vmatmul.mubr.msk.f32.gmra.mxu1 %vm618_vm2, %v11793_v46 }
 0xa14   : > { %10948 = vmatprep.mubr.msk.f32.mxu1 %vm618_vm2, %v11794_v48 }
 0xa15   : > { %10885 = vmatmul.mubr.msk.f32.gmra.mxu0 %vm618_vm2, %v11795_v28 }
 0xa16   : > { %10967 = vmatprep.mubr.msk.f32.mxu0 %vm618_vm2, %v16949_v27 }
 0xa17   : > { %10949 = vmatmul.mubr.msk.f32.gmra.mxu1 %vm618_vm2, %v11796_v22 }
 0xa18   : > { %10995 = vmatprep.mubr.msk.f32.mxu1 %vm618_vm2, %v11797_v17 }
 0xa19   : > { %10968 = vmatmul.mubr.msk.f32.vlgmr.msra.gmra.mxu0 %vm618_vm2, %v16919_v15 }
 0xa1a   : > { %11044 = vmatpush3.msra.mxu0 %v14362_v40  ;;  %10970 = vmatprep.mubr.msk.f32.mxu0 %vm618_vm2, %v16921_v41  ;;  %v16951_v40 = vld [vmem:[#allocation27_spill] sm:$0xff] }
 0xa1b   : > { %11045 = vmatprep.subr.mxu0 %v14365_v10 }
 0xa1c   : > { %11046 = vmatpush3.msra.mxu0 %v14365_v10  ;;  %v16950_v10 = vld [vmem:[#allocation26_spill] sm:$0xff] }
 0xa1d   : > { %11047 = vmatprep.subr.mxu0 %v14372_v53  ;;  %10971 = vmatmul.mubr.msk.f32.gmra.mxu0 %vm618_vm2, %v16923_v51 }
 0xa1e   : > { %11048 = vmatpush3.msra.mxu0 %v14372_v53  ;;  %10973 = vmatprep.mubr.msk.f32.mxu0 %vm618_vm2, %v16925_v38  ;;  %v16952_v53 = vld [vmem:[#allocation28_spill] sm:$0xff] }
 0xa1f   : > { %11049 = vmatprep.subr.mxu0 %v14379_v3 }
 0xa20   : > { %11050 = vmatpush3.msra.mxu0 %v14379_v3  ;;  %v16953_v3 = vld [vmem:[#allocation29_spill] sm:$0xff] }
 0xa21   : > { %11051 = vmatprep.subr.mxu0 %v14386_v25  ;;  %10974 = vmatmul.mubr.msk.f32.gmra.mxu0 %vm618_vm2, %v16927_v32 }
 0xa22   : > { %11052 = vmatpush3.msra.mxu0 %v14386_v25  ;;  %10976 = vmatprep.mubr.msk.f32.mxu0 %vm618_vm2, %v16929_v58  ;;  %v16954_v25 = vld [vmem:[#allocation30_spill] sm:$0xff] }
 0xa23   : > { %11053 = vmatprep.subr.mxu0 %v14393_v62 }
 0xa24   : > { %11054 = vmatpush3.msra.mxu0 %v14393_v62  ;;  %v16955_v62 = vld [vmem:[#allocation31_spill] sm:$0xff] }
 0xa25   : > { %11055 = vmatprep.subr.mxu0 %v14400_v63  ;;  %10977 = vmatmul.mubr.msk.f32.gmra.mxu0 %vm618_vm2, %v16931_v26 }
 0xa26   : > { %11056 = vmatpush3.msra.mxu0 %v14400_v63  ;;  %11059 = vmatprep.mubr.msk.f32.mxu0 %vm618_vm2, %v16950_v10  ;;  %v16956_v63 = vld [vmem:[#allocation32_spill] sm:$0xff] }
 0xa27   : > { %11057 = vmatprep.subr.mxu0 %v14407_v0 }
 0xa28   : > { %11058 = vmatpush3.msra.mxu0 %v14407_v0  ;;  %v11798_v0 = vld [vmem:[%s16504_s3 + $0x300] sm:$0xff] }
 0xa29   : > { %11060 = vmatmul.mubr.msk.f32.vlgmr.msra.gmra.mxu0 %vm618_vm2, %v16951_v40 }
 0xa2a   : > { %11062 = vmatprep.mubr.msk.f32.mxu0 %vm618_vm2, %v16952_v53 }
 0xa2d   : > { %11063 = vmatmul.mubr.msk.f32.gmra.mxu0 %vm618_vm2, %v16953_v3 }
 0xa2e   : > { %11065 = vmatprep.mubr.msk.f32.mxu0 %vm618_vm2, %v16954_v25 }
 0xa31   : > { %11066 = vmatmul.mubr.msk.f32.gmra.mxu0 %vm618_vm2, %v16955_v62 }
 0xa32   : > { %11068 = vmatprep.mubr.msk.f32.mxu0 %vm618_vm2, %v16956_v63 }
 0xa35   : > { %11069 = vmatmul.mubr.msk.f32.gmra.mxu0 %vm618_vm2, %v16957_v20 }
 0xa36   : > { %11087 = vmatprep.mubr.msk.f32.mxu0 %vm618_vm2, %v11798_v0 }
 0xa99   : > { %v10841_v45 = vpop.f32.mrf.mxu0 }
 0xa9b   : > { %v14773_v24 = vpop.f32.mrf.mxu0  ;;  %v10905_v36 = vpop.f32.mrf.mxu1 }
 0xa9c   : > { %16958 = vst [vmem:[#allocation85_spill] sm:$0xff] %v14773_v24  ;;  %v14775_v50 = vadd.f32 %v10905_v36, %v10841_v45 }
 0xa9d   : > { %v10844_v18 = vpop.f32.mrf.mxu0  ;;  %v14777_v34 = vpop.f32.mrf.mxu1 }
 0xa9e   : > { %16959 = vst [vmem:[#allocation119_spill] sm:$0xff] %v14777_v34 }
 0xa9f   : > { %v14779_v7 = vpop.f32.mrf.mxu0  ;;  %v10908_v43 = vpop.f32.mrf.mxu1 }
 0xaa0   : > { %16960 = vst [vmem:[#allocation60_spill] sm:$0xff] %v14779_v7  ;;  %v14781_v59 = vadd.f32 %v10908_v43, %v10844_v18 }
 0xaa1   : > { %v10847_v33 = vpop.f32.mrf.mxu0  ;;  %v14783_v46 = vpop.f32.mrf.mxu1 }
 0xaa2   : > { %16961 = vst [vmem:[#allocation62_spill] sm:$0xff] %v14783_v46 }
 0xaa3   : > { %v14785_v48 = vpop.f32.mrf.mxu0  ;;  %v10911_v28 = vpop.f32.mrf.mxu1 }
 0xaa4   : > { %16962 = vst [vmem:[#allocation61_spill] sm:$0xff] %v14785_v48  ;;  %v14787_v22 = vadd.f32 %v10911_v28, %v10847_v33 }
 0xaa5   : > { %v10850_v17 = vpop.f32.mrf.mxu0  ;;  %v14789_v0 = vpop.f32.mrf.mxu1 }
 0xaa6   : > { %16963 = vst [vmem:[#allocation97_spill] sm:$0xff] %v14789_v0 }
 0xaa7   : > { %v14791_v45 = vpop.f32.mrf.mxu0  ;;  %v10914_v36 = vpop.f32.mrf.mxu1 }
 0xaa8   : > { %16964 = vst [vmem:[#allocation116_spill] sm:$0xff] %v14791_v45  ;;  %v14793_v54 = vadd.f32 %v10914_v36, %v10850_v17 }
 0xaa9   : > { %v10853_v60 = vpop.f32.mrf.mxu0  ;;  %v14795_v30 = vpop.f32.mrf.mxu1 }
 0xaaa   : > { %16965 = vst [vmem:[#allocation40_spill] sm:$0xff] %v14795_v30 }
 0xaab   : > { %v14797_v18 = vpop.f32.mrf.mxu0  ;;  %v10917_v43 = vpop.f32.mrf.mxu1 }
 0xaac   : > { %v14799_v13 = vadd.f32 %v10917_v43, %v10853_v60 }
 0xaad   : > { %v10856_v42 = vpop.f32.mrf.mxu0  ;;  %v14801_v52 = vpop.f32.mrf.mxu1 }
 0xaaf   : > { %v14803_v33 = vpop.f32.mrf.mxu0  ;;  %v10920_v28 = vpop.f32.mrf.mxu1 }
 0xab0   : > { %v14805_v31 = vadd.f32 %v10920_v28, %v10856_v42 }
 0xab1   : > { %v10859_v39 = vpop.f32.mrf.mxu0  ;;  %v14807_v20 = vpop.f32.mrf.mxu1 }
 0xab3   : > { %v14809_v17 = vpop.f32.mrf.mxu0  ;;  %v10923_v36 = vpop.f32.mrf.mxu1 }
 0xab4   : > { %v14811_v63 = vadd.f32 %v10923_v36, %v10859_v39 }
 0xab5   : > { %v10862_v62 = vpop.f32.mrf.mxu0  ;;  %v14813_v25 = vpop.f32.mrf.mxu1 }
 0xab7   : > { %v14815_v60 = vpop.f32.mrf.mxu0  ;;  %v10926_v43 = vpop.f32.mrf.mxu1 }
 0xab8   : > { %v14817_v3 = vadd.f32 %v10926_v43, %v10862_v62 }
 0xab9   : > { %v10865_v53 = vpop.f32.mrf.mxu0  ;;  %v14819_v40 = vpop.f32.mrf.mxu1 }
 0xabb   : > { %v14821_v42 = vpop.f32.mrf.mxu0  ;;  %v10929_v28 = vpop.f32.mrf.mxu1 }
 0xabc   : > { %16966 = vst [vmem:[#allocation36_spill] sm:$0xff] %v14821_v42  ;;  %v14823_v10 = vadd.f32 %v10929_v28, %v10865_v53 }
 0xabd   : > { %v10868_v1 = vpop.f32.mrf.mxu0  ;;  %v14825_v55 = vpop.f32.mrf.mxu1 }
 0xabe   : > { %16967 = vst [vmem:[#allocation88_spill] sm:$0xff] %v14823_v10  ;;  %16968 = vst [vmem:[#allocation121_spill] sm:$0xff] %v14825_v55 }
 0xabf   : > { %v14827_v39 = vpop.f32.mrf.mxu0  ;;  %v10932_v36 = vpop.f32.mrf.mxu1 }
 0xac0   : > { %16969 = vst [vmem:[#allocation99_spill] sm:$0xff] %v14827_v39  ;;  %v14829_v5 = vadd.f32 %v10932_v36, %v10868_v1 }
 0xac1   : > { %v10871_v61 = vpop.f32.mrf.mxu0  ;;  %v14831_v6 = vpop.f32.mrf.mxu1 }
 0xac2   : > { %16970 = vst [vmem:[#allocation111_spill] sm:$0xff] %v14829_v5  ;;  %16971 = vst [vmem:[#allocation67_spill] sm:$0xff] %v14831_v6 }
 0xac3   : > { %v14833_v62 = vpop.f32.mrf.mxu0  ;;  %v10935_v43 = vpop.f32.mrf.mxu1 }
 0xac4   : > { %16972 = vst [vmem:[#allocation57_spill] sm:$0xff] %v14833_v62  ;;  %v14835_v56 = vadd.f32 %v10935_v43, %v10871_v61 }
 0xac5   : > { %v10874_v16 = vpop.f32.mrf.mxu0  ;;  %v14837_v8 = vpop.f32.mrf.mxu1 }
 0xac6   : > { %16973 = vst [vmem:[#allocation59_spill] sm:$0xff] %v14835_v56  ;;  %16974 = vst [vmem:[#allocation58_spill] sm:$0xff] %v14837_v8 }
 0xac7   : > { %v14839_v53 = vpop.f32.mrf.mxu0  ;;  %v10938_v28 = vpop.f32.mrf.mxu1 }
 0xac8   : > { %16975 = vst [vmem:[#allocation94_spill] sm:$0xff] %v14839_v53  ;;  %v14841_v11 = vadd.f32 %v10938_v28, %v10874_v16 }
 0xac9   : > { %v10877_v4 = vpop.f32.mrf.mxu0  ;;  %v14843_v44 = vpop.f32.mrf.mxu1 }
 0xaca   : > { %16976 = vst [vmem:[#allocation113_spill] sm:$0xff] %v14841_v11  ;;  %16977 = vst [vmem:[#allocation41_spill] sm:$0xff] %v14843_v44 }
 0xacb   : > { %v14845_v1 = vpop.f32.mrf.mxu0  ;;  %v10941_v36 = vpop.f32.mrf.mxu1 }
 0xacc   : > { %v14847_v12 = vadd.f32 %v10941_v36, %v10877_v4 }
 0xacd   : > { %v10880_v2 = vpop.f32.mrf.mxu0  ;;  %v14849_v49 = vpop.f32.mrf.mxu1 }
 0xacf   : > { %v14851_v61 = vpop.f32.mrf.mxu0  ;;  %v10944_v43 = vpop.f32.mrf.mxu1 }
 0xad0   : > { %v14853_v37 = vadd.f32 %v10944_v43, %v10880_v2 }
 0xad1   : > { %v10883_v14 = vpop.f32.mrf.mxu0  ;;  %v14855_v21 = vpop.f32.mrf.mxu1 }
 0xad3   : > { %v14857_v16 = vpop.f32.mrf.mxu0  ;;  %v10947_v28 = vpop.f32.mrf.mxu1 }
 0xad4   : > { %v14859_v26 = vadd.f32 %v10947_v28, %v10883_v14 }
 0xad5   : > { %v14861_v19 = vpop.f32.mrf.mxu0 }
 0xad7   : > { %v14863_v4 = vpop.f32.mrf.mxu0 }
 0xad9   : > { %v10969_v36 = vpop.f32.mrf.mxu0 }
 0xadb   : > { %v5230_v58 = vpop.f32.mrf.mxu0 }
 0xadd   : > { %v10972_v35 = vpop.f32.mrf.mxu0 }
 0xadf   : > { %v5240_v32 = vpop.f32.mrf.mxu0 }
 0xae1   : > { %v10975_v47 = vpop.f32.mrf.mxu0 }
 0xae3   : > { %v5250_v38 = vpop.f32.mrf.mxu0 }
 0xae5   : > { %v10978_v2 = vpop.f32.mrf.mxu0 }
 0xae6   : > { %10979 = vmatprep.subr.mxu1 %v10978_v2 }
 0xae7   : > { %v5260_v43 = vpop.f32.mrf.mxu0  ;;  %10980 = vmatpush3.msra.mxu1 %v10978_v2 }
 0xae8   : > { %10981 = vmatprep.subr.mxu1 %v5260_v43 }
 0xae9   : > { %10982 = vmatpush3.msra.mxu1 %v5260_v43  ;;  %v11061_v57 = vpop.f32.mrf.mxu0  ;;  %v11806_v43 = vld [vmem:[%s16504_s3 + $0x240] sm:$0xff] }
 0xaea   : > { %10983 = vmatprep.subr.mxu1 %v10975_v47 }
 0xaeb   : > { %10984 = vmatpush3.msra.mxu1 %v10975_v47  ;;  %v5592_v14 = vpop.f32.mrf.mxu0  ;;  %v11799_v47 = vld [vmem:[%s16504_s3 + $0x208] sm:$0xff] }
 0xaec   : > { %10985 = vmatprep.subr.mxu1 %v5250_v38 }
 0xaed   : > { %10986 = vmatpush3.msra.mxu1 %v5250_v38  ;;  %v11064_v28 = vpop.f32.mrf.mxu0 }
 0xaee   : > { %10987 = vmatprep.subr.mxu1 %v10972_v35 }
 0xaef   : > { %10988 = vmatpush3.msra.mxu1 %v10972_v35  ;;  %v5602_v51 = vpop.f32.mrf.mxu0  ;;  %v11801_v35 = vld [vmem:[%s16504_s3 + $0x218] sm:$0xff] }
 0xaf0   : > { %10989 = vmatprep.subr.mxu1 %v5240_v32 }
 0xaf1   : > { %10990 = vmatpush3.msra.mxu1 %v5240_v32  ;;  %v11067_v9 = vpop.f32.mrf.mxu0  ;;  %v11800_v32 = vld [vmem:[%s16504_s3 + $0x210] sm:$0xff] }
 0xaf2   : > { %10991 = vmatprep.subr.mxu1 %v10969_v36 }
 0xaf3   : > { %10992 = vmatpush3.msra.mxu1 %v10969_v36  ;;  %v5612_v41 = vpop.f32.mrf.mxu0  ;;  %v11803_v36 = vld [vmem:[%s16504_s3 + $0x228] sm:$0xff] }
 0xaf4   : > { %10993 = vmatprep.subr.mxu1 %v5230_v58 }
 0xaf5   : > { %10994 = vmatpush3.msra.mxu1 %v5230_v58  ;;  %v11070_v2 = vpop.f32.mrf.mxu0  ;;  %v11802_v58 = vld [vmem:[%s16504_s3 + $0x220] sm:$0xff] }
 0xaf6   : > { %10996 = vmatmul.mubr.msk.f32.vlgmr.msra.gmra.mxu1 %vm618_vm2, %v11799_v47  ;;  %11071 = vmatprep.subr.mxu0 %v11070_v2  ;;  %v11812_v47 = vld [vmem:[%s16504_s3 + $0x318] sm:$0xff] }
 0xaf7   : > { %v5622_v38 = vpop.f32.mrf.mxu0  ;;  %11072 = vmatpush3.msra.mxu0 %v11070_v2  ;;  %10998 = vmatprep.mubr.msk.f32.mxu1 %vm618_vm2, %v11800_v32  ;;  %v11811_v2 = vld [vmem:[%s16504_s3 + $0x258] sm:$0xff]  ;;  %v11814_v32 = vld [vmem:[%s16504_s3 + $0x320] sm:$0xff] }
 0xaf8   : > { %11073 = vmatprep.subr.mxu0 %v5622_v38 }
 0xaf9   : > { %11074 = vmatpush3.msra.mxu0 %v5622_v38  ;;  %v11813_v38 = vld [vmem:[%s16504_s3 + $0x260] sm:$0xff] }
 0xafa   : > { %10999 = vmatmul.mubr.msk.f32.gmra.mxu1 %vm618_vm2, %v11801_v35  ;;  %11075 = vmatprep.subr.mxu0 %v11067_v9  ;;  %v11815_v35 = vld [vmem:[%s16504_s3 + $0x268] sm:$0xff] }
 0xafb   : > { %11076 = vmatpush3.msra.mxu0 %v11067_v9  ;;  %11001 = vmatprep.mubr.msk.f32.mxu1 %vm618_vm2, %v11802_v58  ;;  %v11804_v9 = vld [vmem:[%s16504_s3 + $0x230] sm:$0xff]  ;;  %v11816_v58 = vld [vmem:[%s16504_s3 + $0x328] sm:$0xff] }
 0xafc   : > { %11077 = vmatprep.subr.mxu0 %v5612_v41 }
 0xafd   : > { %11078 = vmatpush3.msra.mxu0 %v5612_v41  ;;  %v11805_v41 = vld [vmem:[%s16504_s3 + $0x238] sm:$0xff] }
 0xafe   : > { %11002 = vmatmul.mubr.msk.f32.gmra.mxu1 %vm618_vm2, %v11803_v36  ;;  %11079 = vmatprep.subr.mxu0 %v11064_v28  ;;  %v11817_v36 = vld [vmem:[%s16504_s3 + $0x270] sm:$0xff] }
 0xaff   : > { %11080 = vmatpush3.msra.mxu0 %v11064_v28  ;;  %11004 = vmatprep.mubr.msk.f32.mxu1 %vm618_vm2, %v11804_v9  ;;  %v11808_v28 = vld [vmem:[%s16504_s3 + $0x308] sm:$0xff]  ;;  %v11818_v9 = vld [vmem:[%s16504_s3 + $0x330] sm:$0xff] }
 0xb00   : > { %11081 = vmatprep.subr.mxu0 %v5602_v51 }
 0xb01   : > { %11082 = vmatpush3.msra.mxu0 %v5602_v51  ;;  %v11807_v51 = vld [vmem:[%s16504_s3 + $0x248] sm:$0xff] }
 0xb02   : > { %11005 = vmatmul.mubr.msk.f32.gmra.mxu1 %vm618_vm2, %v11805_v41  ;;  %11083 = vmatprep.subr.mxu0 %v11061_v57  ;;  %v11819_v41 = vld [vmem:[%s16504_s3 + $0x278] sm:$0xff] }
 0xb03   : > { %11084 = vmatpush3.msra.mxu0 %v11061_v57  ;;  %11007 = vmatprep.mubr.msk.f32.mxu1 %vm618_vm2, %v11806_v43  ;;  %v11809_v57 = vld [vmem:[%s16504_s3 + $0x250] sm:$0xff]  ;;  %v11820_v43 = vld [vmem:[%s16504_s3 + $0x338] sm:$0xff] }
 0xb04   : > { %11085 = vmatprep.subr.mxu0 %v5592_v14 }
 0xb05   : > { %11086 = vmatpush3.msra.mxu0 %v5592_v14  ;;  %v11810_v14 = vld [vmem:[%s16504_s3 + $0x310] sm:$0xff] }
 0xb06   : > { %11008 = vmatmul.mubr.msk.f32.gmra.mxu1 %vm618_vm2, %v11807_v51  ;;  %11088 = vmatmul.mubr.msk.f32.vlgmr.msra.gmra.mxu0 %vm618_vm2, %v11808_v28  ;;  %v11821_v51 = vld [vmem:[%s16504_s3 + $0x280] sm:$0xff] }
 0xb07   : > { %11010 = vmatprep.mubr.msk.f32.mxu1 %vm618_vm2, %v11809_v57  ;;  %11090 = vmatprep.mubr.msk.f32.mxu0 %vm618_vm2, %v11810_v14  ;;  %v11822_v28 = vld [vmem:[%s16504_s3 + $0x340] sm:$0xff]  ;;  %v11823_v57 = vld [vmem:[%s16504_s3 + $0x288] sm:$0xff] }
 0xb08   : > { %v11824_v14 = vld [vmem:[%s16504_s3 + $0x348] sm:$0xff] }
 0xb0a   : > { %11011 = vmatmul.mubr.msk.f32.gmra.mxu1 %vm618_vm2, %v11811_v2  ;;  %11091 = vmatmul.mubr.msk.f32.gmra.mxu0 %vm618_vm2, %v11812_v47  ;;  %v11825_v2 = vld [vmem:[%s16504_s3 + $0x290] sm:$0xff] }
 0xb0b   : > { %11013 = vmatprep.mubr.msk.f32.mxu1 %vm618_vm2, %v11813_v38  ;;  %11093 = vmatprep.mubr.msk.f32.mxu0 %vm618_vm2, %v11814_v32  ;;  %v11826_v47 = vld [vmem:[%s16504_s3 + $0x350] sm:$0xff]  ;;  %v11827_v38 = vld [vmem:[%s16504_s3 + $0x298] sm:$0xff] }
 0xb0c   : > { %v11828_v32 = vld [vmem:[%s16504_s3 + $0x358] sm:$0xff] }
 0xb0e   : > { %11014 = vmatmul.mubr.msk.f32.gmra.mxu1 %vm618_vm2, %v11815_v35  ;;  %11094 = vmatmul.mubr.msk.f32.gmra.mxu0 %vm618_vm2, %v11816_v58  ;;  %v11829_v35 = vld [vmem:[%s16504_s3 + $0x2a0] sm:$0xff] }
 0xb0f   : > { %11016 = vmatprep.mubr.msk.f32.mxu1 %vm618_vm2, %v11817_v36  ;;  %11096 = vmatprep.mubr.msk.f32.mxu0 %vm618_vm2, %v11818_v9  ;;  %v11830_v58 = vld [vmem:[%s16504_s3 + $0x360] sm:$0xff]  ;;  %v11831_v36 = vld [vmem:[%s16504_s3 + $0x2a8] sm:$0xff] }
 0xb10   : > { %v11832_v9 = vld [vmem:[%s16504_s3 + $0x368] sm:$0xff] }
 0xb12   : > { %11017 = vmatmul.mubr.msk.f32.gmra.mxu1 %vm618_vm2, %v11819_v41  ;;  %11097 = vmatmul.mubr.msk.f32.gmra.mxu0 %vm618_vm2, %v11820_v43  ;;  %v11833_v41 = vld [vmem:[%s16504_s3 + $0x2b0] sm:$0xff] }
 0xb13   : > { %11019 = vmatprep.mubr.msk.f32.mxu1 %vm618_vm2, %v11821_v51  ;;  %11099 = vmatprep.mubr.msk.f32.mxu0 %vm618_vm2, %v11822_v28  ;;  %v11834_v43 = vld [vmem:[%s16504_s3 + $0x370] sm:$0xff]  ;;  %v11835_v51 = vld [vmem:[%s16504_s3 + $0x2b8] sm:$0xff] }
 0xb14   : > { %v11836_v28 = vld [vmem:[%s16504_s3 + $0x378] sm:$0xff] }
 0xb16   : > { %11020 = vmatmul.mubr.msk.f32.gmra.mxu1 %vm618_vm2, %v11823_v57  ;;  %11100 = vmatmul.mubr.msk.f32.gmra.mxu0 %vm618_vm2, %v11824_v14  ;;  %v11837_v57 = vld [vmem:[%s16504_s3 + $0x2c0] sm:$0xff] }
 0xb17   : > { %11022 = vmatprep.mubr.msk.f32.mxu1 %vm618_vm2, %v11825_v2  ;;  %11102 = vmatprep.mubr.msk.f32.mxu0 %vm618_vm2, %v11826_v47  ;;  %v11838_v14 = vld [vmem:[%s16504_s3 + $0x380] sm:$0xff]  ;;  %v11839_v2 = vld [vmem:[%s16504_s3 + $0x2c8] sm:$0xff] }
 0xb18   : > { %v11840_v47 = vld [vmem:[%s16504_s3 + $0x388] sm:$0xff] }
 0xb1a   : > { %11023 = vmatmul.mubr.msk.f32.gmra.mxu1 %vm618_vm2, %v11827_v38  ;;  %11103 = vmatmul.mubr.msk.f32.gmra.mxu0 %vm618_vm2, %v11828_v32  ;;  %v11841_v38 = vld [vmem:[%s16504_s3 + $0x2d0] sm:$0xff] }
 0xb1b   : > { %11025 = vmatprep.mubr.msk.f32.mxu1 %vm618_vm2, %v11829_v35  ;;  %11105 = vmatprep.mubr.msk.f32.mxu0 %vm618_vm2, %v11830_v58  ;;  %v11842_v32 = vld [vmem:[%s16504_s3 + $0x390] sm:$0xff]  ;;  %v11843_v35 = vld [vmem:[%s16504_s3 + $0x2d8] sm:$0xff] }
 0xb1c   : > { %v11844_v58 = vld [vmem:[%s16504_s3 + $0x398] sm:$0xff] }
 0xb1e   : > { %11026 = vmatmul.mubr.msk.f32.gmra.mxu1 %vm618_vm2, %v11831_v36  ;;  %11106 = vmatmul.mubr.msk.f32.gmra.mxu0 %vm618_vm2, %v11832_v9  ;;  %v11845_v36 = vld [vmem:[%s16504_s3 + $0x2e0] sm:$0xff] }
 0xb1f   : > { %11028 = vmatprep.mubr.msk.f32.mxu1 %vm618_vm2, %v11833_v41  ;;  %11108 = vmatprep.mubr.msk.f32.mxu0 %vm618_vm2, %v11834_v43  ;;  %v11846_v9 = vld [vmem:[%s16504_s3 + $0x3a0] sm:$0xff]  ;;  %v11847_v41 = vld [vmem:[%s16504_s3 + $0x2e8] sm:$0xff] }
 0xb20   : > { %v11848_v43 = vld [vmem:[%s16504_s3 + $0x3a8] sm:$0xff] }
 0xb22   : > { %11029 = vmatmul.mubr.msk.f32.gmra.mxu1 %vm618_vm2, %v11835_v51  ;;  %11109 = vmatmul.mubr.msk.f32.gmra.mxu0 %vm618_vm2, %v11836_v28  ;;  %v11849_v51 = vld [vmem:[%s16504_s3 + $0x2f0] sm:$0xff] }
 0xb23   : > { %11031 = vmatprep.mubr.msk.f32.mxu1 %vm618_vm2, %v11837_v57  ;;  %11111 = vmatprep.mubr.msk.f32.mxu0 %vm618_vm2, %v11838_v14  ;;  %v11850_v28 = vld [vmem:[%s16504_s3 + $0x3b0] sm:$0xff]  ;;  %v11851_v57 = vld [vmem:[%s16504_s3 + $0x2f8] sm:$0xff] }
 0xb24   : > { %v11852_v14 = vld [vmem:[%s16504_s3 + $0x3b8] sm:$0xff] }
 0xb26   : > { %11032 = vmatmul.mubr.msk.f32.gmra.mxu1 %vm618_vm2, %v11839_v2  ;;  %11112 = vmatmul.mubr.msk.f32.gmra.mxu0 %vm618_vm2, %v11840_v47  ;;  %v11853_v2 = vld [vmem:[%s16504_s3 + $0x3c0] sm:$0xff]  ;;  %v11854_v47 = vld [vmem:[%s16504_s3 + $0x3c8] sm:$0xff] }
 0xb27   : > { %11034 = vmatprep.mubr.msk.f32.mxu1 %vm618_vm2, %v11841_v38  ;;  %11114 = vmatprep.mubr.msk.f32.mxu0 %vm618_vm2, %v11842_v32  ;;  %v11855_v38 = vld [vmem:[%s16504_s3 + $0x3d0] sm:$0xff]  ;;  %v11856_v32 = vld [vmem:[%s16504_s3 + $0x3d8] sm:$0xff] }
 0xb2a   : > { %11035 = vmatmul.mubr.msk.f32.gmra.mxu1 %vm618_vm2, %v11843_v35  ;;  %11115 = vmatmul.mubr.msk.f32.gmra.mxu0 %vm618_vm2, %v11844_v58  ;;  %v11857_v35 = vld [vmem:[%s16504_s3 + $0x3e0] sm:$0xff]  ;;  %v11858_v58 = vld [vmem:[%s16504_s3 + $0x3e8] sm:$0xff] }
 0xb2b   : > { %11037 = vmatprep.mubr.msk.f32.mxu1 %vm618_vm2, %v11845_v36  ;;  %11117 = vmatprep.mubr.msk.f32.mxu0 %vm618_vm2, %v11846_v9  ;;  %v11859_v36 = vld [vmem:[%s16504_s3 + $0x3f0] sm:$0xff]  ;;  %v11860_v9 = vld [vmem:[%s16504_s3 + $0x3f8] sm:$0xff] }
 0xb2e   : > { %11038 = vmatmul.mubr.msk.f32.gmra.mxu1 %vm618_vm2, %v11847_v41  ;;  %11118 = vmatmul.mubr.msk.f32.gmra.mxu0 %vm618_vm2, %v11848_v43  ;;  %v15116_v41 = vpop.f32.mrf.mxu1 }
 0xb2f   : > { %11040 = vmatprep.mubr.msk.f32.mxu1 %vm618_vm2, %v11849_v51  ;;  %11120 = vmatprep.mubr.msk.f32.mxu0 %vm618_vm2, %v11850_v28 }
 0xb30   : > { %v15118_v43 = vpop.f32.mrf.mxu1 }
 0xb32   : > { %11041 = vmatmul.mubr.msk.f32.gmra.mxu1 %vm618_vm2, %v11851_v57  ;;  %11121 = vmatmul.mubr.msk.f32.gmra.mxu0 %vm618_vm2, %v11852_v14  ;;  %v15120_v51 = vpop.f32.mrf.mxu1 }
 0xb33   : > { %5984 = vmatprep.mubr.f32.mxu1 %v16949_v27  ;;  %11123 = vmatprep.mubr.msk.f32.mxu0 %vm618_vm2, %v11853_v2 }
 0xb36   : > { %11124 = vmatmul.mubr.msk.f32.gmra.mxu0 %vm618_vm2, %v11854_v47 }
 0xb37   : > { %11126 = vmatprep.mubr.msk.f32.mxu0 %vm618_vm2, %v11855_v38 }
 0xb3a   : > { %11127 = vmatmul.mubr.msk.f32.gmra.mxu0 %vm618_vm2, %v11856_v32 }
 0xb3b   : > { %11129 = vmatprep.mubr.msk.f32.mxu0 %vm618_vm2, %v11857_v35 }
 0xb3e   : > { %11130 = vmatmul.mubr.msk.f32.gmra.mxu0 %vm618_vm2, %v11858_v58 }
 0xb3f   : > { %11132 = vmatprep.mubr.msk.f32.mxu0 %vm618_vm2, %v11859_v36 }
 0xb42   : > { %11133 = vmatmul.mubr.msk.f32.gmra.mxu0 %vm618_vm2, %v11860_v9 }
 0xb43   : > { %11151 = vmatprep.mubr.msk.f32.mxu0 %vm618_vm2, %v16918_v23 }
 0xbb6   : > { %v10997_v28 = vpop.f32.mrf.mxu1 }
 0xbb7   : > { %v5495_v57 = vadd.f32 %v10997_v28, %v14775_v50 }
 0xbb8   : > { %v15123_v14 = vpop.f32.mrf.mxu1 }
 0xbb9   : > { %16978 = vst [vmem:[#allocation37_spill] sm:$0xff] %v15123_v14 }
 0xbba   : > { %v11000_v2 = vpop.f32.mrf.mxu1 }
 0xbbb   : > { %v5497_v47 = vadd.f32 %v11000_v2, %v14781_v59 }
 0xbbc   : > { %v15126_v38 = vpop.f32.mrf.mxu1 }
 0xbbd   : > { %16979 = vst [vmem:[#allocation82_spill] sm:$0xff] %v15126_v38 }
 0xbbe   : > { %v11003_v32 = vpop.f32.mrf.mxu1 }
 0xbbf   : > { %v5499_v35 = vadd.f32 %v11003_v32, %v14787_v22 }
 0xbc0   : > { %v15129_v58 = vpop.f32.mrf.mxu1 }
 0xbc1   : > { %16980 = vst [vmem:[#allocation95_spill] sm:$0xff] %v15129_v58 }
 0xbc2   : > { %v11006_v36 = vpop.f32.mrf.mxu1 }
 0xbc3   : > { %v5501_v9 = vadd.f32 %v11006_v36, %v14793_v54 }
 0xbc4   : > { %v15132_v27 = vpop.f32.mrf.mxu1 }
 0xbc5   : > { %16981 = vst [vmem:[#allocation108_spill] sm:$0xff] %v15132_v27 }
 0xbc6   : > { %v15134_v29 = vpop.f32.mrf.mxu1  ;;  %v11089_v50 = vpop.f32.mrf.mxu0 }
 0xbc7   : > { %v15136_v28 = vadd.f32 %v11089_v50, %v5495_v57 }
 0xbc8   : > { %v15138_v15 = vpop.f32.mrf.mxu1  ;;  %v15140_v59 = vpop.f32.mrf.mxu0 }
 0xbc9   : > { %16982 = vst [vmem:[#allocation65_spill] sm:$0xff] %v15136_v28  ;;  %16983 = vst [vmem:[#allocation81_spill] sm:$0xff] %v15140_v59 }
 0xbca   : > { %v15142_v2 = vpop.f32.mrf.mxu1  ;;  %v11092_v23 = vpop.f32.mrf.mxu0 }
 0xbcb   : > { %v15144_v22 = vadd.f32 %v11092_v23, %v5497_v47 }
 0xbcc   : > { %v15146_v32 = vpop.f32.mrf.mxu1  ;;  %v15148_v14 = vpop.f32.mrf.mxu0 }
 0xbcd   : > { %16984 = vst [vmem:[#allocation54_spill] sm:$0xff] %v15144_v22  ;;  %16985 = vst [vmem:[#allocation56_spill] sm:$0xff] %v15148_v14 }
 0xbce   : > { %v15150_v54 = vpop.f32.mrf.mxu1  ;;  %v11095_v36 = vpop.f32.mrf.mxu0 }
 0xbcf   : > { %v15152_v34 = vadd.f32 %v11095_v36, %v5499_v35 }
 0xbd0   : > { %v15154_v57 = vpop.f32.mrf.mxu1  ;;  %v15156_v50 = vpop.f32.mrf.mxu0 }
 0xbd1   : > { %16986 = vst [vmem:[#allocation55_spill] sm:$0xff] %v15152_v34  ;;  %16987 = vst [vmem:[#allocation89_spill] sm:$0xff] %v15156_v50 }
 0xbd2   : > { %v11018_v28 = vpop.f32.mrf.mxu1  ;;  %v11098_v59 = vpop.f32.mrf.mxu0 }
 0xbd3   : > { %v15158_v24 = vadd.f32 %v11098_v59, %v5501_v9 }
 0xbd4   : > { %v5405_v10 = vpop.f32.mrf.mxu1  ;;  %v15160_v23 = vpop.f32.mrf.mxu0 }
 0xbd5   : > { %16988 = vst [vmem:[#allocation110_spill] sm:$0xff] %v15158_v24  ;;  %16989 = vst [vmem:[#allocation43_spill] sm:$0xff] %v15160_v23 }
 0xbd6   : > { %v15162_v47 = vpop.f32.mrf.mxu1  ;;  %v15164_v22 = vpop.f32.mrf.mxu0 }
 0xbd7   : > { %16990 = vst [vmem:[#allocation38_spill] sm:$0xff] %v15162_v47  ;;  %16991 = vst [vmem:[#allocation79_spill] sm:$0xff] %v15164_v22 }
 0xbd8   : > { %v15166_v14 = vpop.f32.mrf.mxu1  ;;  %v15168_v55 = vpop.f32.mrf.mxu0 }
 0xbd9   : > { %16992 = vst [vmem:[#allocation91_spill] sm:$0xff] %v15166_v14  ;;  %16993 = vst [vmem:[#allocation105_spill] sm:$0xff] %v15168_v55 }
 0xbda   : > { %v15170_v35 = vpop.f32.mrf.mxu1  ;;  %v15172_v36 = vpop.f32.mrf.mxu0 }
 0xbdb   : > { %16994 = vst [vmem:[#allocation64_spill] sm:$0xff] %v15170_v35 }
 0xbdc   : > { %v15174_v42 = vpop.f32.mrf.mxu1  ;;  %v15176_v38 = vpop.f32.mrf.mxu0 }
 0xbdd   : > { %16995 = vst [vmem:[#allocation78_spill] sm:$0xff] %v15174_v42 }
 0xbde   : > { %v15178_v9 = vpop.f32.mrf.mxu1  ;;  %v11107_v59 = vpop.f32.mrf.mxu0 }
 0xbdf   : > { %16996 = vst [vmem:[#allocation51_spill] sm:$0xff] %v15178_v9 }
 0xbe0   : > { %v15180_v34 = vpop.f32.mrf.mxu1  ;;  %v5757_v47 = vpop.f32.mrf.mxu0 }
 0xbe1   : > { %16997 = vst [vmem:[#allocation53_spill] sm:$0xff] %v15180_v34 }
 0xbe2   : > { %v15182_v50 = vpop.f32.mrf.mxu1  ;;  %v11110_v46 = vpop.f32.mrf.mxu0 }
 0xbe3   : > { %16998 = vst [vmem:[#allocation52_spill] sm:$0xff] %v15182_v50 }
 0xbe4   : > { %v15184_v14 = vpop.f32.mrf.mxu1  ;;  %v5767_v7 = vpop.f32.mrf.mxu0 }
 0xbe5   : > { %16999 = vst [vmem:[#allocation84_spill] sm:$0xff] %v15184_v14 }
 0xbe6   : > { %v11033_v5 = vpop.f32.mrf.mxu1  ;;  %v15186_v35 = vpop.f32.mrf.mxu0 }
 0xbe7   : > { %17000 = vst [vmem:[#allocation106_spill] sm:$0xff] %v15186_v35 }
 0xbe8   : > { %v15188_v6 = vpop.f32.mrf.mxu1  ;;  %v15190_v42 = vpop.f32.mrf.mxu0 }
 0xbe9   : > { %17001 = vst [vmem:[#allocation39_spill] sm:$0xff] %v15190_v42 }
 0xbea   : > { %v15192_v39 = vpop.f32.mrf.mxu0  ;;  %v11036_v58 = vpop.f32.mrf.mxu1 }
 0xbeb   : > { %17002 = vst [vmem:[#allocation42_spill] sm:$0xff] %v15192_v39 }
 0xbec   : > { %v15194_v24 = vpop.f32.mrf.mxu0  ;;  %v5465_v23 = vpop.f32.mrf.mxu1 }
 0xbed   : > { %17003 = vst [vmem:[#allocation76_spill] sm:$0xff] %v15194_v24  ;;  %v5161_v24 = vadd.f32 %v15118_v43, %v14861_v19  ;;  %v5146_v19 = vadd.f32 %v15116_v41, %v14857_v16  ;;  %v17023_v16 = vld [vmem:[#allocation105_spill] sm:$0xff]  ;;  %v17024_v41 = vld [vmem:[#allocation84_spill] sm:$0xff] }
 0xbee   : > { %v15196_v34 = vpop.f32.mrf.mxu0  ;;  %v11039_v9 = vpop.f32.mrf.mxu1 }
 0xbef   : > { %17004 = vst [vmem:[#allocation87_spill] sm:$0xff] %v15196_v34  ;;  %v5523_v43 = vadd.f32 %v11039_v9, %v14859_v26  ;;  %v17036_v9 = vld [vmem:[#allocation43_spill] sm:$0xff] }
 0xbf0   : > { %v15198_v0 = vpop.f32.mrf.mxu0  ;;  %v5475_v8 = vpop.f32.mrf.mxu1 }
 0xbf1   : > { %17005 = vst [vmem:[#allocation100_spill] sm:$0xff] %v15198_v0  ;;  %v5156_v0 = vadd.f32 %v15120_v51, %v14863_v4 }
 0xbf2   : > { %v15200_v48 = vpop.f32.mrf.mxu0  ;;  %v11042_v42 = vpop.f32.mrf.mxu1 }
 0xbf3   : > { %17006 = vst [vmem:[#allocation63_spill] sm:$0xff] %v15200_v48  ;;  %v5525_v30 = vadd.f32 %v11042_v42, %v5161_v24  ;;  %v5076_v48 = vadd.f32 %v14819_v40, %v14815_v60  ;;  %v5066_v40 = vadd.f32 %v14813_v25, %v14809_v17  ;;  %v5136_v25 = vadd.f32 %v14855_v21, %v14851_v61  ;;  %v17019_v60 = vld [vmem:[#allocation52_spill] sm:$0xff] }
 0xbf4   : > { %v15202_v56 = vpop.f32.mrf.mxu0  ;;  %v5485_v55 = vpop.f32.mrf.mxu1  ;;  %v5505_v24 = vadd.f32 %v15142_v2, %v14805_v31  ;;  %v5519_v31 = vadd.f32 %v11033_v5, %v14847_v12  ;;  %v17015_v5 = vld [vmem:[#allocation79_spill] sm:$0xff]  ;;  %v17029_v2 = vld [vmem:[#allocation58_spill] sm:$0xff] }
 0xbf5   : > { %17007 = vst [vmem:[#allocation75_spill] sm:$0xff] %v15202_v56  ;;  %v5509_v56 = vadd.f32 %v11018_v28, %v14817_v3  ;;  %v5524_v50 = vadd.f32 %v5485_v55, %v5156_v0  ;;  %v5508_v44 = vadd.f32 %v5405_v10, %v5076_v48  ;;  %v5506_v26 = vadd.f32 %v15154_v57, %v5066_v40  ;;  %v17028_v28 = vld [vmem:[#allocation57_spill] sm:$0xff] }
 0xbf6   : > { %v11125_v35 = vpop.f32.mrf.mxu0  ;;  %v5503_v0 = vadd.f32 %v15134_v29, %v14799_v13  ;;  %v17017_v13 = vld [vmem:[#allocation41_spill] sm:$0xff] }
 0xbf7   : > { %v15213_v53 = vadd.f32 %v11110_v46, %v5509_v56  ;;  %v15225_v55 = vadd.f32 %v5767_v7, %v5508_v44  ;;  %v5522_v56 = vadd.f32 %v5475_v8, %v5146_v19  ;;  %v5056_v8 = vadd.f32 %v14807_v20, %v14803_v33  ;;  %v17037_v19 = vld [vmem:[#allocation110_spill] sm:$0xff] }
 0xbf8   : > { %v5817_v62 = vpop.f32.mrf.mxu0  ;;  %v15245_v7 = vadd.f32 %v5757_v47, %v5506_v26  ;;  %v5520_v46 = vadd.f32 %v5465_v23, %v5136_v25  ;;  %v5126_v20 = vadd.f32 %v14849_v49, %v14845_v1  ;;  %v15271_v49 = vadd.f32 %v11125_v35, %v5519_v31  ;;  %v17022_v1 = vld [vmem:[#allocation40_spill] sm:$0xff]  ;;  %v17034_v47 = vld [vmem:[#allocation61_spill] sm:$0xff]  ;;  %v17040_v26 = vld [vmem:[#allocation95_spill] sm:$0xff] }
 0xbf9   : > { %v5504_v21 = vadd.f32 %v15146_v32, %v5056_v8  ;;  %v15276_v17 = vadd.f32 %v17015_v5, %v5503_v0  ;;  %v17030_v32 = vld [vmem:[#allocation59_spill] sm:$0xff]  ;;  %v17035_v35 = vld [vmem:[#allocation97_spill] sm:$0xff]  ;;  %v17045_v31 = vld [vmem:[#allocation100_spill] sm:$0xff] }
 0xbfa   : > { %v11128_v27 = vpop.f32.mrf.mxu0  ;;  %v5518_v33 = vadd.f32 %v15188_v6, %v5126_v20  ;;  %17014 = vst [vmem:[#allocation130_spill] sm:$0xff] %v15271_v49  ;;  %v17021_v6 = vld [vmem:[#allocation116_spill] sm:$0xff]  ;;  %v17042_v8 = vld [vmem:[#allocation67_spill] sm:$0xff]  ;;  %v17048_v5 = vld [vmem:[#allocation89_spill] sm:$0xff] }
 0xbfb   : > { %v5036_v61 = vadd.f32 %v17022_v1, %v17021_v6  ;;  %v17046_v0 = vld [vmem:[#allocation60_spill] sm:$0xff]  ;;  %v17052_v6 = vld [vmem:[#allocation82_spill] sm:$0xff] }
 0xbfc   : > { %v5827_v14 = vpop.f32.mrf.mxu0 }
 0xbfe   : > { %v11131_v39 = vpop.f32.mrf.mxu0 }
 0xbff   : > { %v15228_v10 = vadd.f32 %v11131_v39, %v5523_v43  ;;  %v15283_v39 = vadd.f32 %v5817_v62, %v5518_v33  ;;  %v17038_v43 = vld [vmem:[#allocation53_spill] sm:$0xff]  ;;  %v17047_v33 = vld [vmem:[#allocation62_spill] sm:$0xff] }
 0xc00   : > { %v5837_v34 = vpop.f32.mrf.mxu0 }
 0xc01   : > { %17010 = vst [vmem:[#allocation70_spill] sm:$0xff] %v15228_v10  ;;  %v15238_v44 = vadd.f32 %v5837_v34, %v5522_v56  ;;  %v15259_v34 = vadd.f32 %v5827_v14, %v5520_v46  ;;  %17020 = vst [vmem:[#allocation79_spill] sm:$0xff] %v15283_v39  ;;  %v17025_v14 = vld [vmem:[#allocation63_spill] sm:$0xff] }
 0xc02   : > { %v11134_v45 = vpop.f32.mrf.mxu0  ;;  %v17043_v46 = vld [vmem:[#allocation111_spill] sm:$0xff] }
 0xc03   : > { %v15211_v11 = vadd.f32 %v11134_v45, %v5525_v30  ;;  %v5507_v30 = vadd.f32 %v15150_v54, %v14811_v63  ;;  %v5521_v63 = vadd.f32 %v11036_v58, %v14853_v37  ;;  %17011 = vst [vmem:[#allocation127_spill] sm:$0xff] %v15238_v44  ;;  %v15253_v37 = vadd.f32 %v15172_v36, %v5505_v24  ;;  %v17027_v58 = vld [vmem:[#allocation108_spill] sm:$0xff]  ;;  %v17031_v54 = vld [vmem:[#allocation51_spill] sm:$0xff] }
 0xc04   : > { %v5847_v22 = vpop.f32.mrf.mxu0  ;;  %17013 = vst [vmem:[#allocation129_spill] sm:$0xff] %v15259_v34  ;;  %v15267_v45 = vadd.f32 %v15176_v38, %v5504_v21  ;;  %v5500_v62 = vadd.f32 %v17027_v58, %v5036_v61  ;;  %v5515_v57 = vadd.f32 %v17031_v54, %v17030_v32  ;;  %v5026_v36 = vadd.f32 %v17035_v35, %v17034_v47  ;;  %v17044_v21 = vld [vmem:[#allocation64_spill] sm:$0xff]  ;;  %v17062_v47 = vld [vmem:[#allocation91_spill] sm:$0xff] }
 0xc05   : > { %17008 = vst [vmem:[#allocation103_spill] sm:$0xff] %v15211_v11  ;;  %v15218_v4 = vadd.f32 %v5847_v22, %v5524_v50  ;;  %9715 = vmatprep.subr.mxu1 %v15211_v11  ;;  %v15232_v3 = vadd.f32 %v11107_v59, %v5507_v30  ;;  %v15248_v48 = vadd.f32 %v11128_v27, %v5521_v63  ;;  %v17032_v50 = vld [vmem:[#allocation75_spill] sm:$0xff]  ;;  %v17053_v61 = vld [vmem:[#allocation36_spill] sm:$0xff] }
 0xc06   : > { %9716 = vmatpush3.msra.mxu1 %v15213_v53  ;;  %v5046_v27 = vadd.f32 %v14801_v52, %v14797_v18  ;;  %v17016_v52 = vld [vmem:[#allocation94_spill] sm:$0xff]  ;;  %v17018_v18 = vld [vmem:[#allocation113_spill] sm:$0xff]  ;;  %v5106_v22 = vadd.f32 %v17029_v2, %v17028_v28  ;;  %v15310_v59 = vadd.f32 %v17036_v9, %v5500_v62  ;;  %v17039_v30 = vld [vmem:[#allocation87_spill] sm:$0xff]  ;;  %v5498_v25 = vadd.f32 %v17040_v26, %v5026_v36 }
 0xc07   : > { %17009 = vst [vmem:[#allocation72_spill] sm:$0xff] %v15218_v4  ;;  %9717 = vmatprep.subr.mxu1 %v15218_v4  ;;  %17012 = vst [vmem:[#allocation128_spill] sm:$0xff] %v15248_v48  ;;  %v5116_v29 = vadd.f32 %v17017_v13, %v17016_v52  ;;  %v5517_v42 = vadd.f32 %v17019_v60, %v17018_v18  ;;  %v15315_v56 = vadd.f32 %v17039_v30, %v5515_v57  ;;  %v17041_v63 = vld [vmem:[#allocation99_spill] sm:$0xff]  ;;  %v17051_v60 = vld [vmem:[#allocation42_spill] sm:$0xff] }
 0xc08   : > { %9718 = vmatpush3.msra.mxu1 %v15225_v55  ;;  %v5502_v12 = vadd.f32 %v15138_v15, %v5046_v27  ;;  %v5514_v40 = vadd.f32 %v17038_v43, %v5106_v22  ;;  %v5096_v24 = vadd.f32 %v17042_v8, %v17041_v63  ;;  %v5513_v20 = vadd.f32 %v17044_v21, %v17043_v46  ;;  %v17049_v13 = vld [vmem:[#allocation55_spill] sm:$0xff]  ;;  %v17057_v62 = vld [vmem:[#allocation76_spill] sm:$0xff]  ;;  %v17058_v2 = vld [vmem:[#allocation85_spill] sm:$0xff] }
 0xc09   : > { %9719 = vmatprep.subr.mxu1 %v15228_v10  ;;  %v5516_v51 = vadd.f32 %v17024_v41, %v5116_v29  ;;  %v15294_v38 = vadd.f32 %v17025_v14, %v5517_v42  ;;  %v15331_v52 = vadd.f32 %v17048_v5, %v5498_v25  ;;  %v17050_v29 = vld [vmem:[#allocation78_spill] sm:$0xff]  ;;  %v17059_v22 = vld [vmem:[#allocation119_spill] sm:$0xff]  ;;  %v17060_v54 = vld [vmem:[#allocation56_spill] sm:$0xff] }
 0xc0a   : > { %9720 = vmatpush3.msra.mxu1 %v15232_v3  ;;  %v15289_v15 = vadd.f32 %v17023_v16, %v5502_v12  ;;  %v15325_v27 = vadd.f32 %v17045_v31, %v5514_v40  ;;  %v5016_v12 = vadd.f32 %v17047_v33, %v17046_v0  ;;  %v5512_v18 = vadd.f32 %v17050_v29, %v5096_v24  ;;  %v17054_v16 = vld [vmem:[#allocation121_spill] sm:$0xff]  ;;  %v17056_v14 = vld [vmem:[#allocation38_spill] sm:$0xff]  ;;  %v17065_v30 = vld [vmem:[#allocation39_spill] sm:$0xff] }
 0xc0b   : > { %9721 = vmatprep.subr.mxu1 %v15238_v44  ;;  %17026 = vst [vmem:[#allocation94_spill] sm:$0xff] %v15294_v38  ;;  %v15304_v23 = vadd.f32 %v17032_v50, %v5516_v51  ;;  %v15336_v42 = vadd.f32 %v17051_v60, %v5513_v20  ;;  %v5086_v41 = vadd.f32 %v17054_v16, %v17053_v61  ;;  %v17055_v51 = vld [vmem:[#allocation88_spill] sm:$0xff]  ;;  %v17061_v50 = vld [vmem:[#allocation54_spill] sm:$0xff]  ;;  %v17064_v43 = vld [vmem:[#allocation37_spill] sm:$0xff] }
 0xc0c   : > { %9722 = vmatpush3.msra.mxu1 %v15245_v7  ;;  %v5496_v1 = vadd.f32 %v17052_v6, %v5016_v12  ;;  %v5511_v58 = vadd.f32 %v17056_v14, %v17055_v51  ;;  %v15346_v28 = vadd.f32 %v17057_v62, %v5512_v18  ;;  %v5006_v32 = vadd.f32 %v17059_v22, %v17058_v2  ;;  %v17063_v36 = vld [vmem:[#allocation106_spill] sm:$0xff]  ;;  %v17066_v25 = vld [vmem:[#allocation81_spill] sm:$0xff]  ;;  %v17070_v21 = vld [vmem:[#allocation11_spill] sm:$0xff] }
 0xc0d   : > { %9723 = vmatprep.subr.mxu1 %v15248_v48  ;;  %17033 = vst [vmem:[#allocation41_spill] sm:$0xff] %v15304_v23  ;;  %v5510_v35 = vadd.f32 %v17062_v47, %v5086_v41  ;;  %v17067_v8 = vld [vmem:[#allocation65_spill] sm:$0xff]  ;;  %v17068_v24 = vld [vmem:[#allocation2_spill] sm:$0xff]  ;;  %v17071_v20 = vld [vmem:[#allocation15_spill] sm:$0xff] }
 0xc0e   : > { %9724 = vmatpush3.msra.mxu1 %v15253_v37  ;;  %v15352_v57 = vadd.f32 %v17060_v54, %v5496_v1  ;;  %v15357_v9 = vadd.f32 %v17063_v36, %v5511_v58  ;;  %v5494_v40 = vadd.f32 %v17064_v43, %v5006_v32  ;;  %v17069_v46 = vld [vmem:[#allocation9_spill] sm:$0xff]  ;;  %v17072_v31 = vld [vmem:[#allocation16_spill] sm:$0xff]  ;;  %v17074_v33 = vld [vmem:[#allocation6_spill] sm:$0xff] }
 0xc0f   : > { %9725 = vmatprep.subr.mxu1 %v15259_v34  ;;  %v15363_v26 = vadd.f32 %v17065_v30, %v5510_v35  ;;  %v17073_v0 = vld [vmem:[#allocation5_spill] sm:$0xff]  ;;  %v17076_v5 = vld [vmem:[#allocation14_spill] sm:$0xff]  ;;  %v17078_v18 = vld [vmem:[#allocation12_spill] sm:$0xff] }
 0xc10   : > { %9726 = vmatpush3.msra.mxu1 %v15267_v45  ;;  %v15367_v63 = vadd.f32 %v17066_v25, %v5494_v40  ;;  %v17075_v12 = vld [vmem:[#allocation13_spill] sm:$0xff]  ;;  %v17077_v29 = vld [vmem:[#allocation10_spill] sm:$0xff]  ;;  %v17079_v60 = vld [vmem:[#allocation4_spill] sm:$0xff] }
 0xc11   : > { %9727 = vmatprep.subr.mxu1 %v15271_v49  ;;  %v17080_v6 = vld [vmem:[#allocation3_spill] sm:$0xff]  ;;  %v17081_v1 = vld [vmem:[#allocation8_spill] sm:$0xff]  ;;  %v17083_v16 = vld [vmem:[#allocation18_spill] sm:$0xff] }
 0xc12   : > { %9728 = vmatpush3.msra.mxu1 %v15276_v17  ;;  %v17082_v61 = vld [vmem:[#allocation7_spill] sm:$0xff]  ;;  %v17086_v49 = vld [vmem:[#allocation34_spill] sm:$0xff] }
 0xc13   : > { %9729 = vmatprep.subr.mxu1 %v15283_v39  ;;  %v17085_v34 = vld [vmem:[#allocation35_spill] sm:$0xff] }
 0xc14   : > { %9730 = vmatpush3.msra.mxu1 %v15289_v15 }
 0xc15   : > { %9731 = vmatprep.subr.mxu1 %v15294_v38  ;;  %v17148_v38 = vld [vmem:[#allocation102_spill] sm:$0xff] }
 0xc16   : > { %9732 = vmatpush3.msra.mxu1 %v17037_v19 }
 0xc17   : > { %9733 = vmatprep.subr.mxu1 %v15304_v23 }
 0xc18   : > { %9734 = vmatpush3.msra.mxu1 %v15310_v59 }
 0xc19   : > { %9735 = vmatprep.subr.mxu1 %v15315_v56 }
 0xc1a   : > { %9736 = vmatpush3.msra.mxu1 %v17049_v13 }
 0xc1b   : > { %9737 = vmatprep.subr.mxu1 %v15325_v27 }
 0xc1c   : > { %9738 = vmatpush3.msra.mxu1 %v15331_v52 }
 0xc1d   : > { %9739 = vmatprep.subr.mxu1 %v15336_v42 }
 0xc1e   : > { %9740 = vmatpush3.msra.mxu1 %v17061_v50 }
 0xc1f   : > { %9741 = vmatprep.subr.mxu1 %v15346_v28 }
 0xc20   : > { %9742 = vmatpush3.msra.mxu1 %v15352_v57 }
 0xc21   : > { %9743 = vmatprep.subr.mxu1 %v15357_v9 }
 0xc22   : > { %9744 = vmatpush3.msra.mxu1 %v17067_v8 }
 0xc23   : > { %9745 = vmatprep.subr.mxu1 %v15363_v26 }
 0xc24   : > { %9746 = vmatpush3.msra.mxu1 %v15367_v63 }
 0xc25   : > { %5985 = vmatmul.mubr.f32.vlgmr.msra.gmra.mxu1 %v17068_v24 }
 0xc26   : > { %5989 = vmatprep.mubr.f32.mxu1 %v17069_v46 }
 0xc29   : > { %5990 = vmatmul.mubr.f32.gmra.mxu1 %v17070_v21 }
 0xc2a   : > { %5994 = vmatprep.mubr.f32.mxu1 %v17071_v20 }
 0xc2d   : > { %5995 = vmatmul.mubr.f32.gmra.mxu1 %v17072_v31 }
 0xc2e   : > { %5999 = vmatprep.mubr.f32.mxu1 %v17073_v0 }
 0xc31   : > { %6000 = vmatmul.mubr.f32.gmra.mxu1 %v17074_v33 }
 0xc32   : > { %6004 = vmatprep.mubr.f32.mxu1 %v17075_v12 }
 0xc35   : > { %6005 = vmatmul.mubr.f32.gmra.mxu1 %v17076_v5 }
 0xc36   : > { %6009 = vmatprep.mubr.f32.mxu1 %v17077_v29 }
 0xc39   : > { %6010 = vmatmul.mubr.f32.gmra.mxu1 %v17078_v18 }
 0xc3a   : > { %6014 = vmatprep.mubr.f32.mxu1 %v17079_v60 }
 0xc3d   : > { %6015 = vmatmul.mubr.f32.gmra.mxu1 %v17080_v6 }
 0xc3e   : > { %6019 = vmatprep.mubr.f32.mxu1 %v17081_v1 }
 0xc41   : > { %6020 = vmatmul.mubr.f32.gmra.mxu1 %v17082_v61 }
 0xc42   : > { %11179 = vmatprep.mubr.msk.f32.mxu1 %vm618_vm2, %v17083_v16  ;;  %v17084_v16 = vld [vmem:[#allocation45_spill] sm:$0xff] }
 0xce5   : > { %v9747_v41 = vpop.f32.mrf.mxu1 }
 0xce7   : > { %v9748_v51 = vpop.f32.mrf.mxu1 }
 0xce9   : > { %v9750_v14 = vpop.f32.mrf.mxu1 }
 0xceb   : > { %v9751_v58 = vpop.f32.mrf.mxu1 }
 0xced   : > { %v9753_v62 = vpop.f32.mrf.mxu1 }
 0xcef   : > { %v9754_v2 = vpop.f32.mrf.mxu1 }
 0xcf1   : > { %v9756_v22 = vpop.f32.mrf.mxu1 }
 0xcf3   : > { %v9757_v32 = vpop.f32.mrf.mxu1 }
 0xcf4   : > { %v9758_v39 = vadd.f32 %v9757_v32, %v9756_v22  ;;  %v17093_v32 = vld [vmem:[#allocation19_spill] sm:$0xff] }
 0xcf5   : > { %v9759_v54 = vpop.f32.mrf.mxu1 }
 0xcf7   : > { %v9760_v47 = vpop.f32.mrf.mxu1 }
 0xcf8   : > { %v9761_v10 = vadd.f32 %v9760_v47, %v9759_v54  ;;  %v17094_v47 = vld [vmem:[#allocation21_spill] sm:$0xff] }
 0xcf9   : > { %v9762_v35 = vpop.f32.mrf.mxu1 }
 0xcfb   : > { %v9763_v36 = vpop.f32.mrf.mxu1 }
 0xcfc   : > { %v9764_v11 = vadd.f32 %v9763_v36, %v9762_v35  ;;  %v17095_v35 = vld [vmem:[#allocation22_spill] sm:$0xff] }
 0xcfd   : > { %v9765_v43 = vpop.f32.mrf.mxu1 }
 0xcff   : > { %v9766_v40 = vpop.f32.mrf.mxu1 }
 0xd00   : > { %v9767_v24 = vadd.f32 %v9766_v40, %v9765_v43  ;;  %v15400_v43 = vmul.f32 %v9764_v11, %v17086_v49  ;;  %v9752_v11 = vadd.f32 %v9751_v58, %v9750_v14  ;;  %v17088_v49 = vld [vmem:[#allocation47_spill] sm:$0xff]  ;;  %v17092_v58 = vld [vmem:[#allocation20_spill] sm:$0xff] }
 0xd01   : > { %v9768_v30 = vpop.f32.mrf.mxu1  ;;  %v15414_v22 = vmul.f32 %v9758_v39, %v17088_v49  ;;  %v17090_v39 = vld [vmem:[#allocation49_spill] sm:$0xff] }
 0xd02   : > { %v15393_v48 = vmul.f32 %v9767_v24, %v17085_v34  ;;  %v17087_v34 = vld [vmem:[#allocation46_spill] sm:$0xff]  ;;  %v15428_v14 = vmul.f32 %v9752_v11, %v17090_v39 }
 0xd03   : > { %v9769_v25 = vpop.f32.mrf.mxu1  ;;  %v15407_v54 = vmul.f32 %v9761_v10, %v17087_v34  ;;  %v9749_v10 = vadd.f32 %v9748_v51, %v9747_v41  ;;  %v17091_v41 = vld [vmem:[#allocation44_spill] sm:$0xff] }
 0xd04   : > { %v9770_v4 = vadd.f32 %v9769_v25, %v9768_v30 }
 0xd05   : > { %v15435_v51 = vmul.f32 %v9749_v10, %v17091_v41 }
 0xd06   : > { %v15390_v44 = vmul.f32 %v9770_v4, %v17084_v16  ;;  %v9755_v4 = vadd.f32 %v9754_v2, %v9753_v62  ;;  %v17089_v62 = vld [vmem:[#allocation48_spill] sm:$0xff] }
 0xd08   : > { %11135 = vmatprep.subr.mxu0 %v15390_v44  ;;  %11163 = vmatprep.subr.mxu1 %v15390_v44  ;;  %v15421_v2 = vmul.f32 %v9755_v4, %v17089_v62 }
 0xd09   : > { %11136 = vmatpush3.msra.mxu0 %v15390_v44  ;;  %11164 = vmatpush3.msra.mxu1 %v15390_v44 }
 0xd0a   : > { %11137 = vmatprep.subr.mxu0 %v15393_v48  ;;  %11165 = vmatprep.subr.mxu1 %v15393_v48 }
 0xd0b   : > { %11138 = vmatpush3.msra.mxu0 %v15393_v48  ;;  %11166 = vmatpush3.msra.mxu1 %v15393_v48 }
 0xd0c   : > { %11139 = vmatprep.subr.mxu0 %v15400_v43  ;;  %11167 = vmatprep.subr.mxu1 %v15400_v43 }
 0xd0d   : > { %11140 = vmatpush3.msra.mxu0 %v15400_v43  ;;  %11168 = vmatpush3.msra.mxu1 %v15400_v43 }
 0xd0e   : > { %11141 = vmatprep.subr.mxu0 %v15407_v54  ;;  %11169 = vmatprep.subr.mxu1 %v15407_v54 }
 0xd0f   : > { %11142 = vmatpush3.msra.mxu0 %v15407_v54  ;;  %11170 = vmatpush3.msra.mxu1 %v15407_v54 }
 0xd10   : > { %11143 = vmatprep.subr.mxu0 %v15414_v22  ;;  %11171 = vmatprep.subr.mxu1 %v15414_v22 }
 0xd11   : > { %11144 = vmatpush3.msra.mxu0 %v15414_v22  ;;  %11172 = vmatpush3.msra.mxu1 %v15414_v22 }
 0xd12   : > { %11145 = vmatprep.subr.mxu0 %v15421_v2  ;;  %11173 = vmatprep.subr.mxu1 %v15421_v2 }
 0xd13   : > { %11146 = vmatpush3.msra.mxu0 %v15421_v2  ;;  %11174 = vmatpush3.msra.mxu1 %v15421_v2 }
 0xd14   : > { %11147 = vmatprep.subr.mxu0 %v15428_v14  ;;  %11175 = vmatprep.subr.mxu1 %v15428_v14 }
 0xd15   : > { %11148 = vmatpush3.msra.mxu0 %v15428_v14  ;;  %11176 = vmatpush3.msra.mxu1 %v15428_v14 }
 0xd16   : > { %11149 = vmatprep.subr.mxu0 %v15435_v51  ;;  %11177 = vmatprep.subr.mxu1 %v15435_v51 }
 0xd17   : > { %11150 = vmatpush3.msra.mxu0 %v15435_v51  ;;  %11178 = vmatpush3.msra.mxu1 %v15435_v51 }
 0xd18   : > { %11152 = vmatmul.mubr.msk.f32.vlgmr.msra.gmra.mxu0 %vm618_vm2, %v17070_v21  ;;  %11180 = vmatmul.mubr.msk.f32.vlgmr.msra.gmra.mxu1 %vm618_vm2, %v17092_v58  ;;  %v17096_v21 = vld [vmem:[#allocation23_spill] sm:$0xff] }
 0xd19   : > { %11154 = vmatprep.mubr.msk.f32.mxu0 %vm618_vm2, %v17072_v31  ;;  %11182 = vmatprep.mubr.msk.f32.mxu1 %vm618_vm2, %v17093_v32  ;;  %v17097_v31 = vld [vmem:[#allocation24_spill] sm:$0xff]  ;;  %v11863_v58 = vld [vmem:[%s16504_s3 + $0x108] sm:$0xff] }
 0xd1a   : > { %v11864_v32 = vld [vmem:[%s16504_s3 + $0x110] sm:$0xff] }
 0xd1c   : > { %11155 = vmatmul.mubr.msk.f32.gmra.mxu0 %vm618_vm2, %v17074_v33  ;;  %11183 = vmatmul.mubr.msk.f32.gmra.mxu1 %vm618_vm2, %v17094_v47  ;;  %v17098_v33 = vld [vmem:[#allocation25_spill] sm:$0xff]  ;;  %v11865_v47 = vld [vmem:[%s16504_s3 + $0x8] sm:$0xff] }
 0xd1d   : > { %11157 = vmatprep.mubr.msk.f32.mxu0 %vm618_vm2, %v17076_v5  ;;  %11185 = vmatprep.mubr.msk.f32.mxu1 %vm618_vm2, %v17095_v35  ;;  %v11861_v5 = vld [vmem:[%s16504_s3 + $0x100] sm:$0xff]  ;;  %v11866_v35 = vld [vmem:[%s16504_s3 + $0x10] sm:$0xff] }
 0xd20   : > { %11158 = vmatmul.mubr.msk.f32.gmra.mxu0 %vm618_vm2, %v17078_v18  ;;  %11186 = vmatmul.mubr.msk.f32.gmra.mxu1 %vm618_vm2, %v17096_v21  ;;  %v11862_v18 = vld [vmem:[%s16504_s3] sm:$0xff]  ;;  %v11867_v21 = vld [vmem:[%s16504_s3 + $0x118] sm:$0xff] }
 0xd21   : > { %11160 = vmatprep.mubr.msk.f32.mxu0 %vm618_vm2, %v17080_v6  ;;  %11188 = vmatprep.mubr.msk.f32.mxu1 %vm618_vm2, %v17097_v31  ;;  %v11868_v31 = vld [vmem:[%s16504_s3 + $0x120] sm:$0xff] }
 0xd24   : > { %11161 = vmatmul.mubr.msk.f32.gmra.mxu0 %vm618_vm2, %v17082_v61  ;;  %11189 = vmatmul.mubr.msk.f32.gmra.mxu1 %vm618_vm2, %v17098_v33  ;;  %v11869_v33 = vld [vmem:[%s16504_s3 + $0x18] sm:$0xff] }
 0xd25   : > { %11207 = vmatprep.mubr.msk.f32.mxu0 %vm618_vm2, %v11861_v5  ;;  %11271 = vmatprep.mubr.msk.f32.mxu1 %vm618_vm2, %v11862_v18  ;;  %v11870_v5 = vld [vmem:[%s16504_s3 + $0x20] sm:$0xff]  ;;  %v11871_v18 = vld [vmem:[%s16504_s3 + $0x128] sm:$0xff] }
 0xdd8   : > { %v11153_v6 = vpop.f32.mrf.mxu0  ;;  %v11181_v36 = vpop.f32.mrf.mxu1 }
 0xdda   : > { %v6099_v40 = vpop.f32.mrf.mxu0  ;;  %v6204_v30 = vpop.f32.mrf.mxu1 }
 0xddc   : > { %v11156_v61 = vpop.f32.mrf.mxu0  ;;  %v11184_v25 = vpop.f32.mrf.mxu1 }
 0xdde   : > { %v6109_v24 = vpop.f32.mrf.mxu0  ;;  %v6214_v16 = vpop.f32.mrf.mxu1 }
 0xde0   : > { %v11159_v4 = vpop.f32.mrf.mxu0  ;;  %v11187_v34 = vpop.f32.mrf.mxu1 }
 0xde2   : > { %v6119_v11 = vpop.f32.mrf.mxu0  ;;  %v6224_v49 = vpop.f32.mrf.mxu1 }
 0xde4   : > { %v11162_v10 = vpop.f32.mrf.mxu0  ;;  %v11190_v62 = vpop.f32.mrf.mxu1 }
 0xde5   : > { %11191 = vmatprep.subr.mxu0 %v11190_v62  ;;  %11255 = vmatprep.subr.mxu1 %v11162_v10 }
 0xde6   : > { %v6129_v39 = vpop.f32.mrf.mxu0  ;;  %v6234_v41 = vpop.f32.mrf.mxu1  ;;  %11192 = vmatpush3.msra.mxu0 %v11190_v62  ;;  %11256 = vmatpush3.msra.mxu1 %v11162_v10  ;;  %v11884_v10 = vld [vmem:[%s16504_s3 + $0x160] sm:$0xff]  ;;  %v11885_v62 = vld [vmem:[%s16504_s3 + $0x58] sm:$0xff] }
 0xde7   : > { %11193 = vmatprep.subr.mxu0 %v6234_v41  ;;  %11257 = vmatprep.subr.mxu1 %v6129_v39 }
 0xde8   : > { %11194 = vmatpush3.msra.mxu0 %v6234_v41  ;;  %11258 = vmatpush3.msra.mxu1 %v6129_v39  ;;  %v11886_v39 = vld [vmem:[%s16504_s3 + $0x60] sm:$0xff]  ;;  %v11887_v41 = vld [vmem:[%s16504_s3 + $0x168] sm:$0xff] }
 0xde9   : > { %11195 = vmatprep.subr.mxu0 %v11187_v34  ;;  %11259 = vmatprep.subr.mxu1 %v11159_v4 }
 0xdea   : > { %11196 = vmatpush3.msra.mxu0 %v11187_v34  ;;  %11260 = vmatpush3.msra.mxu1 %v11159_v4  ;;  %v11880_v4 = vld [vmem:[%s16504_s3 + $0x150] sm:$0xff]  ;;  %v11881_v34 = vld [vmem:[%s16504_s3 + $0x48] sm:$0xff] }
 0xdeb   : > { %11197 = vmatprep.subr.mxu0 %v6224_v49  ;;  %11261 = vmatprep.subr.mxu1 %v6119_v11 }
 0xdec   : > { %11198 = vmatpush3.msra.mxu0 %v6224_v49  ;;  %11262 = vmatpush3.msra.mxu1 %v6119_v11  ;;  %v11882_v11 = vld [vmem:[%s16504_s3 + $0x50] sm:$0xff]  ;;  %v11883_v49 = vld [vmem:[%s16504_s3 + $0x158] sm:$0xff] }
 0xded   : > { %11199 = vmatprep.subr.mxu0 %v11184_v25  ;;  %11263 = vmatprep.subr.mxu1 %v11156_v61 }
 0xdee   : > { %11200 = vmatpush3.msra.mxu0 %v11184_v25  ;;  %11264 = vmatpush3.msra.mxu1 %v11156_v61  ;;  %v11876_v61 = vld [vmem:[%s16504_s3 + $0x140] sm:$0xff]  ;;  %v11877_v25 = vld [vmem:[%s16504_s3 + $0x38] sm:$0xff] }
 0xdef   : > { %11201 = vmatprep.subr.mxu0 %v6214_v16  ;;  %11265 = vmatprep.subr.mxu1 %v6109_v24 }
 0xdf0   : > { %11202 = vmatpush3.msra.mxu0 %v6214_v16  ;;  %11266 = vmatpush3.msra.mxu1 %v6109_v24  ;;  %v11878_v24 = vld [vmem:[%s16504_s3 + $0x40] sm:$0xff]  ;;  %v11879_v16 = vld [vmem:[%s16504_s3 + $0x148] sm:$0xff] }
 0xdf1   : > { %11203 = vmatprep.subr.mxu0 %v11181_v36  ;;  %11267 = vmatprep.subr.mxu1 %v11153_v6 }
 0xdf2   : > { %11204 = vmatpush3.msra.mxu0 %v11181_v36  ;;  %11268 = vmatpush3.msra.mxu1 %v11153_v6  ;;  %v11872_v6 = vld [vmem:[%s16504_s3 + $0x130] sm:$0xff]  ;;  %v11873_v36 = vld [vmem:[%s16504_s3 + $0x28] sm:$0xff] }
 0xdf3   : > { %11205 = vmatprep.subr.mxu0 %v6204_v30  ;;  %11269 = vmatprep.subr.mxu1 %v6099_v40 }
 0xdf4   : > { %11206 = vmatpush3.msra.mxu0 %v6204_v30  ;;  %11270 = vmatpush3.msra.mxu1 %v6099_v40  ;;  %v11874_v40 = vld [vmem:[%s16504_s3 + $0x30] sm:$0xff]  ;;  %v11875_v30 = vld [vmem:[%s16504_s3 + $0x138] sm:$0xff] }
 0xdf5   : > { %11208 = vmatmul.mubr.msk.f32.vlgmr.msra.gmra.mxu0 %vm618_vm2, %v11863_v58  ;;  %11319 = vmatprep.subr.mxu0 %v15390_v44  ;;  %v11888_v58 = vld [vmem:[%s16504_s3 + $0x170] sm:$0xff] }
 0xdf6   : > { %11320 = vmatpush3.msra.mxu0 %v15390_v44  ;;  %11210 = vmatprep.mubr.msk.f32.mxu0 %vm618_vm2, %v11864_v32  ;;  %v11889_v32 = vld [vmem:[%s16504_s3 + $0x68] sm:$0xff] }
 0xdf7   : > { %11321 = vmatprep.subr.mxu0 %v15393_v48  ;;  %11272 = vmatmul.mubr.msk.f32.vlgmr.msra.gmra.mxu1 %vm618_vm2, %v11865_v47  ;;  %v11890_v47 = vld [vmem:[%s16504_s3 + $0x70] sm:$0xff] }
 0xdf8   : > { %11322 = vmatpush3.msra.mxu0 %v15393_v48  ;;  %11274 = vmatprep.mubr.msk.f32.mxu1 %vm618_vm2, %v11866_v35  ;;  %v11891_v35 = vld [vmem:[%s16504_s3 + $0x178] sm:$0xff] }
 0xdf9   : > { %11211 = vmatmul.mubr.msk.f32.gmra.mxu0 %vm618_vm2, %v11867_v21  ;;  %11323 = vmatprep.subr.mxu0 %v15400_v43  ;;  %v11892_v21 = vld [vmem:[%s16504_s3 + $0x180] sm:$0xff] }
 0xdfa   : > { %11324 = vmatpush3.msra.mxu0 %v15400_v43  ;;  %11213 = vmatprep.mubr.msk.f32.mxu0 %vm618_vm2, %v11868_v31  ;;  %v11893_v31 = vld [vmem:[%s16504_s3 + $0x78] sm:$0xff] }
 0xdfb   : > { %11325 = vmatprep.subr.mxu0 %v15407_v54  ;;  %11275 = vmatmul.mubr.msk.f32.gmra.mxu1 %vm618_vm2, %v11869_v33  ;;  %v11894_v33 = vld [vmem:[%s16504_s3 + $0x80] sm:$0xff] }
 0xdfc   : > { %11326 = vmatpush3.msra.mxu0 %v15407_v54  ;;  %11277 = vmatprep.mubr.msk.f32.mxu1 %vm618_vm2, %v11870_v5  ;;  %v11895_v5 = vld [vmem:[%s16504_s3 + $0x188] sm:$0xff] }
 0xdfd   : > { %11214 = vmatmul.mubr.msk.f32.gmra.mxu0 %vm618_vm2, %v11871_v18  ;;  %11327 = vmatprep.subr.mxu0 %v15414_v22  ;;  %v11896_v18 = vld [vmem:[%s16504_s3 + $0x190] sm:$0xff] }
 0xdfe   : > { %11328 = vmatpush3.msra.mxu0 %v15414_v22  ;;  %11216 = vmatprep.mubr.msk.f32.mxu0 %vm618_vm2, %v11872_v6  ;;  %v11897_v6 = vld [vmem:[%s16504_s3 + $0x88] sm:$0xff] }
 0xdff   : > { %11329 = vmatprep.subr.mxu0 %v15421_v2  ;;  %11278 = vmatmul.mubr.msk.f32.gmra.mxu1 %vm618_vm2, %v11873_v36  ;;  %v11898_v36 = vld [vmem:[%s16504_s3 + $0x90] sm:$0xff] }
 0xe00   : > { %11330 = vmatpush3.msra.mxu0 %v15421_v2  ;;  %11280 = vmatprep.mubr.msk.f32.mxu1 %vm618_vm2, %v11874_v40  ;;  %v11899_v40 = vld [vmem:[%s16504_s3 + $0x198] sm:$0xff] }
 0xe01   : > { %11217 = vmatmul.mubr.msk.f32.gmra.mxu0 %vm618_vm2, %v11875_v30  ;;  %11331 = vmatprep.subr.mxu0 %v15428_v14  ;;  %v11900_v30 = vld [vmem:[%s16504_s3 + $0x1a0] sm:$0xff] }
 0xe02   : > { %11332 = vmatpush3.msra.mxu0 %v15428_v14  ;;  %11219 = vmatprep.mubr.msk.f32.mxu0 %vm618_vm2, %v11876_v61  ;;  %v11901_v61 = vld [vmem:[%s16504_s3 + $0x98] sm:$0xff] }
 0xe03   : > { %11333 = vmatprep.subr.mxu0 %v15435_v51  ;;  %11281 = vmatmul.mubr.msk.f32.gmra.mxu1 %vm618_vm2, %v11877_v25  ;;  %v11902_v25 = vld [vmem:[%s16504_s3 + $0xa0] sm:$0xff] }
 0xe04   : > { %11334 = vmatpush3.msra.mxu0 %v15435_v51  ;;  %11283 = vmatprep.mubr.msk.f32.mxu1 %vm618_vm2, %v11878_v24  ;;  %v11903_v24 = vld [vmem:[%s16504_s3 + $0x1a8] sm:$0xff] }
 0xe05   : > { %11220 = vmatmul.mubr.msk.f32.gmra.mxu0 %vm618_vm2, %v11879_v16  ;;  %11411 = vmatprep.subr.mxu0 %v15390_v44  ;;  %v11904_v16 = vld [vmem:[%s16504_s3 + $0x1b0] sm:$0xff] }
 0xe06   : > { %11222 = vmatprep.mubr.msk.f32.mxu0 %vm618_vm2, %v11880_v4  ;;  %v11905_v4 = vld [vmem:[%s16504_s3 + $0xa8] sm:$0xff] }
 0xe07   : > { %11284 = vmatmul.mubr.msk.f32.gmra.mxu1 %vm618_vm2, %v11881_v34  ;;  %v11906_v34 = vld [vmem:[%s16504_s3 + $0xb0] sm:$0xff] }
 0xe08   : > { %11286 = vmatprep.mubr.msk.f32.mxu1 %vm618_vm2, %v11882_v11  ;;  %v11907_v11 = vld [vmem:[%s16504_s3 + $0x1b8] sm:$0xff] }
 0xe09   : > { %11223 = vmatmul.mubr.msk.f32.gmra.mxu0 %vm618_vm2, %v11883_v49  ;;  %v11908_v49 = vld [vmem:[%s16504_s3 + $0x1c0] sm:$0xff] }
 0xe0a   : > { %11225 = vmatprep.mubr.msk.f32.mxu0 %vm618_vm2, %v11884_v10  ;;  %v11909_v10 = vld [vmem:[%s16504_s3 + $0xb8] sm:$0xff] }
 0xe0b   : > { %11287 = vmatmul.mubr.msk.f32.gmra.mxu1 %vm618_vm2, %v11885_v62  ;;  %v11910_v62 = vld [vmem:[%s16504_s3 + $0xc0] sm:$0xff] }
 0xe0c   : > { %11289 = vmatprep.mubr.msk.f32.mxu1 %vm618_vm2, %v11886_v39  ;;  %v11911_v39 = vld [vmem:[%s16504_s3 + $0x1c8] sm:$0xff] }
 0xe0d   : > { %11226 = vmatmul.mubr.msk.f32.gmra.mxu0 %vm618_vm2, %v11887_v41  ;;  %v11912_v41 = vld [vmem:[%s16504_s3 + $0x1d0] sm:$0xff] }
 0xe0e   : > { %11228 = vmatprep.mubr.msk.f32.mxu0 %vm618_vm2, %v11888_v58  ;;  %v11913_v58 = vld [vmem:[%s16504_s3 + $0xc8] sm:$0xff] }
 0xe0f   : > { %11290 = vmatmul.mubr.msk.f32.gmra.mxu1 %vm618_vm2, %v11889_v32  ;;  %v11914_v32 = vld [vmem:[%s16504_s3 + $0xd0] sm:$0xff] }
 0xe10   : > { %11292 = vmatprep.mubr.msk.f32.mxu1 %vm618_vm2, %v11890_v47  ;;  %v11915_v47 = vld [vmem:[%s16504_s3 + $0x1d8] sm:$0xff] }
 0xe11   : > { %11229 = vmatmul.mubr.msk.f32.gmra.mxu0 %vm618_vm2, %v11891_v35  ;;  %v11916_v35 = vld [vmem:[%s16504_s3 + $0x1e0] sm:$0xff] }
 0xe12   : > { %11231 = vmatprep.mubr.msk.f32.mxu0 %vm618_vm2, %v11892_v21  ;;  %v11917_v21 = vld [vmem:[%s16504_s3 + $0xd8] sm:$0xff] }
 0xe13   : > { %11293 = vmatmul.mubr.msk.f32.gmra.mxu1 %vm618_vm2, %v11893_v31  ;;  %v11918_v31 = vld [vmem:[%s16504_s3 + $0xe0] sm:$0xff] }
 0xe14   : > { %11295 = vmatprep.mubr.msk.f32.mxu1 %vm618_vm2, %v11894_v33  ;;  %v11919_v33 = vld [vmem:[%s16504_s3 + $0x1e8] sm:$0xff] }
 0xe15   : > { %11232 = vmatmul.mubr.msk.f32.gmra.mxu0 %vm618_vm2, %v11895_v5  ;;  %v11920_v5 = vld [vmem:[%s16504_s3 + $0x1f0] sm:$0xff] }
 0xe16   : > { %11234 = vmatprep.mubr.msk.f32.mxu0 %vm618_vm2, %v11896_v18  ;;  %v11921_v18 = vld [vmem:[%s16504_s3 + $0xe8] sm:$0xff] }
 0xe17   : > { %11296 = vmatmul.mubr.msk.f32.gmra.mxu1 %vm618_vm2, %v11897_v6  ;;  %v11922_v6 = vld [vmem:[%s16504_s3 + $0xf0] sm:$0xff] }
 0xe18   : > { %11298 = vmatprep.mubr.msk.f32.mxu1 %vm618_vm2, %v11898_v36  ;;  %v11923_v36 = vld [vmem:[%s16504_s3 + $0x1f8] sm:$0xff] }
 0xe19   : > { %11235 = vmatmul.mubr.msk.f32.gmra.mxu0 %vm618_vm2, %v11899_v40  ;;  %v17099_v40 = vld [vmem:[#allocation17_spill] sm:$0xff] }
 0xe1a   : > { %11237 = vmatprep.mubr.msk.f32.mxu0 %vm618_vm2, %v11900_v30  ;;  %v11924_v30 = vld [vmem:[%s16504_s3 + $0xf8] sm:$0xff] }
 0xe1b   : > { %11299 = vmatmul.mubr.msk.f32.gmra.mxu1 %vm618_vm2, %v11901_v61  ;;  %v11925_v61 = vld [vmem:[%s16504_s3 + $0x200] sm:$0xff] }
 0xe1c   : > { %11301 = vmatprep.mubr.msk.f32.mxu1 %vm618_vm2, %v11902_v25 }
 0xe1d   : > { %11238 = vmatmul.mubr.msk.f32.gmra.mxu0 %vm618_vm2, %v11903_v24 }
 0xe1e   : > { %11240 = vmatprep.mubr.msk.f32.mxu0 %vm618_vm2, %v11904_v16 }
 0xe1f   : > { %11302 = vmatmul.mubr.msk.f32.gmra.mxu1 %vm618_vm2, %v11905_v4 }
 0xe20   : > { %11304 = vmatprep.mubr.msk.f32.mxu1 %vm618_vm2, %v11906_v34 }
 0xe21   : > { %11241 = vmatmul.mubr.msk.f32.gmra.mxu0 %vm618_vm2, %v11907_v11 }
 0xe22   : > { %11243 = vmatprep.mubr.msk.f32.mxu0 %vm618_vm2, %v11908_v49 }
 0xe23   : > { %11305 = vmatmul.mubr.msk.f32.gmra.mxu1 %vm618_vm2, %v11909_v10 }
 0xe24   : > { %11307 = vmatprep.mubr.msk.f32.mxu1 %vm618_vm2, %v11910_v62 }
 0xe25   : > { %11244 = vmatmul.mubr.msk.f32.gmra.mxu0 %vm618_vm2, %v11911_v39 }
 0xe26   : > { %11246 = vmatprep.mubr.msk.f32.mxu0 %vm618_vm2, %v11912_v41 }
 0xe27   : > { %11308 = vmatmul.mubr.msk.f32.gmra.mxu1 %vm618_vm2, %v11913_v58 }
 0xe28   : > { %11310 = vmatprep.mubr.msk.f32.mxu1 %vm618_vm2, %v11914_v32 }
 0xe29   : > { %11247 = vmatmul.mubr.msk.f32.gmra.mxu0 %vm618_vm2, %v11915_v47 }
 0xe2a   : > { %11249 = vmatprep.mubr.msk.f32.mxu0 %vm618_vm2, %v11916_v35 }
 0xe2b   : > { %11311 = vmatmul.mubr.msk.f32.gmra.mxu1 %vm618_vm2, %v11917_v21 }
 0xe2c   : > { %11313 = vmatprep.mubr.msk.f32.mxu1 %vm618_vm2, %v11918_v31 }
 0xe2d   : > { %11250 = vmatmul.mubr.msk.f32.gmra.mxu0 %vm618_vm2, %v11919_v33 }
 0xe2e   : > { %11252 = vmatprep.mubr.msk.f32.mxu0 %vm618_vm2, %v11920_v5 }
 0xe2f   : > { %11314 = vmatmul.mubr.msk.f32.gmra.mxu1 %vm618_vm2, %v11921_v18 }
 0xe30   : > { %11316 = vmatprep.mubr.msk.f32.mxu1 %vm618_vm2, %v11922_v6 }
 0xe31   : > { %11253 = vmatmul.mubr.msk.f32.gmra.mxu0 %vm618_vm2, %v11923_v36 }
 0xe32   : > { %11335 = vmatprep.mubr.msk.f32.mxu0 %vm618_vm2, %v17099_v40 }
 0xe33   : > { %11317 = vmatmul.mubr.msk.f32.gmra.mxu1 %vm618_vm2, %v11924_v30 }
 0xe34   : > { %11363 = vmatprep.mubr.msk.f32.mxu1 %vm618_vm2, %v11925_v61 }
 0xe35   : > { %11336 = vmatmul.mubr.msk.f32.vlgmr.msra.gmra.mxu0 %vm618_vm2, %v17069_v46  ;;  %v17102_v46 = vld [vmem:[#allocation28_spill] sm:$0xff] }
 0xe36   : > { %11412 = vmatpush3.msra.mxu0 %v15390_v44  ;;  %11338 = vmatprep.mubr.msk.f32.mxu0 %vm618_vm2, %v17071_v20  ;;  %v17100_v44 = vld [vmem:[#allocation26_spill] sm:$0xff]  ;;  %v17103_v20 = vld [vmem:[#allocation29_spill] sm:$0xff] }
 0xe37   : > { %11413 = vmatprep.subr.mxu0 %v15393_v48 }
 0xe38   : > { %11414 = vmatpush3.msra.mxu0 %v15393_v48  ;;  %v17101_v48 = vld [vmem:[#allocation27_spill] sm:$0xff] }
 0xe39   : > { %11415 = vmatprep.subr.mxu0 %v15400_v43  ;;  %11339 = vmatmul.mubr.msk.f32.gmra.mxu0 %vm618_vm2, %v17073_v0  ;;  %v17104_v0 = vld [vmem:[#allocation30_spill] sm:$0xff] }
 0xe3a   : > { %11416 = vmatpush3.msra.mxu0 %v15400_v43  ;;  %11341 = vmatprep.mubr.msk.f32.mxu0 %vm618_vm2, %v17075_v12  ;;  %v17105_v12 = vld [vmem:[#allocation31_spill] sm:$0xff] }
 0xe3b   : > { %11417 = vmatprep.subr.mxu0 %v15407_v54 }
 0xe3c   : > { %11418 = vmatpush3.msra.mxu0 %v15407_v54 }
 0xe3d   : > { %11419 = vmatprep.subr.mxu0 %v15414_v22  ;;  %11342 = vmatmul.mubr.msk.f32.gmra.mxu0 %vm618_vm2, %v17077_v29  ;;  %v17106_v29 = vld [vmem:[#allocation32_spill] sm:$0xff] }
 0xe3e   : > { %11420 = vmatpush3.msra.mxu0 %v15414_v22  ;;  %11344 = vmatprep.mubr.msk.f32.mxu0 %vm618_vm2, %v17079_v60  ;;  %v17107_v60 = vld [vmem:[#allocation33_spill] sm:$0xff] }
 0xe3f   : > { %11421 = vmatprep.subr.mxu0 %v15421_v2 }
 0xe40   : > { %11422 = vmatpush3.msra.mxu0 %v15421_v2 }
 0xe41   : > { %11423 = vmatprep.subr.mxu0 %v15428_v14  ;;  %11345 = vmatmul.mubr.msk.f32.gmra.mxu0 %vm618_vm2, %v17081_v1  ;;  %v11926_v1 = vld [vmem:[%s16504_s3 + $0x300] sm:$0xff] }
 0xe42   : > { %11424 = vmatpush3.msra.mxu0 %v15428_v14  ;;  %11427 = vmatprep.mubr.msk.f32.mxu0 %vm618_vm2, %v17100_v44 }
 0xe43   : > { %11425 = vmatprep.subr.mxu0 %v15435_v51 }
 0xe44   : > { %11426 = vmatpush3.msra.mxu0 %v15435_v51 }
 0xe45   : > { %11428 = vmatmul.mubr.msk.f32.vlgmr.msra.gmra.mxu0 %vm618_vm2, %v17101_v48 }
 0xe46   : > { %11430 = vmatprep.mubr.msk.f32.mxu0 %vm618_vm2, %v17102_v46 }
 0xe49   : > { %11431 = vmatmul.mubr.msk.f32.gmra.mxu0 %vm618_vm2, %v17103_v20 }
 0xe4a   : > { %11433 = vmatprep.mubr.msk.f32.mxu0 %vm618_vm2, %v17104_v0 }
 0xe4d   : > { %11434 = vmatmul.mubr.msk.f32.gmra.mxu0 %vm618_vm2, %v17105_v12 }
 0xe4e   : > { %11436 = vmatprep.mubr.msk.f32.mxu0 %vm618_vm2, %v17106_v29 }
 0xe51   : > { %11437 = vmatmul.mubr.msk.f32.gmra.mxu0 %vm618_vm2, %v17107_v60 }
 0xe52   : > { %11455 = vmatprep.mubr.msk.f32.mxu0 %vm618_vm2, %v11926_v1 }
 0xeb5   : > { %v11209_v43 = vpop.f32.mrf.mxu0 }
 0xeb7   : > { %v6309_v54 = vpop.f32.mrf.mxu0  ;;  %v11273_v22 = vpop.f32.mrf.mxu1 }
 0xeb8   : > { %v15801_v2 = vadd.f32 %v11273_v22, %v11209_v43 }
 0xeb9   : > { %v11212_v14 = vpop.f32.mrf.mxu0  ;;  %v6534_v51 = vpop.f32.mrf.mxu1 }
 0xeba   : > { %v15803_v25 = vadd.f32 %v6534_v51, %v6309_v54 }
 0xebb   : > { %v6319_v24 = vpop.f32.mrf.mxu0  ;;  %v11276_v16 = vpop.f32.mrf.mxu1 }
 0xebc   : > { %v15805_v4 = vadd.f32 %v11276_v16, %v11212_v14 }
 0xebd   : > { %v11215_v34 = vpop.f32.mrf.mxu0  ;;  %v6544_v11 = vpop.f32.mrf.mxu1 }
 0xebe   : > { %17108 = vst [vmem:[#allocation113_spill] sm:$0xff] %v15805_v4  ;;  %v15807_v49 = vadd.f32 %v6544_v11, %v6319_v24 }
 0xebf   : > { %v6329_v10 = vpop.f32.mrf.mxu0  ;;  %v11279_v62 = vpop.f32.mrf.mxu1 }
 0xec0   : > { %v15809_v39 = vadd.f32 %v11279_v62, %v11215_v34 }
 0xec1   : > { %v11218_v41 = vpop.f32.mrf.mxu0  ;;  %v6554_v58 = vpop.f32.mrf.mxu1 }
 0xec2   : > { %17109 = vst [vmem:[#allocation52_spill] sm:$0xff] %v15809_v39  ;;  %v15811_v32 = vadd.f32 %v6554_v58, %v6329_v10 }
 0xec3   : > { %v6339_v47 = vpop.f32.mrf.mxu0  ;;  %v11282_v35 = vpop.f32.mrf.mxu1 }
 0xec4   : > { %17110 = vst [vmem:[#allocation116_spill] sm:$0xff] %v15811_v32  ;;  %v15813_v21 = vadd.f32 %v11282_v35, %v11218_v41 }
 0xec5   : > { %v11221_v31 = vpop.f32.mrf.mxu0  ;;  %v6564_v33 = vpop.f32.mrf.mxu1 }
 0xec6   : > { %17111 = vst [vmem:[#allocation40_spill] sm:$0xff] %v15813_v21  ;;  %v15815_v5 = vadd.f32 %v6564_v33, %v6339_v47 }
 0xec7   : > { %v15817_v18 = vpop.f32.mrf.mxu0  ;;  %v11285_v6 = vpop.f32.mrf.mxu1 }
 0xec8   : > { %17112 = vst [vmem:[#allocation105_spill] sm:$0xff] %v15815_v5  ;;  %v15819_v36 = vadd.f32 %v11285_v6, %v11221_v31 }
 0xec9   : > { %v11224_v40 = vpop.f32.mrf.mxu0  ;;  %v15821_v30 = vpop.f32.mrf.mxu1 }
 0xecb   : > { %v15823_v61 = vpop.f32.mrf.mxu0  ;;  %v11288_v44 = vpop.f32.mrf.mxu1 }
 0xecc   : > { %v15825_v48 = vadd.f32 %v11288_v44, %v11224_v40 }
 0xecd   : > { %v11227_v46 = vpop.f32.mrf.mxu0  ;;  %v15827_v20 = vpop.f32.mrf.mxu1 }
 0xecf   : > { %v15829_v0 = vpop.f32.mrf.mxu0  ;;  %v11291_v12 = vpop.f32.mrf.mxu1 }
 0xed0   : > { %v15831_v29 = vadd.f32 %v11291_v12, %v11227_v46 }
 0xed1   : > { %v11230_v60 = vpop.f32.mrf.mxu0  ;;  %v15833_v1 = vpop.f32.mrf.mxu1 }
 0xed3   : > { %v15835_v43 = vpop.f32.mrf.mxu0  ;;  %v11294_v54 = vpop.f32.mrf.mxu1 }
 0xed4   : > { %v15837_v22 = vadd.f32 %v11294_v54, %v11230_v60 }
 0xed5   : > { %v11233_v14 = vpop.f32.mrf.mxu0  ;;  %v15839_v51 = vpop.f32.mrf.mxu1 }
 0xed7   : > { %v15841_v24 = vpop.f32.mrf.mxu0  ;;  %v11297_v16 = vpop.f32.mrf.mxu1 }
 0xed8   : > { %v15843_v34 = vadd.f32 %v11297_v16, %v11233_v14 }
 0xed9   : > { %v11236_v11 = vpop.f32.mrf.mxu0  ;;  %v15845_v10 = vpop.f32.mrf.mxu1 }
 0xeda   : > { %17113 = vst [vmem:[#allocation84_spill] sm:$0xff] %v15843_v34  ;;  %v17149_v34 = vld [vmem:[#allocation71_spill] sm:$0xff] }
 0xedb   : > { %v15847_v62 = vpop.f32.mrf.mxu0  ;;  %v11300_v41 = vpop.f32.mrf.mxu1 }
 0xedc   : > { %17114 = vst [vmem:[#allocation63_spill] sm:$0xff] %v15847_v62  ;;  %v15849_v58 = vadd.f32 %v11300_v41, %v11236_v11 }
 0xedd   : > { %v11239_v47 = vpop.f32.mrf.mxu0  ;;  %v15851_v35 = vpop.f32.mrf.mxu1 }
 0xede   : > { %17115 = vst [vmem:[#allocation108_spill] sm:$0xff] %v15849_v58  ;;  %17116 = vst [vmem:[#allocation57_spill] sm:$0xff] %v15851_v35  ;;  %v6575_v35 = vadd.f32 %v15821_v30, %v15817_v18 }
 0xedf   : > { %v15853_v31 = vpop.f32.mrf.mxu0  ;;  %v11303_v33 = vpop.f32.mrf.mxu1 }
 0xee0   : > { %17117 = vst [vmem:[#allocation58_spill] sm:$0xff] %v15853_v31  ;;  %v15855_v6 = vadd.f32 %v11303_v33, %v11239_v47 }
 0xee1   : > { %v11242_v40 = vpop.f32.mrf.mxu0  ;;  %v15857_v44 = vpop.f32.mrf.mxu1 }
 0xee2   : > { %17118 = vst [vmem:[#allocation59_spill] sm:$0xff] %v15855_v6  ;;  %17119 = vst [vmem:[#allocation51_spill] sm:$0xff] %v15857_v44 }
 0xee3   : > { %v15859_v46 = vpop.f32.mrf.mxu0  ;;  %v11306_v12 = vpop.f32.mrf.mxu1 }
 0xee4   : > { %17120 = vst [vmem:[#allocation75_spill] sm:$0xff] %v15859_v46  ;;  %v15861_v60 = vadd.f32 %v11306_v12, %v11242_v40 }
 0xee5   : > { %v11245_v54 = vpop.f32.mrf.mxu0  ;;  %v15863_v14 = vpop.f32.mrf.mxu1 }
 0xee6   : > { %17121 = vst [vmem:[#allocation61_spill] sm:$0xff] %v15861_v60  ;;  %17122 = vst [vmem:[#allocation97_spill] sm:$0xff] %v15863_v14 }
 0xee7   : > { %v15865_v16 = vpop.f32.mrf.mxu0  ;;  %v11309_v11 = vpop.f32.mrf.mxu1 }
 0xee8   : > { %17123 = vst [vmem:[#allocation43_spill] sm:$0xff] %v15865_v16  ;;  %v15867_v41 = vadd.f32 %v11309_v11, %v11245_v54 }
 0xee9   : > { %v11248_v23 = vpop.f32.mrf.mxu0  ;;  %v15869_v19 = vpop.f32.mrf.mxu1 }
 0xeea   : > { %17124 = vst [vmem:[#allocation53_spill] sm:$0xff] %v15867_v41  ;;  %17125 = vst [vmem:[#allocation87_spill] sm:$0xff] %v15869_v19 }
 0xeeb   : > { %v15871_v47 = vpop.f32.mrf.mxu0  ;;  %v11312_v33 = vpop.f32.mrf.mxu1 }
 0xeec   : > { %17126 = vst [vmem:[#allocation95_spill] sm:$0xff] %v15871_v47  ;;  %v15873_v21 = vadd.f32 %v11312_v33, %v11248_v23 }
 0xeed   : > { %v11251_v46 = vpop.f32.mrf.mxu0  ;;  %v15875_v6 = vpop.f32.mrf.mxu1 }
 0xeee   : > { %17127 = vst [vmem:[#allocation99_spill] sm:$0xff] %v15873_v21  ;;  %17128 = vst [vmem:[#allocation67_spill] sm:$0xff] %v15875_v6 }
 0xeef   : > { %v15877_v40 = vpop.f32.mrf.mxu0  ;;  %v11315_v12 = vpop.f32.mrf.mxu1 }
 0xef0   : > { %17129 = vst [vmem:[#allocation111_spill] sm:$0xff] %v15877_v40  ;;  %v15879_v60 = vadd.f32 %v11315_v12, %v11251_v46 }
 0xef1   : > { %v11254_v16 = vpop.f32.mrf.mxu0  ;;  %v15881_v14 = vpop.f32.mrf.mxu1 }
 0xef2   : > { %17130 = vst [vmem:[#allocation64_spill] sm:$0xff] %v15879_v60  ;;  %17131 = vst [vmem:[#allocation100_spill] sm:$0xff] %v15881_v14 }
 0xef3   : > { %v15883_v54 = vpop.f32.mrf.mxu0  ;;  %v11318_v11 = vpop.f32.mrf.mxu1 }
 0xef4   : > { %17132 = vst [vmem:[#allocation60_spill] sm:$0xff] %v15883_v54  ;;  %v15885_v41 = vadd.f32 %v11318_v11, %v11254_v16 }
 0xef5   : > { %v11337_v47 = vpop.f32.mrf.mxu0 }
 0xef6   : > { %17133 = vst [vmem:[#allocation62_spill] sm:$0xff] %v15885_v41 }
 0xef7   : > { %v6759_v19 = vpop.f32.mrf.mxu0 }
 0xef9   : > { %v11340_v23 = vpop.f32.mrf.mxu0 }
 0xefb   : > { %v6769_v33 = vpop.f32.mrf.mxu0 }
 0xefd   : > { %v11343_v21 = vpop.f32.mrf.mxu0 }
 0xeff   : > { %v6779_v5 = vpop.f32.mrf.mxu0 }
 0xf01   : > { %v11346_v6 = vpop.f32.mrf.mxu0 }
 0xf02   : > { %11347 = vmatprep.subr.mxu1 %v11346_v6 }
 0xf03   : > { %v6789_v40 = vpop.f32.mrf.mxu0  ;;  %11348 = vmatpush3.msra.mxu1 %v11346_v6 }
 0xf04   : > { %11349 = vmatprep.subr.mxu1 %v6789_v40 }
 0xf05   : > { %11350 = vmatpush3.msra.mxu1 %v6789_v40  ;;  %v11429_v46 = vpop.f32.mrf.mxu0  ;;  %v11928_v40 = vld [vmem:[%s16504_s3 + $0x210] sm:$0xff] }
 0xf06   : > { %11351 = vmatprep.subr.mxu1 %v11343_v21 }
 0xf07   : > { %11352 = vmatpush3.msra.mxu1 %v11343_v21  ;;  %v7121_v12 = vpop.f32.mrf.mxu0  ;;  %v11927_v21 = vld [vmem:[%s16504_s3 + $0x208] sm:$0xff] }
 0xf08   : > { %11353 = vmatprep.subr.mxu1 %v6779_v5 }
 0xf09   : > { %11354 = vmatpush3.msra.mxu1 %v6779_v5  ;;  %v11432_v16 = vpop.f32.mrf.mxu0 }
 0xf0a   : > { %11355 = vmatprep.subr.mxu1 %v11340_v23 }
 0xf0b   : > { %11356 = vmatpush3.msra.mxu1 %v11340_v23  ;;  %v7131_v11 = vpop.f32.mrf.mxu0  ;;  %v11931_v23 = vld [vmem:[%s16504_s3 + $0x228] sm:$0xff] }
 0xf0c   : > { %11357 = vmatprep.subr.mxu1 %v6769_v33 }
 0xf0d   : > { %11358 = vmatpush3.msra.mxu1 %v6769_v33  ;;  %v11435_v41 = vpop.f32.mrf.mxu0  ;;  %v11934_v33 = vld [vmem:[%s16504_s3 + $0x240] sm:$0xff] }
 0xf0e   : > { %11359 = vmatprep.subr.mxu1 %v11337_v47 }
 0xf0f   : > { %11360 = vmatpush3.msra.mxu1 %v11337_v47  ;;  %v7141_v54 = vpop.f32.mrf.mxu0  ;;  %v11930_v47 = vld [vmem:[%s16504_s3 + $0x220] sm:$0xff] }
 0xf10   : > { %11361 = vmatprep.subr.mxu1 %v6759_v19 }
 0xf11   : > { %11362 = vmatpush3.msra.mxu1 %v6759_v19  ;;  %v11438_v6 = vpop.f32.mrf.mxu0  ;;  %v11929_v19 = vld [vmem:[%s16504_s3 + $0x218] sm:$0xff] }
 0xf12   : > { %11364 = vmatmul.mubr.msk.f32.vlgmr.msra.gmra.mxu1 %vm618_vm2, %v11927_v21  ;;  %11439 = vmatprep.subr.mxu0 %v11438_v6  ;;  %v11940_v21 = vld [vmem:[%s16504_s3 + $0x318] sm:$0xff] }
 0xf13   : > { %v7151_v5 = vpop.f32.mrf.mxu0  ;;  %11440 = vmatpush3.msra.mxu0 %v11438_v6  ;;  %11366 = vmatprep.mubr.msk.f32.mxu1 %vm618_vm2, %v11928_v40  ;;  %v11939_v6 = vld [vmem:[%s16504_s3 + $0x258] sm:$0xff]  ;;  %v11942_v40 = vld [vmem:[%s16504_s3 + $0x320] sm:$0xff] }
 0xf14   : > { %11441 = vmatprep.subr.mxu0 %v7151_v5 }
 0xf15   : > { %11442 = vmatpush3.msra.mxu0 %v7151_v5  ;;  %v11941_v5 = vld [vmem:[%s16504_s3 + $0x260] sm:$0xff] }
 0xf16   : > { %11367 = vmatmul.mubr.msk.f32.gmra.mxu1 %vm618_vm2, %v11929_v19  ;;  %11443 = vmatprep.subr.mxu0 %v11435_v41  ;;  %v11943_v19 = vld [vmem:[%s16504_s3 + $0x268] sm:$0xff] }
 0xf17   : > { %11444 = vmatpush3.msra.mxu0 %v11435_v41  ;;  %11369 = vmatprep.mubr.msk.f32.mxu1 %vm618_vm2, %v11930_v47  ;;  %v11932_v41 = vld [vmem:[%s16504_s3 + $0x230] sm:$0xff]  ;;  %v11944_v47 = vld [vmem:[%s16504_s3 + $0x328] sm:$0xff] }
 0xf18   : > { %11445 = vmatprep.subr.mxu0 %v7141_v54 }
 0xf19   : > { %11446 = vmatpush3.msra.mxu0 %v7141_v54  ;;  %v11933_v54 = vld [vmem:[%s16504_s3 + $0x238] sm:$0xff] }
 0xf1a   : > { %11370 = vmatmul.mubr.msk.f32.gmra.mxu1 %vm618_vm2, %v11931_v23  ;;  %11447 = vmatprep.subr.mxu0 %v11432_v16  ;;  %v11945_v23 = vld [vmem:[%s16504_s3 + $0x270] sm:$0xff] }
 0xf1b   : > { %11448 = vmatpush3.msra.mxu0 %v11432_v16  ;;  %11372 = vmatprep.mubr.msk.f32.mxu1 %vm618_vm2, %v11932_v41  ;;  %v11935_v16 = vld [vmem:[%s16504_s3 + $0x248] sm:$0xff]  ;;  %v11946_v41 = vld [vmem:[%s16504_s3 + $0x330] sm:$0xff] }
 0xf1c   : > { %11449 = vmatprep.subr.mxu0 %v7131_v11 }
 0xf1d   : > { %11450 = vmatpush3.msra.mxu0 %v7131_v11  ;;  %v11936_v11 = vld [vmem:[%s16504_s3 + $0x308] sm:$0xff] }
 0xf1e   : > { %11373 = vmatmul.mubr.msk.f32.gmra.mxu1 %vm618_vm2, %v11933_v54  ;;  %11451 = vmatprep.subr.mxu0 %v11429_v46  ;;  %v11947_v54 = vld [vmem:[%s16504_s3 + $0x278] sm:$0xff] }
 0xf1f   : > { %11452 = vmatpush3.msra.mxu0 %v11429_v46  ;;  %11375 = vmatprep.mubr.msk.f32.mxu1 %vm618_vm2, %v11934_v33  ;;  %v11937_v46 = vld [vmem:[%s16504_s3 + $0x250] sm:$0xff]  ;;  %v11948_v33 = vld [vmem:[%s16504_s3 + $0x338] sm:$0xff] }
 0xf20   : > { %11453 = vmatprep.subr.mxu0 %v7121_v12 }
 0xf21   : > { %11454 = vmatpush3.msra.mxu0 %v7121_v12  ;;  %v11938_v12 = vld [vmem:[%s16504_s3 + $0x310] sm:$0xff] }
 0xf22   : > { %11376 = vmatmul.mubr.msk.f32.gmra.mxu1 %vm618_vm2, %v11935_v16  ;;  %11456 = vmatmul.mubr.msk.f32.vlgmr.msra.gmra.mxu0 %vm618_vm2, %v11936_v11  ;;  %v11949_v16 = vld [vmem:[%s16504_s3 + $0x280] sm:$0xff] }
 0xf23   : > { %11378 = vmatprep.mubr.msk.f32.mxu1 %vm618_vm2, %v11937_v46  ;;  %11458 = vmatprep.mubr.msk.f32.mxu0 %vm618_vm2, %v11938_v12  ;;  %v11950_v11 = vld [vmem:[%s16504_s3 + $0x340] sm:$0xff]  ;;  %v11951_v46 = vld [vmem:[%s16504_s3 + $0x288] sm:$0xff] }
 0xf24   : > { %v11952_v12 = vld [vmem:[%s16504_s3 + $0x348] sm:$0xff] }
 0xf26   : > { %11379 = vmatmul.mubr.msk.f32.gmra.mxu1 %vm618_vm2, %v11939_v6  ;;  %11459 = vmatmul.mubr.msk.f32.gmra.mxu0 %vm618_vm2, %v11940_v21  ;;  %v11953_v6 = vld [vmem:[%s16504_s3 + $0x290] sm:$0xff] }
 0xf27   : > { %11381 = vmatprep.mubr.msk.f32.mxu1 %vm618_vm2, %v11941_v5  ;;  %11461 = vmatprep.mubr.msk.f32.mxu0 %vm618_vm2, %v11942_v40  ;;  %v11954_v21 = vld [vmem:[%s16504_s3 + $0x350] sm:$0xff]  ;;  %v11955_v5 = vld [vmem:[%s16504_s3 + $0x298] sm:$0xff] }
 0xf28   : > { %v11956_v40 = vld [vmem:[%s16504_s3 + $0x358] sm:$0xff] }
 0xf2a   : > { %11382 = vmatmul.mubr.msk.f32.gmra.mxu1 %vm618_vm2, %v11943_v19  ;;  %11462 = vmatmul.mubr.msk.f32.gmra.mxu0 %vm618_vm2, %v11944_v47  ;;  %v11957_v19 = vld [vmem:[%s16504_s3 + $0x2a0] sm:$0xff] }
 0xf2b   : > { %11384 = vmatprep.mubr.msk.f32.mxu1 %vm618_vm2, %v11945_v23  ;;  %11464 = vmatprep.mubr.msk.f32.mxu0 %vm618_vm2, %v11946_v41  ;;  %v11958_v47 = vld [vmem:[%s16504_s3 + $0x360] sm:$0xff]  ;;  %v11959_v23 = vld [vmem:[%s16504_s3 + $0x2a8] sm:$0xff] }
 0xf2c   : > { %v11960_v41 = vld [vmem:[%s16504_s3 + $0x368] sm:$0xff] }
 0xf2e   : > { %11385 = vmatmul.mubr.msk.f32.gmra.mxu1 %vm618_vm2, %v11947_v54  ;;  %11465 = vmatmul.mubr.msk.f32.gmra.mxu0 %vm618_vm2, %v11948_v33  ;;  %v11961_v54 = vld [vmem:[%s16504_s3 + $0x2b0] sm:$0xff] }
 0xf2f   : > { %11387 = vmatprep.mubr.msk.f32.mxu1 %vm618_vm2, %v11949_v16  ;;  %11467 = vmatprep.mubr.msk.f32.mxu0 %vm618_vm2, %v11950_v11  ;;  %v11962_v33 = vld [vmem:[%s16504_s3 + $0x370] sm:$0xff]  ;;  %v11963_v16 = vld [vmem:[%s16504_s3 + $0x2b8] sm:$0xff] }
 0xf30   : > { %v11964_v11 = vld [vmem:[%s16504_s3 + $0x378] sm:$0xff] }
 0xf32   : > { %11388 = vmatmul.mubr.msk.f32.gmra.mxu1 %vm618_vm2, %v11951_v46  ;;  %11468 = vmatmul.mubr.msk.f32.gmra.mxu0 %vm618_vm2, %v11952_v12  ;;  %v11965_v46 = vld [vmem:[%s16504_s3 + $0x2c0] sm:$0xff] }
 0xf33   : > { %11390 = vmatprep.mubr.msk.f32.mxu1 %vm618_vm2, %v11953_v6  ;;  %11470 = vmatprep.mubr.msk.f32.mxu0 %vm618_vm2, %v11954_v21  ;;  %v11966_v12 = vld [vmem:[%s16504_s3 + $0x380] sm:$0xff]  ;;  %v11967_v6 = vld [vmem:[%s16504_s3 + $0x2c8] sm:$0xff] }
 0xf34   : > { %v11968_v21 = vld [vmem:[%s16504_s3 + $0x388] sm:$0xff] }
 0xf36   : > { %11391 = vmatmul.mubr.msk.f32.gmra.mxu1 %vm618_vm2, %v11955_v5  ;;  %11471 = vmatmul.mubr.msk.f32.gmra.mxu0 %vm618_vm2, %v11956_v40  ;;  %v11969_v5 = vld [vmem:[%s16504_s3 + $0x2d0] sm:$0xff] }
 0xf37   : > { %11393 = vmatprep.mubr.msk.f32.mxu1 %vm618_vm2, %v11957_v19  ;;  %11473 = vmatprep.mubr.msk.f32.mxu0 %vm618_vm2, %v11958_v47  ;;  %v11970_v40 = vld [vmem:[%s16504_s3 + $0x390] sm:$0xff]  ;;  %v11971_v19 = vld [vmem:[%s16504_s3 + $0x2d8] sm:$0xff] }
 0xf38   : > { %v11972_v47 = vld [vmem:[%s16504_s3 + $0x398] sm:$0xff] }
 0xf3a   : > { %11394 = vmatmul.mubr.msk.f32.gmra.mxu1 %vm618_vm2, %v11959_v23  ;;  %11474 = vmatmul.mubr.msk.f32.gmra.mxu0 %vm618_vm2, %v11960_v41  ;;  %v11973_v23 = vld [vmem:[%s16504_s3 + $0x2e0] sm:$0xff] }
 0xf3b   : > { %11396 = vmatprep.mubr.msk.f32.mxu1 %vm618_vm2, %v11961_v54  ;;  %11476 = vmatprep.mubr.msk.f32.mxu0 %vm618_vm2, %v11962_v33  ;;  %v11974_v41 = vld [vmem:[%s16504_s3 + $0x3a0] sm:$0xff]  ;;  %v11975_v54 = vld [vmem:[%s16504_s3 + $0x2e8] sm:$0xff] }
 0xf3c   : > { %v11976_v33 = vld [vmem:[%s16504_s3 + $0x3a8] sm:$0xff] }
 0xf3e   : > { %11397 = vmatmul.mubr.msk.f32.gmra.mxu1 %vm618_vm2, %v11963_v16  ;;  %11477 = vmatmul.mubr.msk.f32.gmra.mxu0 %vm618_vm2, %v11964_v11  ;;  %v11977_v16 = vld [vmem:[%s16504_s3 + $0x2f0] sm:$0xff] }
 0xf3f   : > { %11399 = vmatprep.mubr.msk.f32.mxu1 %vm618_vm2, %v11965_v46  ;;  %11479 = vmatprep.mubr.msk.f32.mxu0 %vm618_vm2, %v11966_v12  ;;  %v11978_v11 = vld [vmem:[%s16504_s3 + $0x3b0] sm:$0xff]  ;;  %v11979_v46 = vld [vmem:[%s16504_s3 + $0x2f8] sm:$0xff] }
 0xf40   : > { %v11980_v12 = vld [vmem:[%s16504_s3 + $0x3b8] sm:$0xff] }
 0xf42   : > { %11400 = vmatmul.mubr.msk.f32.gmra.mxu1 %vm618_vm2, %v11967_v6  ;;  %11480 = vmatmul.mubr.msk.f32.gmra.mxu0 %vm618_vm2, %v11968_v21  ;;  %v11981_v6 = vld [vmem:[%s16504_s3 + $0x3c0] sm:$0xff]  ;;  %v11982_v21 = vld [vmem:[%s16504_s3 + $0x3c8] sm:$0xff] }
 0xf43   : > { %11402 = vmatprep.mubr.msk.f32.mxu1 %vm618_vm2, %v11969_v5  ;;  %11482 = vmatprep.mubr.msk.f32.mxu0 %vm618_vm2, %v11970_v40  ;;  %v11983_v5 = vld [vmem:[%s16504_s3 + $0x3d0] sm:$0xff]  ;;  %v11984_v40 = vld [vmem:[%s16504_s3 + $0x3d8] sm:$0xff] }
 0xf46   : > { %11403 = vmatmul.mubr.msk.f32.gmra.mxu1 %vm618_vm2, %v11971_v19  ;;  %11483 = vmatmul.mubr.msk.f32.gmra.mxu0 %vm618_vm2, %v11972_v47  ;;  %v11985_v19 = vld [vmem:[%s16504_s3 + $0x3e0] sm:$0xff]  ;;  %v11986_v47 = vld [vmem:[%s16504_s3 + $0x3e8] sm:$0xff] }
 0xf47   : > { %11405 = vmatprep.mubr.msk.f32.mxu1 %vm618_vm2, %v11973_v23  ;;  %11485 = vmatprep.mubr.msk.f32.mxu0 %vm618_vm2, %v11974_v41  ;;  %v11987_v23 = vld [vmem:[%s16504_s3 + $0x3f0] sm:$0xff]  ;;  %v11988_v41 = vld [vmem:[%s16504_s3 + $0x3f8] sm:$0xff] }
 0xf4a   : > { %11406 = vmatmul.mubr.msk.f32.gmra.mxu1 %vm618_vm2, %v11975_v54  ;;  %11486 = vmatmul.mubr.msk.f32.gmra.mxu0 %vm618_vm2, %v11976_v33  ;;  %v8887_v54 = vld [vmem:[%s16505_s4 + $0x4] sm:$0xf]  ;;  %v16143_v33 = vld [vmem:[%s16505_s4] sm:$0xf] }
 0xf4b   : > { %11408 = vmatprep.mubr.msk.f32.mxu1 %vm618_vm2, %v11977_v16  ;;  %11488 = vmatprep.mubr.msk.f32.mxu0 %vm618_vm2, %v11978_v11  ;;  %v8906_v16 = vld [vmem:[%s16505_s4 + $0x8] sm:$0xf]  ;;  %v16152_v11 = vpop.f32.mrf.mxu1 }
 0xf4c   : > { %11503 = vmatprep.subr.msk.mxu1 %vm450_vm0, %v8887_v54  ;;  %11531 = vmatprep.subr.msk.mxu0 %vm450_vm0, %v8906_v16  ;;  %17134 = vst [vmem:[#allocation89_spill] sm:$0xff] %v16152_v11 }
 0xf4d   : > { %11504 = vmatpush3.msk.msra.mxu1 %vm450_vm0, %v8887_v54  ;;  %11532 = vmatpush3.msk.msra.mxu0 %vm450_vm0, %v8906_v16 }
 0xf4e   : > { %11409 = vmatmul.mubr.msk.f32.gmra.mxu1 %vm618_vm2, %v11979_v46  ;;  %11489 = vmatmul.mubr.msk.f32.gmra.mxu0 %vm618_vm2, %v11980_v12 }
 0xf4f   : > { %11491 = vmatprep.mubr.msk.f32.mxu0 %vm618_vm2, %v11981_v6  ;;  %11517 = vmatprep.subr.msk.mxu1 %vm450_vm0, %v16143_v33 }
 0xf52   : > { %11492 = vmatmul.mubr.msk.f32.gmra.mxu0 %vm618_vm2, %v11982_v21 }
 0xf53   : > { %11494 = vmatprep.mubr.msk.f32.mxu0 %vm618_vm2, %v11983_v5 }
 0xf56   : > { %11495 = vmatmul.mubr.msk.f32.gmra.mxu0 %vm618_vm2, %v11984_v40 }
 0xf57   : > { %11497 = vmatprep.mubr.msk.f32.mxu0 %vm618_vm2, %v11985_v19 }
 0xf5a   : > { %11498 = vmatmul.mubr.msk.f32.gmra.mxu0 %vm618_vm2, %v11986_v47 }
 0xf5b   : > { %11500 = vmatprep.mubr.msk.f32.mxu0 %vm618_vm2, %v11987_v23 }
 0xf5e   : > { %11501 = vmatmul.mubr.msk.f32.gmra.mxu0 %vm618_vm2, %v11988_v41 }
 0xfd2   : > { %v16154_v46 = vpop.f32.mrf.mxu1 }
 0xfd4   : > { %v16156_v12 = vpop.f32.mrf.mxu1 }
 0xfd6   : > { %v16158_v6 = vpop.f32.mrf.mxu1 }
 0xfd7   : > { %17135 = vst [vmem:[#allocation55_spill] sm:$0xff] %v16158_v6  ;;  %v17147_v6 = vld [vmem:[#allocation74_spill] sm:$0xff] }
 0xfd8   : > { %v16160_v21 = vpop.f32.mrf.mxu1 }
 0xfda   : > { %v16162_v5 = vpop.f32.mrf.mxu1 }
 0xfdb   : > { %17136 = vst [vmem:[#allocation78_spill] sm:$0xff] %v16162_v5 }
 0xfdc   : > { %v16164_v40 = vpop.f32.mrf.mxu1 }
 0xfdd   : > { %17137 = vst [vmem:[#allocation42_spill] sm:$0xff] %v16164_v40 }
 0xfde   : > { %v16166_v19 = vpop.f32.mrf.mxu1 }
 0xfdf   : > { %17138 = vst [vmem:[#allocation82_spill] sm:$0xff] %v16166_v19 }
 0xfe0   : > { %v16168_v47 = vpop.f32.mrf.mxu1 }
 0xfe1   : > { %17139 = vst [vmem:[#allocation36_spill] sm:$0xff] %v16168_v47 }
 0xfe2   : > { %v11377_v23 = vpop.f32.mrf.mxu1  ;;  %v16170_v41 = vpop.f32.mrf.mxu0 }
 0xfe3   : > { %17140 = vst [vmem:[#allocation121_spill] sm:$0xff] %v16170_v41  ;;  %v17150_v41 = vld [vmem:[#allocation50_spill] sm:$0xff] }
 0xfe4   : > { %v6904_v54 = vpop.f32.mrf.mxu1  ;;  %v16172_v16 = vpop.f32.mrf.mxu0  ;;  %v16205_v18 = vmul.f32 %v17061_v50, %v17150_v41  ;;  %v17155_v41 = vld [vmem:[#allocation118_spill] sm:$0xff] }
 0xfe5   : > { %v7031_v4 = vadd.f32 %v6904_v54, %v6575_v35 }
 0xfe6   : > { %v11380_v11 = vpop.f32.mrf.mxu1  ;;  %v16174_v60 = vpop.f32.mrf.mxu0 }
 0xfe7   : > { %17141 = vst [vmem:[#allocation88_spill] sm:$0xff] %v16174_v60  ;;  %v7032_v60 = vadd.f32 %v11377_v23, %v15819_v36  ;;  %v17151_v36 = vld [vmem:[#allocation80_spill] sm:$0xff] }
 0xfe8   : > { %v6914_v14 = vpop.f32.mrf.mxu1  ;;  %v16176_v39 = vpop.f32.mrf.mxu0  ;;  %v5896_v30 = vmul.f32 %v15289_v15, %v17151_v36  ;;  %v17158_v36 = vld [vmem:[#allocation98_spill] sm:$0xff] }
 0xfe9   : > { %17142 = vst [vmem:[#allocation38_spill] sm:$0xff] %v16176_v39 }
 0xfea   : > { %v11383_v44 = vpop.f32.mrf.mxu1  ;;  %v16178_v5 = vpop.f32.mrf.mxu0 }
 0xfeb   : > { %17143 = vst [vmem:[#allocation76_spill] sm:$0xff] %v16178_v5  ;;  %v5897_v5 = vmul.f32 %v15276_v17, %v17147_v6  ;;  %v17154_v6 = vld [vmem:[#allocation125_spill] sm:$0xff] }
 0xfec   : > { %v6924_v31 = vpop.f32.mrf.mxu1  ;;  %v16180_v58 = vpop.f32.mrf.mxu0  ;;  %v16224_v15 = vmul.f32 %v15331_v52, %v17154_v6  ;;  %v16238_v52 = vmul.f32 %v15232_v3, %v17158_v36  ;;  %v17161_v6 = vld [vmem:[#allocation114_spill] sm:$0xff] }
 0xfed   : > { %17144 = vst [vmem:[#allocation85_spill] sm:$0xff] %v16180_v58 }
 0xfee   : > { %v11386_v19 = vpop.f32.mrf.mxu1  ;;  %v16182_v47 = vpop.f32.mrf.mxu0 }
 0xfef   : > { %17145 = vst [vmem:[#allocation119_spill] sm:$0xff] %v16182_v47  ;;  %v16197_v47 = vmul.f32 %v17067_v8, %v17148_v38  ;;  %v7034_v38 = vadd.f32 %v11380_v11, %v15825_v48  ;;  %v7038_v36 = vadd.f32 %v11386_v19, %v15837_v22  ;;  %v11992_v22 = vld [vmem:[%s12764_s17 + $0x58] sm:$0xff] }
 0xff0   : > { %v16184_v40 = vpop.f32.mrf.mxu1  ;;  %v16186_v32 = vpop.f32.mrf.mxu0 }
 0xff1   : > { %17146 = vst [vmem:[#allocation56_spill] sm:$0xff] %v16186_v32  ;;  %v16201_v32 = vmul.f32 %v15367_v63, %v17149_v34  ;;  %v17153_v34 = vld [vmem:[#allocation123_spill] sm:$0xff] }
 0xff2   : > { %v16191_v62 = vpop.f32.mrf.mxu1  ;;  %v11469_v39 = vpop.f32.mrf.mxu0  ;;  %v16220_v50 = vmul.f32 %v17049_v13, %v17153_v34  ;;  %v17160_v34 = vld [vmem:[#allocation109_spill] sm:$0xff] }
 0xff3   : > { %v7394_v58 = vadd.f32 %v11469_v39, %v7032_v60  ;;  %v6585_v39 = vadd.f32 %v15827_v20, %v15823_v61  ;;  %v17152_v60 = vld [vmem:[#allocation92_spill] sm:$0xff]  ;;  %v16228_v61 = vmul.f32 %v15310_v59, %v17155_v41  ;;  %v17156_v20 = vld [vmem:[#allocation86_spill] sm:$0xff]  ;;  %v6595_v59 = vadd.f32 %v15833_v1, %v15829_v0  ;;  %v11990_v1 = vld [vmem:[%s12764_s17 + $0x48] sm:$0xff] }
 0xff4   : > { %v16209_v23 = vpop.f32.mrf.mxu1  ;;  %v7266_v17 = vpop.f32.mrf.mxu0  ;;  %v16216_v63 = vmul.f32 %v15352_v57, %v17152_v60  ;;  %v5899_v57 = vmul.f32 %v15253_v37, %v17156_v20  ;;  %v7036_v37 = vadd.f32 %v11383_v44, %v15831_v29  ;;  %v16250_v3 = vmul.f32 %v15213_v53, %v17160_v34  ;;  %v17162_v44 = vld [vmem:[#allocation122_spill] sm:$0xff]  ;;  %v16267_v53 = vld [vmem:[%s16505_s4 + $0xc] sm:$0xf] }
 0xff5   : > { %v7426_v8 = vsub.f32 %v5897_v5, %v7394_v58  ;;  %v7393_v35 = vadd.f32 %v7266_v17, %v7031_v4  ;;  %v7033_v58 = vadd.f32 %v6914_v14, %v6585_v39  ;;  %v17157_v5 = vld [vmem:[#allocation93_spill] sm:$0xff]  ;;  %v11989_v14 = vld [vmem:[%s12764_s17 + $0x40] sm:$0xff]  ;;  %v16254_v0 = vmul.f32 %v15225_v55, %v17161_v6  ;;  %v17163_v55 = vld [vmem:[#allocation115_spill] sm:$0xff] }
 0xff6   : > { %v16230_v48 = vpop.f32.mrf.mxu1  ;;  %v11472_v4 = vpop.f32.mrf.mxu0  ;;  %v5898_v54 = vmul.f32 %v15267_v45, %v17157_v5  ;;  %v16261_v20 = vmul.f32 %v15357_v9, %v17162_v44  ;;  %v6605_v9 = vadd.f32 %v15839_v51, %v15835_v43  ;;  %v17170_v44 = vld [vmem:[#allocation66_spill] sm:$0xff] }
 0xff7   : > { %v7425_v11 = vsub.f32 %v5896_v30, %v7393_v35  ;;  %v7396_v13 = vadd.f32 %v11472_v4, %v7034_v38  ;;  %v17159_v35 = vld [vmem:[#allocation104_spill] sm:$0xff]  ;;  %v7458_v41 = vsub.f32 %v11990_v1, %v7426_v8  ;;  %v16271_v8 = vmul.f32 %v15363_v26, %v17163_v55  ;;  %v11993_v1 = vld [vmem:[%s12764_s17 + $0x60] sm:$0xff]  ;;  %v11994_v55 = vld [vmem:[%s12764_s17 + $0x68] sm:$0xff] }
 0xff8   : > { %v16242_v17 = vpop.f32.mrf.mxu1  ;;  %v7276_v60 = vpop.f32.mrf.mxu0  ;;  %v5900_v45 = vmul.f32 %v15245_v7, %v17159_v35  ;;  %v11991_v26 = vld [vmem:[%s12764_s17 + $0x50] sm:$0xff]  ;;  %v17168_v35 = vld [vmem:[#allocation121_spill] sm:$0xff] }
 0xff9   : > { %v7457_v30 = vsub.f32 %v11989_v14, %v7425_v11  ;;  %v7428_v39 = vsub.f32 %v5899_v57, %v7396_v13  ;;  %v7395_v38 = vadd.f32 %v7276_v60, %v7033_v58  ;;  %v7035_v57 = vadd.f32 %v6924_v31, %v6595_v59  ;;  %v17164_v11 = vld [vmem:[#allocation126_spill] sm:$0xff] }
 0xffa   : > { %v16257_v4 = vpop.f32.mrf.mxu1  ;;  %v11475_v29 = vpop.f32.mrf.mxu0  ;;  %v16275_v13 = vmul.f32 %v15336_v42, %v17164_v11  ;;  %v7023_v31 = vadd.f32 %v16156_v12, %v15803_v25  ;;  %v17165_v42 = vld [vmem:[#allocation69_spill] sm:$0xff]  ;;  %v17166_v25 = vld [vmem:[#allocation120_spill] sm:$0xff]  ;;  %v7024_v12 = vadd.f32 %v16154_v46, %v15801_v2  ;;  %v6615_v46 = vadd.f32 %v15845_v10, %v15841_v24  ;;  %v17171_v24 = vld [vmem:[#allocation94_spill] sm:$0xff] }
 0xffb   : > { %v7427_v7 = vsub.f32 %v5898_v54, %v7395_v38  ;;  %v7398_v58 = vadd.f32 %v11475_v29, %v7036_v37  ;;  %11505 = vmatprep.mubr.msk.f32.mxu1 %vm7484_vm3, %v7457_v30  ;;  %v16291_v43 = vmul.f32 %v15346_v28, %v17165_v42  ;;  %v16295_v51 = vmul.f32 %v15315_v56, %v17166_v25  ;;  %v17167_v56 = vld [vmem:[#allocation124_spill] sm:$0xff]  ;;  %v17178_v25 = vld [vmem:[#allocation42_spill] sm:$0xff] }
 0xffc   : > { %v16281_v5 = vpop.f32.mrf.mxu1  ;;  %v7286_v54 = vpop.f32.mrf.mxu0  ;;  %11506 = vmatmul.mubr.msk.f32.vlgmr.msra.gmra.mxu1 %vm7484_vm3, %v7458_v41  ;;  %v7460_v19 = vsub.f32 %v11992_v22, %v7428_v39  ;;  %v7037_v28 = vadd.f32 %v16184_v40, %v6605_v9  ;;  %v16309_v2 = vmul.f32 %v15325_v27, %v17167_v56  ;;  %v7025_v39 = vadd.f32 %v16160_v21, %v15807_v49  ;;  %v17172_v49 = vld [vmem:[#allocation113_spill] sm:$0xff]  ;;  %v17173_v21 = vld [vmem:[#allocation55_spill] sm:$0xff]  ;;  %v17177_v42 = vld [vmem:[#allocation116_spill] sm:$0xff] }
 0xffd   : > { %v7459_v59 = vsub.f32 %v11991_v26, %v7427_v7  ;;  %v7430_v60 = vsub.f32 %v16238_v52, %v7398_v58  ;;  %v7397_v37 = vadd.f32 %v7286_v54, %v7035_v57  ;;  %11518 = vmatpush3.msk.msra.mxu1 %vm450_vm0, %v16143_v33  ;;  %v7385_v33 = vadd.f32 %v16172_v16, %v7023_v31  ;;  %v17174_v7 = vld [vmem:[#allocation38_spill] sm:$0xff]  ;;  %v17175_v26 = vld [vmem:[#allocation63_spill] sm:$0xff]  ;;  %v17179_v22 = vld [vmem:[#allocation88_spill] sm:$0xff] }
 0xffe   : > { %v16300_v14 = vpop.f32.mrf.mxu1  ;;  %v11478_v52 = vpop.f32.mrf.mxu0  ;;  %11545 = vmatprep.subr.msk.mxu1 %vm450_vm0, %v16267_v53  ;;  %v7386_v34 = vadd.f32 %v17168_v35, %v7024_v12  ;;  %v16325_v10 = vmul.f32 %v17171_v24, %v17170_v44  ;;  %v7026_v57 = vadd.f32 %v17173_v21, %v17172_v49  ;;  %v7387_v58 = vadd.f32 %v17174_v7, %v7025_v39  ;;  %v17181_v56 = vld [vmem:[#allocation58_spill] sm:$0xff]  ;;  %v17183_v35 = vld [vmem:[#allocation85_spill] sm:$0xff]  ;;  %v17184_v44 = vld [vmem:[#allocation52_spill] sm:$0xff] }
 0xfff   : > { %v7429_v30 = vsub.f32 %v5900_v45, %v7397_v37  ;;  %v7400_v38 = vadd.f32 %v11478_v52, %v7038_v36  ;;  %11508 = vmatprep.mubr.msk.f32.mxu1 %vm7484_vm3, %v7459_v59  ;;  %v17169_v45 = vld [vmem:[#allocation84_spill] sm:$0xff]  ;;  %v7462_v11 = vsub.f32 %v11994_v55, %v7430_v60  ;;  %v7417_v31 = vsub.f32 %v16201_v32, %v7385_v33  ;;  %v17176_v59 = vld [vmem:[#allocation57_spill] sm:$0xff]  ;;  %v17185_v24 = vld [vmem:[#allocation78_spill] sm:$0xff] }
0x1000   : > { %v16316_v16 = vpop.f32.mrf.mxu1  ;;  %v7296_v40 = vpop.f32.mrf.mxu0  ;;  %11509 = vmatmul.mubr.msk.f32.gmra.mxu1 %vm7484_vm3, %v7460_v19  ;;  %v7040_v6 = vadd.f32 %v16191_v62, %v17169_v45  ;;  %v6625_v37 = vadd.f32 %v17176_v59, %v17175_v26  ;;  %v7027_v60 = vadd.f32 %v17178_v25, %v17177_v42  ;;  %v7418_v12 = vsub.f32 %v16197_v47, %v7386_v34  ;;  %v11995_v33 = vld [vmem:[%s12764_s17 + $0x70] sm:$0xff]  ;;  %v11998_v7 = vld [vmem:[%s12764_s17 + $0x8] sm:$0xff] }
0x1001   : > { %v7461_v41 = vsub.f32 %v11993_v1, %v7429_v30  ;;  %v7432_v27 = vsub.f32 %v16250_v3, %v7400_v38  ;;  %v7399_v29 = vadd.f32 %v7296_v40, %v7037_v28  ;;  %v7039_v3 = vadd.f32 %v16209_v23, %v6615_v46  ;;  %v17182_v46 = vld [vmem:[#allocation51_spill] sm:$0xff]  ;;  %v11996_v40 = vld [vmem:[%s12764_s17 + $0x78] sm:$0xff]  ;;  %v11997_v1 = vld [vmem:[%s12764_s17] sm:$0xff] }
0x1002   : > { %v16331_v9 = vpop.f32.mrf.mxu1  ;;  %v11481_v62 = vpop.f32.mrf.mxu0  ;;  %v7388_v19 = vadd.f32 %v17179_v22, %v7026_v57  ;;  %v6635_v47 = vadd.f32 %v17182_v46, %v17181_v56  ;;  %v7419_v39 = vsub.f32 %v16216_v63, %v7387_v58  ;;  %v7389_v34 = vadd.f32 %v17183_v35, %v7027_v60  ;;  %v17186_v63 = vld [vmem:[#allocation105_spill] sm:$0xff]  ;;  %v17187_v21 = vld [vmem:[#allocation36_spill] sm:$0xff]  ;;  %v12001_v42 = vld [vmem:[%s12764_s17 + $0x88] sm:$0xff] }
0x1003   : > { %v7431_v54 = vsub.f32 %v16254_v0, %v7399_v29  ;;  %v7402_v36 = vadd.f32 %v11481_v62, %v7040_v6  ;;  %11511 = vmatprep.mubr.msk.f32.mxu1 %vm7484_vm3, %v7461_v41  ;;  %v17180_v0 = vld [vmem:[#allocation108_spill] sm:$0xff]  ;;  %v7464_v45 = vsub.f32 %v11996_v40, %v7432_v27  ;;  %v7449_v41 = vsub.f32 %v11997_v1, %v7417_v31  ;;  %v11999_v62 = vld [vmem:[%s12764_s17 + $0x80] sm:$0xff]  ;;  %v17196_v1 = vld [vmem:[#allocation119_spill] sm:$0xff] }
0x1004   : > { %v16343_v32 = vpop.f32.mrf.mxu1  ;;  %v7306_v23 = vpop.f32.mrf.mxu0  ;;  %11512 = vmatmul.mubr.msk.f32.gmra.mxu1 %vm7484_vm3, %v7462_v11  ;;  %v7042_v52 = vadd.f32 %v16230_v48, %v17180_v0  ;;  %v7041_v48 = vadd.f32 %v16242_v17, %v6625_v37  ;;  %v7028_v49 = vadd.f32 %v17185_v24, %v17184_v44  ;;  %v7029_v57 = vadd.f32 %v17187_v21, %v17186_v63  ;;  %v17189_v59 = vld [vmem:[#allocation76_spill] sm:$0xff]  ;;  %v17192_v0 = vld [vmem:[#allocation97_spill] sm:$0xff] }
0x1005   : > { %v7463_v28 = vsub.f32 %v11995_v33, %v7431_v54  ;;  %v7434_v30 = vsub.f32 %v16261_v20, %v7402_v36  ;;  %v7401_v38 = vadd.f32 %v7306_v23, %v7039_v3  ;;  %v7450_v27 = vsub.f32 %v11998_v7, %v7418_v12  ;;  %v12000_v36 = vld [vmem:[%s12764_s17 + $0x10] sm:$0xff]  ;;  %v17191_v23 = vld [vmem:[#allocation75_spill] sm:$0xff]  ;;  %v17199_v21 = vld [vmem:[#allocation117_spill] sm:$0xff] }
0x1006   : > { %v11484_v6 = vpop.f32.mrf.mxu0  ;;  %v7420_v58 = vsub.f32 %v16205_v18, %v7388_v19  ;;  %v16365_v55 = vpop.f32.mrf.mxu1  ;;  %v7451_v26 = vsub.f32 %v12000_v36, %v7419_v39  ;;  %v7390_v18 = vadd.f32 %v17189_v59, %v7028_v49  ;;  %v7421_v37 = vsub.f32 %v16224_v15, %v7389_v34  ;;  %v17190_v12 = vld [vmem:[#allocation56_spill] sm:$0xff]  ;;  %v17198_v49 = vld [vmem:[#allocation110_spill] sm:$0xff] }
0x1007   : > { %v7433_v29 = vsub.f32 %v16271_v8, %v7401_v38  ;;  %v7404_v20 = vadd.f32 %v11484_v6, %v7042_v52  ;;  %11514 = vmatprep.mubr.msk.f32.mxu1 %vm7484_vm3, %v7463_v28  ;;  %v17188_v8 = vld [vmem:[#allocation59_spill] sm:$0xff]  ;;  %v7466_v25 = vsub.f32 %v12001_v42, %v7434_v30  ;;  %v7043_v22 = vadd.f32 %v16281_v5, %v6635_v47  ;;  %v17193_v33 = vld [vmem:[#allocation40_spill] sm:$0xff]  ;;  %v17194_v28 = vld [vmem:[#allocation82_spill] sm:$0xff] }
0x1008   : > { %v7316_v17 = vpop.f32.mrf.mxu0  ;;  %11515 = vmatmul.mubr.msk.f32.gmra.mxu1 %vm7484_vm3, %v7464_v45  ;;  %v7044_v11 = vadd.f32 %v16257_v4, %v17188_v8  ;;  %v7391_v4 = vadd.f32 %v17190_v12, %v7029_v57  ;;  %v6645_v52 = vadd.f32 %v17192_v0, %v17191_v23  ;;  %v7030_v15 = vadd.f32 %v17194_v28, %v17193_v33  ;;  %v12002_v38 = vld [vmem:[%s12764_s17 + $0x18] sm:$0xff]  ;;  %v16386_v56 = vpop.f32.mrf.mxu1  ;;  %v12003_v47 = vld [vmem:[%s12764_s17 + $0x90] sm:$0xff]  ;;  %v12004_v45 = vld [vmem:[%s12764_s17 + $0x20] sm:$0xff] }
0x1009   : > { %v7465_v31 = vsub.f32 %v11999_v62, %v7433_v29  ;;  %v7436_v3 = vsub.f32 %v16275_v13, %v7404_v20  ;;  %v7403_v54 = vadd.f32 %v7316_v17, %v7041_v48  ;;  %11519 = vmatprep.mubr.msk.f32.mxu1 %vm7484_vm3, %v7449_v41  ;;  %v7452_v30 = vsub.f32 %v12002_v38, %v7420_v58  ;;  %v17195_v5 = vld [vmem:[#allocation61_spill] sm:$0xff]  ;;  %v17202_v58 = vld [vmem:[#allocation87_spill] sm:$0xff]  ;;  %v12006_v8 = vld [vmem:[%s12764_s17 + $0xa0] sm:$0xff] }
0x100a   : > { %v11487_v60 = vpop.f32.mrf.mxu0  ;;  %v7422_v40 = vsub.f32 %v16220_v50, %v7390_v18  ;;  %v7453_v6 = vsub.f32 %v12004_v45, %v7421_v37  ;;  %v7392_v41 = vadd.f32 %v17196_v1, %v7030_v15  ;;  %v12005_v48 = vld [vmem:[%s12764_s17 + $0x98] sm:$0xff]  ;;  %v17197_v50 = vld [vmem:[#allocation68_spill] sm:$0xff]  ;;  %v11407_v17 = vpop.f32.mrf.mxu1  ;;  %v12008_v37 = vld [vmem:[%s12764_s17 + $0xa8] sm:$0xff] }
0x100b   : > { %v7435_v13 = vsub.f32 %v16291_v43, %v7403_v54  ;;  %v7406_v19 = vadd.f32 %v11487_v60, %v7044_v11  ;;  %11533 = vmatprep.mubr.msk.f32.mxu0 %vm7484_vm3, %v7465_v31  ;;  %v7046_v43 = vadd.f32 %v16300_v14, %v17195_v5  ;;  %v7468_v29 = vsub.f32 %v12005_v48, %v7436_v3  ;;  %v17200_v57 = vld [vmem:[#allocation41_spill] sm:$0xff]  ;;  %v17205_v54 = vld [vmem:[#allocation130_spill] sm:$0xff]  ;;  %v12009_v60 = vld [vmem:[%s12764_s17 + $0x30] sm:$0xff] }
0x100c   : > { %v7326_v46 = vpop.f32.mrf.mxu0  ;;  %11520 = vmatmul.mubr.msk.f32.vlgmr.msra.gmra.mxu1 %vm7484_vm3, %v7450_v27  ;;  %11534 = vmatmul.mubr.msk.f32.vlgmr.msra.gmra.mxu0 %vm7484_vm3, %v7466_v25  ;;  %v7423_v14 = vsub.f32 %v16228_v61, %v7391_v4  ;;  %v5895_v63 = vmul.f32 %v17198_v49, %v17197_v50  ;;  %v5910_v7 = vmul.f32 %v17200_v57, %v17199_v21  ;;  %v17201_v27 = vld [vmem:[#allocation43_spill] sm:$0xff]  ;;  %v17204_v3 = vld [vmem:[#allocation73_spill] sm:$0xff]  ;;  %v7004_v33 = vpop.f32.mrf.mxu1  ;;  %v12010_v38 = vld [vmem:[%s12764_s17 + $0xb0] sm:$0xff] }
0x100d   : > { %v7467_v39 = vsub.f32 %v12003_v47, %v7435_v13  ;;  %v7438_v35 = vsub.f32 %v16295_v51, %v7406_v19  ;;  %v7405_v34 = vadd.f32 %v7326_v46, %v7043_v22  ;;  %11522 = vmatprep.mubr.msk.f32.mxu1 %vm7484_vm3, %v7451_v26  ;;  %11546 = vmatpush3.msk.msra.mxu1 %vm450_vm0, %v16267_v53  ;;  %v12007_v26 = vld [vmem:[%s12764_s17 + $0x28] sm:$0xff]  ;;  %v17206_v22 = vld [vmem:[#allocation77_spill] sm:$0xff]  ;;  %v17212_v45 = vld [vmem:[#allocation128_spill] sm:$0xff] }
0x100e   : > { %v11490_v20 = vpop.f32.mrf.mxu0  ;;  %v7045_v51 = vadd.f32 %v16316_v16, %v6645_v52  ;;  %v6655_v53 = vadd.f32 %v17202_v58, %v17201_v27  ;;  %v5913_v36 = vmul.f32 %v17205_v54, %v17204_v3  ;;  %v7454_v59 = vsub.f32 %v12007_v26, %v7422_v40  ;;  %v17207_v13 = vld [vmem:[#allocation79_spill] sm:$0xff]  ;;  %v17213_v48 = vld [vmem:[#allocation90_spill] sm:$0xff]  ;;  %v17217_v49 = vld [vmem:[#allocation64_spill] sm:$0xff] }
0x100f   : > { %v7437_v44 = vsub.f32 %v16309_v2, %v7405_v34  ;;  %v7408_v24 = vadd.f32 %v11490_v20, %v7046_v43  ;;  %11536 = vmatprep.mubr.msk.f32.mxu0 %vm7484_vm3, %v7467_v39  ;;  %v17203_v2 = vld [vmem:[#allocation53_spill] sm:$0xff]  ;;  %v7424_v18 = vsub.f32 %v5895_v63, %v7392_v41  ;;  %v7470_v42 = vsub.f32 %v12008_v37, %v7438_v35  ;;  %v17208_v23 = vld [vmem:[#allocation95_spill] sm:$0xff]  ;;  %v12013_v21 = vld [vmem:[%s12764_s17 + $0xc0] sm:$0xff] }
0x1010   : > { %v7336_v61 = vpop.f32.mrf.mxu0  ;;  %11523 = vmatmul.mubr.msk.f32.gmra.mxu1 %vm7484_vm3, %v7452_v30  ;;  %11537 = vmatmul.mubr.msk.f32.gmra.mxu0 %vm7484_vm3, %v7468_v29  ;;  %v7048_v16 = vadd.f32 %v16331_v9, %v17203_v2  ;;  %v7455_v12 = vsub.f32 %v12009_v60, %v7423_v14  ;;  %v7047_v9 = vadd.f32 %v16343_v32, %v6655_v53  ;;  %v17209_v0 = vld [vmem:[#allocation67_spill] sm:$0xff]  ;;  %v12011_v43 = vld [vmem:[%s12764_s17 + $0x38] sm:$0xff]  ;;  %v17219_v2 = vld [vmem:[#allocation70_spill] sm:$0xff] }
0x1011   : > { %v7469_v11 = vsub.f32 %v12006_v8, %v7437_v44  ;;  %v7440_v62 = vsub.f32 %v16325_v10, %v7408_v24  ;;  %v7407_v31 = vadd.f32 %v7336_v61, %v7045_v51  ;;  %11525 = vmatprep.mubr.msk.f32.mxu1 %vm7484_vm3, %v7453_v6  ;;  %v5912_v19 = vmul.f32 %v17207_v13, %v17206_v22  ;;  %v17210_v15 = vld [vmem:[#allocation99_spill] sm:$0xff]  ;;  %v12012_v39 = vld [vmem:[%s12764_s17 + $0xb8] sm:$0xff]  ;;  %v17216_v51 = vld [vmem:[#allocation100_spill] sm:$0xff]  ;;  %v11410_v24 = vpop.f32.mrf.mxu1 }
0x1012   : > { %v11493_v25 = vpop.f32.mrf.mxu0  ;;  %v6665_v52 = vadd.f32 %v17209_v0, %v17208_v23  ;;  %v7050_v32 = vadd.f32 %v16365_v55, %v17210_v15  ;;  %v7456_v47 = vsub.f32 %v12011_v43, %v7424_v18  ;;  %v17211_v40 = vld [vmem:[#allocation83_spill] sm:$0xff]  ;;  %v17214_v29 = vld [vmem:[#allocation129_spill] sm:$0xff]  ;;  %v7052_v63 = vadd.f32 %v11407_v17, %v17217_v49  ;;  %v17218_v61 = vld [vmem:[#allocation96_spill] sm:$0xff] }
0x1013   : > { %v7439_v4 = vsub.f32 %v5910_v7, %v7407_v31  ;;  %v7410_v10 = vadd.f32 %v11493_v25, %v7048_v16  ;;  %11539 = vmatprep.mubr.msk.f32.mxu0 %vm7484_vm3, %v7469_v11  ;;  %v7472_v35 = vsub.f32 %v12012_v39, %v7440_v62  ;;  %v5915_v6 = vmul.f32 %v17212_v45, %v17211_v40  ;;  %v17215_v14 = vld [vmem:[#allocation111_spill] sm:$0xff]  ;;  %v17220_v31 = vld [vmem:[#allocation101_spill] sm:$0xff]  ;;  %v17222_v54 = vld [vmem:[#allocation60_spill] sm:$0xff] }
0x1014   : > { %v7346_v28 = vpop.f32.mrf.mxu0  ;;  %11526 = vmatmul.mubr.msk.f32.gmra.mxu1 %vm7484_vm3, %v7454_v59  ;;  %11540 = vmatmul.mubr.msk.f32.gmra.mxu0 %vm7484_vm3, %v7470_v42  ;;  %v7049_v1 = vadd.f32 %v16386_v56, %v6665_v52  ;;  %v5914_v20 = vmul.f32 %v17214_v29, %v17213_v48  ;;  %v6675_v44 = vadd.f32 %v17216_v51, %v17215_v14  ;;  %v12014_v27 = vld [vmem:[%s12764_s17 + $0xc8] sm:$0xff]  ;;  %v7014_v59 = vpop.f32.mrf.mxu1  ;;  %v17224_v37 = vld [vmem:[#allocation62_spill] sm:$0xff]  ;;  %v12015_v25 = vld [vmem:[%s12764_s17 + $0xd0] sm:$0xff] }
0x1015   : > { %v7471_v30 = vsub.f32 %v12010_v38, %v7439_v4  ;;  %v7442_v46 = vsub.f32 %v5913_v36, %v7410_v10  ;;  %v7409_v5 = vadd.f32 %v7346_v28, %v7047_v9  ;;  %11528 = vmatprep.mubr.msk.f32.mxu1 %vm7484_vm3, %v7455_v12  ;;  %v5917_v16 = vmul.f32 %v17219_v2, %v17218_v61  ;;  %v17221_v3 = vld [vmem:[#allocation127_spill] sm:$0xff]  ;;  %v17223_v36 = vld [vmem:[#allocation89_spill] sm:$0xff]  ;;  %v17227_v15 = vld [vmem:[#allocation112_spill] sm:$0xff] }
0x1016   : > { %v11496_v34 = vpop.f32.mrf.mxu0  ;;  %v7051_v8 = vadd.f32 %v7004_v33, %v6675_v44  ;;  %v5916_v17 = vmul.f32 %v17221_v3, %v17220_v31  ;;  %v6685_v26 = vadd.f32 %v17223_v36, %v17222_v54  ;;  %v7054_v42 = vadd.f32 %v11410_v24, %v17224_v37  ;;  %v12016_v4 = vld [vmem:[%s12764_s17 + $0xd8] sm:$0xff]  ;;  %v17225_v13 = vld [vmem:[#allocation107_spill] sm:$0xff] }
0x1017   : > { %v7441_v41 = vsub.f32 %v5912_v19, %v7409_v5  ;;  %v7412_v55 = vadd.f32 %v11496_v34, %v7050_v32  ;;  %11542 = vmatprep.mubr.msk.f32.mxu0 %vm7484_vm3, %v7471_v30  ;;  %v7474_v58 = vsub.f32 %v12014_v27, %v7442_v46  ;;  %v17226_v19 = vld [vmem:[#allocation103_spill] sm:$0xff]  ;;  %v17228_v32 = vld [vmem:[#allocation72_spill] sm:$0xff]  ;;  %v12017_v30 = vld [vmem:[%s12764_s17 + $0xe0] sm:$0xff] }
0x1018   : > { %v7356_v50 = vpop.f32.mrf.mxu0  ;;  %11529 = vmatmul.mubr.msk.f32.gmra.mxu1 %vm7484_vm3, %v7456_v47  ;;  %11543 = vmatmul.mubr.msk.f32.gmra.mxu0 %vm7484_vm3, %v7472_v35  ;;  %v5919_v23 = vmul.f32 %v17226_v19, %v17225_v13  ;;  %v7053_v0 = vadd.f32 %v7014_v59, %v6685_v26  ;;  %v5918_v38 = vmul.f32 %v17228_v32, %v17227_v15  ;;  %v12018_v47 = vld [vmem:[%s12764_s17 + $0xe8] sm:$0xff]  ;;  %v12019_v34 = vld [vmem:[%s12764_s17 + $0xf0] sm:$0xff]  ;;  %v12020_v45 = vld [vmem:[%s12764_s17 + $0xf8] sm:$0xff] }
0x1019   : > { %v7473_v56 = vsub.f32 %v12013_v21, %v7441_v41  ;;  %v7444_v57 = vsub.f32 %v5915_v6, %v7412_v55  ;;  %v7411_v7 = vadd.f32 %v7356_v50, %v7049_v1 }
0x101a   : > { %v11499_v53 = vpop.f32.mrf.mxu0 }
0x101b   : > { %v7443_v11 = vsub.f32 %v5914_v20, %v7411_v7  ;;  %v7414_v62 = vadd.f32 %v11499_v53, %v7052_v63  ;;  %11547 = vmatprep.mubr.msk.f32.mxu1 %vm7484_vm3, %v7473_v56  ;;  %v7476_v10 = vsub.f32 %v12016_v4, %v7444_v57 }
0x101c   : > { %v7366_v18 = vpop.f32.mrf.mxu0  ;;  %11548 = vmatmul.mubr.msk.f32.vlgmr.msra.gmra.mxu1 %vm7484_vm3, %v7474_v58 }
0x101d   : > { %v7475_v60 = vsub.f32 %v12015_v25, %v7443_v11  ;;  %v7446_v12 = vsub.f32 %v5917_v16, %v7414_v62  ;;  %v7413_v9 = vadd.f32 %v7366_v18, %v7051_v8 }
0x101e   : > { %v11502_v22 = vpop.f32.mrf.mxu0 }
0x101f   : > { %v7445_v52 = vsub.f32 %v5916_v17, %v7413_v9  ;;  %v7416_v33 = vadd.f32 %v11502_v22, %v7054_v42  ;;  %11550 = vmatprep.mubr.msk.f32.mxu1 %vm7484_vm3, %v7475_v60  ;;  %v7478_v39 = vsub.f32 %v12018_v47, %v7446_v12 }
0x1020   : > { %v7376_v28 = vpop.f32.mrf.mxu0  ;;  %11551 = vmatmul.mubr.msk.f32.gmra.mxu1 %vm7484_vm3, %v7476_v10 }
0x1021   : > { %v7477_v46 = vsub.f32 %v12017_v30, %v7445_v52  ;;  %v7448_v5 = vsub.f32 %v5919_v23, %v7416_v33  ;;  %v7415_v43 = vadd.f32 %v7376_v28, %v7053_v0 }
0x1023   : > { %v7447_v35 = vsub.f32 %v5918_v38, %v7415_v43  ;;  %11553 = vmatprep.mubr.msk.f32.mxu1 %vm7484_vm3, %v7477_v46  ;;  %v7480_v6 = vsub.f32 %v12020_v45, %v7448_v5 }
0x1024   : > { %11554 = vmatmul.mubr.msk.f32.gmra.mxu1 %vm7484_vm3, %v7478_v39 }
0x1025   : > { %v7479_v40 = vsub.f32 %v12019_v34, %v7447_v35 }
0x1027   : > { %11556 = vmatprep.mubr.msk.f32.mxu1 %vm7484_vm3, %v7479_v40 }
0x1028   : > { %11557 = vmatmul.mubr.msk.f32.gmra.mxu1 %vm7484_vm3, %v7480_v6 }
0x10bc   : > { %v11507_v1 = vpop.f32.mrf.mxu1 }
0x10be   : > { %v7578_v41 = vpop.f32.mrf.mxu1 }
0x10c0   : > { %v11510_v55 = vpop.f32.mrf.mxu1 }
0x10c2   : > { %v7588_v48 = vpop.f32.mrf.mxu1 }
0x10c4   : > { %v11513_v29 = vpop.f32.mrf.mxu1 }
0x10c6   : > { %v7598_v20 = vpop.f32.mrf.mxu1 }
0x10c8   : > { %v11516_v14 = vpop.f32.mrf.mxu1 }
0x10ca   : > { %v7608_v51 = vpop.f32.mrf.mxu1 }
0x10cc   : > { %v11521_v44 = vpop.f32.mrf.mxu1  ;;  %v11535_v24 = vpop.f32.mrf.mxu0 }
0x10cd   : > { %v7716_v27 = vadd.f32 %v11521_v44, %v11507_v1 }
0x10ce   : > { %v7710_v50 = vpop.f32.mrf.mxu1  ;;  %v7844_v49 = vpop.f32.mrf.mxu0 }
0x10cf   : > { %v7711_v61 = vadd.f32 %v7710_v50, %v7578_v41  ;;  %v7884_v16 = vadd.f32 %v11535_v24, %v7716_v27 }
0x10d0   : > { %v11524_v63 = vpop.f32.mrf.mxu1  ;;  %v11538_v56 = vpop.f32.mrf.mxu0 }
0x10d1   : > { %v7726_v8 = vadd.f32 %v11524_v63, %v11510_v55  ;;  %v7883_v31 = vadd.f32 %v7844_v49, %v7711_v61 }
0x10d2   : > { %v7720_v21 = vpop.f32.mrf.mxu1  ;;  %v7854_v58 = vpop.f32.mrf.mxu0 }
0x10d3   : > { %v7721_v3 = vadd.f32 %v7720_v21, %v7588_v48  ;;  %v7886_v36 = vadd.f32 %v11538_v56, %v7726_v8 }
0x10d4   : > { %v11527_v57 = vpop.f32.mrf.mxu1  ;;  %v11541_v11 = vpop.f32.mrf.mxu0 }
0x10d5   : > { %v7736_v26 = vadd.f32 %v11527_v57, %v11513_v29  ;;  %v7885_v25 = vadd.f32 %v7854_v58, %v7721_v3 }
0x10d6   : > { %v7730_v7 = vpop.f32.mrf.mxu1  ;;  %v7864_v37 = vpop.f32.mrf.mxu0 }
0x10d7   : > { %v7731_v60 = vadd.f32 %v7730_v7, %v7598_v20  ;;  %v7888_v10 = vadd.f32 %v11541_v11, %v7736_v26 }
0x10d8   : > { %v11530_v53 = vpop.f32.mrf.mxu1  ;;  %v11544_v23 = vpop.f32.mrf.mxu0 }
0x10d9   : > { %v7746_v22 = vadd.f32 %v11530_v53, %v11516_v14  ;;  %v7887_v52 = vadd.f32 %v7864_v37, %v7731_v60 }
0x10da   : > { %v7740_v2 = vpop.f32.mrf.mxu1  ;;  %v7874_v5 = vpop.f32.mrf.mxu0 }
0x10db   : > { %v7741_v33 = vadd.f32 %v7740_v2, %v7608_v51  ;;  %v7890_v38 = vadd.f32 %v11544_v23, %v7746_v22 }
0x10dc   : > { %v11549_v62 = vpop.f32.mrf.mxu1 }
0x10dd   : > { %v8026_v17 = vadd.f32 %v11549_v62, %v7884_v16  ;;  %v7889_v47 = vadd.f32 %v7874_v5, %v7741_v33 }
0x10de   : > { %v7986_v54 = vpop.f32.mrf.mxu1 }
0x10df   : > { %v8034_v59 = vmax.f32 %v8026_v17, 0.0  ;;  %v8025_v18 = vadd.f32 %v7986_v54, %v7883_v31 }
0x10e0   : > { %v11552_v42 = vpop.f32.mrf.mxu1 }
0x10e1   : > { %8043 = vst.msk [vmem:[%s16480_s29 + $0x8] sm:$0xff] %vm8041_vm4, %v8034_v59  ;;  %v8033_v12 = vmax.f32 %v8025_v18, 0.0  ;;  %v8028_v9 = vadd.f32 %v11552_v42, %v7886_v36 }
0x10e2   : > { %v7996_v4 = vpop.f32.mrf.mxu1 }
0x10e3   : > { %8042 = vst.msk [vmem:[%s16480_s29] sm:$0xff] %vm8041_vm4, %v8033_v12  ;;  %v8036_v13 = vmax.f32 %v8028_v9, 0.0  ;;  %v8027_v19 = vadd.f32 %v7996_v4, %v7885_v25 }
0x10e4   : > { %v11555_v0 = vpop.f32.mrf.mxu1 }
0x10e5   : > { %8045 = vst.msk [vmem:[%s16480_s29 + $0x18] sm:$0xff] %vm8041_vm4, %v8036_v13  ;;  %v8035_v28 = vmax.f32 %v8027_v19, 0.0  ;;  %v8030_v15 = vadd.f32 %v11555_v0, %v7888_v10 }
0x10e6   : > { %v8006_v32 = vpop.f32.mrf.mxu1 }
0x10e7   : > { %8044 = vst.msk [vmem:[%s16480_s29 + $0x10] sm:$0xff] %vm8041_vm4, %v8035_v28  ;;  %v8038_v30 = vmax.f32 %v8030_v15, 0.0  ;;  %v8029_v46 = vadd.f32 %v8006_v32, %v7887_v52 }
0x10e8   : > { %v11558_v43 = vpop.f32.mrf.mxu1 }
0x10e9   : > { %8047 = vst.msk [vmem:[%s16480_s29 + $0x28] sm:$0xff] %vm8041_vm4, %v8038_v30  ;;  %v8037_v39 = vmax.f32 %v8029_v46, 0.0  ;;  %v8032_v35 = vadd.f32 %v11558_v43, %v7890_v38 }
0x10ea   : > { %v8016_v34 = vpop.f32.mrf.mxu1 }
0x10eb   : > { %8046 = vst.msk [vmem:[%s16480_s29 + $0x20] sm:$0xff] %vm8041_vm4, %v8037_v39  ;;  %v8040_v40 = vmax.f32 %v8032_v35, 0.0  ;;  %v8031_v45 = vadd.f32 %v8016_v34, %v7889_v47 }
0x10ed   : > { %8049 = vst.msk [vmem:[%s16480_s29 + $0x38] sm:$0xff] %vm8041_vm4, %v8040_v40  ;;  %v8039_v6 = vmax.f32 %v8031_v45, 0.0 }
0x10ef   : > { %8048 = vst.msk [vmem:[%s16480_s29 + $0x30] sm:$0xff] %vm8041_vm4, %v8039_v6 }
0x10f0 PF: > { %s17_s24 = sadd.s32 1, %s12027_s24  }
0x10f1   : > { %p14_p4 = scmp.ge.s32.totalorder %s17_s24, 4  }
0x10f3   :  { %16 = sbr.rel (!%p14_p4) target bundleno = 1 (0x1), region = 90 }

</bundles_post_ra>
